<compile_context>
chip_gen: v7x
topology: tpu7x:2x2x1
jax: 0.10.0
libtpu: 0.0.40
codegen_flags: <defaults>
</compile_context>

<pallas_src>
import math

import jax
import jax.numpy as jnp
from jax.experimental import pallas as pl
from jax.experimental.pallas import tpu as pltpu

# ----------------------------- hyper-parameters ------------------------------
D_MODEL = 32
NHEAD = 2
DIM_FF = 64
N_ENC_LAYERS = 2
N_DEC_LAYERS = 2
NUM_QUERIES = 8
D_DETECTIONS = 3
N_TIMESTEPS = 10
D_PRED_HIDDEN = 32
N_PRED_LAYERS = 3
PRED_DIMS = 2                      # prediction_space_dimensions
DT = 0.1
MAX_RANGE, MIN_RANGE = 10.0, 0.0
MAX_RANGE_RATE = 5.0
MAX_THETA, MIN_THETA = math.pi, -math.pi
WITH_STATE_REFINE = True
RETURN_INTERMEDIATE = True

MEAS_NORM = jnp.array(
    [MAX_RANGE - MIN_RANGE, MAX_RANGE_RATE, MAX_THETA - MIN_THETA], jnp.float32)
OUTPUT_SCALING = (MAX_RANGE * 4.0, MAX_RANGE_RATE * 4.0)

# Ordered list of VMEM-resident weight operands of the fused kernel.
WEIGHT_NAMES = (
    "pre_w", "pre_b", "query_embed", "ref_w", "ref_b", "dec_norm_g", "dec_norm_b",
    "enc_qkv_w", "enc_qkv_b", "enc_out_w", "enc_out_b",
    "enc_ffn1_w", "enc_ffn1_b", "enc_ffn2_w", "enc_ffn2_b",
    "enc_norm1_g", "enc_norm1_b", "enc_norm2_g", "enc_norm2_b",
    "dec_sa_qkv_w", "dec_sa_qkv_b", "dec_sa_out_w", "dec_sa_out_b",
    "dec_ca_qkv_w", "dec_ca_qkv_b", "dec_ca_out_w", "dec_ca_out_b",
    "dec_ffn1_w", "dec_ffn1_b", "dec_ffn2_w", "dec_ffn2_b",
    "dec_norm1_g", "dec_norm1_b", "dec_norm2_g", "dec_norm2_b", "dec_norm3_g", "dec_norm3_b",
    "pv_w1", "pv_b1", "pv_w2", "pv_b2", "pv_w3", "pv_b3",
    "un_w1", "un_b1", "un_w2", "un_b2", "un_w3", "un_b3",
    "obj_w", "obj_b",
)
IN_NAMES = ("meas", "pos", "mask_bias") + WEIGHT_NAMES


# ------------------------------ fused mega-kernel ------------------------------
def _mt3v2_kernel(*refs):
    r = dict(zip(IN_NAMES, refs))
    state_ref, logits_ref, unc_ref = refs[len(IN_NAMES):]

    f32 = jnp.float32
    D, H = D_MODEL, NHEAD
    Dh = D // H
    scale = 1.0 / math.sqrt(Dh)

    meas = r["meas"][0]           # (Nm, d_detections)   normalized measurements
    pos = r["pos"][0]             # (Nm, D)              temporal positional encoding
    kbias = r["mask_bias"][0]     # (1, Nm)              0 for valid keys, -1e9 for padded

    def layer_norm(x, g, b):
        mu = jnp.mean(x, axis=-1, keepdims=True)
        xc = x - mu
        var = jnp.mean(xc * xc, axis=-1, keepdims=True)
        return xc * jax.lax.rsqrt(var + 1e-5) * g + b

    def sigmoid(x):
        return 1.0 / (1.0 + jnp.exp(-x))

    def softplus(x):
        return jnp.where(x > 20.0, x, jnp.log1p(jnp.exp(jnp.minimum(x, 20.0))))

    def mha(q_src, k_src, v_src, w, b, ow, ob, key_bias):
        """torch.nn.MultiheadAttention semantics (dropout=0, eval).
        w:(D,3D) b:(1,3D) ow:(D,D) ob:(1,D); sources are (L, D) 2-D tiles."""
        if q_src is k_src:        # shared q/k source -> one (M, 2D) matmul
            qk = jnp.dot(q_src, w[:, :2 * D], preferred_element_type=f32) + b[:, :2 * D]
            q, k = qk[:, :D], qk[:, D:]
        else:
            q = jnp.dot(q_src, w[:, :D], preferred_element_type=f32) + b[:, :D]
            k = jnp.dot(k_src, w[:, D:2 * D], preferred_element_type=f32) + b[:, D:2 * D]
        v = jnp.dot(v_src, w[:, 2 * D:], preferred_element_type=f32) + b[:, 2 * D:]
        heads = []
        for h in range(H):        # heads via static lane slices (H = 2, unrolled)
            sl = slice(h * Dh, (h + 1) * Dh)
            s = jax.lax.dot_general(q[:, sl], k[:, sl], (((1,), (1,)), ((), ())),
                                    preferred_element_type=f32) * scale
            if key_bias is not None:
                s = s + key_bias
            s = s - jnp.max(s, axis=-1, keepdims=True)
            p = jnp.exp(s)
            p = p / jnp.sum(p, axis=-1, keepdims=True)
            heads.append(jnp.dot(p, v[:, sl], preferred_element_type=f32))
        o = jnp.concatenate(heads, axis=-1)
        return jnp.dot(o, ow, preferred_element_type=f32) + ob

    # ------------------------------ preprocessor -------------------------------
    src = jnp.dot(meas, r["pre_w"][...], preferred_element_type=f32) + r["pre_b"][...]

    # -------------------------------- encoder ----------------------------------
    for l in range(N_ENC_LAYERS):
        qk = src + pos
        a = mha(qk, qk, src,
                r["enc_qkv_w"][l], r["enc_qkv_b"][l:l + 1],
                r["enc_out_w"][l], r["enc_out_b"][l:l + 1], kbias)
        src = layer_norm(src + a, r["enc_norm1_g"][l:l + 1], r["enc_norm1_b"][l:l + 1])
        h = jnp.maximum(
            jnp.dot(src, r["enc_ffn1_w"][l], preferred_element_type=f32)
            + r["enc_ffn1_b"][l:l + 1], 0.0)
        h = jnp.dot(h, r["enc_ffn2_w"][l], preferred_element_type=f32) + r["enc_ffn2_b"][l:l + 1]
        src = layer_norm(src + h, r["enc_norm2_g"][l:l + 1], r["enc_norm2_b"][l:l + 1])
    memory = src
    mem_k = memory + pos

    # ------------------ queries / initial reference points ---------------------
    qpos = r["query_embed"][...]                                          # (nq, D)
    refp = sigmoid(jnp.dot(qpos, r["ref_w"][...], preferred_element_type=f32)
                   + r["ref_b"][...])                                     # (nq, 4)
    tgt = jnp.zeros((NUM_QUERIES, D), f32)

    # -------------------------------- decoder ----------------------------------
    for l in range(N_DEC_LAYERS):
        q = tgt + qpos
        a = mha(q, q, tgt,
                r["dec_sa_qkv_w"][l], r["dec_sa_qkv_b"][l:l + 1],
                r["dec_sa_out_w"][l], r["dec_sa_out_b"][l:l + 1], None)
        tgt = layer_norm(tgt + a, r["dec_norm1_g"][l:l + 1], r["dec_norm1_b"][l:l + 1])
        a = mha(tgt + qpos, mem_k, memory,
                r["dec_ca_qkv_w"][l], r["dec_ca_qkv_b"][l:l + 1],
                r["dec_ca_out_w"][l], r["dec_ca_out_b"][l:l + 1], kbias)
        tgt = layer_norm(tgt + a, r["dec_norm2_g"][l:l + 1], r["dec_norm2_b"][l:l + 1])
        h = jnp.maximum(
            jnp.dot(tgt, r["dec_ffn1_w"][l], preferred_element_type=f32)
            + r["dec_ffn1_b"][l:l + 1], 0.0)
        h = jnp.dot(h, r["dec_ffn2_w"][l], preferred_element_type=f32) + r["dec_ffn2_b"][l:l + 1]
        tgt = layer_norm(tgt + h, r["dec_norm3_g"][l:l + 1], r["dec_norm3_b"][l:l + 1])

        normed = layer_norm(tgt, r["dec_norm_g"][...], r["dec_norm_b"][...])

        # pos/vel delta head (3-layer MLP, last layer zero-init)
        h1 = jnp.maximum(jnp.dot(normed, r["pv_w1"][l], preferred_element_type=f32)
                         + r["pv_b1"][l:l + 1], 0.0)
        h1 = jnp.maximum(jnp.dot(h1, r["pv_w2"][l], preferred_element_type=f32)
                         + r["pv_b2"][l:l + 1], 0.0)
        delta = jnp.dot(h1, r["pv_w3"][l], preferred_element_type=f32) + r["pv_b3"][l:l + 1]

        # iterative reference-point refinement: sigmoid(delta + inverse_sigmoid(refp))
        rp = jnp.clip(refp, 0.0, 1.0)
        inv = jnp.log(jnp.maximum(rp, 1e-5) / jnp.maximum(1.0 - rp, 1e-5))
        new_ref = sigmoid(delta + inv)

        # existence logits
        logit = jnp.dot(normed, r["obj_w"][l], preferred_element_type=f32) + r["obj_b"][l:l + 1]

        # uncertainty head (3-layer MLP, softplus at end)
        u = jnp.maximum(jnp.dot(normed, r["un_w1"][l], preferred_element_type=f32)
                        + r["un_b1"][l:l + 1], 0.0)
        u = jnp.maximum(jnp.dot(u, r["un_w2"][l], preferred_element_type=f32)
                        + r["un_b2"][l:l + 1], 0.0)
        u = softplus(jnp.dot(u, r["un_w3"][l], preferred_element_type=f32) + r["un_b3"][l:l + 1])

        refp = new_ref            # with_state_refine (stop_gradient irrelevant in forward)

        # de-normalize states: (x - 0.5) * output_scaling
        sp = new_ref - 0.5
        sp = jnp.concatenate([sp[:, :PRED_DIMS] * OUTPUT_SCALING[0],
                              sp[:, PRED_DIMS:] * OUTPUT_SCALING[1]], axis=-1)

        state_ref[l, 0] = sp
        logits_ref[l, 0] = logit
        unc_ref[l, 0] = u


# ------------------------------ BlockSpec helpers ------------------------------
def _full_spec(arr):
    nd = arr.ndim
    return pl.BlockSpec(arr.shape, lambda b, _nd=nd: (0,) * _nd)


def _batch_spec(arr):
    nd = arr.ndim
    return pl.BlockSpec((1,) + arr.shape[1:], lambda b, _nd=nd: (b,) + (0,) * (_nd - 1))


# ------------------------------- full forward --------------------------------
def mt3v2_forward(params, meas_tensors, mask):
    """meas_tensors: (B, N, d_detections+1) [range, range_rate, theta, time]; mask: (B, N) bool."""
    B, Nm, _ = meas_tensors.shape

    # temporal positional encoding (learned embedding lookup — glue outside kernel)
    mapped_time_idx = jnp.round(meas_tensors[:, :, -1] / DT).astype(jnp.int32)
    time_encoding = params["temporal_emb"][mapped_time_idx]                 # (B, Nm, D)

    # preprocessor normalization (projection happens inside the kernel)
    meas = (meas_tensors[:, :, :D_DETECTIONS] / MEAS_NORM).astype(jnp.float32)

    # key-padding bias built ONCE per forward (shared by all enc/dec attention layers)
    mask_bias = jnp.where(mask, -1e9, 0.0).astype(jnp.float32)[:, None, :]  # (B, 1, Nm)

    batch_inputs = [meas, time_encoding, mask_bias]
    weight_inputs = [params[n] for n in WEIGHT_NAMES]
    all_inputs = batch_inputs + weight_inputs
    in_specs = [_batch_spec(a) for a in batch_inputs] + [_full_spec(a) for a in weight_inputs]

    nd = N_DEC_LAYERS
    out_shapes = (
        jax.ShapeDtypeStruct((nd, B, NUM_QUERIES, 2 * PRED_DIMS), jnp.float32),
        jax.ShapeDtypeStruct((nd, B, NUM_QUERIES, 1), jnp.float32),
        jax.ShapeDtypeStruct((nd, B, NUM_QUERIES, 2 * PRED_DIMS), jnp.float32),
    )
    out_specs = (
        pl.BlockSpec((nd, 1, NUM_QUERIES, 2 * PRED_DIMS), lambda b: (0, b, 0, 0)),
        pl.BlockSpec((nd, 1, NUM_QUERIES, 1), lambda b: (0, b, 0, 0)),
        pl.BlockSpec((nd, 1, NUM_QUERIES, 2 * PRED_DIMS), lambda b: (0, b, 0, 0)),
    )

    sp, logits, unc = pl.pallas_call(
        _mt3v2_kernel,
        out_shape=out_shapes,
        grid=(B,),
        in_specs=in_specs,
        out_specs=out_specs,
        compiler_params=pltpu.CompilerParams(dimension_semantics=("parallel",)),
    )(*all_inputs)

    aux_classifications = {}     # contrastive / false classifiers disabled in this config
    debug_dict = {}

    prediction = dict(positions=sp[-1][:, :, :PRED_DIMS],
                      velocities=sp[-1][:, :, PRED_DIMS:],
                      uncertainties=unc[-1],
                      logits=logits[-1])
    intermediate_predictions = (
        [dict(positions=p_[:, :, :PRED_DIMS], velocities=p_[:, :, PRED_DIMS:],
              uncertainties=u_, logits=l_)
         for p_, l_, u_ in zip(sp[:-1], logits[:-1], unc[:-1])]
        if RETURN_INTERMEDIATE else None)
    encoder_prediction = None    # two_stage == False
    return prediction, intermediate_predictions, encoder_prediction, aux_classifications, debug_dict


# ----------------------------- parameter creation -----------------------------
def init_params(key):
    keys = iter(jax.random.split(key, 256))
    f32 = jnp.float32

    def xavier(shape):
        bound = math.sqrt(6.0 / (shape[-2] + shape[-1]))
        return jax.random.uniform(next(keys), shape, f32, -bound, bound)

    def stack_x(n, shape):
        return jnp.stack([xavier(shape) for _ in range(n)])

    def zeros(n, dim):
        return jnp.zeros((n, dim), f32)

    def ones(n, dim):
        return jnp.ones((n, dim), f32)

    p = {}
    p["temporal_emb"] = xavier((N_TIMESTEPS, D_MODEL))
    p["pre_w"] = xavier((D_DETECTIONS, D_MODEL))
    p["pre_b"] = jnp.zeros((1, D_MODEL), f32)
    p["query_embed"] = xavier((NUM_QUERIES, D_MODEL))
    p["ref_w"] = xavier((D_MODEL, 2 * PRED_DIMS))
    p["ref_b"] = jnp.zeros((1, 2 * PRED_DIMS), f32)
    p["dec_norm_g"] = jnp.ones((1, D_MODEL), f32)
    p["dec_norm_b"] = jnp.zeros((1, D_MODEL), f32)

    # encoder layers (independent init after _reset_parameters)
    L = N_ENC_LAYERS
    p["enc_qkv_w"] = stack_x(L, (D_MODEL, 3 * D_MODEL)); p["enc_qkv_b"] = zeros(L, 3 * D_MODEL)
    p["enc_out_w"] = stack_x(L, (D_MODEL, D_MODEL));     p["enc_out_b"] = zeros(L, D_MODEL)
    p["enc_ffn1_w"] = stack_x(L, (D_MODEL, DIM_FF));     p["enc_ffn1_b"] = zeros(L, DIM_FF)
    p["enc_ffn2_w"] = stack_x(L, (DIM_FF, D_MODEL));     p["enc_ffn2_b"] = zeros(L, D_MODEL)
    p["enc_norm1_g"] = ones(L, D_MODEL); p["enc_norm1_b"] = zeros(L, D_MODEL)
    p["enc_norm2_g"] = ones(L, D_MODEL); p["enc_norm2_b"] = zeros(L, D_MODEL)

    # decoder layers
    L = N_DEC_LAYERS
    p["dec_sa_qkv_w"] = stack_x(L, (D_MODEL, 3 * D_MODEL)); p["dec_sa_qkv_b"] = zeros(L, 3 * D_MODEL)
    p["dec_sa_out_w"] = stack_x(L, (D_MODEL, D_MODEL));     p["dec_sa_out_b"] = zeros(L, D_MODEL)
    p["dec_ca_qkv_w"] = stack_x(L, (D_MODEL, 3 * D_MODEL)); p["dec_ca_qkv_b"] = zeros(L, 3 * D_MODEL)
    p["dec_ca_out_w"] = stack_x(L, (D_MODEL, D_MODEL));     p["dec_ca_out_b"] = zeros(L, D_MODEL)
    p["dec_ffn1_w"] = stack_x(L, (D_MODEL, DIM_FF));        p["dec_ffn1_b"] = zeros(L, DIM_FF)
    p["dec_ffn2_w"] = stack_x(L, (DIM_FF, D_MODEL));        p["dec_ffn2_b"] = zeros(L, D_MODEL)
    for n in ("1", "2", "3"):
        p[f"dec_norm{n}_g"] = ones(L, D_MODEL)
        p[f"dec_norm{n}_b"] = zeros(L, D_MODEL)

    # prediction heads: torch deepcopy clones share identical init values -> replicate same arrays
    pv_w1, pv_w2 = xavier((D_MODEL, D_PRED_HIDDEN)), xavier((D_PRED_HIDDEN, D_PRED_HIDDEN))
    pv_w3 = jnp.zeros((D_PRED_HIDDEN, 2 * PRED_DIMS), f32)   # nn.init.constant_(last layer, 0)
    un_w1, un_w2 = xavier((D_MODEL, D_PRED_HIDDEN)), xavier((D_PRED_HIDDEN, D_PRED_HIDDEN))
    un_w3 = xavier((D_PRED_HIDDEN, 2 * PRED_DIMS))
    obj_w = xavier((D_MODEL, 1))

    def rep(a):
        return jnp.stack([a] * N_DEC_LAYERS)

    p["pv_w1"], p["pv_w2"], p["pv_w3"] = rep(pv_w1), rep(pv_w2), rep(pv_w3)
    p["pv_b1"] = zeros(L, D_PRED_HIDDEN); p["pv_b2"] = zeros(L, D_PRED_HIDDEN)
    p["pv_b3"] = zeros(L, 2 * PRED_DIMS)
    p["un_w1"], p["un_w2"], p["un_w3"] = rep(un_w1), rep(un_w2), rep(un_w3)
    p["un_b1"] = zeros(L, D_PRED_HIDDEN); p["un_b2"] = zeros(L, D_PRED_HIDDEN)
    p["un_b3"] = zeros(L, 2 * PRED_DIMS)
    p["obj_w"] = rep(obj_w)
    p["obj_b"] = zeros(L, 1)
    return p


# ------------------------------------ main ------------------------------------
if __name__ == "__main__":
    key = jax.random.PRNGKey(0)
    k1, k2, k3, k4, kp = jax.random.split(key, 5)

    B, Nm = 2, 16
    rng = jax.random.uniform(k1, (B, Nm), jnp.float32, 0.5, MAX_RANGE)
    rate = jax.random.uniform(k2, (B, Nm), jnp.float32, -MAX_RANGE_RATE, MAX_RANGE_RATE)
    theta = jax.random.uniform(k3, (B, Nm), jnp.float32, MIN_THETA, MAX_THETA)
    t_idx = jax.random.randint(k4, (B, Nm), 0, N_TIMESTEPS)
    time = t_idx.astype(jnp.float32) * DT
    meas_tensors = jnp.stack([rng, rate, theta, time], axis=-1)             # (2, 16, 4)
    mask = jnp.zeros((B, Nm), bool).at[1, 12:].set(True)                    # padding mask

    params = init_params(kp)
    out = jax.jit(mt3v2_forward)(params, meas_tensors, mask)
    jax.block_until_ready(out)
    print("KERNEL_OK")
</pallas_src>

<mosaic_0001>
module attributes {stable_mosaic.version = 11 : i64} {
  func.func @_mt3v2_kernel(%arg0: i32, %arg1: memref<1x16x3xf32, #tpu.memory_space<vmem>>, %arg2: memref<1x16x32xf32, #tpu.memory_space<vmem>>, %arg3: memref<1x1x16xf32, #tpu.memory_space<vmem>>, %arg4: memref<3x32xf32, #tpu.memory_space<vmem>>, %arg5: memref<1x32xf32, #tpu.memory_space<vmem>>, %arg6: memref<8x32xf32, #tpu.memory_space<vmem>>, %arg7: memref<32x4xf32, #tpu.memory_space<vmem>>, %arg8: memref<1x4xf32, #tpu.memory_space<vmem>>, %arg9: memref<1x32xf32, #tpu.memory_space<vmem>>, %arg10: memref<1x32xf32, #tpu.memory_space<vmem>>, %arg11: memref<2x32x96xf32, #tpu.memory_space<vmem>>, %arg12: memref<2x96xf32, #tpu.memory_space<vmem>>, %arg13: memref<2x32x32xf32, #tpu.memory_space<vmem>>, %arg14: memref<2x32xf32, #tpu.memory_space<vmem>>, %arg15: memref<2x32x64xf32, #tpu.memory_space<vmem>>, %arg16: memref<2x64xf32, #tpu.memory_space<vmem>>, %arg17: memref<2x64x32xf32, #tpu.memory_space<vmem>>, %arg18: memref<2x32xf32, #tpu.memory_space<vmem>>, %arg19: memref<2x32xf32, #tpu.memory_space<vmem>>, %arg20: memref<2x32xf32, #tpu.memory_space<vmem>>, %arg21: memref<2x32xf32, #tpu.memory_space<vmem>>, %arg22: memref<2x32xf32, #tpu.memory_space<vmem>>, %arg23: memref<2x32x96xf32, #tpu.memory_space<vmem>>, %arg24: memref<2x96xf32, #tpu.memory_space<vmem>>, %arg25: memref<2x32x32xf32, #tpu.memory_space<vmem>>, %arg26: memref<2x32xf32, #tpu.memory_space<vmem>>, %arg27: memref<2x32x96xf32, #tpu.memory_space<vmem>>, %arg28: memref<2x96xf32, #tpu.memory_space<vmem>>, %arg29: memref<2x32x32xf32, #tpu.memory_space<vmem>>, %arg30: memref<2x32xf32, #tpu.memory_space<vmem>>, %arg31: memref<2x32x64xf32, #tpu.memory_space<vmem>>, %arg32: memref<2x64xf32, #tpu.memory_space<vmem>>, %arg33: memref<2x64x32xf32, #tpu.memory_space<vmem>>, %arg34: memref<2x32xf32, #tpu.memory_space<vmem>>, %arg35: memref<2x32xf32, #tpu.memory_space<vmem>>, %arg36: memref<2x32xf32, #tpu.memory_space<vmem>>, %arg37: memref<2x32xf32, #tpu.memory_space<vmem>>, %arg38: memref<2x32xf32, #tpu.memory_space<vmem>>, %arg39: memref<2x32xf32, #tpu.memory_space<vmem>>, %arg40: memref<2x32xf32, #tpu.memory_space<vmem>>, %arg41: memref<2x32x32xf32, #tpu.memory_space<vmem>>, %arg42: memref<2x32xf32, #tpu.memory_space<vmem>>, %arg43: memref<2x32x32xf32, #tpu.memory_space<vmem>>, %arg44: memref<2x32xf32, #tpu.memory_space<vmem>>, %arg45: memref<2x32x4xf32, #tpu.memory_space<vmem>>, %arg46: memref<2x4xf32, #tpu.memory_space<vmem>>, %arg47: memref<2x32x32xf32, #tpu.memory_space<vmem>>, %arg48: memref<2x32xf32, #tpu.memory_space<vmem>>, %arg49: memref<2x32x32xf32, #tpu.memory_space<vmem>>, %arg50: memref<2x32xf32, #tpu.memory_space<vmem>>, %arg51: memref<2x32x4xf32, #tpu.memory_space<vmem>>, %arg52: memref<2x4xf32, #tpu.memory_space<vmem>>, %arg53: memref<2x32x1xf32, #tpu.memory_space<vmem>>, %arg54: memref<2x1xf32, #tpu.memory_space<vmem>>, %arg55: memref<2x1x8x4xf32, #tpu.memory_space<vmem>>, %arg56: memref<2x1x8x1xf32, #tpu.memory_space<vmem>>, %arg57: memref<2x1x8x4xf32, #tpu.memory_space<vmem>>) attributes {dimension_semantics = [#tpu.dimension_semantics<parallel>], iteration_bounds = array<i64: 2>, scalar_prefetch = 0 : i64, scratch_operands = 0 : i64, tpu.core_type = #tpu.core_type<tc>, window_params = [{transform_indices = @transform_0, window_bounds = array<i64: 1, 16, 3>}, {transform_indices = @transform_1, window_bounds = array<i64: 1, 16, 32>}, {transform_indices = @transform_2, window_bounds = array<i64: 1, 1, 16>}, {pipeline_mode = #tpu.pipeline_mode<synchronous>, transform_indices = @transform_3, window_bounds = array<i64: 3, 32>}, {pipeline_mode = #tpu.pipeline_mode<synchronous>, transform_indices = @transform_4, window_bounds = array<i64: 1, 32>}, {pipeline_mode = #tpu.pipeline_mode<synchronous>, transform_indices = @transform_5, window_bounds = array<i64: 8, 32>}, {pipeline_mode = #tpu.pipeline_mode<synchronous>, transform_indices = @transform_6, window_bounds = array<i64: 32, 4>}, {pipeline_mode = #tpu.pipeline_mode<synchronous>, transform_indices = @transform_7, window_bounds = array<i64: 1, 4>}, {pipeline_mode = #tpu.pipeline_mode<synchronous>, transform_indices = @transform_8, window_bounds = array<i64: 1, 32>}, {pipeline_mode = #tpu.pipeline_mode<synchronous>, transform_indices = @transform_9, window_bounds = array<i64: 1, 32>}, {pipeline_mode = #tpu.pipeline_mode<synchronous>, transform_indices = @transform_10, window_bounds = array<i64: 2, 32, 96>}, {pipeline_mode = #tpu.pipeline_mode<synchronous>, transform_indices = @transform_11, window_bounds = array<i64: 2, 96>}, {pipeline_mode = #tpu.pipeline_mode<synchronous>, transform_indices = @transform_12, window_bounds = array<i64: 2, 32, 32>}, {pipeline_mode = #tpu.pipeline_mode<synchronous>, transform_indices = @transform_13, window_bounds = array<i64: 2, 32>}, {pipeline_mode = #tpu.pipeline_mode<synchronous>, transform_indices = @transform_14, window_bounds = array<i64: 2, 32, 64>}, {pipeline_mode = #tpu.pipeline_mode<synchronous>, transform_indices = @transform_15, window_bounds = array<i64: 2, 64>}, {pipeline_mode = #tpu.pipeline_mode<synchronous>, transform_indices = @transform_16, window_bounds = array<i64: 2, 64, 32>}, {pipeline_mode = #tpu.pipeline_mode<synchronous>, transform_indices = @transform_17, window_bounds = array<i64: 2, 32>}, {pipeline_mode = #tpu.pipeline_mode<synchronous>, transform_indices = @transform_18, window_bounds = array<i64: 2, 32>}, {pipeline_mode = #tpu.pipeline_mode<synchronous>, transform_indices = @transform_19, window_bounds = array<i64: 2, 32>}, {pipeline_mode = #tpu.pipeline_mode<synchronous>, transform_indices = @transform_20, window_bounds = array<i64: 2, 32>}, {pipeline_mode = #tpu.pipeline_mode<synchronous>, transform_indices = @transform_21, window_bounds = array<i64: 2, 32>}, {pipeline_mode = #tpu.pipeline_mode<synchronous>, transform_indices = @transform_22, window_bounds = array<i64: 2, 32, 96>}, {pipeline_mode = #tpu.pipeline_mode<synchronous>, transform_indices = @transform_23, window_bounds = array<i64: 2, 96>}, {pipeline_mode = #tpu.pipeline_mode<synchronous>, transform_indices = @transform_24, window_bounds = array<i64: 2, 32, 32>}, {pipeline_mode = #tpu.pipeline_mode<synchronous>, transform_indices = @transform_25, window_bounds = array<i64: 2, 32>}, {pipeline_mode = #tpu.pipeline_mode<synchronous>, transform_indices = @transform_26, window_bounds = array<i64: 2, 32, 96>}, {pipeline_mode = #tpu.pipeline_mode<synchronous>, transform_indices = @transform_27, window_bounds = array<i64: 2, 96>}, {pipeline_mode = #tpu.pipeline_mode<synchronous>, transform_indices = @transform_28, window_bounds = array<i64: 2, 32, 32>}, {pipeline_mode = #tpu.pipeline_mode<synchronous>, transform_indices = @transform_29, window_bounds = array<i64: 2, 32>}, {pipeline_mode = #tpu.pipeline_mode<synchronous>, transform_indices = @transform_30, window_bounds = array<i64: 2, 32, 64>}, {pipeline_mode = #tpu.pipeline_mode<synchronous>, transform_indices = @transform_31, window_bounds = array<i64: 2, 64>}, {pipeline_mode = #tpu.pipeline_mode<synchronous>, transform_indices = @transform_32, window_bounds = array<i64: 2, 64, 32>}, {pipeline_mode = #tpu.pipeline_mode<synchronous>, transform_indices = @transform_33, window_bounds = array<i64: 2, 32>}, {pipeline_mode = #tpu.pipeline_mode<synchronous>, transform_indices = @transform_34, window_bounds = array<i64: 2, 32>}, {pipeline_mode = #tpu.pipeline_mode<synchronous>, transform_indices = @transform_35, window_bounds = array<i64: 2, 32>}, {pipeline_mode = #tpu.pipeline_mode<synchronous>, transform_indices = @transform_36, window_bounds = array<i64: 2, 32>}, {pipeline_mode = #tpu.pipeline_mode<synchronous>, transform_indices = @transform_37, window_bounds = array<i64: 2, 32>}, {pipeline_mode = #tpu.pipeline_mode<synchronous>, transform_indices = @transform_38, window_bounds = array<i64: 2, 32>}, {pipeline_mode = #tpu.pipeline_mode<synchronous>, transform_indices = @transform_39, window_bounds = array<i64: 2, 32>}, {pipeline_mode = #tpu.pipeline_mode<synchronous>, transform_indices = @transform_40, window_bounds = array<i64: 2, 32, 32>}, {pipeline_mode = #tpu.pipeline_mode<synchronous>, transform_indices = @transform_41, window_bounds = array<i64: 2, 32>}, {pipeline_mode = #tpu.pipeline_mode<synchronous>, transform_indices = @transform_42, window_bounds = array<i64: 2, 32, 32>}, {pipeline_mode = #tpu.pipeline_mode<synchronous>, transform_indices = @transform_43, window_bounds = array<i64: 2, 32>}, {pipeline_mode = #tpu.pipeline_mode<synchronous>, transform_indices = @transform_44, window_bounds = array<i64: 2, 32, 4>}, {pipeline_mode = #tpu.pipeline_mode<synchronous>, transform_indices = @transform_45, window_bounds = array<i64: 2, 4>}, {pipeline_mode = #tpu.pipeline_mode<synchronous>, transform_indices = @transform_46, window_bounds = array<i64: 2, 32, 32>}, {pipeline_mode = #tpu.pipeline_mode<synchronous>, transform_indices = @transform_47, window_bounds = array<i64: 2, 32>}, {pipeline_mode = #tpu.pipeline_mode<synchronous>, transform_indices = @transform_48, window_bounds = array<i64: 2, 32, 32>}, {pipeline_mode = #tpu.pipeline_mode<synchronous>, transform_indices = @transform_49, window_bounds = array<i64: 2, 32>}, {pipeline_mode = #tpu.pipeline_mode<synchronous>, transform_indices = @transform_50, window_bounds = array<i64: 2, 32, 4>}, {pipeline_mode = #tpu.pipeline_mode<synchronous>, transform_indices = @transform_51, window_bounds = array<i64: 2, 4>}, {pipeline_mode = #tpu.pipeline_mode<synchronous>, transform_indices = @transform_52, window_bounds = array<i64: 2, 32, 1>}, {pipeline_mode = #tpu.pipeline_mode<synchronous>, transform_indices = @transform_53, window_bounds = array<i64: 2, 1>}, {transform_indices = @transform_54, window_bounds = array<i64: 2, 1, 8, 4>}, {transform_indices = @transform_55, window_bounds = array<i64: 2, 1, 8, 1>}, {transform_indices = @transform_56, window_bounds = array<i64: 2, 1, 8, 4>}]} {
    %c0 = arith.constant 0 : index
    %c0_0 = arith.constant 0 : index
    %c0_1 = arith.constant 0 : index
    %0 = vector.load %arg1[%c0, %c0_0, %c0_1] : memref<1x16x3xf32, #tpu.memory_space<vmem>>, vector<1x16x3xf32>
    %1 = vector.shape_cast %0 : vector<1x16x3xf32> to vector<16x3xf32>
    %c0_2 = arith.constant 0 : index
    %c0_3 = arith.constant 0 : index
    %c0_4 = arith.constant 0 : index
    %2 = vector.load %arg2[%c0_2, %c0_3, %c0_4] : memref<1x16x32xf32, #tpu.memory_space<vmem>>, vector<1x16x32xf32>
    %3 = vector.shape_cast %2 : vector<1x16x32xf32> to vector<16x32xf32>
    %c0_5 = arith.constant 0 : index
    %c0_6 = arith.constant 0 : index
    %c0_7 = arith.constant 0 : index
    %4 = vector.load %arg3[%c0_5, %c0_6, %c0_7] : memref<1x1x16xf32, #tpu.memory_space<vmem>>, vector<1x1x16xf32>
    %5 = vector.shape_cast %4 : vector<1x1x16xf32> to vector<1x16xf32>
    %c0_8 = arith.constant 0 : index
    %c0_9 = arith.constant 0 : index
    %6 = vector.load %arg4[%c0_8, %c0_9] : memref<3x32xf32, #tpu.memory_space<vmem>>, vector<3x32xf32>
    %cst = arith.constant dense<0.000000e+00> : vector<16x32xf32>
    %7 = tpu.matmul %1, %6, %cst {dimension_numbers = #tpu.dot_dimension_numbers<[1], [0], [0], [1], [0, 0, 1, 1], [], []>} : vector<16x3xf32>, vector<3x32xf32>, vector<16x32xf32> -> vector<16x32xf32>
    %c0_10 = arith.constant 0 : index
    %c0_11 = arith.constant 0 : index
    %8 = vector.load %arg5[%c0_10, %c0_11] : memref<1x32xf32, #tpu.memory_space<vmem>>, vector<1x32xf32>
    %9 = vector.broadcast %8 : vector<1x32xf32> to vector<16x32xf32>
    %10 = arith.addf %7, %9 : vector<16x32xf32>
    %11 = arith.addf %10, %3 : vector<16x32xf32>
    %c0_12 = arith.constant 0 : index
    %c0_13 = arith.constant 0 : index
    %c0_14 = arith.constant 0 : index
    %12 = vector.load %arg11[%c0_12, %c0_13, %c0_14] : memref<2x32x96xf32, #tpu.memory_space<vmem>>, vector<1x32x96xf32>
    %13 = vector.shape_cast %12 : vector<1x32x96xf32> to vector<32x96xf32>
    %c0_15 = arith.constant 0 : index
    %c0_16 = arith.constant 0 : index
    %14 = vector.load %arg12[%c0_15, %c0_16] : memref<2x96xf32, #tpu.memory_space<vmem>>, vector<1x96xf32>
    %c0_17 = arith.constant 0 : index
    %c0_18 = arith.constant 0 : index
    %c0_19 = arith.constant 0 : index
    %15 = vector.load %arg13[%c0_17, %c0_18, %c0_19] : memref<2x32x32xf32, #tpu.memory_space<vmem>>, vector<1x32x32xf32>
    %16 = vector.shape_cast %15 : vector<1x32x32xf32> to vector<32x32xf32>
    %c0_20 = arith.constant 0 : index
    %c0_21 = arith.constant 0 : index
    %17 = vector.load %arg14[%c0_20, %c0_21] : memref<2x32xf32, #tpu.memory_space<vmem>>, vector<1x32xf32>
    %18 = vector.extract_strided_slice %13 {offsets = [0, 0], sizes = [32, 64], strides = [1, 1]} : vector<32x96xf32> to vector<32x64xf32>
    %cst_22 = arith.constant dense<0.000000e+00> : vector<16x64xf32>
    %19 = tpu.matmul %11, %18, %cst_22 {dimension_numbers = #tpu.dot_dimension_numbers<[1], [0], [0], [1], [0, 0, 1, 1], [], []>} : vector<16x32xf32>, vector<32x64xf32>, vector<16x64xf32> -> vector<16x64xf32>
    %20 = vector.extract_strided_slice %14 {offsets = [0, 0], sizes = [1, 64], strides = [1, 1]} : vector<1x96xf32> to vector<1x64xf32>
    %21 = vector.broadcast %20 : vector<1x64xf32> to vector<16x64xf32>
    %22 = arith.addf %19, %21 : vector<16x64xf32>
    %23 = vector.extract_strided_slice %22 {offsets = [0, 0], sizes = [16, 32], strides = [1, 1]} : vector<16x64xf32> to vector<16x32xf32>
    %24 = vector.extract_strided_slice %22 {offsets = [0, 32], sizes = [16, 32], strides = [1, 1]} : vector<16x64xf32> to vector<16x32xf32>
    %25 = vector.extract_strided_slice %13 {offsets = [0, 64], sizes = [32, 32], strides = [1, 1]} : vector<32x96xf32> to vector<32x32xf32>
    %cst_23 = arith.constant dense<0.000000e+00> : vector<16x32xf32>
    %26 = tpu.matmul %10, %25, %cst_23 {dimension_numbers = #tpu.dot_dimension_numbers<[1], [0], [0], [1], [0, 0, 1, 1], [], []>} : vector<16x32xf32>, vector<32x32xf32>, vector<16x32xf32> -> vector<16x32xf32>
    %27 = vector.extract_strided_slice %14 {offsets = [0, 64], sizes = [1, 32], strides = [1, 1]} : vector<1x96xf32> to vector<1x32xf32>
    %28 = vector.broadcast %27 : vector<1x32xf32> to vector<16x32xf32>
    %29 = arith.addf %26, %28 : vector<16x32xf32>
    %30 = vector.extract_strided_slice %23 {offsets = [0, 0], sizes = [16, 16], strides = [1, 1]} : vector<16x32xf32> to vector<16x16xf32>
    %31 = vector.extract_strided_slice %24 {offsets = [0, 0], sizes = [16, 16], strides = [1, 1]} : vector<16x32xf32> to vector<16x16xf32>
    %cst_24 = arith.constant dense<0.000000e+00> : vector<16x16xf32>
    %32 = tpu.matmul %30, %31, %cst_24 {dimension_numbers = #tpu.dot_dimension_numbers<[1], [1], [0], [0], [0, 0, 1, 0], [], []>} : vector<16x16xf32>, vector<16x16xf32>, vector<16x16xf32> -> vector<16x16xf32>
    %cst_25 = arith.constant 2.500000e-01 : f32
    %33 = vector.broadcast %cst_25 : f32 to vector<16x16xf32>
    %34 = arith.mulf %32, %33 : vector<16x16xf32>
    %35 = vector.broadcast %5 : vector<1x16xf32> to vector<16x16xf32>
    %36 = arith.addf %34, %35 : vector<16x16xf32>
    %cst_26 = arith.constant dense<0xFF800000> : vector<16xf32>
    %37 = vector.multi_reduction <maximumf>, %36, %cst_26 [1] : vector<16x16xf32> to vector<16xf32>
    %38 = vector.shape_cast %37 : vector<16xf32> to vector<16x1xf32>
    %39 = vector.broadcast %38 : vector<16x1xf32> to vector<16x16xf32>
    %40 = arith.subf %36, %39 : vector<16x16xf32>
    %41 = math.exp %40 : vector<16x16xf32>
    %cst_27 = arith.constant dense<0.000000e+00> : vector<16xf32>
    %42 = vector.multi_reduction <add>, %41, %cst_27 [1] : vector<16x16xf32> to vector<16xf32>
    %43 = vector.shape_cast %42 : vector<16xf32> to vector<16x1xf32>
    %44 = vector.broadcast %43 : vector<16x1xf32> to vector<16x16xf32>
    %45 = arith.divf %41, %44 : vector<16x16xf32>
    %46 = vector.extract_strided_slice %29 {offsets = [0, 0], sizes = [16, 16], strides = [1, 1]} : vector<16x32xf32> to vector<16x16xf32>
    %cst_28 = arith.constant dense<0.000000e+00> : vector<16x16xf32>
    %47 = tpu.matmul %45, %46, %cst_28 {dimension_numbers = #tpu.dot_dimension_numbers<[1], [0], [0], [1], [0, 0, 1, 1], [], []>} : vector<16x16xf32>, vector<16x16xf32>, vector<16x16xf32> -> vector<16x16xf32>
    %48 = vector.extract_strided_slice %23 {offsets = [0, 16], sizes = [16, 16], strides = [1, 1]} : vector<16x32xf32> to vector<16x16xf32>
    %49 = vector.extract_strided_slice %24 {offsets = [0, 16], sizes = [16, 16], strides = [1, 1]} : vector<16x32xf32> to vector<16x16xf32>
    %cst_29 = arith.constant dense<0.000000e+00> : vector<16x16xf32>
    %50 = tpu.matmul %48, %49, %cst_29 {dimension_numbers = #tpu.dot_dimension_numbers<[1], [1], [0], [0], [0, 0, 1, 0], [], []>} : vector<16x16xf32>, vector<16x16xf32>, vector<16x16xf32> -> vector<16x16xf32>
    %cst_30 = arith.constant 2.500000e-01 : f32
    %51 = vector.broadcast %cst_30 : f32 to vector<16x16xf32>
    %52 = arith.mulf %50, %51 : vector<16x16xf32>
    %53 = vector.broadcast %5 : vector<1x16xf32> to vector<16x16xf32>
    %54 = arith.addf %52, %53 : vector<16x16xf32>
    %cst_31 = arith.constant dense<0xFF800000> : vector<16xf32>
    %55 = vector.multi_reduction <maximumf>, %54, %cst_31 [1] : vector<16x16xf32> to vector<16xf32>
    %56 = vector.shape_cast %55 : vector<16xf32> to vector<16x1xf32>
    %57 = vector.broadcast %56 : vector<16x1xf32> to vector<16x16xf32>
    %58 = arith.subf %54, %57 : vector<16x16xf32>
    %59 = math.exp %58 : vector<16x16xf32>
    %cst_32 = arith.constant dense<0.000000e+00> : vector<16xf32>
    %60 = vector.multi_reduction <add>, %59, %cst_32 [1] : vector<16x16xf32> to vector<16xf32>
    %61 = vector.shape_cast %60 : vector<16xf32> to vector<16x1xf32>
    %62 = vector.broadcast %61 : vector<16x1xf32> to vector<16x16xf32>
    %63 = arith.divf %59, %62 : vector<16x16xf32>
    %64 = vector.extract_strided_slice %29 {offsets = [0, 16], sizes = [16, 16], strides = [1, 1]} : vector<16x32xf32> to vector<16x16xf32>
    %cst_33 = arith.constant dense<0.000000e+00> : vector<16x16xf32>
    %65 = tpu.matmul %63, %64, %cst_33 {dimension_numbers = #tpu.dot_dimension_numbers<[1], [0], [0], [1], [0, 0, 1, 1], [], []>} : vector<16x16xf32>, vector<16x16xf32>, vector<16x16xf32> -> vector<16x16xf32>
    %66 = tpu.concatenate %47, %65 in 1 : vector<16x16xf32>, vector<16x16xf32> -> vector<16x32xf32>
    %cst_34 = arith.constant dense<0.000000e+00> : vector<16x32xf32>
    %67 = tpu.matmul %66, %16, %cst_34 {dimension_numbers = #tpu.dot_dimension_numbers<[1], [0], [0], [1], [0, 0, 1, 1], [], []>} : vector<16x32xf32>, vector<32x32xf32>, vector<16x32xf32> -> vector<16x32xf32>
    %68 = vector.broadcast %17 : vector<1x32xf32> to vector<16x32xf32>
    %69 = arith.addf %67, %68 : vector<16x32xf32>
    %70 = arith.addf %10, %69 : vector<16x32xf32>
    %c0_35 = arith.constant 0 : index
    %c0_36 = arith.constant 0 : index
    %71 = vector.load %arg19[%c0_35, %c0_36] : memref<2x32xf32, #tpu.memory_space<vmem>>, vector<1x32xf32>
    %c0_37 = arith.constant 0 : index
    %c0_38 = arith.constant 0 : index
    %72 = vector.load %arg20[%c0_37, %c0_38] : memref<2x32xf32, #tpu.memory_space<vmem>>, vector<1x32xf32>
    %cst_39 = arith.constant dense<0.000000e+00> : vector<16xf32>
    %73 = vector.multi_reduction <add>, %70, %cst_39 [1] : vector<16x32xf32> to vector<16xf32>
    %74 = vector.shape_cast %73 : vector<16xf32> to vector<16x1xf32>
    %cst_40 = arith.constant 3.200000e+01 : f32
    %75 = vector.broadcast %cst_40 : f32 to vector<16x1xf32>
    %76 = arith.divf %74, %75 : vector<16x1xf32>
    %77 = vector.broadcast %76 : vector<16x1xf32> to vector<16x32xf32>
    %78 = arith.subf %70, %77 : vector<16x32xf32>
    %79 = arith.mulf %78, %78 : vector<16x32xf32>
    %cst_41 = arith.constant dense<0.000000e+00> : vector<16xf32>
    %80 = vector.multi_reduction <add>, %79, %cst_41 [1] : vector<16x32xf32> to vector<16xf32>
    %81 = vector.shape_cast %80 : vector<16xf32> to vector<16x1xf32>
    %cst_42 = arith.constant 3.200000e+01 : f32
    %82 = vector.broadcast %cst_42 : f32 to vector<16x1xf32>
    %83 = arith.divf %81, %82 : vector<16x1xf32>
    %cst_43 = arith.constant 9.99999974E-6 : f32
    %84 = vector.broadcast %cst_43 : f32 to vector<16x1xf32>
    %85 = arith.addf %83, %84 : vector<16x1xf32>
    %86 = math.rsqrt %85 : vector<16x1xf32>
    %87 = vector.broadcast %86 : vector<16x1xf32> to vector<16x32xf32>
    %88 = arith.mulf %78, %87 : vector<16x32xf32>
    %89 = vector.broadcast %71 : vector<1x32xf32> to vector<16x32xf32>
    %90 = arith.mulf %88, %89 : vector<16x32xf32>
    %91 = vector.broadcast %72 : vector<1x32xf32> to vector<16x32xf32>
    %92 = arith.addf %90, %91 : vector<16x32xf32>
    %c0_44 = arith.constant 0 : index
    %c0_45 = arith.constant 0 : index
    %c0_46 = arith.constant 0 : index
    %93 = vector.load %arg15[%c0_44, %c0_45, %c0_46] : memref<2x32x64xf32, #tpu.memory_space<vmem>>, vector<1x32x64xf32>
    %94 = vector.shape_cast %93 : vector<1x32x64xf32> to vector<32x64xf32>
    %cst_47 = arith.constant dense<0.000000e+00> : vector<16x64xf32>
    %95 = tpu.matmul %92, %94, %cst_47 {dimension_numbers = #tpu.dot_dimension_numbers<[1], [0], [0], [1], [0, 0, 1, 1], [], []>} : vector<16x32xf32>, vector<32x64xf32>, vector<16x64xf32> -> vector<16x64xf32>
    %c0_48 = arith.constant 0 : index
    %c0_49 = arith.constant 0 : index
    %96 = vector.load %arg16[%c0_48, %c0_49] : memref<2x64xf32, #tpu.memory_space<vmem>>, vector<1x64xf32>
    %97 = vector.broadcast %96 : vector<1x64xf32> to vector<16x64xf32>
    %98 = arith.addf %95, %97 : vector<16x64xf32>
    %cst_50 = arith.constant 0.000000e+00 : f32
    %99 = vector.broadcast %cst_50 : f32 to vector<16x64xf32>
    %100 = arith.maximumf %98, %99 : vector<16x64xf32>
    %c0_51 = arith.constant 0 : index
    %c0_52 = arith.constant 0 : index
    %c0_53 = arith.constant 0 : index
    %101 = vector.load %arg17[%c0_51, %c0_52, %c0_53] : memref<2x64x32xf32, #tpu.memory_space<vmem>>, vector<1x64x32xf32>
    %102 = vector.shape_cast %101 : vector<1x64x32xf32> to vector<64x32xf32>
    %cst_54 = arith.constant dense<0.000000e+00> : vector<16x32xf32>
    %103 = tpu.matmul %100, %102, %cst_54 {dimension_numbers = #tpu.dot_dimension_numbers<[1], [0], [0], [1], [0, 0, 1, 1], [], []>} : vector<16x64xf32>, vector<64x32xf32>, vector<16x32xf32> -> vector<16x32xf32>
    %c0_55 = arith.constant 0 : index
    %c0_56 = arith.constant 0 : index
    %104 = vector.load %arg18[%c0_55, %c0_56] : memref<2x32xf32, #tpu.memory_space<vmem>>, vector<1x32xf32>
    %105 = vector.broadcast %104 : vector<1x32xf32> to vector<16x32xf32>
    %106 = arith.addf %103, %105 : vector<16x32xf32>
    %107 = arith.addf %92, %106 : vector<16x32xf32>
    %c0_57 = arith.constant 0 : index
    %c0_58 = arith.constant 0 : index
    %108 = vector.load %arg21[%c0_57, %c0_58] : memref<2x32xf32, #tpu.memory_space<vmem>>, vector<1x32xf32>
    %c0_59 = arith.constant 0 : index
    %c0_60 = arith.constant 0 : index
    %109 = vector.load %arg22[%c0_59, %c0_60] : memref<2x32xf32, #tpu.memory_space<vmem>>, vector<1x32xf32>
    %cst_61 = arith.constant dense<0.000000e+00> : vector<16xf32>
    %110 = vector.multi_reduction <add>, %107, %cst_61 [1] : vector<16x32xf32> to vector<16xf32>
    %111 = vector.shape_cast %110 : vector<16xf32> to vector<16x1xf32>
    %cst_62 = arith.constant 3.200000e+01 : f32
    %112 = vector.broadcast %cst_62 : f32 to vector<16x1xf32>
    %113 = arith.divf %111, %112 : vector<16x1xf32>
    %114 = vector.broadcast %113 : vector<16x1xf32> to vector<16x32xf32>
    %115 = arith.subf %107, %114 : vector<16x32xf32>
    %116 = arith.mulf %115, %115 : vector<16x32xf32>
    %cst_63 = arith.constant dense<0.000000e+00> : vector<16xf32>
    %117 = vector.multi_reduction <add>, %116, %cst_63 [1] : vector<16x32xf32> to vector<16xf32>
    %118 = vector.shape_cast %117 : vector<16xf32> to vector<16x1xf32>
    %cst_64 = arith.constant 3.200000e+01 : f32
    %119 = vector.broadcast %cst_64 : f32 to vector<16x1xf32>
    %120 = arith.divf %118, %119 : vector<16x1xf32>
    %cst_65 = arith.constant 9.99999974E-6 : f32
    %121 = vector.broadcast %cst_65 : f32 to vector<16x1xf32>
    %122 = arith.addf %120, %121 : vector<16x1xf32>
    %123 = math.rsqrt %122 : vector<16x1xf32>
    %124 = vector.broadcast %123 : vector<16x1xf32> to vector<16x32xf32>
    %125 = arith.mulf %115, %124 : vector<16x32xf32>
    %126 = vector.broadcast %108 : vector<1x32xf32> to vector<16x32xf32>
    %127 = arith.mulf %125, %126 : vector<16x32xf32>
    %128 = vector.broadcast %109 : vector<1x32xf32> to vector<16x32xf32>
    %129 = arith.addf %127, %128 : vector<16x32xf32>
    %130 = arith.addf %129, %3 : vector<16x32xf32>
    %c1 = arith.constant 1 : index
    %c0_66 = arith.constant 0 : index
    %c0_67 = arith.constant 0 : index
    %131 = vector.load %arg11[%c1, %c0_66, %c0_67] : memref<2x32x96xf32, #tpu.memory_space<vmem>>, vector<1x32x96xf32>
    %132 = vector.shape_cast %131 : vector<1x32x96xf32> to vector<32x96xf32>
    %c1_68 = arith.constant 1 : index
    %c0_69 = arith.constant 0 : index
    %133 = vector.load %arg12[%c1_68, %c0_69] : memref<2x96xf32, #tpu.memory_space<vmem>>, vector<1x96xf32>
    %c1_70 = arith.constant 1 : index
    %c0_71 = arith.constant 0 : index
    %c0_72 = arith.constant 0 : index
    %134 = vector.load %arg13[%c1_70, %c0_71, %c0_72] : memref<2x32x32xf32, #tpu.memory_space<vmem>>, vector<1x32x32xf32>
    %135 = vector.shape_cast %134 : vector<1x32x32xf32> to vector<32x32xf32>
    %c1_73 = arith.constant 1 : index
    %c0_74 = arith.constant 0 : index
    %136 = vector.load %arg14[%c1_73, %c0_74] : memref<2x32xf32, #tpu.memory_space<vmem>>, vector<1x32xf32>
    %137 = vector.extract_strided_slice %132 {offsets = [0, 0], sizes = [32, 64], strides = [1, 1]} : vector<32x96xf32> to vector<32x64xf32>
    %cst_75 = arith.constant dense<0.000000e+00> : vector<16x64xf32>
    %138 = tpu.matmul %130, %137, %cst_75 {dimension_numbers = #tpu.dot_dimension_numbers<[1], [0], [0], [1], [0, 0, 1, 1], [], []>} : vector<16x32xf32>, vector<32x64xf32>, vector<16x64xf32> -> vector<16x64xf32>
    %139 = vector.extract_strided_slice %133 {offsets = [0, 0], sizes = [1, 64], strides = [1, 1]} : vector<1x96xf32> to vector<1x64xf32>
    %140 = vector.broadcast %139 : vector<1x64xf32> to vector<16x64xf32>
    %141 = arith.addf %138, %140 : vector<16x64xf32>
    %142 = vector.extract_strided_slice %141 {offsets = [0, 0], sizes = [16, 32], strides = [1, 1]} : vector<16x64xf32> to vector<16x32xf32>
    %143 = vector.extract_strided_slice %141 {offsets = [0, 32], sizes = [16, 32], strides = [1, 1]} : vector<16x64xf32> to vector<16x32xf32>
    %144 = vector.extract_strided_slice %132 {offsets = [0, 64], sizes = [32, 32], strides = [1, 1]} : vector<32x96xf32> to vector<32x32xf32>
    %cst_76 = arith.constant dense<0.000000e+00> : vector<16x32xf32>
    %145 = tpu.matmul %129, %144, %cst_76 {dimension_numbers = #tpu.dot_dimension_numbers<[1], [0], [0], [1], [0, 0, 1, 1], [], []>} : vector<16x32xf32>, vector<32x32xf32>, vector<16x32xf32> -> vector<16x32xf32>
    %146 = vector.extract_strided_slice %133 {offsets = [0, 64], sizes = [1, 32], strides = [1, 1]} : vector<1x96xf32> to vector<1x32xf32>
    %147 = vector.broadcast %146 : vector<1x32xf32> to vector<16x32xf32>
    %148 = arith.addf %145, %147 : vector<16x32xf32>
    %149 = vector.extract_strided_slice %142 {offsets = [0, 0], sizes = [16, 16], strides = [1, 1]} : vector<16x32xf32> to vector<16x16xf32>
    %150 = vector.extract_strided_slice %143 {offsets = [0, 0], sizes = [16, 16], strides = [1, 1]} : vector<16x32xf32> to vector<16x16xf32>
    %cst_77 = arith.constant dense<0.000000e+00> : vector<16x16xf32>
    %151 = tpu.matmul %149, %150, %cst_77 {dimension_numbers = #tpu.dot_dimension_numbers<[1], [1], [0], [0], [0, 0, 1, 0], [], []>} : vector<16x16xf32>, vector<16x16xf32>, vector<16x16xf32> -> vector<16x16xf32>
    %cst_78 = arith.constant 2.500000e-01 : f32
    %152 = vector.broadcast %cst_78 : f32 to vector<16x16xf32>
    %153 = arith.mulf %151, %152 : vector<16x16xf32>
    %154 = vector.broadcast %5 : vector<1x16xf32> to vector<16x16xf32>
    %155 = arith.addf %153, %154 : vector<16x16xf32>
    %cst_79 = arith.constant dense<0xFF800000> : vector<16xf32>
    %156 = vector.multi_reduction <maximumf>, %155, %cst_79 [1] : vector<16x16xf32> to vector<16xf32>
    %157 = vector.shape_cast %156 : vector<16xf32> to vector<16x1xf32>
    %158 = vector.broadcast %157 : vector<16x1xf32> to vector<16x16xf32>
    %159 = arith.subf %155, %158 : vector<16x16xf32>
    %160 = math.exp %159 : vector<16x16xf32>
    %cst_80 = arith.constant dense<0.000000e+00> : vector<16xf32>
    %161 = vector.multi_reduction <add>, %160, %cst_80 [1] : vector<16x16xf32> to vector<16xf32>
    %162 = vector.shape_cast %161 : vector<16xf32> to vector<16x1xf32>
    %163 = vector.broadcast %162 : vector<16x1xf32> to vector<16x16xf32>
    %164 = arith.divf %160, %163 : vector<16x16xf32>
    %165 = vector.extract_strided_slice %148 {offsets = [0, 0], sizes = [16, 16], strides = [1, 1]} : vector<16x32xf32> to vector<16x16xf32>
    %cst_81 = arith.constant dense<0.000000e+00> : vector<16x16xf32>
    %166 = tpu.matmul %164, %165, %cst_81 {dimension_numbers = #tpu.dot_dimension_numbers<[1], [0], [0], [1], [0, 0, 1, 1], [], []>} : vector<16x16xf32>, vector<16x16xf32>, vector<16x16xf32> -> vector<16x16xf32>
    %167 = vector.extract_strided_slice %142 {offsets = [0, 16], sizes = [16, 16], strides = [1, 1]} : vector<16x32xf32> to vector<16x16xf32>
    %168 = vector.extract_strided_slice %143 {offsets = [0, 16], sizes = [16, 16], strides = [1, 1]} : vector<16x32xf32> to vector<16x16xf32>
    %cst_82 = arith.constant dense<0.000000e+00> : vector<16x16xf32>
    %169 = tpu.matmul %167, %168, %cst_82 {dimension_numbers = #tpu.dot_dimension_numbers<[1], [1], [0], [0], [0, 0, 1, 0], [], []>} : vector<16x16xf32>, vector<16x16xf32>, vector<16x16xf32> -> vector<16x16xf32>
    %cst_83 = arith.constant 2.500000e-01 : f32
    %170 = vector.broadcast %cst_83 : f32 to vector<16x16xf32>
    %171 = arith.mulf %169, %170 : vector<16x16xf32>
    %172 = vector.broadcast %5 : vector<1x16xf32> to vector<16x16xf32>
    %173 = arith.addf %171, %172 : vector<16x16xf32>
    %cst_84 = arith.constant dense<0xFF800000> : vector<16xf32>
    %174 = vector.multi_reduction <maximumf>, %173, %cst_84 [1] : vector<16x16xf32> to vector<16xf32>
    %175 = vector.shape_cast %174 : vector<16xf32> to vector<16x1xf32>
    %176 = vector.broadcast %175 : vector<16x1xf32> to vector<16x16xf32>
    %177 = arith.subf %173, %176 : vector<16x16xf32>
    %178 = math.exp %177 : vector<16x16xf32>
    %cst_85 = arith.constant dense<0.000000e+00> : vector<16xf32>
    %179 = vector.multi_reduction <add>, %178, %cst_85 [1] : vector<16x16xf32> to vector<16xf32>
    %180 = vector.shape_cast %179 : vector<16xf32> to vector<16x1xf32>
    %181 = vector.broadcast %180 : vector<16x1xf32> to vector<16x16xf32>
    %182 = arith.divf %178, %181 : vector<16x16xf32>
    %183 = vector.extract_strided_slice %148 {offsets = [0, 16], sizes = [16, 16], strides = [1, 1]} : vector<16x32xf32> to vector<16x16xf32>
    %cst_86 = arith.constant dense<0.000000e+00> : vector<16x16xf32>
    %184 = tpu.matmul %182, %183, %cst_86 {dimension_numbers = #tpu.dot_dimension_numbers<[1], [0], [0], [1], [0, 0, 1, 1], [], []>} : vector<16x16xf32>, vector<16x16xf32>, vector<16x16xf32> -> vector<16x16xf32>
    %185 = tpu.concatenate %166, %184 in 1 : vector<16x16xf32>, vector<16x16xf32> -> vector<16x32xf32>
    %cst_87 = arith.constant dense<0.000000e+00> : vector<16x32xf32>
    %186 = tpu.matmul %185, %135, %cst_87 {dimension_numbers = #tpu.dot_dimension_numbers<[1], [0], [0], [1], [0, 0, 1, 1], [], []>} : vector<16x32xf32>, vector<32x32xf32>, vector<16x32xf32> -> vector<16x32xf32>
    %187 = vector.broadcast %136 : vector<1x32xf32> to vector<16x32xf32>
    %188 = arith.addf %186, %187 : vector<16x32xf32>
    %189 = arith.addf %129, %188 : vector<16x32xf32>
    %c1_88 = arith.constant 1 : index
    %c0_89 = arith.constant 0 : index
    %190 = vector.load %arg19[%c1_88, %c0_89] : memref<2x32xf32, #tpu.memory_space<vmem>>, vector<1x32xf32>
    %c1_90 = arith.constant 1 : index
    %c0_91 = arith.constant 0 : index
    %191 = vector.load %arg20[%c1_90, %c0_91] : memref<2x32xf32, #tpu.memory_space<vmem>>, vector<1x32xf32>
    %cst_92 = arith.constant dense<0.000000e+00> : vector<16xf32>
    %192 = vector.multi_reduction <add>, %189, %cst_92 [1] : vector<16x32xf32> to vector<16xf32>
    %193 = vector.shape_cast %192 : vector<16xf32> to vector<16x1xf32>
    %cst_93 = arith.constant 3.200000e+01 : f32
    %194 = vector.broadcast %cst_93 : f32 to vector<16x1xf32>
    %195 = arith.divf %193, %194 : vector<16x1xf32>
    %196 = vector.broadcast %195 : vector<16x1xf32> to vector<16x32xf32>
    %197 = arith.subf %189, %196 : vector<16x32xf32>
    %198 = arith.mulf %197, %197 : vector<16x32xf32>
    %cst_94 = arith.constant dense<0.000000e+00> : vector<16xf32>
    %199 = vector.multi_reduction <add>, %198, %cst_94 [1] : vector<16x32xf32> to vector<16xf32>
    %200 = vector.shape_cast %199 : vector<16xf32> to vector<16x1xf32>
    %cst_95 = arith.constant 3.200000e+01 : f32
    %201 = vector.broadcast %cst_95 : f32 to vector<16x1xf32>
    %202 = arith.divf %200, %201 : vector<16x1xf32>
    %cst_96 = arith.constant 9.99999974E-6 : f32
    %203 = vector.broadcast %cst_96 : f32 to vector<16x1xf32>
    %204 = arith.addf %202, %203 : vector<16x1xf32>
    %205 = math.rsqrt %204 : vector<16x1xf32>
    %206 = vector.broadcast %205 : vector<16x1xf32> to vector<16x32xf32>
    %207 = arith.mulf %197, %206 : vector<16x32xf32>
    %208 = vector.broadcast %190 : vector<1x32xf32> to vector<16x32xf32>
    %209 = arith.mulf %207, %208 : vector<16x32xf32>
    %210 = vector.broadcast %191 : vector<1x32xf32> to vector<16x32xf32>
    %211 = arith.addf %209, %210 : vector<16x32xf32>
    %c1_97 = arith.constant 1 : index
    %c0_98 = arith.constant 0 : index
    %c0_99 = arith.constant 0 : index
    %212 = vector.load %arg15[%c1_97, %c0_98, %c0_99] : memref<2x32x64xf32, #tpu.memory_space<vmem>>, vector<1x32x64xf32>
    %213 = vector.shape_cast %212 : vector<1x32x64xf32> to vector<32x64xf32>
    %cst_100 = arith.constant dense<0.000000e+00> : vector<16x64xf32>
    %214 = tpu.matmul %211, %213, %cst_100 {dimension_numbers = #tpu.dot_dimension_numbers<[1], [0], [0], [1], [0, 0, 1, 1], [], []>} : vector<16x32xf32>, vector<32x64xf32>, vector<16x64xf32> -> vector<16x64xf32>
    %c1_101 = arith.constant 1 : index
    %c0_102 = arith.constant 0 : index
    %215 = vector.load %arg16[%c1_101, %c0_102] : memref<2x64xf32, #tpu.memory_space<vmem>>, vector<1x64xf32>
    %216 = vector.broadcast %215 : vector<1x64xf32> to vector<16x64xf32>
    %217 = arith.addf %214, %216 : vector<16x64xf32>
    %cst_103 = arith.constant 0.000000e+00 : f32
    %218 = vector.broadcast %cst_103 : f32 to vector<16x64xf32>
    %219 = arith.maximumf %217, %218 : vector<16x64xf32>
    %c1_104 = arith.constant 1 : index
    %c0_105 = arith.constant 0 : index
    %c0_106 = arith.constant 0 : index
    %220 = vector.load %arg17[%c1_104, %c0_105, %c0_106] : memref<2x64x32xf32, #tpu.memory_space<vmem>>, vector<1x64x32xf32>
    %221 = vector.shape_cast %220 : vector<1x64x32xf32> to vector<64x32xf32>
    %cst_107 = arith.constant dense<0.000000e+00> : vector<16x32xf32>
    %222 = tpu.matmul %219, %221, %cst_107 {dimension_numbers = #tpu.dot_dimension_numbers<[1], [0], [0], [1], [0, 0, 1, 1], [], []>} : vector<16x64xf32>, vector<64x32xf32>, vector<16x32xf32> -> vector<16x32xf32>
    %c1_108 = arith.constant 1 : index
    %c0_109 = arith.constant 0 : index
    %223 = vector.load %arg18[%c1_108, %c0_109] : memref<2x32xf32, #tpu.memory_space<vmem>>, vector<1x32xf32>
    %224 = vector.broadcast %223 : vector<1x32xf32> to vector<16x32xf32>
    %225 = arith.addf %222, %224 : vector<16x32xf32>
    %226 = arith.addf %211, %225 : vector<16x32xf32>
    %c1_110 = arith.constant 1 : index
    %c0_111 = arith.constant 0 : index
    %227 = vector.load %arg21[%c1_110, %c0_111] : memref<2x32xf32, #tpu.memory_space<vmem>>, vector<1x32xf32>
    %c1_112 = arith.constant 1 : index
    %c0_113 = arith.constant 0 : index
    %228 = vector.load %arg22[%c1_112, %c0_113] : memref<2x32xf32, #tpu.memory_space<vmem>>, vector<1x32xf32>
    %cst_114 = arith.constant dense<0.000000e+00> : vector<16xf32>
    %229 = vector.multi_reduction <add>, %226, %cst_114 [1] : vector<16x32xf32> to vector<16xf32>
    %230 = vector.shape_cast %229 : vector<16xf32> to vector<16x1xf32>
    %cst_115 = arith.constant 3.200000e+01 : f32
    %231 = vector.broadcast %cst_115 : f32 to vector<16x1xf32>
    %232 = arith.divf %230, %231 : vector<16x1xf32>
    %233 = vector.broadcast %232 : vector<16x1xf32> to vector<16x32xf32>
    %234 = arith.subf %226, %233 : vector<16x32xf32>
    %235 = arith.mulf %234, %234 : vector<16x32xf32>
    %cst_116 = arith.constant dense<0.000000e+00> : vector<16xf32>
    %236 = vector.multi_reduction <add>, %235, %cst_116 [1] : vector<16x32xf32> to vector<16xf32>
    %237 = vector.shape_cast %236 : vector<16xf32> to vector<16x1xf32>
    %cst_117 = arith.constant 3.200000e+01 : f32
    %238 = vector.broadcast %cst_117 : f32 to vector<16x1xf32>
    %239 = arith.divf %237, %238 : vector<16x1xf32>
    %cst_118 = arith.constant 9.99999974E-6 : f32
    %240 = vector.broadcast %cst_118 : f32 to vector<16x1xf32>
    %241 = arith.addf %239, %240 : vector<16x1xf32>
    %242 = math.rsqrt %241 : vector<16x1xf32>
    %243 = vector.broadcast %242 : vector<16x1xf32> to vector<16x32xf32>
    %244 = arith.mulf %234, %243 : vector<16x32xf32>
    %245 = vector.broadcast %227 : vector<1x32xf32> to vector<16x32xf32>
    %246 = arith.mulf %244, %245 : vector<16x32xf32>
    %247 = vector.broadcast %228 : vector<1x32xf32> to vector<16x32xf32>
    %248 = arith.addf %246, %247 : vector<16x32xf32>
    %249 = arith.addf %248, %3 : vector<16x32xf32>
    %c0_119 = arith.constant 0 : index
    %c0_120 = arith.constant 0 : index
    %250 = vector.load %arg6[%c0_119, %c0_120] : memref<8x32xf32, #tpu.memory_space<vmem>>, vector<8x32xf32>
    %c0_121 = arith.constant 0 : index
    %c0_122 = arith.constant 0 : index
    %251 = vector.load %arg7[%c0_121, %c0_122] : memref<32x4xf32, #tpu.memory_space<vmem>>, vector<32x4xf32>
    %cst_123 = arith.constant dense<0.000000e+00> : vector<8x4xf32>
    %252 = tpu.matmul %250, %251, %cst_123 {dimension_numbers = #tpu.dot_dimension_numbers<[1], [0], [0], [1], [0, 0, 1, 1], [], []>} : vector<8x32xf32>, vector<32x4xf32>, vector<8x4xf32> -> vector<8x4xf32>
    %c0_124 = arith.constant 0 : index
    %c0_125 = arith.constant 0 : index
    %253 = vector.load %arg8[%c0_124, %c0_125] : memref<1x4xf32, #tpu.memory_space<vmem>>, vector<1x4xf32>
    %254 = vector.broadcast %253 : vector<1x4xf32> to vector<8x4xf32>
    %255 = arith.addf %252, %254 : vector<8x4xf32>
    %cst_126 = arith.constant 0.000000e+00 : f32
    %256 = vector.broadcast %cst_126 : f32 to vector<8x4xf32>
    %257 = arith.subf %256, %255 : vector<8x4xf32>
    %258 = math.exp %257 : vector<8x4xf32>
    %cst_127 = arith.constant 1.000000e+00 : f32
    %259 = vector.broadcast %cst_127 : f32 to vector<8x4xf32>
    %260 = arith.addf %259, %258 : vector<8x4xf32>
    %cst_128 = arith.constant 1.000000e+00 : f32
    %261 = vector.broadcast %cst_128 : f32 to vector<8x4xf32>
    %262 = arith.divf %261, %260 : vector<8x4xf32>
    %cst_129 = arith.constant 0.000000e+00 : f32
    %263 = vector.broadcast %cst_129 : f32 to vector<8x32xf32>
    %264 = arith.addf %263, %250 : vector<8x32xf32>
    %c0_130 = arith.constant 0 : index
    %c0_131 = arith.constant 0 : index
    %c0_132 = arith.constant 0 : index
    %265 = vector.load %arg23[%c0_130, %c0_131, %c0_132] : memref<2x32x96xf32, #tpu.memory_space<vmem>>, vector<1x32x96xf32>
    %266 = vector.shape_cast %265 : vector<1x32x96xf32> to vector<32x96xf32>
    %c0_133 = arith.constant 0 : index
    %c0_134 = arith.constant 0 : index
    %267 = vector.load %arg24[%c0_133, %c0_134] : memref<2x96xf32, #tpu.memory_space<vmem>>, vector<1x96xf32>
    %c0_135 = arith.constant 0 : index
    %c0_136 = arith.constant 0 : index
    %c0_137 = arith.constant 0 : index
    %268 = vector.load %arg25[%c0_135, %c0_136, %c0_137] : memref<2x32x32xf32, #tpu.memory_space<vmem>>, vector<1x32x32xf32>
    %269 = vector.shape_cast %268 : vector<1x32x32xf32> to vector<32x32xf32>
    %c0_138 = arith.constant 0 : index
    %c0_139 = arith.constant 0 : index
    %270 = vector.load %arg26[%c0_138, %c0_139] : memref<2x32xf32, #tpu.memory_space<vmem>>, vector<1x32xf32>
    %271 = vector.extract_strided_slice %266 {offsets = [0, 0], sizes = [32, 64], strides = [1, 1]} : vector<32x96xf32> to vector<32x64xf32>
    %cst_140 = arith.constant dense<0.000000e+00> : vector<8x64xf32>
    %272 = tpu.matmul %264, %271, %cst_140 {dimension_numbers = #tpu.dot_dimension_numbers<[1], [0], [0], [1], [0, 0, 1, 1], [], []>} : vector<8x32xf32>, vector<32x64xf32>, vector<8x64xf32> -> vector<8x64xf32>
    %273 = vector.extract_strided_slice %267 {offsets = [0, 0], sizes = [1, 64], strides = [1, 1]} : vector<1x96xf32> to vector<1x64xf32>
    %274 = vector.broadcast %273 : vector<1x64xf32> to vector<8x64xf32>
    %275 = arith.addf %272, %274 : vector<8x64xf32>
    %276 = vector.extract_strided_slice %275 {offsets = [0, 0], sizes = [8, 32], strides = [1, 1]} : vector<8x64xf32> to vector<8x32xf32>
    %277 = vector.extract_strided_slice %275 {offsets = [0, 32], sizes = [8, 32], strides = [1, 1]} : vector<8x64xf32> to vector<8x32xf32>
    %278 = vector.extract_strided_slice %266 {offsets = [0, 64], sizes = [32, 32], strides = [1, 1]} : vector<32x96xf32> to vector<32x32xf32>
    %cst_141 = arith.constant dense<0.000000e+00> : vector<8x32xf32>
    %279 = tpu.matmul %263, %278, %cst_141 {dimension_numbers = #tpu.dot_dimension_numbers<[1], [0], [0], [1], [0, 0, 1, 1], [], []>} : vector<8x32xf32>, vector<32x32xf32>, vector<8x32xf32> -> vector<8x32xf32>
    %280 = vector.extract_strided_slice %267 {offsets = [0, 64], sizes = [1, 32], strides = [1, 1]} : vector<1x96xf32> to vector<1x32xf32>
    %281 = vector.broadcast %280 : vector<1x32xf32> to vector<8x32xf32>
    %282 = arith.addf %279, %281 : vector<8x32xf32>
    %283 = vector.extract_strided_slice %276 {offsets = [0, 0], sizes = [8, 16], strides = [1, 1]} : vector<8x32xf32> to vector<8x16xf32>
    %284 = vector.extract_strided_slice %277 {offsets = [0, 0], sizes = [8, 16], strides = [1, 1]} : vector<8x32xf32> to vector<8x16xf32>
    %cst_142 = arith.constant dense<0.000000e+00> : vector<8x8xf32>
    %285 = tpu.matmul %283, %284, %cst_142 {dimension_numbers = #tpu.dot_dimension_numbers<[1], [1], [0], [0], [0, 0, 1, 0], [], []>} : vector<8x16xf32>, vector<8x16xf32>, vector<8x8xf32> -> vector<8x8xf32>
    %cst_143 = arith.constant 2.500000e-01 : f32
    %286 = vector.broadcast %cst_143 : f32 to vector<8x8xf32>
    %287 = arith.mulf %285, %286 : vector<8x8xf32>
    %cst_144 = arith.constant dense<0xFF800000> : vector<8xf32>
    %288 = vector.multi_reduction <maximumf>, %287, %cst_144 [1] : vector<8x8xf32> to vector<8xf32>
    %289 = vector.shape_cast %288 : vector<8xf32> to vector<8x1xf32>
    %290 = vector.broadcast %289 : vector<8x1xf32> to vector<8x8xf32>
    %291 = arith.subf %287, %290 : vector<8x8xf32>
    %292 = math.exp %291 : vector<8x8xf32>
    %cst_145 = arith.constant dense<0.000000e+00> : vector<8xf32>
    %293 = vector.multi_reduction <add>, %292, %cst_145 [1] : vector<8x8xf32> to vector<8xf32>
    %294 = vector.shape_cast %293 : vector<8xf32> to vector<8x1xf32>
    %295 = vector.broadcast %294 : vector<8x1xf32> to vector<8x8xf32>
    %296 = arith.divf %292, %295 : vector<8x8xf32>
    %297 = vector.extract_strided_slice %282 {offsets = [0, 0], sizes = [8, 16], strides = [1, 1]} : vector<8x32xf32> to vector<8x16xf32>
    %cst_146 = arith.constant dense<0.000000e+00> : vector<8x16xf32>
    %298 = tpu.matmul %296, %297, %cst_146 {dimension_numbers = #tpu.dot_dimension_numbers<[1], [0], [0], [1], [0, 0, 1, 1], [], []>} : vector<8x8xf32>, vector<8x16xf32>, vector<8x16xf32> -> vector<8x16xf32>
    %299 = vector.extract_strided_slice %276 {offsets = [0, 16], sizes = [8, 16], strides = [1, 1]} : vector<8x32xf32> to vector<8x16xf32>
    %300 = vector.extract_strided_slice %277 {offsets = [0, 16], sizes = [8, 16], strides = [1, 1]} : vector<8x32xf32> to vector<8x16xf32>
    %cst_147 = arith.constant dense<0.000000e+00> : vector<8x8xf32>
    %301 = tpu.matmul %299, %300, %cst_147 {dimension_numbers = #tpu.dot_dimension_numbers<[1], [1], [0], [0], [0, 0, 1, 0], [], []>} : vector<8x16xf32>, vector<8x16xf32>, vector<8x8xf32> -> vector<8x8xf32>
    %cst_148 = arith.constant 2.500000e-01 : f32
    %302 = vector.broadcast %cst_148 : f32 to vector<8x8xf32>
    %303 = arith.mulf %301, %302 : vector<8x8xf32>
    %cst_149 = arith.constant dense<0xFF800000> : vector<8xf32>
    %304 = vector.multi_reduction <maximumf>, %303, %cst_149 [1] : vector<8x8xf32> to vector<8xf32>
    %305 = vector.shape_cast %304 : vector<8xf32> to vector<8x1xf32>
    %306 = vector.broadcast %305 : vector<8x1xf32> to vector<8x8xf32>
    %307 = arith.subf %303, %306 : vector<8x8xf32>
    %308 = math.exp %307 : vector<8x8xf32>
    %cst_150 = arith.constant dense<0.000000e+00> : vector<8xf32>
    %309 = vector.multi_reduction <add>, %308, %cst_150 [1] : vector<8x8xf32> to vector<8xf32>
    %310 = vector.shape_cast %309 : vector<8xf32> to vector<8x1xf32>
    %311 = vector.broadcast %310 : vector<8x1xf32> to vector<8x8xf32>
    %312 = arith.divf %308, %311 : vector<8x8xf32>
    %313 = vector.extract_strided_slice %282 {offsets = [0, 16], sizes = [8, 16], strides = [1, 1]} : vector<8x32xf32> to vector<8x16xf32>
    %cst_151 = arith.constant dense<0.000000e+00> : vector<8x16xf32>
    %314 = tpu.matmul %312, %313, %cst_151 {dimension_numbers = #tpu.dot_dimension_numbers<[1], [0], [0], [1], [0, 0, 1, 1], [], []>} : vector<8x8xf32>, vector<8x16xf32>, vector<8x16xf32> -> vector<8x16xf32>
    %315 = tpu.concatenate %298, %314 in 1 : vector<8x16xf32>, vector<8x16xf32> -> vector<8x32xf32>
    %cst_152 = arith.constant dense<0.000000e+00> : vector<8x32xf32>
    %316 = tpu.matmul %315, %269, %cst_152 {dimension_numbers = #tpu.dot_dimension_numbers<[1], [0], [0], [1], [0, 0, 1, 1], [], []>} : vector<8x32xf32>, vector<32x32xf32>, vector<8x32xf32> -> vector<8x32xf32>
    %317 = vector.broadcast %270 : vector<1x32xf32> to vector<8x32xf32>
    %318 = arith.addf %316, %317 : vector<8x32xf32>
    %319 = arith.addf %263, %318 : vector<8x32xf32>
    %c0_153 = arith.constant 0 : index
    %c0_154 = arith.constant 0 : index
    %320 = vector.load %arg35[%c0_153, %c0_154] : memref<2x32xf32, #tpu.memory_space<vmem>>, vector<1x32xf32>
    %c0_155 = arith.constant 0 : index
    %c0_156 = arith.constant 0 : index
    %321 = vector.load %arg36[%c0_155, %c0_156] : memref<2x32xf32, #tpu.memory_space<vmem>>, vector<1x32xf32>
    %cst_157 = arith.constant dense<0.000000e+00> : vector<8xf32>
    %322 = vector.multi_reduction <add>, %319, %cst_157 [1] : vector<8x32xf32> to vector<8xf32>
    %323 = vector.shape_cast %322 : vector<8xf32> to vector<8x1xf32>
    %cst_158 = arith.constant 3.200000e+01 : f32
    %324 = vector.broadcast %cst_158 : f32 to vector<8x1xf32>
    %325 = arith.divf %323, %324 : vector<8x1xf32>
    %326 = vector.broadcast %325 : vector<8x1xf32> to vector<8x32xf32>
    %327 = arith.subf %319, %326 : vector<8x32xf32>
    %328 = arith.mulf %327, %327 : vector<8x32xf32>
    %cst_159 = arith.constant dense<0.000000e+00> : vector<8xf32>
    %329 = vector.multi_reduction <add>, %328, %cst_159 [1] : vector<8x32xf32> to vector<8xf32>
    %330 = vector.shape_cast %329 : vector<8xf32> to vector<8x1xf32>
    %cst_160 = arith.constant 3.200000e+01 : f32
    %331 = vector.broadcast %cst_160 : f32 to vector<8x1xf32>
    %332 = arith.divf %330, %331 : vector<8x1xf32>
    %cst_161 = arith.constant 9.99999974E-6 : f32
    %333 = vector.broadcast %cst_161 : f32 to vector<8x1xf32>
    %334 = arith.addf %332, %333 : vector<8x1xf32>
    %335 = math.rsqrt %334 : vector<8x1xf32>
    %336 = vector.broadcast %335 : vector<8x1xf32> to vector<8x32xf32>
    %337 = arith.mulf %327, %336 : vector<8x32xf32>
    %338 = vector.broadcast %320 : vector<1x32xf32> to vector<8x32xf32>
    %339 = arith.mulf %337, %338 : vector<8x32xf32>
    %340 = vector.broadcast %321 : vector<1x32xf32> to vector<8x32xf32>
    %341 = arith.addf %339, %340 : vector<8x32xf32>
    %342 = arith.addf %341, %250 : vector<8x32xf32>
    %c0_162 = arith.constant 0 : index
    %c0_163 = arith.constant 0 : index
    %c0_164 = arith.constant 0 : index
    %343 = vector.load %arg27[%c0_162, %c0_163, %c0_164] : memref<2x32x96xf32, #tpu.memory_space<vmem>>, vector<1x32x96xf32>
    %344 = vector.shape_cast %343 : vector<1x32x96xf32> to vector<32x96xf32>
    %c0_165 = arith.constant 0 : index
    %c0_166 = arith.constant 0 : index
    %345 = vector.load %arg28[%c0_165, %c0_166] : memref<2x96xf32, #tpu.memory_space<vmem>>, vector<1x96xf32>
    %c0_167 = arith.constant 0 : index
    %c0_168 = arith.constant 0 : index
    %c0_169 = arith.constant 0 : index
    %346 = vector.load %arg29[%c0_167, %c0_168, %c0_169] : memref<2x32x32xf32, #tpu.memory_space<vmem>>, vector<1x32x32xf32>
    %347 = vector.shape_cast %346 : vector<1x32x32xf32> to vector<32x32xf32>
    %c0_170 = arith.constant 0 : index
    %c0_171 = arith.constant 0 : index
    %348 = vector.load %arg30[%c0_170, %c0_171] : memref<2x32xf32, #tpu.memory_space<vmem>>, vector<1x32xf32>
    %349 = vector.extract_strided_slice %344 {offsets = [0, 0], sizes = [32, 32], strides = [1, 1]} : vector<32x96xf32> to vector<32x32xf32>
    %cst_172 = arith.constant dense<0.000000e+00> : vector<8x32xf32>
    %350 = tpu.matmul %342, %349, %cst_172 {dimension_numbers = #tpu.dot_dimension_numbers<[1], [0], [0], [1], [0, 0, 1, 1], [], []>} : vector<8x32xf32>, vector<32x32xf32>, vector<8x32xf32> -> vector<8x32xf32>
    %351 = vector.extract_strided_slice %345 {offsets = [0, 0], sizes = [1, 32], strides = [1, 1]} : vector<1x96xf32> to vector<1x32xf32>
    %352 = vector.broadcast %351 : vector<1x32xf32> to vector<8x32xf32>
    %353 = arith.addf %350, %352 : vector<8x32xf32>
    %354 = vector.extract_strided_slice %344 {offsets = [0, 32], sizes = [32, 32], strides = [1, 1]} : vector<32x96xf32> to vector<32x32xf32>
    %cst_173 = arith.constant dense<0.000000e+00> : vector<16x32xf32>
    %355 = tpu.matmul %249, %354, %cst_173 {dimension_numbers = #tpu.dot_dimension_numbers<[1], [0], [0], [1], [0, 0, 1, 1], [], []>} : vector<16x32xf32>, vector<32x32xf32>, vector<16x32xf32> -> vector<16x32xf32>
    %356 = vector.extract_strided_slice %345 {offsets = [0, 32], sizes = [1, 32], strides = [1, 1]} : vector<1x96xf32> to vector<1x32xf32>
    %357 = vector.broadcast %356 : vector<1x32xf32> to vector<16x32xf32>
    %358 = arith.addf %355, %357 : vector<16x32xf32>
    %359 = vector.extract_strided_slice %344 {offsets = [0, 64], sizes = [32, 32], strides = [1, 1]} : vector<32x96xf32> to vector<32x32xf32>
    %cst_174 = arith.constant dense<0.000000e+00> : vector<16x32xf32>
    %360 = tpu.matmul %248, %359, %cst_174 {dimension_numbers = #tpu.dot_dimension_numbers<[1], [0], [0], [1], [0, 0, 1, 1], [], []>} : vector<16x32xf32>, vector<32x32xf32>, vector<16x32xf32> -> vector<16x32xf32>
    %361 = vector.extract_strided_slice %345 {offsets = [0, 64], sizes = [1, 32], strides = [1, 1]} : vector<1x96xf32> to vector<1x32xf32>
    %362 = vector.broadcast %361 : vector<1x32xf32> to vector<16x32xf32>
    %363 = arith.addf %360, %362 : vector<16x32xf32>
    %364 = vector.extract_strided_slice %353 {offsets = [0, 0], sizes = [8, 16], strides = [1, 1]} : vector<8x32xf32> to vector<8x16xf32>
    %365 = vector.extract_strided_slice %358 {offsets = [0, 0], sizes = [16, 16], strides = [1, 1]} : vector<16x32xf32> to vector<16x16xf32>
    %cst_175 = arith.constant dense<0.000000e+00> : vector<8x16xf32>
    %366 = tpu.matmul %364, %365, %cst_175 {dimension_numbers = #tpu.dot_dimension_numbers<[1], [1], [0], [0], [0, 0, 1, 0], [], []>} : vector<8x16xf32>, vector<16x16xf32>, vector<8x16xf32> -> vector<8x16xf32>
    %cst_176 = arith.constant 2.500000e-01 : f32
    %367 = vector.broadcast %cst_176 : f32 to vector<8x16xf32>
    %368 = arith.mulf %366, %367 : vector<8x16xf32>
    %369 = vector.broadcast %5 : vector<1x16xf32> to vector<8x16xf32>
    %370 = arith.addf %368, %369 : vector<8x16xf32>
    %cst_177 = arith.constant dense<0xFF800000> : vector<8xf32>
    %371 = vector.multi_reduction <maximumf>, %370, %cst_177 [1] : vector<8x16xf32> to vector<8xf32>
    %372 = vector.shape_cast %371 : vector<8xf32> to vector<8x1xf32>
    %373 = vector.broadcast %372 : vector<8x1xf32> to vector<8x16xf32>
    %374 = arith.subf %370, %373 : vector<8x16xf32>
    %375 = math.exp %374 : vector<8x16xf32>
    %cst_178 = arith.constant dense<0.000000e+00> : vector<8xf32>
    %376 = vector.multi_reduction <add>, %375, %cst_178 [1] : vector<8x16xf32> to vector<8xf32>
    %377 = vector.shape_cast %376 : vector<8xf32> to vector<8x1xf32>
    %378 = vector.broadcast %377 : vector<8x1xf32> to vector<8x16xf32>
    %379 = arith.divf %375, %378 : vector<8x16xf32>
    %380 = vector.extract_strided_slice %363 {offsets = [0, 0], sizes = [16, 16], strides = [1, 1]} : vector<16x32xf32> to vector<16x16xf32>
    %cst_179 = arith.constant dense<0.000000e+00> : vector<8x16xf32>
    %381 = tpu.matmul %379, %380, %cst_179 {dimension_numbers = #tpu.dot_dimension_numbers<[1], [0], [0], [1], [0, 0, 1, 1], [], []>} : vector<8x16xf32>, vector<16x16xf32>, vector<8x16xf32> -> vector<8x16xf32>
    %382 = vector.extract_strided_slice %353 {offsets = [0, 16], sizes = [8, 16], strides = [1, 1]} : vector<8x32xf32> to vector<8x16xf32>
    %383 = vector.extract_strided_slice %358 {offsets = [0, 16], sizes = [16, 16], strides = [1, 1]} : vector<16x32xf32> to vector<16x16xf32>
    %cst_180 = arith.constant dense<0.000000e+00> : vector<8x16xf32>
    %384 = tpu.matmul %382, %383, %cst_180 {dimension_numbers = #tpu.dot_dimension_numbers<[1], [1], [0], [0], [0, 0, 1, 0], [], []>} : vector<8x16xf32>, vector<16x16xf32>, vector<8x16xf32> -> vector<8x16xf32>
    %cst_181 = arith.constant 2.500000e-01 : f32
    %385 = vector.broadcast %cst_181 : f32 to vector<8x16xf32>
    %386 = arith.mulf %384, %385 : vector<8x16xf32>
    %387 = vector.broadcast %5 : vector<1x16xf32> to vector<8x16xf32>
    %388 = arith.addf %386, %387 : vector<8x16xf32>
    %cst_182 = arith.constant dense<0xFF800000> : vector<8xf32>
    %389 = vector.multi_reduction <maximumf>, %388, %cst_182 [1] : vector<8x16xf32> to vector<8xf32>
    %390 = vector.shape_cast %389 : vector<8xf32> to vector<8x1xf32>
    %391 = vector.broadcast %390 : vector<8x1xf32> to vector<8x16xf32>
    %392 = arith.subf %388, %391 : vector<8x16xf32>
    %393 = math.exp %392 : vector<8x16xf32>
    %cst_183 = arith.constant dense<0.000000e+00> : vector<8xf32>
    %394 = vector.multi_reduction <add>, %393, %cst_183 [1] : vector<8x16xf32> to vector<8xf32>
    %395 = vector.shape_cast %394 : vector<8xf32> to vector<8x1xf32>
    %396 = vector.broadcast %395 : vector<8x1xf32> to vector<8x16xf32>
    %397 = arith.divf %393, %396 : vector<8x16xf32>
    %398 = vector.extract_strided_slice %363 {offsets = [0, 16], sizes = [16, 16], strides = [1, 1]} : vector<16x32xf32> to vector<16x16xf32>
    %cst_184 = arith.constant dense<0.000000e+00> : vector<8x16xf32>
    %399 = tpu.matmul %397, %398, %cst_184 {dimension_numbers = #tpu.dot_dimension_numbers<[1], [0], [0], [1], [0, 0, 1, 1], [], []>} : vector<8x16xf32>, vector<16x16xf32>, vector<8x16xf32> -> vector<8x16xf32>
    %400 = tpu.concatenate %381, %399 in 1 : vector<8x16xf32>, vector<8x16xf32> -> vector<8x32xf32>
    %cst_185 = arith.constant dense<0.000000e+00> : vector<8x32xf32>
    %401 = tpu.matmul %400, %347, %cst_185 {dimension_numbers = #tpu.dot_dimension_numbers<[1], [0], [0], [1], [0, 0, 1, 1], [], []>} : vector<8x32xf32>, vector<32x32xf32>, vector<8x32xf32> -> vector<8x32xf32>
    %402 = vector.broadcast %348 : vector<1x32xf32> to vector<8x32xf32>
    %403 = arith.addf %401, %402 : vector<8x32xf32>
    %404 = arith.addf %341, %403 : vector<8x32xf32>
    %c0_186 = arith.constant 0 : index
    %c0_187 = arith.constant 0 : index
    %405 = vector.load %arg37[%c0_186, %c0_187] : memref<2x32xf32, #tpu.memory_space<vmem>>, vector<1x32xf32>
    %c0_188 = arith.constant 0 : index
    %c0_189 = arith.constant 0 : index
    %406 = vector.load %arg38[%c0_188, %c0_189] : memref<2x32xf32, #tpu.memory_space<vmem>>, vector<1x32xf32>
    %cst_190 = arith.constant dense<0.000000e+00> : vector<8xf32>
    %407 = vector.multi_reduction <add>, %404, %cst_190 [1] : vector<8x32xf32> to vector<8xf32>
    %408 = vector.shape_cast %407 : vector<8xf32> to vector<8x1xf32>
    %cst_191 = arith.constant 3.200000e+01 : f32
    %409 = vector.broadcast %cst_191 : f32 to vector<8x1xf32>
    %410 = arith.divf %408, %409 : vector<8x1xf32>
    %411 = vector.broadcast %410 : vector<8x1xf32> to vector<8x32xf32>
    %412 = arith.subf %404, %411 : vector<8x32xf32>
    %413 = arith.mulf %412, %412 : vector<8x32xf32>
    %cst_192 = arith.constant dense<0.000000e+00> : vector<8xf32>
    %414 = vector.multi_reduction <add>, %413, %cst_192 [1] : vector<8x32xf32> to vector<8xf32>
    %415 = vector.shape_cast %414 : vector<8xf32> to vector<8x1xf32>
    %cst_193 = arith.constant 3.200000e+01 : f32
    %416 = vector.broadcast %cst_193 : f32 to vector<8x1xf32>
    %417 = arith.divf %415, %416 : vector<8x1xf32>
    %cst_194 = arith.constant 9.99999974E-6 : f32
    %418 = vector.broadcast %cst_194 : f32 to vector<8x1xf32>
    %419 = arith.addf %417, %418 : vector<8x1xf32>
    %420 = math.rsqrt %419 : vector<8x1xf32>
    %421 = vector.broadcast %420 : vector<8x1xf32> to vector<8x32xf32>
    %422 = arith.mulf %412, %421 : vector<8x32xf32>
    %423 = vector.broadcast %405 : vector<1x32xf32> to vector<8x32xf32>
    %424 = arith.mulf %422, %423 : vector<8x32xf32>
    %425 = vector.broadcast %406 : vector<1x32xf32> to vector<8x32xf32>
    %426 = arith.addf %424, %425 : vector<8x32xf32>
    %c0_195 = arith.constant 0 : index
    %c0_196 = arith.constant 0 : index
    %c0_197 = arith.constant 0 : index
    %427 = vector.load %arg31[%c0_195, %c0_196, %c0_197] : memref<2x32x64xf32, #tpu.memory_space<vmem>>, vector<1x32x64xf32>
    %428 = vector.shape_cast %427 : vector<1x32x64xf32> to vector<32x64xf32>
    %cst_198 = arith.constant dense<0.000000e+00> : vector<8x64xf32>
    %429 = tpu.matmul %426, %428, %cst_198 {dimension_numbers = #tpu.dot_dimension_numbers<[1], [0], [0], [1], [0, 0, 1, 1], [], []>} : vector<8x32xf32>, vector<32x64xf32>, vector<8x64xf32> -> vector<8x64xf32>
    %c0_199 = arith.constant 0 : index
    %c0_200 = arith.constant 0 : index
    %430 = vector.load %arg32[%c0_199, %c0_200] : memref<2x64xf32, #tpu.memory_space<vmem>>, vector<1x64xf32>
    %431 = vector.broadcast %430 : vector<1x64xf32> to vector<8x64xf32>
    %432 = arith.addf %429, %431 : vector<8x64xf32>
    %cst_201 = arith.constant 0.000000e+00 : f32
    %433 = vector.broadcast %cst_201 : f32 to vector<8x64xf32>
    %434 = arith.maximumf %432, %433 : vector<8x64xf32>
    %c0_202 = arith.constant 0 : index
    %c0_203 = arith.constant 0 : index
    %c0_204 = arith.constant 0 : index
    %435 = vector.load %arg33[%c0_202, %c0_203, %c0_204] : memref<2x64x32xf32, #tpu.memory_space<vmem>>, vector<1x64x32xf32>
    %436 = vector.shape_cast %435 : vector<1x64x32xf32> to vector<64x32xf32>
    %cst_205 = arith.constant dense<0.000000e+00> : vector<8x32xf32>
    %437 = tpu.matmul %434, %436, %cst_205 {dimension_numbers = #tpu.dot_dimension_numbers<[1], [0], [0], [1], [0, 0, 1, 1], [], []>} : vector<8x64xf32>, vector<64x32xf32>, vector<8x32xf32> -> vector<8x32xf32>
    %c0_206 = arith.constant 0 : index
    %c0_207 = arith.constant 0 : index
    %438 = vector.load %arg34[%c0_206, %c0_207] : memref<2x32xf32, #tpu.memory_space<vmem>>, vector<1x32xf32>
    %439 = vector.broadcast %438 : vector<1x32xf32> to vector<8x32xf32>
    %440 = arith.addf %437, %439 : vector<8x32xf32>
    %441 = arith.addf %426, %440 : vector<8x32xf32>
    %c0_208 = arith.constant 0 : index
    %c0_209 = arith.constant 0 : index
    %442 = vector.load %arg39[%c0_208, %c0_209] : memref<2x32xf32, #tpu.memory_space<vmem>>, vector<1x32xf32>
    %c0_210 = arith.constant 0 : index
    %c0_211 = arith.constant 0 : index
    %443 = vector.load %arg40[%c0_210, %c0_211] : memref<2x32xf32, #tpu.memory_space<vmem>>, vector<1x32xf32>
    %cst_212 = arith.constant dense<0.000000e+00> : vector<8xf32>
    %444 = vector.multi_reduction <add>, %441, %cst_212 [1] : vector<8x32xf32> to vector<8xf32>
    %445 = vector.shape_cast %444 : vector<8xf32> to vector<8x1xf32>
    %cst_213 = arith.constant 3.200000e+01 : f32
    %446 = vector.broadcast %cst_213 : f32 to vector<8x1xf32>
    %447 = arith.divf %445, %446 : vector<8x1xf32>
    %448 = vector.broadcast %447 : vector<8x1xf32> to vector<8x32xf32>
    %449 = arith.subf %441, %448 : vector<8x32xf32>
    %450 = arith.mulf %449, %449 : vector<8x32xf32>
    %cst_214 = arith.constant dense<0.000000e+00> : vector<8xf32>
    %451 = vector.multi_reduction <add>, %450, %cst_214 [1] : vector<8x32xf32> to vector<8xf32>
    %452 = vector.shape_cast %451 : vector<8xf32> to vector<8x1xf32>
    %cst_215 = arith.constant 3.200000e+01 : f32
    %453 = vector.broadcast %cst_215 : f32 to vector<8x1xf32>
    %454 = arith.divf %452, %453 : vector<8x1xf32>
    %cst_216 = arith.constant 9.99999974E-6 : f32
    %455 = vector.broadcast %cst_216 : f32 to vector<8x1xf32>
    %456 = arith.addf %454, %455 : vector<8x1xf32>
    %457 = math.rsqrt %456 : vector<8x1xf32>
    %458 = vector.broadcast %457 : vector<8x1xf32> to vector<8x32xf32>
    %459 = arith.mulf %449, %458 : vector<8x32xf32>
    %460 = vector.broadcast %442 : vector<1x32xf32> to vector<8x32xf32>
    %461 = arith.mulf %459, %460 : vector<8x32xf32>
    %462 = vector.broadcast %443 : vector<1x32xf32> to vector<8x32xf32>
    %463 = arith.addf %461, %462 : vector<8x32xf32>
    %c0_217 = arith.constant 0 : index
    %c0_218 = arith.constant 0 : index
    %464 = vector.load %arg9[%c0_217, %c0_218] : memref<1x32xf32, #tpu.memory_space<vmem>>, vector<1x32xf32>
    %c0_219 = arith.constant 0 : index
    %c0_220 = arith.constant 0 : index
    %465 = vector.load %arg10[%c0_219, %c0_220] : memref<1x32xf32, #tpu.memory_space<vmem>>, vector<1x32xf32>
    %cst_221 = arith.constant dense<0.000000e+00> : vector<8xf32>
    %466 = vector.multi_reduction <add>, %463, %cst_221 [1] : vector<8x32xf32> to vector<8xf32>
    %467 = vector.shape_cast %466 : vector<8xf32> to vector<8x1xf32>
    %cst_222 = arith.constant 3.200000e+01 : f32
    %468 = vector.broadcast %cst_222 : f32 to vector<8x1xf32>
    %469 = arith.divf %467, %468 : vector<8x1xf32>
    %470 = vector.broadcast %469 : vector<8x1xf32> to vector<8x32xf32>
    %471 = arith.subf %463, %470 : vector<8x32xf32>
    %472 = arith.mulf %471, %471 : vector<8x32xf32>
    %cst_223 = arith.constant dense<0.000000e+00> : vector<8xf32>
    %473 = vector.multi_reduction <add>, %472, %cst_223 [1] : vector<8x32xf32> to vector<8xf32>
    %474 = vector.shape_cast %473 : vector<8xf32> to vector<8x1xf32>
    %cst_224 = arith.constant 3.200000e+01 : f32
    %475 = vector.broadcast %cst_224 : f32 to vector<8x1xf32>
    %476 = arith.divf %474, %475 : vector<8x1xf32>
    %cst_225 = arith.constant 9.99999974E-6 : f32
    %477 = vector.broadcast %cst_225 : f32 to vector<8x1xf32>
    %478 = arith.addf %476, %477 : vector<8x1xf32>
    %479 = math.rsqrt %478 : vector<8x1xf32>
    %480 = vector.broadcast %479 : vector<8x1xf32> to vector<8x32xf32>
    %481 = arith.mulf %471, %480 : vector<8x32xf32>
    %482 = vector.broadcast %464 : vector<1x32xf32> to vector<8x32xf32>
    %483 = arith.mulf %481, %482 : vector<8x32xf32>
    %484 = vector.broadcast %465 : vector<1x32xf32> to vector<8x32xf32>
    %485 = arith.addf %483, %484 : vector<8x32xf32>
    %c0_226 = arith.constant 0 : index
    %c0_227 = arith.constant 0 : index
    %c0_228 = arith.constant 0 : index
    %486 = vector.load %arg41[%c0_226, %c0_227, %c0_228] : memref<2x32x32xf32, #tpu.memory_space<vmem>>, vector<1x32x32xf32>
    %487 = vector.shape_cast %486 : vector<1x32x32xf32> to vector<32x32xf32>
    %cst_229 = arith.constant dense<0.000000e+00> : vector<8x32xf32>
    %488 = tpu.matmul %485, %487, %cst_229 {dimension_numbers = #tpu.dot_dimension_numbers<[1], [0], [0], [1], [0, 0, 1, 1], [], []>} : vector<8x32xf32>, vector<32x32xf32>, vector<8x32xf32> -> vector<8x32xf32>
    %c0_230 = arith.constant 0 : index
    %c0_231 = arith.constant 0 : index
    %489 = vector.load %arg42[%c0_230, %c0_231] : memref<2x32xf32, #tpu.memory_space<vmem>>, vector<1x32xf32>
    %490 = vector.broadcast %489 : vector<1x32xf32> to vector<8x32xf32>
    %491 = arith.addf %488, %490 : vector<8x32xf32>
    %cst_232 = arith.constant 0.000000e+00 : f32
    %492 = vector.broadcast %cst_232 : f32 to vector<8x32xf32>
    %493 = arith.maximumf %491, %492 : vector<8x32xf32>
    %c0_233 = arith.constant 0 : index
    %c0_234 = arith.constant 0 : index
    %c0_235 = arith.constant 0 : index
    %494 = vector.load %arg43[%c0_233, %c0_234, %c0_235] : memref<2x32x32xf32, #tpu.memory_space<vmem>>, vector<1x32x32xf32>
    %495 = vector.shape_cast %494 : vector<1x32x32xf32> to vector<32x32xf32>
    %cst_236 = arith.constant dense<0.000000e+00> : vector<8x32xf32>
    %496 = tpu.matmul %493, %495, %cst_236 {dimension_numbers = #tpu.dot_dimension_numbers<[1], [0], [0], [1], [0, 0, 1, 1], [], []>} : vector<8x32xf32>, vector<32x32xf32>, vector<8x32xf32> -> vector<8x32xf32>
    %c0_237 = arith.constant 0 : index
    %c0_238 = arith.constant 0 : index
    %497 = vector.load %arg44[%c0_237, %c0_238] : memref<2x32xf32, #tpu.memory_space<vmem>>, vector<1x32xf32>
    %498 = vector.broadcast %497 : vector<1x32xf32> to vector<8x32xf32>
    %499 = arith.addf %496, %498 : vector<8x32xf32>
    %cst_239 = arith.constant 0.000000e+00 : f32
    %500 = vector.broadcast %cst_239 : f32 to vector<8x32xf32>
    %501 = arith.maximumf %499, %500 : vector<8x32xf32>
    %c0_240 = arith.constant 0 : index
    %c0_241 = arith.constant 0 : index
    %c0_242 = arith.constant 0 : index
    %502 = vector.load %arg45[%c0_240, %c0_241, %c0_242] : memref<2x32x4xf32, #tpu.memory_space<vmem>>, vector<1x32x4xf32>
    %503 = vector.shape_cast %502 : vector<1x32x4xf32> to vector<32x4xf32>
    %cst_243 = arith.constant dense<0.000000e+00> : vector<8x4xf32>
    %504 = tpu.matmul %501, %503, %cst_243 {dimension_numbers = #tpu.dot_dimension_numbers<[1], [0], [0], [1], [0, 0, 1, 1], [], []>} : vector<8x32xf32>, vector<32x4xf32>, vector<8x4xf32> -> vector<8x4xf32>
    %c0_244 = arith.constant 0 : index
    %c0_245 = arith.constant 0 : index
    %505 = vector.load %arg46[%c0_244, %c0_245] : memref<2x4xf32, #tpu.memory_space<vmem>>, vector<1x4xf32>
    %506 = vector.broadcast %505 : vector<1x4xf32> to vector<8x4xf32>
    %507 = arith.addf %504, %506 : vector<8x4xf32>
    %cst_246 = arith.constant 0.000000e+00 : f32
    %cst_247 = arith.constant 1.000000e+00 : f32
    %508 = vector.broadcast %cst_246 : f32 to vector<8x4xf32>
    %509 = arith.maximumf %508, %262 : vector<8x4xf32>
    %510 = vector.broadcast %cst_247 : f32 to vector<8x4xf32>
    %511 = arith.minimumf %510, %509 : vector<8x4xf32>
    %cst_248 = arith.constant 9.99999974E-6 : f32
    %512 = vector.broadcast %cst_248 : f32 to vector<8x4xf32>
    %513 = arith.maximumf %511, %512 : vector<8x4xf32>
    %cst_249 = arith.constant 1.000000e+00 : f32
    %514 = vector.broadcast %cst_249 : f32 to vector<8x4xf32>
    %515 = arith.subf %514, %511 : vector<8x4xf32>
    %cst_250 = arith.constant 9.99999974E-6 : f32
    %516 = vector.broadcast %cst_250 : f32 to vector<8x4xf32>
    %517 = arith.maximumf %515, %516 : vector<8x4xf32>
    %518 = arith.divf %513, %517 : vector<8x4xf32>
    %519 = math.log %518 : vector<8x4xf32>
    %520 = arith.addf %507, %519 : vector<8x4xf32>
    %cst_251 = arith.constant 0.000000e+00 : f32
    %521 = vector.broadcast %cst_251 : f32 to vector<8x4xf32>
    %522 = arith.subf %521, %520 : vector<8x4xf32>
    %523 = math.exp %522 : vector<8x4xf32>
    %cst_252 = arith.constant 1.000000e+00 : f32
    %524 = vector.broadcast %cst_252 : f32 to vector<8x4xf32>
    %525 = arith.addf %524, %523 : vector<8x4xf32>
    %cst_253 = arith.constant 1.000000e+00 : f32
    %526 = vector.broadcast %cst_253 : f32 to vector<8x4xf32>
    %527 = arith.divf %526, %525 : vector<8x4xf32>
    %c0_254 = arith.constant 0 : index
    %c0_255 = arith.constant 0 : index
    %c0_256 = arith.constant 0 : index
    %528 = vector.load %arg53[%c0_254, %c0_255, %c0_256] : memref<2x32x1xf32, #tpu.memory_space<vmem>>, vector<1x32x1xf32>
    %529 = vector.shape_cast %528 : vector<1x32x1xf32> to vector<32x1xf32>
    %cst_257 = arith.constant dense<0.000000e+00> : vector<8x1xf32>
    %530 = tpu.matmul %485, %529, %cst_257 {dimension_numbers = #tpu.dot_dimension_numbers<[1], [0], [0], [1], [0, 0, 1, 1], [], []>} : vector<8x32xf32>, vector<32x1xf32>, vector<8x1xf32> -> vector<8x1xf32>
    %c0_258 = arith.constant 0 : index
    %c0_259 = arith.constant 0 : index
    %531 = vector.load %arg54[%c0_258, %c0_259] : memref<2x1xf32, #tpu.memory_space<vmem>>, vector<1x1xf32>
    %532 = vector.broadcast %531 : vector<1x1xf32> to vector<8x1xf32>
    %533 = arith.addf %530, %532 : vector<8x1xf32>
    %c0_260 = arith.constant 0 : index
    %c0_261 = arith.constant 0 : index
    %c0_262 = arith.constant 0 : index
    %534 = vector.load %arg47[%c0_260, %c0_261, %c0_262] : memref<2x32x32xf32, #tpu.memory_space<vmem>>, vector<1x32x32xf32>
    %535 = vector.shape_cast %534 : vector<1x32x32xf32> to vector<32x32xf32>
    %cst_263 = arith.constant dense<0.000000e+00> : vector<8x32xf32>
    %536 = tpu.matmul %485, %535, %cst_263 {dimension_numbers = #tpu.dot_dimension_numbers<[1], [0], [0], [1], [0, 0, 1, 1], [], []>} : vector<8x32xf32>, vector<32x32xf32>, vector<8x32xf32> -> vector<8x32xf32>
    %c0_264 = arith.constant 0 : index
    %c0_265 = arith.constant 0 : index
    %537 = vector.load %arg48[%c0_264, %c0_265] : memref<2x32xf32, #tpu.memory_space<vmem>>, vector<1x32xf32>
    %538 = vector.broadcast %537 : vector<1x32xf32> to vector<8x32xf32>
    %539 = arith.addf %536, %538 : vector<8x32xf32>
    %cst_266 = arith.constant 0.000000e+00 : f32
    %540 = vector.broadcast %cst_266 : f32 to vector<8x32xf32>
    %541 = arith.maximumf %539, %540 : vector<8x32xf32>
    %c0_267 = arith.constant 0 : index
    %c0_268 = arith.constant 0 : index
    %c0_269 = arith.constant 0 : index
    %542 = vector.load %arg49[%c0_267, %c0_268, %c0_269] : memref<2x32x32xf32, #tpu.memory_space<vmem>>, vector<1x32x32xf32>
    %543 = vector.shape_cast %542 : vector<1x32x32xf32> to vector<32x32xf32>
    %cst_270 = arith.constant dense<0.000000e+00> : vector<8x32xf32>
    %544 = tpu.matmul %541, %543, %cst_270 {dimension_numbers = #tpu.dot_dimension_numbers<[1], [0], [0], [1], [0, 0, 1, 1], [], []>} : vector<8x32xf32>, vector<32x32xf32>, vector<8x32xf32> -> vector<8x32xf32>
    %c0_271 = arith.constant 0 : index
    %c0_272 = arith.constant 0 : index
    %545 = vector.load %arg50[%c0_271, %c0_272] : memref<2x32xf32, #tpu.memory_space<vmem>>, vector<1x32xf32>
    %546 = vector.broadcast %545 : vector<1x32xf32> to vector<8x32xf32>
    %547 = arith.addf %544, %546 : vector<8x32xf32>
    %cst_273 = arith.constant 0.000000e+00 : f32
    %548 = vector.broadcast %cst_273 : f32 to vector<8x32xf32>
    %549 = arith.maximumf %547, %548 : vector<8x32xf32>
    %c0_274 = arith.constant 0 : index
    %c0_275 = arith.constant 0 : index
    %c0_276 = arith.constant 0 : index
    %550 = vector.load %arg51[%c0_274, %c0_275, %c0_276] : memref<2x32x4xf32, #tpu.memory_space<vmem>>, vector<1x32x4xf32>
    %551 = vector.shape_cast %550 : vector<1x32x4xf32> to vector<32x4xf32>
    %cst_277 = arith.constant dense<0.000000e+00> : vector<8x4xf32>
    %552 = tpu.matmul %549, %551, %cst_277 {dimension_numbers = #tpu.dot_dimension_numbers<[1], [0], [0], [1], [0, 0, 1, 1], [], []>} : vector<8x32xf32>, vector<32x4xf32>, vector<8x4xf32> -> vector<8x4xf32>
    %c0_278 = arith.constant 0 : index
    %c0_279 = arith.constant 0 : index
    %553 = vector.load %arg52[%c0_278, %c0_279] : memref<2x4xf32, #tpu.memory_space<vmem>>, vector<1x4xf32>
    %554 = vector.broadcast %553 : vector<1x4xf32> to vector<8x4xf32>
    %555 = arith.addf %552, %554 : vector<8x4xf32>
    %cst_280 = arith.constant 2.000000e+01 : f32
    %556 = vector.broadcast %cst_280 : f32 to vector<8x4xf32>
    %557 = arith.cmpf ogt, %555, %556 : vector<8x4xf32>
    %cst_281 = arith.constant 2.000000e+01 : f32
    %558 = vector.broadcast %cst_281 : f32 to vector<8x4xf32>
    %559 = arith.minimumf %555, %558 : vector<8x4xf32>
    %560 = math.exp %559 : vector<8x4xf32>
    %561 = math.log1p %560 : vector<8x4xf32>
    %562 = arith.select %557, %555, %561 : vector<8x4xi1>, vector<8x4xf32>
    %cst_282 = arith.constant 5.000000e-01 : f32
    %563 = vector.broadcast %cst_282 : f32 to vector<8x4xf32>
    %564 = arith.subf %527, %563 : vector<8x4xf32>
    %565 = vector.extract_strided_slice %564 {offsets = [0, 0], sizes = [8, 2], strides = [1, 1]} : vector<8x4xf32> to vector<8x2xf32>
    %cst_283 = arith.constant 4.000000e+01 : f32
    %566 = vector.broadcast %cst_283 : f32 to vector<8x2xf32>
    %567 = arith.mulf %565, %566 : vector<8x2xf32>
    %568 = vector.extract_strided_slice %564 {offsets = [0, 2], sizes = [8, 2], strides = [1, 1]} : vector<8x4xf32> to vector<8x2xf32>
    %cst_284 = arith.constant 2.000000e+01 : f32
    %569 = vector.broadcast %cst_284 : f32 to vector<8x2xf32>
    %570 = arith.mulf %568, %569 : vector<8x2xf32>
    %571 = tpu.concatenate %567, %570 in 1 : vector<8x2xf32>, vector<8x2xf32> -> vector<8x4xf32>
    %c0_285 = arith.constant 0 : index
    %c0_286 = arith.constant 0 : index
    %c0_287 = arith.constant 0 : index
    %c0_288 = arith.constant 0 : index
    %572 = vector.load %arg55[%c0_285, %c0_286, %c0_287, %c0_288] : memref<2x1x8x4xf32, #tpu.memory_space<vmem>>, vector<1x1x8x4xf32>
    %573 = vector.shape_cast %572 : vector<1x1x8x4xf32> to vector<8x4xf32>
    %574 = vector.shape_cast %571 : vector<8x4xf32> to vector<1x1x8x4xf32>
    tpu.vector_store %arg55[%c0_285, %c0_286, %c0_287, %c0_288], %574 {strides = array<i32>} : memref<2x1x8x4xf32, #tpu.memory_space<vmem>>, vector<1x1x8x4xf32>,
    %c0_289 = arith.constant 0 : index
    %c0_290 = arith.constant 0 : index
    %c0_291 = arith.constant 0 : index
    %c0_292 = arith.constant 0 : index
    %575 = vector.load %arg56[%c0_289, %c0_290, %c0_291, %c0_292] : memref<2x1x8x1xf32, #tpu.memory_space<vmem>>, vector<1x1x8x1xf32>
    %576 = vector.shape_cast %575 : vector<1x1x8x1xf32> to vector<8x1xf32>
    %577 = vector.shape_cast %533 : vector<8x1xf32> to vector<1x1x8x1xf32>
    tpu.vector_store %arg56[%c0_289, %c0_290, %c0_291, %c0_292], %577 {strides = array<i32>} : memref<2x1x8x1xf32, #tpu.memory_space<vmem>>, vector<1x1x8x1xf32>,
    %c0_293 = arith.constant 0 : index
    %c0_294 = arith.constant 0 : index
    %c0_295 = arith.constant 0 : index
    %c0_296 = arith.constant 0 : index
    %578 = vector.load %arg57[%c0_293, %c0_294, %c0_295, %c0_296] : memref<2x1x8x4xf32, #tpu.memory_space<vmem>>, vector<1x1x8x4xf32>
    %579 = vector.shape_cast %578 : vector<1x1x8x4xf32> to vector<8x4xf32>
    %580 = vector.shape_cast %562 : vector<8x4xf32> to vector<1x1x8x4xf32>
    tpu.vector_store %arg57[%c0_293, %c0_294, %c0_295, %c0_296], %580 {strides = array<i32>} : memref<2x1x8x4xf32, #tpu.memory_space<vmem>>, vector<1x1x8x4xf32>,
    %581 = arith.addf %463, %250 : vector<8x32xf32>
    %c1_297 = arith.constant 1 : index
    %c0_298 = arith.constant 0 : index
    %c0_299 = arith.constant 0 : index
    %582 = vector.load %arg23[%c1_297, %c0_298, %c0_299] : memref<2x32x96xf32, #tpu.memory_space<vmem>>, vector<1x32x96xf32>
    %583 = vector.shape_cast %582 : vector<1x32x96xf32> to vector<32x96xf32>
    %c1_300 = arith.constant 1 : index
    %c0_301 = arith.constant 0 : index
    %584 = vector.load %arg24[%c1_300, %c0_301] : memref<2x96xf32, #tpu.memory_space<vmem>>, vector<1x96xf32>
    %c1_302 = arith.constant 1 : index
    %c0_303 = arith.constant 0 : index
    %c0_304 = arith.constant 0 : index
    %585 = vector.load %arg25[%c1_302, %c0_303, %c0_304] : memref<2x32x32xf32, #tpu.memory_space<vmem>>, vector<1x32x32xf32>
    %586 = vector.shape_cast %585 : vector<1x32x32xf32> to vector<32x32xf32>
    %c1_305 = arith.constant 1 : index
    %c0_306 = arith.constant 0 : index
    %587 = vector.load %arg26[%c1_305, %c0_306] : memref<2x32xf32, #tpu.memory_space<vmem>>, vector<1x32xf32>
    %588 = vector.extract_strided_slice %583 {offsets = [0, 0], sizes = [32, 64], strides = [1, 1]} : vector<32x96xf32> to vector<32x64xf32>
    %cst_307 = arith.constant dense<0.000000e+00> : vector<8x64xf32>
    %589 = tpu.matmul %581, %588, %cst_307 {dimension_numbers = #tpu.dot_dimension_numbers<[1], [0], [0], [1], [0, 0, 1, 1], [], []>} : vector<8x32xf32>, vector<32x64xf32>, vector<8x64xf32> -> vector<8x64xf32>
    %590 = vector.extract_strided_slice %584 {offsets = [0, 0], sizes = [1, 64], strides = [1, 1]} : vector<1x96xf32> to vector<1x64xf32>
    %591 = vector.broadcast %590 : vector<1x64xf32> to vector<8x64xf32>
    %592 = arith.addf %589, %591 : vector<8x64xf32>
    %593 = vector.extract_strided_slice %592 {offsets = [0, 0], sizes = [8, 32], strides = [1, 1]} : vector<8x64xf32> to vector<8x32xf32>
    %594 = vector.extract_strided_slice %592 {offsets = [0, 32], sizes = [8, 32], strides = [1, 1]} : vector<8x64xf32> to vector<8x32xf32>
    %595 = vector.extract_strided_slice %583 {offsets = [0, 64], sizes = [32, 32], strides = [1, 1]} : vector<32x96xf32> to vector<32x32xf32>
    %cst_308 = arith.constant dense<0.000000e+00> : vector<8x32xf32>
    %596 = tpu.matmul %463, %595, %cst_308 {dimension_numbers = #tpu.dot_dimension_numbers<[1], [0], [0], [1], [0, 0, 1, 1], [], []>} : vector<8x32xf32>, vector<32x32xf32>, vector<8x32xf32> -> vector<8x32xf32>
    %597 = vector.extract_strided_slice %584 {offsets = [0, 64], sizes = [1, 32], strides = [1, 1]} : vector<1x96xf32> to vector<1x32xf32>
    %598 = vector.broadcast %597 : vector<1x32xf32> to vector<8x32xf32>
    %599 = arith.addf %596, %598 : vector<8x32xf32>
    %600 = vector.extract_strided_slice %593 {offsets = [0, 0], sizes = [8, 16], strides = [1, 1]} : vector<8x32xf32> to vector<8x16xf32>
    %601 = vector.extract_strided_slice %594 {offsets = [0, 0], sizes = [8, 16], strides = [1, 1]} : vector<8x32xf32> to vector<8x16xf32>
    %cst_309 = arith.constant dense<0.000000e+00> : vector<8x8xf32>
    %602 = tpu.matmul %600, %601, %cst_309 {dimension_numbers = #tpu.dot_dimension_numbers<[1], [1], [0], [0], [0, 0, 1, 0], [], []>} : vector<8x16xf32>, vector<8x16xf32>, vector<8x8xf32> -> vector<8x8xf32>
    %cst_310 = arith.constant 2.500000e-01 : f32
    %603 = vector.broadcast %cst_310 : f32 to vector<8x8xf32>
    %604 = arith.mulf %602, %603 : vector<8x8xf32>
    %cst_311 = arith.constant dense<0xFF800000> : vector<8xf32>
    %605 = vector.multi_reduction <maximumf>, %604, %cst_311 [1] : vector<8x8xf32> to vector<8xf32>
    %606 = vector.shape_cast %605 : vector<8xf32> to vector<8x1xf32>
    %607 = vector.broadcast %606 : vector<8x1xf32> to vector<8x8xf32>
    %608 = arith.subf %604, %607 : vector<8x8xf32>
    %609 = math.exp %608 : vector<8x8xf32>
    %cst_312 = arith.constant dense<0.000000e+00> : vector<8xf32>
    %610 = vector.multi_reduction <add>, %609, %cst_312 [1] : vector<8x8xf32> to vector<8xf32>
    %611 = vector.shape_cast %610 : vector<8xf32> to vector<8x1xf32>
    %612 = vector.broadcast %611 : vector<8x1xf32> to vector<8x8xf32>
    %613 = arith.divf %609, %612 : vector<8x8xf32>
    %614 = vector.extract_strided_slice %599 {offsets = [0, 0], sizes = [8, 16], strides = [1, 1]} : vector<8x32xf32> to vector<8x16xf32>
    %cst_313 = arith.constant dense<0.000000e+00> : vector<8x16xf32>
    %615 = tpu.matmul %613, %614, %cst_313 {dimension_numbers = #tpu.dot_dimension_numbers<[1], [0], [0], [1], [0, 0, 1, 1], [], []>} : vector<8x8xf32>, vector<8x16xf32>, vector<8x16xf32> -> vector<8x16xf32>
    %616 = vector.extract_strided_slice %593 {offsets = [0, 16], sizes = [8, 16], strides = [1, 1]} : vector<8x32xf32> to vector<8x16xf32>
    %617 = vector.extract_strided_slice %594 {offsets = [0, 16], sizes = [8, 16], strides = [1, 1]} : vector<8x32xf32> to vector<8x16xf32>
    %cst_314 = arith.constant dense<0.000000e+00> : vector<8x8xf32>
    %618 = tpu.matmul %616, %617, %cst_314 {dimension_numbers = #tpu.dot_dimension_numbers<[1], [1], [0], [0], [0, 0, 1, 0], [], []>} : vector<8x16xf32>, vector<8x16xf32>, vector<8x8xf32> -> vector<8x8xf32>
    %cst_315 = arith.constant 2.500000e-01 : f32
    %619 = vector.broadcast %cst_315 : f32 to vector<8x8xf32>
    %620 = arith.mulf %618, %619 : vector<8x8xf32>
    %cst_316 = arith.constant dense<0xFF800000> : vector<8xf32>
    %621 = vector.multi_reduction <maximumf>, %620, %cst_316 [1] : vector<8x8xf32> to vector<8xf32>
    %622 = vector.shape_cast %621 : vector<8xf32> to vector<8x1xf32>
    %623 = vector.broadcast %622 : vector<8x1xf32> to vector<8x8xf32>
    %624 = arith.subf %620, %623 : vector<8x8xf32>
    %625 = math.exp %624 : vector<8x8xf32>
    %cst_317 = arith.constant dense<0.000000e+00> : vector<8xf32>
    %626 = vector.multi_reduction <add>, %625, %cst_317 [1] : vector<8x8xf32> to vector<8xf32>
    %627 = vector.shape_cast %626 : vector<8xf32> to vector<8x1xf32>
    %628 = vector.broadcast %627 : vector<8x1xf32> to vector<8x8xf32>
    %629 = arith.divf %625, %628 : vector<8x8xf32>
    %630 = vector.extract_strided_slice %599 {offsets = [0, 16], sizes = [8, 16], strides = [1, 1]} : vector<8x32xf32> to vector<8x16xf32>
    %cst_318 = arith.constant dense<0.000000e+00> : vector<8x16xf32>
    %631 = tpu.matmul %629, %630, %cst_318 {dimension_numbers = #tpu.dot_dimension_numbers<[1], [0], [0], [1], [0, 0, 1, 1], [], []>} : vector<8x8xf32>, vector<8x16xf32>, vector<8x16xf32> -> vector<8x16xf32>
    %632 = tpu.concatenate %615, %631 in 1 : vector<8x16xf32>, vector<8x16xf32> -> vector<8x32xf32>
    %cst_319 = arith.constant dense<0.000000e+00> : vector<8x32xf32>
    %633 = tpu.matmul %632, %586, %cst_319 {dimension_numbers = #tpu.dot_dimension_numbers<[1], [0], [0], [1], [0, 0, 1, 1], [], []>} : vector<8x32xf32>, vector<32x32xf32>, vector<8x32xf32> -> vector<8x32xf32>
    %634 = vector.broadcast %587 : vector<1x32xf32> to vector<8x32xf32>
    %635 = arith.addf %633, %634 : vector<8x32xf32>
    %636 = arith.addf %463, %635 : vector<8x32xf32>
    %c1_320 = arith.constant 1 : index
    %c0_321 = arith.constant 0 : index
    %637 = vector.load %arg35[%c1_320, %c0_321] : memref<2x32xf32, #tpu.memory_space<vmem>>, vector<1x32xf32>
    %c1_322 = arith.constant 1 : index
    %c0_323 = arith.constant 0 : index
    %638 = vector.load %arg36[%c1_322, %c0_323] : memref<2x32xf32, #tpu.memory_space<vmem>>, vector<1x32xf32>
    %cst_324 = arith.constant dense<0.000000e+00> : vector<8xf32>
    %639 = vector.multi_reduction <add>, %636, %cst_324 [1] : vector<8x32xf32> to vector<8xf32>
    %640 = vector.shape_cast %639 : vector<8xf32> to vector<8x1xf32>
    %cst_325 = arith.constant 3.200000e+01 : f32
    %641 = vector.broadcast %cst_325 : f32 to vector<8x1xf32>
    %642 = arith.divf %640, %641 : vector<8x1xf32>
    %643 = vector.broadcast %642 : vector<8x1xf32> to vector<8x32xf32>
    %644 = arith.subf %636, %643 : vector<8x32xf32>
    %645 = arith.mulf %644, %644 : vector<8x32xf32>
    %cst_326 = arith.constant dense<0.000000e+00> : vector<8xf32>
    %646 = vector.multi_reduction <add>, %645, %cst_326 [1] : vector<8x32xf32> to vector<8xf32>
    %647 = vector.shape_cast %646 : vector<8xf32> to vector<8x1xf32>
    %cst_327 = arith.constant 3.200000e+01 : f32
    %648 = vector.broadcast %cst_327 : f32 to vector<8x1xf32>
    %649 = arith.divf %647, %648 : vector<8x1xf32>
    %cst_328 = arith.constant 9.99999974E-6 : f32
    %650 = vector.broadcast %cst_328 : f32 to vector<8x1xf32>
    %651 = arith.addf %649, %650 : vector<8x1xf32>
    %652 = math.rsqrt %651 : vector<8x1xf32>
    %653 = vector.broadcast %652 : vector<8x1xf32> to vector<8x32xf32>
    %654 = arith.mulf %644, %653 : vector<8x32xf32>
    %655 = vector.broadcast %637 : vector<1x32xf32> to vector<8x32xf32>
    %656 = arith.mulf %654, %655 : vector<8x32xf32>
    %657 = vector.broadcast %638 : vector<1x32xf32> to vector<8x32xf32>
    %658 = arith.addf %656, %657 : vector<8x32xf32>
    %659 = arith.addf %658, %250 : vector<8x32xf32>
    %c1_329 = arith.constant 1 : index
    %c0_330 = arith.constant 0 : index
    %c0_331 = arith.constant 0 : index
    %660 = vector.load %arg27[%c1_329, %c0_330, %c0_331] : memref<2x32x96xf32, #tpu.memory_space<vmem>>, vector<1x32x96xf32>
    %661 = vector.shape_cast %660 : vector<1x32x96xf32> to vector<32x96xf32>
    %c1_332 = arith.constant 1 : index
    %c0_333 = arith.constant 0 : index
    %662 = vector.load %arg28[%c1_332, %c0_333] : memref<2x96xf32, #tpu.memory_space<vmem>>, vector<1x96xf32>
    %c1_334 = arith.constant 1 : index
    %c0_335 = arith.constant 0 : index
    %c0_336 = arith.constant 0 : index
    %663 = vector.load %arg29[%c1_334, %c0_335, %c0_336] : memref<2x32x32xf32, #tpu.memory_space<vmem>>, vector<1x32x32xf32>
    %664 = vector.shape_cast %663 : vector<1x32x32xf32> to vector<32x32xf32>
    %c1_337 = arith.constant 1 : index
    %c0_338 = arith.constant 0 : index
    %665 = vector.load %arg30[%c1_337, %c0_338] : memref<2x32xf32, #tpu.memory_space<vmem>>, vector<1x32xf32>
    %666 = vector.extract_strided_slice %661 {offsets = [0, 0], sizes = [32, 32], strides = [1, 1]} : vector<32x96xf32> to vector<32x32xf32>
    %cst_339 = arith.constant dense<0.000000e+00> : vector<8x32xf32>
    %667 = tpu.matmul %659, %666, %cst_339 {dimension_numbers = #tpu.dot_dimension_numbers<[1], [0], [0], [1], [0, 0, 1, 1], [], []>} : vector<8x32xf32>, vector<32x32xf32>, vector<8x32xf32> -> vector<8x32xf32>
    %668 = vector.extract_strided_slice %662 {offsets = [0, 0], sizes = [1, 32], strides = [1, 1]} : vector<1x96xf32> to vector<1x32xf32>
    %669 = vector.broadcast %668 : vector<1x32xf32> to vector<8x32xf32>
    %670 = arith.addf %667, %669 : vector<8x32xf32>
    %671 = vector.extract_strided_slice %661 {offsets = [0, 32], sizes = [32, 32], strides = [1, 1]} : vector<32x96xf32> to vector<32x32xf32>
    %cst_340 = arith.constant dense<0.000000e+00> : vector<16x32xf32>
    %672 = tpu.matmul %249, %671, %cst_340 {dimension_numbers = #tpu.dot_dimension_numbers<[1], [0], [0], [1], [0, 0, 1, 1], [], []>} : vector<16x32xf32>, vector<32x32xf32>, vector<16x32xf32> -> vector<16x32xf32>
    %673 = vector.extract_strided_slice %662 {offsets = [0, 32], sizes = [1, 32], strides = [1, 1]} : vector<1x96xf32> to vector<1x32xf32>
    %674 = vector.broadcast %673 : vector<1x32xf32> to vector<16x32xf32>
    %675 = arith.addf %672, %674 : vector<16x32xf32>
    %676 = vector.extract_strided_slice %661 {offsets = [0, 64], sizes = [32, 32], strides = [1, 1]} : vector<32x96xf32> to vector<32x32xf32>
    %cst_341 = arith.constant dense<0.000000e+00> : vector<16x32xf32>
    %677 = tpu.matmul %248, %676, %cst_341 {dimension_numbers = #tpu.dot_dimension_numbers<[1], [0], [0], [1], [0, 0, 1, 1], [], []>} : vector<16x32xf32>, vector<32x32xf32>, vector<16x32xf32> -> vector<16x32xf32>
    %678 = vector.extract_strided_slice %662 {offsets = [0, 64], sizes = [1, 32], strides = [1, 1]} : vector<1x96xf32> to vector<1x32xf32>
    %679 = vector.broadcast %678 : vector<1x32xf32> to vector<16x32xf32>
    %680 = arith.addf %677, %679 : vector<16x32xf32>
    %681 = vector.extract_strided_slice %670 {offsets = [0, 0], sizes = [8, 16], strides = [1, 1]} : vector<8x32xf32> to vector<8x16xf32>
    %682 = vector.extract_strided_slice %675 {offsets = [0, 0], sizes = [16, 16], strides = [1, 1]} : vector<16x32xf32> to vector<16x16xf32>
    %cst_342 = arith.constant dense<0.000000e+00> : vector<8x16xf32>
    %683 = tpu.matmul %681, %682, %cst_342 {dimension_numbers = #tpu.dot_dimension_numbers<[1], [1], [0], [0], [0, 0, 1, 0], [], []>} : vector<8x16xf32>, vector<16x16xf32>, vector<8x16xf32> -> vector<8x16xf32>
    %cst_343 = arith.constant 2.500000e-01 : f32
    %684 = vector.broadcast %cst_343 : f32 to vector<8x16xf32>
    %685 = arith.mulf %683, %684 : vector<8x16xf32>
    %686 = vector.broadcast %5 : vector<1x16xf32> to vector<8x16xf32>
    %687 = arith.addf %685, %686 : vector<8x16xf32>
    %cst_344 = arith.constant dense<0xFF800000> : vector<8xf32>
    %688 = vector.multi_reduction <maximumf>, %687, %cst_344 [1] : vector<8x16xf32> to vector<8xf32>
    %689 = vector.shape_cast %688 : vector<8xf32> to vector<8x1xf32>
    %690 = vector.broadcast %689 : vector<8x1xf32> to vector<8x16xf32>
    %691 = arith.subf %687, %690 : vector<8x16xf32>
    %692 = math.exp %691 : vector<8x16xf32>
    %cst_345 = arith.constant dense<0.000000e+00> : vector<8xf32>
    %693 = vector.multi_reduction <add>, %692, %cst_345 [1] : vector<8x16xf32> to vector<8xf32>
    %694 = vector.shape_cast %693 : vector<8xf32> to vector<8x1xf32>
    %695 = vector.broadcast %694 : vector<8x1xf32> to vector<8x16xf32>
    %696 = arith.divf %692, %695 : vector<8x16xf32>
    %697 = vector.extract_strided_slice %680 {offsets = [0, 0], sizes = [16, 16], strides = [1, 1]} : vector<16x32xf32> to vector<16x16xf32>
    %cst_346 = arith.constant dense<0.000000e+00> : vector<8x16xf32>
    %698 = tpu.matmul %696, %697, %cst_346 {dimension_numbers = #tpu.dot_dimension_numbers<[1], [0], [0], [1], [0, 0, 1, 1], [], []>} : vector<8x16xf32>, vector<16x16xf32>, vector<8x16xf32> -> vector<8x16xf32>
    %699 = vector.extract_strided_slice %670 {offsets = [0, 16], sizes = [8, 16], strides = [1, 1]} : vector<8x32xf32> to vector<8x16xf32>
    %700 = vector.extract_strided_slice %675 {offsets = [0, 16], sizes = [16, 16], strides = [1, 1]} : vector<16x32xf32> to vector<16x16xf32>
    %cst_347 = arith.constant dense<0.000000e+00> : vector<8x16xf32>
    %701 = tpu.matmul %699, %700, %cst_347 {dimension_numbers = #tpu.dot_dimension_numbers<[1], [1], [0], [0], [0, 0, 1, 0], [], []>} : vector<8x16xf32>, vector<16x16xf32>, vector<8x16xf32> -> vector<8x16xf32>
    %cst_348 = arith.constant 2.500000e-01 : f32
    %702 = vector.broadcast %cst_348 : f32 to vector<8x16xf32>
    %703 = arith.mulf %701, %702 : vector<8x16xf32>
    %704 = vector.broadcast %5 : vector<1x16xf32> to vector<8x16xf32>
    %705 = arith.addf %703, %704 : vector<8x16xf32>
    %cst_349 = arith.constant dense<0xFF800000> : vector<8xf32>
    %706 = vector.multi_reduction <maximumf>, %705, %cst_349 [1] : vector<8x16xf32> to vector<8xf32>
    %707 = vector.shape_cast %706 : vector<8xf32> to vector<8x1xf32>
    %708 = vector.broadcast %707 : vector<8x1xf32> to vector<8x16xf32>
    %709 = arith.subf %705, %708 : vector<8x16xf32>
    %710 = math.exp %709 : vector<8x16xf32>
    %cst_350 = arith.constant dense<0.000000e+00> : vector<8xf32>
    %711 = vector.multi_reduction <add>, %710, %cst_350 [1] : vector<8x16xf32> to vector<8xf32>
    %712 = vector.shape_cast %711 : vector<8xf32> to vector<8x1xf32>
    %713 = vector.broadcast %712 : vector<8x1xf32> to vector<8x16xf32>
    %714 = arith.divf %710, %713 : vector<8x16xf32>
    %715 = vector.extract_strided_slice %680 {offsets = [0, 16], sizes = [16, 16], strides = [1, 1]} : vector<16x32xf32> to vector<16x16xf32>
    %cst_351 = arith.constant dense<0.000000e+00> : vector<8x16xf32>
    %716 = tpu.matmul %714, %715, %cst_351 {dimension_numbers = #tpu.dot_dimension_numbers<[1], [0], [0], [1], [0, 0, 1, 1], [], []>} : vector<8x16xf32>, vector<16x16xf32>, vector<8x16xf32> -> vector<8x16xf32>
    %717 = tpu.concatenate %698, %716 in 1 : vector<8x16xf32>, vector<8x16xf32> -> vector<8x32xf32>
    %cst_352 = arith.constant dense<0.000000e+00> : vector<8x32xf32>
    %718 = tpu.matmul %717, %664, %cst_352 {dimension_numbers = #tpu.dot_dimension_numbers<[1], [0], [0], [1], [0, 0, 1, 1], [], []>} : vector<8x32xf32>, vector<32x32xf32>, vector<8x32xf32> -> vector<8x32xf32>
    %719 = vector.broadcast %665 : vector<1x32xf32> to vector<8x32xf32>
    %720 = arith.addf %718, %719 : vector<8x32xf32>
    %721 = arith.addf %658, %720 : vector<8x32xf32>
    %c1_353 = arith.constant 1 : index
    %c0_354 = arith.constant 0 : index
    %722 = vector.load %arg37[%c1_353, %c0_354] : memref<2x32xf32, #tpu.memory_space<vmem>>, vector<1x32xf32>
    %c1_355 = arith.constant 1 : index
    %c0_356 = arith.constant 0 : index
    %723 = vector.load %arg38[%c1_355, %c0_356] : memref<2x32xf32, #tpu.memory_space<vmem>>, vector<1x32xf32>
    %cst_357 = arith.constant dense<0.000000e+00> : vector<8xf32>
    %724 = vector.multi_reduction <add>, %721, %cst_357 [1] : vector<8x32xf32> to vector<8xf32>
    %725 = vector.shape_cast %724 : vector<8xf32> to vector<8x1xf32>
    %cst_358 = arith.constant 3.200000e+01 : f32
    %726 = vector.broadcast %cst_358 : f32 to vector<8x1xf32>
    %727 = arith.divf %725, %726 : vector<8x1xf32>
    %728 = vector.broadcast %727 : vector<8x1xf32> to vector<8x32xf32>
    %729 = arith.subf %721, %728 : vector<8x32xf32>
    %730 = arith.mulf %729, %729 : vector<8x32xf32>
    %cst_359 = arith.constant dense<0.000000e+00> : vector<8xf32>
    %731 = vector.multi_reduction <add>, %730, %cst_359 [1] : vector<8x32xf32> to vector<8xf32>
    %732 = vector.shape_cast %731 : vector<8xf32> to vector<8x1xf32>
    %cst_360 = arith.constant 3.200000e+01 : f32
    %733 = vector.broadcast %cst_360 : f32 to vector<8x1xf32>
    %734 = arith.divf %732, %733 : vector<8x1xf32>
    %cst_361 = arith.constant 9.99999974E-6 : f32
    %735 = vector.broadcast %cst_361 : f32 to vector<8x1xf32>
    %736 = arith.addf %734, %735 : vector<8x1xf32>
    %737 = math.rsqrt %736 : vector<8x1xf32>
    %738 = vector.broadcast %737 : vector<8x1xf32> to vector<8x32xf32>
    %739 = arith.mulf %729, %738 : vector<8x32xf32>
    %740 = vector.broadcast %722 : vector<1x32xf32> to vector<8x32xf32>
    %741 = arith.mulf %739, %740 : vector<8x32xf32>
    %742 = vector.broadcast %723 : vector<1x32xf32> to vector<8x32xf32>
    %743 = arith.addf %741, %742 : vector<8x32xf32>
    %c1_362 = arith.constant 1 : index
    %c0_363 = arith.constant 0 : index
    %c0_364 = arith.constant 0 : index
    %744 = vector.load %arg31[%c1_362, %c0_363, %c0_364] : memref<2x32x64xf32, #tpu.memory_space<vmem>>, vector<1x32x64xf32>
    %745 = vector.shape_cast %744 : vector<1x32x64xf32> to vector<32x64xf32>
    %cst_365 = arith.constant dense<0.000000e+00> : vector<8x64xf32>
    %746 = tpu.matmul %743, %745, %cst_365 {dimension_numbers = #tpu.dot_dimension_numbers<[1], [0], [0], [1], [0, 0, 1, 1], [], []>} : vector<8x32xf32>, vector<32x64xf32>, vector<8x64xf32> -> vector<8x64xf32>
    %c1_366 = arith.constant 1 : index
    %c0_367 = arith.constant 0 : index
    %747 = vector.load %arg32[%c1_366, %c0_367] : memref<2x64xf32, #tpu.memory_space<vmem>>, vector<1x64xf32>
    %748 = vector.broadcast %747 : vector<1x64xf32> to vector<8x64xf32>
    %749 = arith.addf %746, %748 : vector<8x64xf32>
    %cst_368 = arith.constant 0.000000e+00 : f32
    %750 = vector.broadcast %cst_368 : f32 to vector<8x64xf32>
    %751 = arith.maximumf %749, %750 : vector<8x64xf32>
    %c1_369 = arith.constant 1 : index
    %c0_370 = arith.constant 0 : index
    %c0_371 = arith.constant 0 : index
    %752 = vector.load %arg33[%c1_369, %c0_370, %c0_371] : memref<2x64x32xf32, #tpu.memory_space<vmem>>, vector<1x64x32xf32>
    %753 = vector.shape_cast %752 : vector<1x64x32xf32> to vector<64x32xf32>
    %cst_372 = arith.constant dense<0.000000e+00> : vector<8x32xf32>
    %754 = tpu.matmul %751, %753, %cst_372 {dimension_numbers = #tpu.dot_dimension_numbers<[1], [0], [0], [1], [0, 0, 1, 1], [], []>} : vector<8x64xf32>, vector<64x32xf32>, vector<8x32xf32> -> vector<8x32xf32>
    %c1_373 = arith.constant 1 : index
    %c0_374 = arith.constant 0 : index
    %755 = vector.load %arg34[%c1_373, %c0_374] : memref<2x32xf32, #tpu.memory_space<vmem>>, vector<1x32xf32>
    %756 = vector.broadcast %755 : vector<1x32xf32> to vector<8x32xf32>
    %757 = arith.addf %754, %756 : vector<8x32xf32>
    %758 = arith.addf %743, %757 : vector<8x32xf32>
    %c1_375 = arith.constant 1 : index
    %c0_376 = arith.constant 0 : index
    %759 = vector.load %arg39[%c1_375, %c0_376] : memref<2x32xf32, #tpu.memory_space<vmem>>, vector<1x32xf32>
    %c1_377 = arith.constant 1 : index
    %c0_378 = arith.constant 0 : index
    %760 = vector.load %arg40[%c1_377, %c0_378] : memref<2x32xf32, #tpu.memory_space<vmem>>, vector<1x32xf32>
    %cst_379 = arith.constant dense<0.000000e+00> : vector<8xf32>
    %761 = vector.multi_reduction <add>, %758, %cst_379 [1] : vector<8x32xf32> to vector<8xf32>
    %762 = vector.shape_cast %761 : vector<8xf32> to vector<8x1xf32>
    %cst_380 = arith.constant 3.200000e+01 : f32
    %763 = vector.broadcast %cst_380 : f32 to vector<8x1xf32>
    %764 = arith.divf %762, %763 : vector<8x1xf32>
    %765 = vector.broadcast %764 : vector<8x1xf32> to vector<8x32xf32>
    %766 = arith.subf %758, %765 : vector<8x32xf32>
    %767 = arith.mulf %766, %766 : vector<8x32xf32>
    %cst_381 = arith.constant dense<0.000000e+00> : vector<8xf32>
    %768 = vector.multi_reduction <add>, %767, %cst_381 [1] : vector<8x32xf32> to vector<8xf32>
    %769 = vector.shape_cast %768 : vector<8xf32> to vector<8x1xf32>
    %cst_382 = arith.constant 3.200000e+01 : f32
    %770 = vector.broadcast %cst_382 : f32 to vector<8x1xf32>
    %771 = arith.divf %769, %770 : vector<8x1xf32>
    %cst_383 = arith.constant 9.99999974E-6 : f32
    %772 = vector.broadcast %cst_383 : f32 to vector<8x1xf32>
    %773 = arith.addf %771, %772 : vector<8x1xf32>
    %774 = math.rsqrt %773 : vector<8x1xf32>
    %775 = vector.broadcast %774 : vector<8x1xf32> to vector<8x32xf32>
    %776 = arith.mulf %766, %775 : vector<8x32xf32>
    %777 = vector.broadcast %759 : vector<1x32xf32> to vector<8x32xf32>
    %778 = arith.mulf %776, %777 : vector<8x32xf32>
    %779 = vector.broadcast %760 : vector<1x32xf32> to vector<8x32xf32>
    %780 = arith.addf %778, %779 : vector<8x32xf32>
    %c0_384 = arith.constant 0 : index
    %c0_385 = arith.constant 0 : index
    %781 = vector.load %arg9[%c0_384, %c0_385] : memref<1x32xf32, #tpu.memory_space<vmem>>, vector<1x32xf32>
    %c0_386 = arith.constant 0 : index
    %c0_387 = arith.constant 0 : index
    %782 = vector.load %arg10[%c0_386, %c0_387] : memref<1x32xf32, #tpu.memory_space<vmem>>, vector<1x32xf32>
    %cst_388 = arith.constant dense<0.000000e+00> : vector<8xf32>
    %783 = vector.multi_reduction <add>, %780, %cst_388 [1] : vector<8x32xf32> to vector<8xf32>
    %784 = vector.shape_cast %783 : vector<8xf32> to vector<8x1xf32>
    %cst_389 = arith.constant 3.200000e+01 : f32
    %785 = vector.broadcast %cst_389 : f32 to vector<8x1xf32>
    %786 = arith.divf %784, %785 : vector<8x1xf32>
    %787 = vector.broadcast %786 : vector<8x1xf32> to vector<8x32xf32>
    %788 = arith.subf %780, %787 : vector<8x32xf32>
    %789 = arith.mulf %788, %788 : vector<8x32xf32>
    %cst_390 = arith.constant dense<0.000000e+00> : vector<8xf32>
    %790 = vector.multi_reduction <add>, %789, %cst_390 [1] : vector<8x32xf32> to vector<8xf32>
    %791 = vector.shape_cast %790 : vector<8xf32> to vector<8x1xf32>
    %cst_391 = arith.constant 3.200000e+01 : f32
    %792 = vector.broadcast %cst_391 : f32 to vector<8x1xf32>
    %793 = arith.divf %791, %792 : vector<8x1xf32>
    %cst_392 = arith.constant 9.99999974E-6 : f32
    %794 = vector.broadcast %cst_392 : f32 to vector<8x1xf32>
    %795 = arith.addf %793, %794 : vector<8x1xf32>
    %796 = math.rsqrt %795 : vector<8x1xf32>
    %797 = vector.broadcast %796 : vector<8x1xf32> to vector<8x32xf32>
    %798 = arith.mulf %788, %797 : vector<8x32xf32>
    %799 = vector.broadcast %781 : vector<1x32xf32> to vector<8x32xf32>
    %800 = arith.mulf %798, %799 : vector<8x32xf32>
    %801 = vector.broadcast %782 : vector<1x32xf32> to vector<8x32xf32>
    %802 = arith.addf %800, %801 : vector<8x32xf32>
    %c1_393 = arith.constant 1 : index
    %c0_394 = arith.constant 0 : index
    %c0_395 = arith.constant 0 : index
    %803 = vector.load %arg41[%c1_393, %c0_394, %c0_395] : memref<2x32x32xf32, #tpu.memory_space<vmem>>, vector<1x32x32xf32>
    %804 = vector.shape_cast %803 : vector<1x32x32xf32> to vector<32x32xf32>
    %cst_396 = arith.constant dense<0.000000e+00> : vector<8x32xf32>
    %805 = tpu.matmul %802, %804, %cst_396 {dimension_numbers = #tpu.dot_dimension_numbers<[1], [0], [0], [1], [0, 0, 1, 1], [], []>} : vector<8x32xf32>, vector<32x32xf32>, vector<8x32xf32> -> vector<8x32xf32>
    %c1_397 = arith.constant 1 : index
    %c0_398 = arith.constant 0 : index
    %806 = vector.load %arg42[%c1_397, %c0_398] : memref<2x32xf32, #tpu.memory_space<vmem>>, vector<1x32xf32>
    %807 = vector.broadcast %806 : vector<1x32xf32> to vector<8x32xf32>
    %808 = arith.addf %805, %807 : vector<8x32xf32>
    %cst_399 = arith.constant 0.000000e+00 : f32
    %809 = vector.broadcast %cst_399 : f32 to vector<8x32xf32>
    %810 = arith.maximumf %808, %809 : vector<8x32xf32>
    %c1_400 = arith.constant 1 : index
    %c0_401 = arith.constant 0 : index
    %c0_402 = arith.constant 0 : index
    %811 = vector.load %arg43[%c1_400, %c0_401, %c0_402] : memref<2x32x32xf32, #tpu.memory_space<vmem>>, vector<1x32x32xf32>
    %812 = vector.shape_cast %811 : vector<1x32x32xf32> to vector<32x32xf32>
    %cst_403 = arith.constant dense<0.000000e+00> : vector<8x32xf32>
    %813 = tpu.matmul %810, %812, %cst_403 {dimension_numbers = #tpu.dot_dimension_numbers<[1], [0], [0], [1], [0, 0, 1, 1], [], []>} : vector<8x32xf32>, vector<32x32xf32>, vector<8x32xf32> -> vector<8x32xf32>
    %c1_404 = arith.constant 1 : index
    %c0_405 = arith.constant 0 : index
    %814 = vector.load %arg44[%c1_404, %c0_405] : memref<2x32xf32, #tpu.memory_space<vmem>>, vector<1x32xf32>
    %815 = vector.broadcast %814 : vector<1x32xf32> to vector<8x32xf32>
    %816 = arith.addf %813, %815 : vector<8x32xf32>
    %cst_406 = arith.constant 0.000000e+00 : f32
    %817 = vector.broadcast %cst_406 : f32 to vector<8x32xf32>
    %818 = arith.maximumf %816, %817 : vector<8x32xf32>
    %c1_407 = arith.constant 1 : index
    %c0_408 = arith.constant 0 : index
    %c0_409 = arith.constant 0 : index
    %819 = vector.load %arg45[%c1_407, %c0_408, %c0_409] : memref<2x32x4xf32, #tpu.memory_space<vmem>>, vector<1x32x4xf32>
    %820 = vector.shape_cast %819 : vector<1x32x4xf32> to vector<32x4xf32>
    %cst_410 = arith.constant dense<0.000000e+00> : vector<8x4xf32>
    %821 = tpu.matmul %818, %820, %cst_410 {dimension_numbers = #tpu.dot_dimension_numbers<[1], [0], [0], [1], [0, 0, 1, 1], [], []>} : vector<8x32xf32>, vector<32x4xf32>, vector<8x4xf32> -> vector<8x4xf32>
    %c1_411 = arith.constant 1 : index
    %c0_412 = arith.constant 0 : index
    %822 = vector.load %arg46[%c1_411, %c0_412] : memref<2x4xf32, #tpu.memory_space<vmem>>, vector<1x4xf32>
    %823 = vector.broadcast %822 : vector<1x4xf32> to vector<8x4xf32>
    %824 = arith.addf %821, %823 : vector<8x4xf32>
    %cst_413 = arith.constant 0.000000e+00 : f32
    %cst_414 = arith.constant 1.000000e+00 : f32
    %825 = vector.broadcast %cst_413 : f32 to vector<8x4xf32>
    %826 = arith.maximumf %825, %527 : vector<8x4xf32>
    %827 = vector.broadcast %cst_414 : f32 to vector<8x4xf32>
    %828 = arith.minimumf %827, %826 : vector<8x4xf32>
    %cst_415 = arith.constant 9.99999974E-6 : f32
    %829 = vector.broadcast %cst_415 : f32 to vector<8x4xf32>
    %830 = arith.maximumf %828, %829 : vector<8x4xf32>
    %cst_416 = arith.constant 1.000000e+00 : f32
    %831 = vector.broadcast %cst_416 : f32 to vector<8x4xf32>
    %832 = arith.subf %831, %828 : vector<8x4xf32>
    %cst_417 = arith.constant 9.99999974E-6 : f32
    %833 = vector.broadcast %cst_417 : f32 to vector<8x4xf32>
    %834 = arith.maximumf %832, %833 : vector<8x4xf32>
    %835 = arith.divf %830, %834 : vector<8x4xf32>
    %836 = math.log %835 : vector<8x4xf32>
    %837 = arith.addf %824, %836 : vector<8x4xf32>
    %cst_418 = arith.constant 0.000000e+00 : f32
    %838 = vector.broadcast %cst_418 : f32 to vector<8x4xf32>
    %839 = arith.subf %838, %837 : vector<8x4xf32>
    %840 = math.exp %839 : vector<8x4xf32>
    %cst_419 = arith.constant 1.000000e+00 : f32
    %841 = vector.broadcast %cst_419 : f32 to vector<8x4xf32>
    %842 = arith.addf %841, %840 : vector<8x4xf32>
    %cst_420 = arith.constant 1.000000e+00 : f32
    %843 = vector.broadcast %cst_420 : f32 to vector<8x4xf32>
    %844 = arith.divf %843, %842 : vector<8x4xf32>
    %c1_421 = arith.constant 1 : index
    %c0_422 = arith.constant 0 : index
    %c0_423 = arith.constant 0 : index
    %845 = vector.load %arg53[%c1_421, %c0_422, %c0_423] : memref<2x32x1xf32, #tpu.memory_space<vmem>>, vector<1x32x1xf32>
    %846 = vector.shape_cast %845 : vector<1x32x1xf32> to vector<32x1xf32>
    %cst_424 = arith.constant dense<0.000000e+00> : vector<8x1xf32>
    %847 = tpu.matmul %802, %846, %cst_424 {dimension_numbers = #tpu.dot_dimension_numbers<[1], [0], [0], [1], [0, 0, 1, 1], [], []>} : vector<8x32xf32>, vector<32x1xf32>, vector<8x1xf32> -> vector<8x1xf32>
    %c1_425 = arith.constant 1 : index
    %c0_426 = arith.constant 0 : index
    %848 = vector.load %arg54[%c1_425, %c0_426] : memref<2x1xf32, #tpu.memory_space<vmem>>, vector<1x1xf32>
    %849 = vector.broadcast %848 : vector<1x1xf32> to vector<8x1xf32>
    %850 = arith.addf %847, %849 : vector<8x1xf32>
    %c1_427 = arith.constant 1 : index
    %c0_428 = arith.constant 0 : index
    %c0_429 = arith.constant 0 : index
    %851 = vector.load %arg47[%c1_427, %c0_428, %c0_429] : memref<2x32x32xf32, #tpu.memory_space<vmem>>, vector<1x32x32xf32>
    %852 = vector.shape_cast %851 : vector<1x32x32xf32> to vector<32x32xf32>
    %cst_430 = arith.constant dense<0.000000e+00> : vector<8x32xf32>
    %853 = tpu.matmul %802, %852, %cst_430 {dimension_numbers = #tpu.dot_dimension_numbers<[1], [0], [0], [1], [0, 0, 1, 1], [], []>} : vector<8x32xf32>, vector<32x32xf32>, vector<8x32xf32> -> vector<8x32xf32>
    %c1_431 = arith.constant 1 : index
    %c0_432 = arith.constant 0 : index
    %854 = vector.load %arg48[%c1_431, %c0_432] : memref<2x32xf32, #tpu.memory_space<vmem>>, vector<1x32xf32>
    %855 = vector.broadcast %854 : vector<1x32xf32> to vector<8x32xf32>
    %856 = arith.addf %853, %855 : vector<8x32xf32>
    %cst_433 = arith.constant 0.000000e+00 : f32
    %857 = vector.broadcast %cst_433 : f32 to vector<8x32xf32>
    %858 = arith.maximumf %856, %857 : vector<8x32xf32>
    %c1_434 = arith.constant 1 : index
    %c0_435 = arith.constant 0 : index
    %c0_436 = arith.constant 0 : index
    %859 = vector.load %arg49[%c1_434, %c0_435, %c0_436] : memref<2x32x32xf32, #tpu.memory_space<vmem>>, vector<1x32x32xf32>
    %860 = vector.shape_cast %859 : vector<1x32x32xf32> to vector<32x32xf32>
    %cst_437 = arith.constant dense<0.000000e+00> : vector<8x32xf32>
    %861 = tpu.matmul %858, %860, %cst_437 {dimension_numbers = #tpu.dot_dimension_numbers<[1], [0], [0], [1], [0, 0, 1, 1], [], []>} : vector<8x32xf32>, vector<32x32xf32>, vector<8x32xf32> -> vector<8x32xf32>
    %c1_438 = arith.constant 1 : index
    %c0_439 = arith.constant 0 : index
    %862 = vector.load %arg50[%c1_438, %c0_439] : memref<2x32xf32, #tpu.memory_space<vmem>>, vector<1x32xf32>
    %863 = vector.broadcast %862 : vector<1x32xf32> to vector<8x32xf32>
    %864 = arith.addf %861, %863 : vector<8x32xf32>
    %cst_440 = arith.constant 0.000000e+00 : f32
    %865 = vector.broadcast %cst_440 : f32 to vector<8x32xf32>
    %866 = arith.maximumf %864, %865 : vector<8x32xf32>
    %c1_441 = arith.constant 1 : index
    %c0_442 = arith.constant 0 : index
    %c0_443 = arith.constant 0 : index
    %867 = vector.load %arg51[%c1_441, %c0_442, %c0_443] : memref<2x32x4xf32, #tpu.memory_space<vmem>>, vector<1x32x4xf32>
    %868 = vector.shape_cast %867 : vector<1x32x4xf32> to vector<32x4xf32>
    %cst_444 = arith.constant dense<0.000000e+00> : vector<8x4xf32>
    %869 = tpu.matmul %866, %868, %cst_444 {dimension_numbers = #tpu.dot_dimension_numbers<[1], [0], [0], [1], [0, 0, 1, 1], [], []>} : vector<8x32xf32>, vector<32x4xf32>, vector<8x4xf32> -> vector<8x4xf32>
    %c1_445 = arith.constant 1 : index
    %c0_446 = arith.constant 0 : index
    %870 = vector.load %arg52[%c1_445, %c0_446] : memref<2x4xf32, #tpu.memory_space<vmem>>, vector<1x4xf32>
    %871 = vector.broadcast %870 : vector<1x4xf32> to vector<8x4xf32>
    %872 = arith.addf %869, %871 : vector<8x4xf32>
    %cst_447 = arith.constant 2.000000e+01 : f32
    %873 = vector.broadcast %cst_447 : f32 to vector<8x4xf32>
    %874 = arith.cmpf ogt, %872, %873 : vector<8x4xf32>
    %cst_448 = arith.constant 2.000000e+01 : f32
    %875 = vector.broadcast %cst_448 : f32 to vector<8x4xf32>
    %876 = arith.minimumf %872, %875 : vector<8x4xf32>
    %877 = math.exp %876 : vector<8x4xf32>
    %878 = math.log1p %877 : vector<8x4xf32>
    %879 = arith.select %874, %872, %878 : vector<8x4xi1>, vector<8x4xf32>
    %cst_449 = arith.constant 5.000000e-01 : f32
    %880 = vector.broadcast %cst_449 : f32 to vector<8x4xf32>
    %881 = arith.subf %844, %880 : vector<8x4xf32>
    %882 = vector.extract_strided_slice %881 {offsets = [0, 0], sizes = [8, 2], strides = [1, 1]} : vector<8x4xf32> to vector<8x2xf32>
    %cst_450 = arith.constant 4.000000e+01 : f32
    %883 = vector.broadcast %cst_450 : f32 to vector<8x2xf32>
    %884 = arith.mulf %882, %883 : vector<8x2xf32>
    %885 = vector.extract_strided_slice %881 {offsets = [0, 2], sizes = [8, 2], strides = [1, 1]} : vector<8x4xf32> to vector<8x2xf32>
    %cst_451 = arith.constant 2.000000e+01 : f32
    %886 = vector.broadcast %cst_451 : f32 to vector<8x2xf32>
    %887 = arith.mulf %885, %886 : vector<8x2xf32>
    %888 = tpu.concatenate %884, %887 in 1 : vector<8x2xf32>, vector<8x2xf32> -> vector<8x4xf32>
    %c1_452 = arith.constant 1 : index
    %c0_453 = arith.constant 0 : index
    %c0_454 = arith.constant 0 : index
    %c0_455 = arith.constant 0 : index
    %889 = vector.load %arg55[%c1_452, %c0_453, %c0_454, %c0_455] : memref<2x1x8x4xf32, #tpu.memory_space<vmem>>, vector<1x1x8x4xf32>
    %890 = vector.shape_cast %889 : vector<1x1x8x4xf32> to vector<8x4xf32>
    %891 = vector.shape_cast %888 : vector<8x4xf32> to vector<1x1x8x4xf32>
    tpu.vector_store %arg55[%c1_452, %c0_453, %c0_454, %c0_455], %891 {strides = array<i32>} : memref<2x1x8x4xf32, #tpu.memory_space<vmem>>, vector<1x1x8x4xf32>,
    %c1_456 = arith.constant 1 : index
    %c0_457 = arith.constant 0 : index
    %c0_458 = arith.constant 0 : index
    %c0_459 = arith.constant 0 : index
    %892 = vector.load %arg56[%c1_456, %c0_457, %c0_458, %c0_459] : memref<2x1x8x1xf32, #tpu.memory_space<vmem>>, vector<1x1x8x1xf32>
    %893 = vector.shape_cast %892 : vector<1x1x8x1xf32> to vector<8x1xf32>
    %894 = vector.shape_cast %850 : vector<8x1xf32> to vector<1x1x8x1xf32>
    tpu.vector_store %arg56[%c1_456, %c0_457, %c0_458, %c0_459], %894 {strides = array<i32>} : memref<2x1x8x1xf32, #tpu.memory_space<vmem>>, vector<1x1x8x1xf32>,
    %c1_460 = arith.constant 1 : index
    %c0_461 = arith.constant 0 : index
    %c0_462 = arith.constant 0 : index
    %c0_463 = arith.constant 0 : index
    %895 = vector.load %arg57[%c1_460, %c0_461, %c0_462, %c0_463] : memref<2x1x8x4xf32, #tpu.memory_space<vmem>>, vector<1x1x8x4xf32>
    %896 = vector.shape_cast %895 : vector<1x1x8x4xf32> to vector<8x4xf32>
    %897 = vector.shape_cast %879 : vector<8x4xf32> to vector<1x1x8x4xf32>
    tpu.vector_store %arg57[%c1_460, %c0_461, %c0_462, %c0_463], %897 {strides = array<i32>} : memref<2x1x8x4xf32, #tpu.memory_space<vmem>>, vector<1x1x8x4xf32>,
    return
  }
  func.func @transform_0(%arg0: i32) -> (i32, i32, i32) {
    %c0_i32 = arith.constant 0 : i32
    %c0_i32_0 = arith.constant 0 : i32
    %c0_i32_1 = arith.constant 0 : i32
    return %arg0, %c0_i32, %c0_i32_0 : i32, i32, i32
  }
  func.func @transform_1(%arg0: i32) -> (i32, i32, i32) {
    %c0_i32 = arith.constant 0 : i32
    %c0_i32_0 = arith.constant 0 : i32
    %c0_i32_1 = arith.constant 0 : i32
    return %arg0, %c0_i32, %c0_i32_0 : i32, i32, i32
  }
  func.func @transform_2(%arg0: i32) -> (i32, i32, i32) {
    %c0_i32 = arith.constant 0 : i32
    %c0_i32_0 = arith.constant 0 : i32
    %c0_i32_1 = arith.constant 0 : i32
    return %arg0, %c0_i32, %c0_i32_0 : i32, i32, i32
  }
  func.func @transform_3(%arg0: i32) -> (i32, i32) {
    %c0_i32 = arith.constant 0 : i32
    %c0_i32_0 = arith.constant 0 : i32
    %c0_i32_1 = arith.constant 0 : i32
    return %c0_i32, %c0_i32_0 : i32, i32
  }
  func.func @transform_4(%arg0: i32) -> (i32, i32) {
    %c0_i32 = arith.constant 0 : i32
    %c0_i32_0 = arith.constant 0 : i32
    %c0_i32_1 = arith.constant 0 : i32
    return %c0_i32, %c0_i32_0 : i32, i32
  }
  func.func @transform_5(%arg0: i32) -> (i32, i32) {
    %c0_i32 = arith.constant 0 : i32
    %c0_i32_0 = arith.constant 0 : i32
    %c0_i32_1 = arith.constant 0 : i32
    return %c0_i32, %c0_i32_0 : i32, i32
  }
  func.func @transform_6(%arg0: i32) -> (i32, i32) {
    %c0_i32 = arith.constant 0 : i32
    %c0_i32_0 = arith.constant 0 : i32
    %c0_i32_1 = arith.constant 0 : i32
    return %c0_i32, %c0_i32_0 : i32, i32
  }
  func.func @transform_7(%arg0: i32) -> (i32, i32) {
    %c0_i32 = arith.constant 0 : i32
    %c0_i32_0 = arith.constant 0 : i32
    %c0_i32_1 = arith.constant 0 : i32
    return %c0_i32, %c0_i32_0 : i32, i32
  }
  func.func @transform_8(%arg0: i32) -> (i32, i32) {
    %c0_i32 = arith.constant 0 : i32
    %c0_i32_0 = arith.constant 0 : i32
    %c0_i32_1 = arith.constant 0 : i32
    return %c0_i32, %c0_i32_0 : i32, i32
  }
  func.func @transform_9(%arg0: i32) -> (i32, i32) {
    %c0_i32 = arith.constant 0 : i32
    %c0_i32_0 = arith.constant 0 : i32
    %c0_i32_1 = arith.constant 0 : i32
    return %c0_i32, %c0_i32_0 : i32, i32
  }
  func.func @transform_10(%arg0: i32) -> (i32, i32, i32) {
    %c0_i32 = arith.constant 0 : i32
    %c0_i32_0 = arith.constant 0 : i32
    %c0_i32_1 = arith.constant 0 : i32
    %c0_i32_2 = arith.constant 0 : i32
    return %c0_i32, %c0_i32_0, %c0_i32_1 : i32, i32, i32
  }
  func.func @transform_11(%arg0: i32) -> (i32, i32) {
    %c0_i32 = arith.constant 0 : i32
    %c0_i32_0 = arith.constant 0 : i32
    %c0_i32_1 = arith.constant 0 : i32
    return %c0_i32, %c0_i32_0 : i32, i32
  }
  func.func @transform_12(%arg0: i32) -> (i32, i32, i32) {
    %c0_i32 = arith.constant 0 : i32
    %c0_i32_0 = arith.constant 0 : i32
    %c0_i32_1 = arith.constant 0 : i32
    %c0_i32_2 = arith.constant 0 : i32
    return %c0_i32, %c0_i32_0, %c0_i32_1 : i32, i32, i32
  }
  func.func @transform_13(%arg0: i32) -> (i32, i32) {
    %c0_i32 = arith.constant 0 : i32
    %c0_i32_0 = arith.constant 0 : i32
    %c0_i32_1 = arith.constant 0 : i32
    return %c0_i32, %c0_i32_0 : i32, i32
  }
  func.func @transform_14(%arg0: i32) -> (i32, i32, i32) {
    %c0_i32 = arith.constant 0 : i32
    %c0_i32_0 = arith.constant 0 : i32
    %c0_i32_1 = arith.constant 0 : i32
    %c0_i32_2 = arith.constant 0 : i32
    return %c0_i32, %c0_i32_0, %c0_i32_1 : i32, i32, i32
  }
  func.func @transform_15(%arg0: i32) -> (i32, i32) {
    %c0_i32 = arith.constant 0 : i32
    %c0_i32_0 = arith.constant 0 : i32
    %c0_i32_1 = arith.constant 0 : i32
    return %c0_i32, %c0_i32_0 : i32, i32
  }
  func.func @transform_16(%arg0: i32) -> (i32, i32, i32) {
    %c0_i32 = arith.constant 0 : i32
    %c0_i32_0 = arith.constant 0 : i32
    %c0_i32_1 = arith.constant 0 : i32
    %c0_i32_2 = arith.constant 0 : i32
    return %c0_i32, %c0_i32_0, %c0_i32_1 : i32, i32, i32
  }
  func.func @transform_17(%arg0: i32) -> (i32, i32) {
    %c0_i32 = arith.constant 0 : i32
    %c0_i32_0 = arith.constant 0 : i32
    %c0_i32_1 = arith.constant 0 : i32
    return %c0_i32, %c0_i32_0 : i32, i32
  }
  func.func @transform_18(%arg0: i32) -> (i32, i32) {
    %c0_i32 = arith.constant 0 : i32
    %c0_i32_0 = arith.constant 0 : i32
    %c0_i32_1 = arith.constant 0 : i32
    return %c0_i32, %c0_i32_0 : i32, i32
  }
  func.func @transform_19(%arg0: i32) -> (i32, i32) {
    %c0_i32 = arith.constant 0 : i32
    %c0_i32_0 = arith.constant 0 : i32
    %c0_i32_1 = arith.constant 0 : i32
    return %c0_i32, %c0_i32_0 : i32, i32
  }
  func.func @transform_20(%arg0: i32) -> (i32, i32) {
    %c0_i32 = arith.constant 0 : i32
    %c0_i32_0 = arith.constant 0 : i32
    %c0_i32_1 = arith.constant 0 : i32
    return %c0_i32, %c0_i32_0 : i32, i32
  }
  func.func @transform_21(%arg0: i32) -> (i32, i32) {
    %c0_i32 = arith.constant 0 : i32
    %c0_i32_0 = arith.constant 0 : i32
    %c0_i32_1 = arith.constant 0 : i32
    return %c0_i32, %c0_i32_0 : i32, i32
  }
  func.func @transform_22(%arg0: i32) -> (i32, i32, i32) {
    %c0_i32 = arith.constant 0 : i32
    %c0_i32_0 = arith.constant 0 : i32
    %c0_i32_1 = arith.constant 0 : i32
    %c0_i32_2 = arith.constant 0 : i32
    return %c0_i32, %c0_i32_0, %c0_i32_1 : i32, i32, i32
  }
  func.func @transform_23(%arg0: i32) -> (i32, i32) {
    %c0_i32 = arith.constant 0 : i32
    %c0_i32_0 = arith.constant 0 : i32
    %c0_i32_1 = arith.constant 0 : i32
    return %c0_i32, %c0_i32_0 : i32, i32
  }
  func.func @transform_24(%arg0: i32) -> (i32, i32, i32) {
    %c0_i32 = arith.constant 0 : i32
    %c0_i32_0 = arith.constant 0 : i32
    %c0_i32_1 = arith.constant 0 : i32
    %c0_i32_2 = arith.constant 0 : i32
    return %c0_i32, %c0_i32_0, %c0_i32_1 : i32, i32, i32
  }
  func.func @transform_25(%arg0: i32) -> (i32, i32) {
    %c0_i32 = arith.constant 0 : i32
    %c0_i32_0 = arith.constant 0 : i32
    %c0_i32_1 = arith.constant 0 : i32
    return %c0_i32, %c0_i32_0 : i32, i32
  }
  func.func @transform_26(%arg0: i32) -> (i32, i32, i32) {
    %c0_i32 = arith.constant 0 : i32
    %c0_i32_0 = arith.constant 0 : i32
    %c0_i32_1 = arith.constant 0 : i32
    %c0_i32_2 = arith.constant 0 : i32
    return %c0_i32, %c0_i32_0, %c0_i32_1 : i32, i32, i32
  }
  func.func @transform_27(%arg0: i32) -> (i32, i32) {
    %c0_i32 = arith.constant 0 : i32
    %c0_i32_0 = arith.constant 0 : i32
    %c0_i32_1 = arith.constant 0 : i32
    return %c0_i32, %c0_i32_0 : i32, i32
  }
  func.func @transform_28(%arg0: i32) -> (i32, i32, i32) {
    %c0_i32 = arith.constant 0 : i32
    %c0_i32_0 = arith.constant 0 : i32
    %c0_i32_1 = arith.constant 0 : i32
    %c0_i32_2 = arith.constant 0 : i32
    return %c0_i32, %c0_i32_0, %c0_i32_1 : i32, i32, i32
  }
  func.func @transform_29(%arg0: i32) -> (i32, i32) {
    %c0_i32 = arith.constant 0 : i32
    %c0_i32_0 = arith.constant 0 : i32
    %c0_i32_1 = arith.constant 0 : i32
    return %c0_i32, %c0_i32_0 : i32, i32
  }
  func.func @transform_30(%arg0: i32) -> (i32, i32, i32) {
    %c0_i32 = arith.constant 0 : i32
    %c0_i32_0 = arith.constant 0 : i32
    %c0_i32_1 = arith.constant 0 : i32
    %c0_i32_2 = arith.constant 0 : i32
    return %c0_i32, %c0_i32_0, %c0_i32_1 : i32, i32, i32
  }
  func.func @transform_31(%arg0: i32) -> (i32, i32) {
    %c0_i32 = arith.constant 0 : i32
    %c0_i32_0 = arith.constant 0 : i32
    %c0_i32_1 = arith.constant 0 : i32
    return %c0_i32, %c0_i32_0 : i32, i32
  }
  func.func @transform_32(%arg0: i32) -> (i32, i32, i32) {
    %c0_i32 = arith.constant 0 : i32
    %c0_i32_0 = arith.constant 0 : i32
    %c0_i32_1 = arith.constant 0 : i32
    %c0_i32_2 = arith.constant 0 : i32
    return %c0_i32, %c0_i32_0, %c0_i32_1 : i32, i32, i32
  }
  func.func @transform_33(%arg0: i32) -> (i32, i32) {
    %c0_i32 = arith.constant 0 : i32
    %c0_i32_0 = arith.constant 0 : i32
    %c0_i32_1 = arith.constant 0 : i32
    return %c0_i32, %c0_i32_0 : i32, i32
  }
  func.func @transform_34(%arg0: i32) -> (i32, i32) {
    %c0_i32 = arith.constant 0 : i32
    %c0_i32_0 = arith.constant 0 : i32
    %c0_i32_1 = arith.constant 0 : i32
    return %c0_i32, %c0_i32_0 : i32, i32
  }
  func.func @transform_35(%arg0: i32) -> (i32, i32) {
    %c0_i32 = arith.constant 0 : i32
    %c0_i32_0 = arith.constant 0 : i32
    %c0_i32_1 = arith.constant 0 : i32
    return %c0_i32, %c0_i32_0 : i32, i32
  }
  func.func @transform_36(%arg0: i32) -> (i32, i32) {
    %c0_i32 = arith.constant 0 : i32
    %c0_i32_0 = arith.constant 0 : i32
    %c0_i32_1 = arith.constant 0 : i32
    return %c0_i32, %c0_i32_0 : i32, i32
  }
  func.func @transform_37(%arg0: i32) -> (i32, i32) {
    %c0_i32 = arith.constant 0 : i32
    %c0_i32_0 = arith.constant 0 : i32
    %c0_i32_1 = arith.constant 0 : i32
    return %c0_i32, %c0_i32_0 : i32, i32
  }
  func.func @transform_38(%arg0: i32) -> (i32, i32) {
    %c0_i32 = arith.constant 0 : i32
    %c0_i32_0 = arith.constant 0 : i32
    %c0_i32_1 = arith.constant 0 : i32
    return %c0_i32, %c0_i32_0 : i32, i32
  }
  func.func @transform_39(%arg0: i32) -> (i32, i32) {
    %c0_i32 = arith.constant 0 : i32
    %c0_i32_0 = arith.constant 0 : i32
    %c0_i32_1 = arith.constant 0 : i32
    return %c0_i32, %c0_i32_0 : i32, i32
  }
  func.func @transform_40(%arg0: i32) -> (i32, i32, i32) {
    %c0_i32 = arith.constant 0 : i32
    %c0_i32_0 = arith.constant 0 : i32
    %c0_i32_1 = arith.constant 0 : i32
    %c0_i32_2 = arith.constant 0 : i32
    return %c0_i32, %c0_i32_0, %c0_i32_1 : i32, i32, i32
  }
  func.func @transform_41(%arg0: i32) -> (i32, i32) {
    %c0_i32 = arith.constant 0 : i32
    %c0_i32_0 = arith.constant 0 : i32
    %c0_i32_1 = arith.constant 0 : i32
    return %c0_i32, %c0_i32_0 : i32, i32
  }
  func.func @transform_42(%arg0: i32) -> (i32, i32, i32) {
    %c0_i32 = arith.constant 0 : i32
    %c0_i32_0 = arith.constant 0 : i32
    %c0_i32_1 = arith.constant 0 : i32
    %c0_i32_2 = arith.constant 0 : i32
    return %c0_i32, %c0_i32_0, %c0_i32_1 : i32, i32, i32
  }
  func.func @transform_43(%arg0: i32) -> (i32, i32) {
    %c0_i32 = arith.constant 0 : i32
    %c0_i32_0 = arith.constant 0 : i32
    %c0_i32_1 = arith.constant 0 : i32
    return %c0_i32, %c0_i32_0 : i32, i32
  }
  func.func @transform_44(%arg0: i32) -> (i32, i32, i32) {
    %c0_i32 = arith.constant 0 : i32
    %c0_i32_0 = arith.constant 0 : i32
    %c0_i32_1 = arith.constant 0 : i32
    %c0_i32_2 = arith.constant 0 : i32
    return %c0_i32, %c0_i32_0, %c0_i32_1 : i32, i32, i32
  }
  func.func @transform_45(%arg0: i32) -> (i32, i32) {
    %c0_i32 = arith.constant 0 : i32
    %c0_i32_0 = arith.constant 0 : i32
    %c0_i32_1 = arith.constant 0 : i32
    return %c0_i32, %c0_i32_0 : i32, i32
  }
  func.func @transform_46(%arg0: i32) -> (i32, i32, i32) {
    %c0_i32 = arith.constant 0 : i32
    %c0_i32_0 = arith.constant 0 : i32
    %c0_i32_1 = arith.constant 0 : i32
    %c0_i32_2 = arith.constant 0 : i32
    return %c0_i32, %c0_i32_0, %c0_i32_1 : i32, i32, i32
  }
  func.func @transform_47(%arg0: i32) -> (i32, i32) {
    %c0_i32 = arith.constant 0 : i32
    %c0_i32_0 = arith.constant 0 : i32
    %c0_i32_1 = arith.constant 0 : i32
    return %c0_i32, %c0_i32_0 : i32, i32
  }
  func.func @transform_48(%arg0: i32) -> (i32, i32, i32) {
    %c0_i32 = arith.constant 0 : i32
    %c0_i32_0 = arith.constant 0 : i32
    %c0_i32_1 = arith.constant 0 : i32
    %c0_i32_2 = arith.constant 0 : i32
    return %c0_i32, %c0_i32_0, %c0_i32_1 : i32, i32, i32
  }
  func.func @transform_49(%arg0: i32) -> (i32, i32) {
    %c0_i32 = arith.constant 0 : i32
    %c0_i32_0 = arith.constant 0 : i32
    %c0_i32_1 = arith.constant 0 : i32
    return %c0_i32, %c0_i32_0 : i32, i32
  }
  func.func @transform_50(%arg0: i32) -> (i32, i32, i32) {
    %c0_i32 = arith.constant 0 : i32
    %c0_i32_0 = arith.constant 0 : i32
    %c0_i32_1 = arith.constant 0 : i32
    %c0_i32_2 = arith.constant 0 : i32
    return %c0_i32, %c0_i32_0, %c0_i32_1 : i32, i32, i32
  }
  func.func @transform_51(%arg0: i32) -> (i32, i32) {
    %c0_i32 = arith.constant 0 : i32
    %c0_i32_0 = arith.constant 0 : i32
    %c0_i32_1 = arith.constant 0 : i32
    return %c0_i32, %c0_i32_0 : i32, i32
  }
  func.func @transform_52(%arg0: i32) -> (i32, i32, i32) {
    %c0_i32 = arith.constant 0 : i32
    %c0_i32_0 = arith.constant 0 : i32
    %c0_i32_1 = arith.constant 0 : i32
    %c0_i32_2 = arith.constant 0 : i32
    return %c0_i32, %c0_i32_0, %c0_i32_1 : i32, i32, i32
  }
  func.func @transform_53(%arg0: i32) -> (i32, i32) {
    %c0_i32 = arith.constant 0 : i32
    %c0_i32_0 = arith.constant 0 : i32
    %c0_i32_1 = arith.constant 0 : i32
    return %c0_i32, %c0_i32_0 : i32, i32
  }
  func.func @transform_54(%arg0: i32) -> (i32, i32, i32, i32) {
    %c0_i32 = arith.constant 0 : i32
    %c0_i32_0 = arith.constant 0 : i32
    %c0_i32_1 = arith.constant 0 : i32
    %c0_i32_2 = arith.constant 0 : i32
    return %c0_i32, %arg0, %c0_i32_0, %c0_i32_1 : i32, i32, i32, i32
  }
  func.func @transform_55(%arg0: i32) -> (i32, i32, i32, i32) {
    %c0_i32 = arith.constant 0 : i32
    %c0_i32_0 = arith.constant 0 : i32
    %c0_i32_1 = arith.constant 0 : i32
    %c0_i32_2 = arith.constant 0 : i32
    return %c0_i32, %arg0, %c0_i32_0, %c0_i32_1 : i32, i32, i32, i32
  }
  func.func @transform_56(%arg0: i32) -> (i32, i32, i32, i32) {
    %c0_i32 = arith.constant 0 : i32
    %c0_i32_0 = arith.constant 0 : i32
    %c0_i32_1 = arith.constant 0 : i32
    %c0_i32_2 = arith.constant 0 : i32
    return %c0_i32, %arg0, %c0_i32_0, %c0_i32_1 : i32, i32, i32, i32
  }
}

</mosaic_0001>

<bundles_post_ra>
// kernel: mt3v2_forward.1
= control target key start
LH: loop header
LB: loop body
LE: loop exit
PB: predicated region body
PF: predicated region fallthrough
CT: control target
= control target key end

     0   :  { %s11191_s6 = smov 1   ;;  %s11192_s10 = smov 2   ;;  %s12569_s0 = inlined_call_operand.smem [shape: u32[57], index: -1, kind: input, shape index: {}] }
   0x1   :  { %s11273_s5 = sld [smem:[%s12569_s0]]   ;;  %s11193_s14 = smov 3  }
   0x2   :  { %s11278_s9 = sld [smem:[%s12569_s0 + %s11191_s6]]   ;;  %s11194_s18 = smov 4  }
   0x3   :  { %s11283_s13 = sld [smem:[%s12569_s0 + %s11192_s10]]   ;;  %s11195_s22 = smov 5  }
   0x4   :  { %s11288_s17 = sld [smem:[%s12569_s0 + %s11193_s14]]   ;;  %s11196_s26 = smov 6  }
   0x5   :  { %s11293_s21 = sld [smem:[%s12569_s0 + %s11194_s18]]   ;;  %s11197_s30 = smov 7  }
   0x6   :  { %s11298_s25 = sld [smem:[%s12569_s0 + %s11195_s22]]   ;;  %s11198_s4 = smov 8  }
   0x7   :  { %12660 = sst [smem:[#allocation27_spill]] %s11273_s5  ;;  %s11199_s10 = smov 9  }
   0x8   :  { %12661 = sst [smem:[#allocation28_spill]] %s11278_s9  ;;  %s11200_s15 = smov 10  }
   0x9   :  { %12662 = sst [smem:[#allocation29_spill]] %s11283_s13  ;;  %s11201_s20 = smov 11  }
   0xa   :  { %12663 = sst [smem:[#allocation30_spill]] %s11288_s17  ;;  %s11203_s1 = smov 13  }
   0xb   :  { %12664 = sst [smem:[#allocation31_spill]] %s11293_s21  ;;  %s11204_s7 = smov 14  }
   0xc   :  { %12665 = sst [smem:[#allocation32_spill]] %s11298_s25  ;;  %s11206_s22 = smov 16  }
   0xd   :  { %s11303_s29 = sld [smem:[%s12569_s0 + %s11196_s26]]   ;;  %s11202_s26 = smov 12  }
   0xe   :  { %s11308_s3 = sld [smem:[%s12569_s0 + %s11197_s30]]   ;;  %s11207_s28 = smov 17  }
   0xf   :  { %s11313_s8 = sld [smem:[%s12569_s0 + %s11198_s4]]  }
  0x10   :  { %s11318_s14 = sld [smem:[%s12569_s0 + %s11199_s10]]  }
  0x11   :  { %s11323_s19 = sld [smem:[%s12569_s0 + %s11200_s15]]   ;;  %s11205_s15 = smov 15  }
  0x12   :  { %s11328_s24 = sld [smem:[%s12569_s0 + %s11201_s20]]  }
  0x13   :  { %12666 = sst [smem:[#allocation33_spill]] %s11303_s29 }
  0x14   :  { %12667 = sst [smem:[#allocation34_spill]] %s11308_s3 }
  0x15   :  { %12668 = sst [smem:[#allocation35_spill]] %s11313_s8 }
  0x16   :  { %12669 = sst [smem:[#allocation36_spill]] %s11318_s14 }
  0x17   :  { %12670 = sst [smem:[#allocation37_spill]] %s11323_s19 }
  0x18   :  { %12671 = sst [smem:[#allocation38_spill]] %s11328_s24 }
  0x19   :  { %s11333_s30 = sld [smem:[%s12569_s0 + %s11202_s26]]  }
  0x1a   :  { %s11338_s6 = sld [smem:[%s12569_s0 + %s11203_s1]]  }
  0x1b   :  { %s11343_s12 = sld [smem:[%s12569_s0 + %s11204_s7]]   ;;  %s11208_s7 = smov 18  }
  0x1c   :  { %s11348_s20 = sld [smem:[%s12569_s0 + %s11205_s15]]   ;;  %s11209_s15 = smov 19  }
  0x1d   :  { %s11353_s27 = sld [smem:[%s12569_s0 + %s11206_s22]]   ;;  %s11210_s22 = smov 20  }
  0x1e   :  { %s11358_s4 = sld [smem:[%s12569_s0 + %s11207_s28]]   ;;  %s11211_s28 = smov 21  }
  0x1f   :  { %12672 = sst [smem:[#allocation39_spill]] %s11333_s30 }
  0x20   :  { %12673 = sst [smem:[#allocation40_spill]] %s11338_s6 }
  0x21   :  { %12674 = sst [smem:[#allocation41_spill]] %s11343_s12 }
  0x22   :  { %12675 = sst [smem:[#allocation42_spill]] %s11348_s20 }
  0x23   :  { %12676 = sst [smem:[#allocation43_spill]] %s11353_s27 }
  0x24   :  { %12677 = sst [smem:[#allocation44_spill]] %s11358_s4 }
  0x25   :  { %s11363_s25 = sld [smem:[%s12569_s0 + %s11208_s7]]   ;;  %s11212_s7 = smov 22  }
  0x26   :  { %s11368_s29 = sld [smem:[%s12569_s0 + %s11209_s15]]   ;;  %s11213_s15 = smov 23  }
  0x27   :  { %s11373_s20 = sld [smem:[%s12569_s0 + %s11210_s22]]   ;;  %s11214_s22 = smov 24  }
  0x28   :  { %s11378_s4 = sld [smem:[%s12569_s0 + %s11211_s28]]   ;;  %s11215_s28 = smov 25  }
  0x2b   :  { %12678 = sst [smem:[#allocation45_spill]] %s11363_s25 }
  0x2c   :  { %12679 = sst [smem:[#allocation46_spill]] %s11368_s29 }
  0x2d   :  { %12680 = sst [smem:[#allocation47_spill]] %s11373_s20 }
  0x2e   :  { %12681 = sst [smem:[#allocation48_spill]] %s11378_s4 }
  0x2f   :  { %s11383_s25 = sld [smem:[%s12569_s0 + %s11212_s7]]   ;;  %s11216_s7 = smov 26  }
  0x30   :  { %s11388_s29 = sld [smem:[%s12569_s0 + %s11213_s15]]   ;;  %s11217_s15 = smov 27  }
  0x31   :  { %s11393_s20 = sld [smem:[%s12569_s0 + %s11214_s22]]   ;;  %s11218_s22 = smov 28  }
  0x32   :  { %s11398_s4 = sld [smem:[%s12569_s0 + %s11215_s28]]   ;;  %s11219_s28 = smov 29  }
  0x35   :  { %12682 = sst [smem:[#allocation49_spill]] %s11383_s25 }
  0x36   :  { %12683 = sst [smem:[#allocation50_spill]] %s11388_s29 }
  0x37   :  { %12684 = sst [smem:[#allocation51_spill]] %s11393_s20 }
  0x38   :  { %12685 = sst [smem:[#allocation52_spill]] %s11398_s4 }
  0x39   :  { %s11403_s25 = sld [smem:[%s12569_s0 + %s11216_s7]]   ;;  %s11220_s7 = smov 30  }
  0x3a   :  { %s11408_s29 = sld [smem:[%s12569_s0 + %s11217_s15]]   ;;  %s11221_s15 = smov 31  }
  0x3b   :  { %s11413_s20 = sld [smem:[%s12569_s0 + %s11218_s22]]   ;;  %s11222_s22 = smov 32  }
  0x3c   :  { %s11418_s4 = sld [smem:[%s12569_s0 + %s11219_s28]]   ;;  %s11223_s28 = smov 33  }
  0x3f   :  { %12686 = sst [smem:[#allocation53_spill]] %s11403_s25 }
  0x40   :  { %12687 = sst [smem:[#allocation54_spill]] %s11408_s29 }
  0x41   :  { %12688 = sst [smem:[#allocation55_spill]] %s11413_s20 }
  0x42   :  { %12689 = sst [smem:[#allocation56_spill]] %s11418_s4 }
  0x43   :  { %s11423_s25 = sld [smem:[%s12569_s0 + %s11220_s7]]   ;;  %s11224_s7 = smov 34  }
  0x44   :  { %s11428_s29 = sld [smem:[%s12569_s0 + %s11221_s15]]   ;;  %s11225_s15 = smov 35  }
  0x45   :  { %s11433_s20 = sld [smem:[%s12569_s0 + %s11222_s22]]   ;;  %s11226_s22 = smov 36  }
  0x46   :  { %s11438_s4 = sld [smem:[%s12569_s0 + %s11223_s28]]   ;;  %s11227_s28 = smov 37  }
  0x49   :  { %12690 = sst [smem:[#allocation57_spill]] %s11423_s25 }
  0x4a   :  { %12691 = sst [smem:[#allocation58_spill]] %s11428_s29 }
  0x4b   :  { %12692 = sst [smem:[#allocation59_spill]] %s11433_s20 }
  0x4c   :  { %12693 = sst [smem:[#allocation60_spill]] %s11438_s4 }
  0x4d   :  { %s11443_s25 = sld [smem:[%s12569_s0 + %s11224_s7]]   ;;  %s11228_s7 = smov 38  }
  0x4e   :  { %s11448_s29 = sld [smem:[%s12569_s0 + %s11225_s15]]   ;;  %s11229_s15 = smov 39  }
  0x4f   :  { %s11453_s20 = sld [smem:[%s12569_s0 + %s11226_s22]]   ;;  %s11230_s22 = smov 40  }
  0x50   :  { %s11458_s4 = sld [smem:[%s12569_s0 + %s11227_s28]]   ;;  %s11231_s28 = smov 41  }
  0x53   :  { %12694 = sst [smem:[#allocation61_spill]] %s11443_s25 }
  0x54   :  { %12695 = sst [smem:[#allocation62_spill]] %s11448_s29 }
  0x55   :  { %12696 = sst [smem:[#allocation63_spill]] %s11453_s20 }
  0x56   :  { %12697 = sst [smem:[#allocation64_spill]] %s11458_s4 }
  0x57   :  { %s11463_s25 = sld [smem:[%s12569_s0 + %s11228_s7]]   ;;  %s11232_s7 = smov 42  }
  0x58   :  { %s11468_s29 = sld [smem:[%s12569_s0 + %s11229_s15]]   ;;  %s11233_s15 = smov 43  }
  0x59   :  { %s11473_s20 = sld [smem:[%s12569_s0 + %s11230_s22]]   ;;  %s11234_s22 = smov 44  }
  0x5a   :  { %s11478_s4 = sld [smem:[%s12569_s0 + %s11231_s28]]   ;;  %s11235_s28 = smov 45  }
  0x5b   :  { %s11498_s27 = sld [smem:[%s12569_s0 + %s11235_s28]]   ;;  %s11239_s28 = smov 49  }
  0x5c   :  { %s11518_s6 = sld [smem:[%s12569_s0 + %s11239_s28]]   ;;  %s11243_s28 = smov 53  }
  0x5d   :  { %12698 = sst [smem:[#allocation65_spill]] %s11463_s25 }
  0x5e   :  { %12699 = sst [smem:[#allocation66_spill]] %s11468_s29 }
  0x5f   :  { %12700 = sst [smem:[#allocation67_spill]] %s11473_s20 }
  0x60   :  { %12701 = sst [smem:[#allocation68_spill]] %s11478_s4 }
  0x61   :  { %s11483_s25 = sld [smem:[%s12569_s0 + %s11232_s7]]   ;;  %s11236_s7 = smov 46  }
  0x62   :  { %s11488_s29 = sld [smem:[%s12569_s0 + %s11233_s15]]   ;;  %s11237_s15 = smov 47  }
  0x63   :  { %s11493_s20 = sld [smem:[%s12569_s0 + %s11234_s22]]   ;;  %s11238_s22 = smov 48  }
  0x64   :  { %12705 = sst [smem:[#allocation72_spill]] %s11498_s27 }
  0x65   :  { %s11508_s12 = sld [smem:[%s12569_s0 + %s11237_s15]]   ;;  %s11241_s15 = smov 51  }
  0x66   :  { %12709 = sst [smem:[#allocation76_spill]] %s11518_s6 }
  0x67   :  { %12702 = sst [smem:[#allocation69_spill]] %s11483_s25 }
  0x68   :  { %12703 = sst [smem:[#allocation70_spill]] %s11488_s29 }
  0x69   :  { %12704 = sst [smem:[#allocation71_spill]] %s11493_s20 }
  0x6a   :  { %s11503_s25 = sld [smem:[%s12569_s0 + %s11236_s7]]   ;;  %s11240_s7 = smov 50  }
  0x6b   :  { %12707 = sst [smem:[#allocation74_spill]] %s11508_s12 }
  0x6c   :  { %s11513_s20 = sld [smem:[%s12569_s0 + %s11238_s22]]   ;;  %s11242_s22 = smov 52  }
  0x6d   :  { %s11528_s30 = sld [smem:[%s12569_s0 + %s11241_s15]]   ;;  %s11245_s15 = smov 55  }
  0x6e   :  { %s11538_s13 = sld [smem:[%s12569_s0 + %s11243_s28]]  }
  0x6f   :  { %s11548_s24 = sld [smem:[%s12569_s0 + %s11245_s15]]  }
  0x70   :  { %12706 = sst [smem:[#allocation73_spill]] %s11503_s25 }
  0x71   :  { %s11523_s25 = sld [smem:[%s12569_s0 + %s11240_s7]]   ;;  %s11244_s7 = smov 54  }
  0x72   :  { %12708 = sst [smem:[#allocation75_spill]] %s11513_s20 }
  0x73   :  { %12711 = sst [smem:[#allocation78_spill]] %s11528_s30 }
  0x74   :  { %s11533_s20 = sld [smem:[%s12569_s0 + %s11242_s22]]   ;;  %s11246_s22 = smov 56  }
  0x75   :  { %12714 = sst [smem:[#allocation81_spill]] %s11548_s24 }
  0x77   :  { %12710 = sst [smem:[#allocation77_spill]] %s11523_s25 }
  0x78   :  { %s11543_s25 = sld [smem:[%s12569_s0 + %s11244_s7]]  }
  0x7a   :  { %12712 = sst [smem:[#allocation79_spill]] %s11533_s20 }
  0x7b   :  { %s11553_s20 = sld [smem:[%s12569_s0 + %s11246_s22]]  }
  0x7e   :  { %12713 = sst [smem:[#allocation80_spill]] %s11543_s25 }
  0x81   :  { %12715 = sst [smem:[#allocation82_spill]] %s11553_s20 }
  0x82   :  { %119 = vsyncpa [#allocation3], 0 }
  0x83   :  { %120 = vsyncpa [#allocation5], 0 }
  0x84   :  { %121 = vsyncpa [#allocation8], 0 }
  0x85   :  { %122 = vsyncpa [#allocation11], 0 }
  0x86   :  { %123 = vsyncpa [#allocation14], 0 }
  0x87   :  { %124 = vsyncpa [#allocation17], 0  ;;  %s11555_s28 = smov 0   ;;  %s11557_s1 = smov 0  }
  0x88   :  { %s11559_s2 = smov 0  }
  0x89 LB: > { %s12716_s30 = sld [smem:[#allocation78_spill]]  ;;  %s12718_s27 = sld [smem:[#allocation72_spill]]  ;;  %s11185_s1 = sphi %s11557_s1, %s12818_s1   ;;  %s11181_s28 = sphi %s11555_s28, %s12817_s28   ;;  %s11189_s2 = sphi %s11559_s2, %s12816_s2  }
  0x8a   : > { %s12717_s29 = sld [smem:[#allocation70_spill]]  ;;  %s12719_s21 = sld [smem:[#allocation31_spill]] }
  0x8b   : > { %s12720_s19 = sld [smem:[#allocation37_spill]]  ;;  %s12721_s14 = sld [smem:[#allocation36_spill]] }
  0x8c   : > { %s12722_s8 = sld [smem:[#allocation35_spill]]  ;;  %s12723_s6 = sld [smem:[#allocation76_spill]] }
  0x8d   : > { %s12724_s4 = sld [smem:[#allocation68_spill]]  ;;  %s12725_s12 = sld [smem:[#allocation74_spill]] }
  0x8e   : > { %s12726_s3 = sld [smem:[#allocation34_spill]]  ;;  %12727 = sst [smem:[#allocation83_spill]] %s11185_s1 }
  0x8f   : > { %s11568_s0 = sadd.s32 4294967295, %s11189_s2   ;;  %s11570_s7 = sadd.s32 1, %s11189_s2  }
  0x90   : > { %12728 = sst [smem:[#allocation84_spill]] %s11568_s0  ;;  %s1283_s10 = ssub.s32 %s11189_s2, %s11570_s7 }
  0x91   : > { %12729 = sst [smem:[#allocation85_spill]] %s11570_s7  ;;  %s1286_s11 = sadd.s32 1, %s11185_s1 }
  0x92   : > { %p1284_p0 = scmp.eq.s32.totalorder %s1283_s10, 0  ;;  %p1296_p1 = scmp.ne.s32.totalorder %s11185_s1, %s11181_s28 }
  0x93   : > { %p1297_p2 = scmp.eq.s32.totalorder %s11568_s0, 1  ;;  %p8758_p3 = scmp.ge.s32.totalorder %s11189_s2, 1 }
  0x94   : > { %s11578_s15 = scalar_select %p1284_p0, %s11185_s1, %s1286_s11  }
  0x95   : > { %p11580_p4 = por %p1297_p2, %p1296_p1  ;;  %p1362_p5 = scmp.lt.s32.totalorder %s11189_s2, 3 }
  0x96   : > { %12730 = sst [smem:[#allocation86_spill]] %s11578_s15  ;;  %p12609_p6 = scmp.eq.s32.totalorder %s11568_s0, 0 }
  0x97   : > { %s12731_s16 = scalar_select %p11580_p4, 1, 0 }
  0x98   : > { %p11585_p7 = pnand %p8758_p3, %p1362_p5  ;;  %s11247_s22 = smov [#allocation4]  }
  0x99   : > { %12732 = sst [smem:[#allocation87_spill]] %s12731_s16  ;;  %s1395_s23 = sshll.u32 %s11247_s22, 4  ;;  %s1396_s23 = int_to_ptr.vmem [resolvable:$true] %s1395_s23 }
  0x9a   : > { %s12733_s18 = scalar_select %p11585_p7, 1, 0 }
  0x9b   : > { %p10455_p8 = pneg %p11585_p7  ;;  %s11248_s26 = smov [#allocation7]  }
  0x9c   : > { %s1417_s10 = sshll.u32 %s11248_s26, 4  ;;  %s11249_s2 = smov [#allocation10]   ;;  %s11597_s10 = int_to_ptr.vmem [resolvable:$true] %s1417_s10 }
  0x9d   : > { %p11593_p9 = pnand %p12609_p6, %p10455_p8  ;;  %s1535_s15 = sshll.u32 %s11249_s2, 4  ;;  %s11599_s15 = int_to_ptr.vmem [resolvable:$true] %s1535_s15 }
  0x9e   : > { %s10863_s1 = scalar_lea.hbm %s12726_s3, 16 }
  0x9f   : > { %p10864_p10 = scmp.ne.s32.totalorder %s12726_s3, %s10863_s1  ;;  %p11605_p11 = pneg %p11593_p9 }
  0xa0   : > { %p10870_p0 = scmp.lt.u32.totalorder %s10863_s1, %s12726_s3 }
  0xa1   : > { %p10866_p12 = pnand %p11605_p11, %p10864_p10 }
  0xa3   : > { %p10867_p13 = pneg %p10866_p12 }
  0xa5   : > { %p10872_p1 = pnand %p10870_p0, %p10867_p13 }
  0xa7   : > { %10875 = shalt.err (!%p10872_p1)
}
  0xa8   : > { %s10876_s26 = scalar_lea.vmem %s1396_s23, 16  ;;  %s10883_s2 = scalar_lea.vmem %s1396_s23, 32 }
  0xa9   : > { %p10877_p2 = scmp.ne.s32.totalorder %s1396_s23, %s10876_s26  ;;  %p10884_p8 = scmp.lt.s32.totalorder %s1396_s23, %s1396_s23 }
  0xaa   : > { %p10885_p6 = scmp.lt.s32.totalorder %s10883_s2, %s10876_s26 }
  0xab   : > { %p10879_p3 = pnand %p10877_p2, %p11605_p11 }
  0xac   : > { %p10886_p4 = por %p10885_p6, %p10884_p8 }
  0xad   : > { %p10880_p5 = pneg %p10879_p3 }
  0xaf   : > { %p10887_p7 = pnand %p10886_p4, %p10880_p5 }
  0xb1   : > { %10890 = shalt.err (!%p10887_p7)
}
  0xb2   : > { %10461 = dma.hbm_to_vmem [thread:$0]  (!%p11593_p9), %s12726_s3, 16, %s1396_s23, [#allocation5]  }
  0xb3   : > { %s10891_s1 = scalar_lea.hbm %s12721_s14, 16 }
  0xb4   : > { %p10892_p10 = scmp.ne.s32.totalorder %s12721_s14, %s10891_s1  ;;  %p10898_p0 = scmp.lt.u32.totalorder %s10891_s1, %s12721_s14 }
  0xb6   : > { %p10894_p12 = pnand %p10892_p10, %p11605_p11 }
  0xb8   : > { %p10895_p13 = pneg %p10894_p12 }
  0xba   : > { %p10900_p1 = pnand %p10898_p0, %p10895_p13 }
  0xbc   : > { %10903 = shalt.err (!%p10900_p1)
}
  0xbd   : > { %s10904_s26 = scalar_lea.vmem %s11597_s10, 16  ;;  %s10911_s2 = scalar_lea.vmem %s11597_s10, 32 }
  0xbe   : > { %p10905_p4 = scmp.ne.s32.totalorder %s11597_s10, %s10904_s26  ;;  %p10912_p2 = scmp.lt.s32.totalorder %s11597_s10, %s11597_s10 }
  0xbf   : > { %p10913_p3 = scmp.lt.s32.totalorder %s10911_s2, %s10904_s26 }
  0xc0   : > { %p10907_p6 = pnand %p10905_p4, %p11605_p11 }
  0xc1   : > { %p10914_p5 = por %p10913_p3, %p10912_p2 }
  0xc2   : > { %p10908_p7 = pneg %p10907_p6 }
  0xc4   : > { %p10915_p8 = pnand %p10914_p5, %p10908_p7 }
  0xc6   : > { %10918 = shalt.err (!%p10915_p8)
}
  0xc7   : > { %10467 = dma.hbm_to_vmem [thread:$0]  (!%p11593_p9), %s12721_s14, 16, %s11597_s10, [#allocation8]  }
  0xc8   : > { %s10919_s23 = scalar_lea.hbm %s12717_s29, 32 }
  0xc9   : > { %p10920_p10 = scmp.ne.s32.totalorder %s12717_s29, %s10919_s23  ;;  %p10926_p0 = scmp.lt.u32.totalorder %s10919_s23, %s12717_s29 }
  0xcb   : > { %p10922_p12 = pnand %p10920_p10, %p11605_p11 }
  0xcd   : > { %p10923_p13 = pneg %p10922_p12 }
  0xcf   : > { %p10928_p1 = pnand %p10926_p0, %p10923_p13 }
  0xd1   : > { %10931 = shalt.err (!%p10928_p1)
}
  0xd2   : > { %s10932_s1 = scalar_lea.vmem %s11599_s15, 32  ;;  %p10940_p2 = scmp.lt.s32.totalorder %s11599_s15, %s11599_s15 }
  0xd3   : > { %p10933_p4 = scmp.ne.s32.totalorder %s11599_s15, %s10932_s1  ;;  %p10941_p3 = scmp.lt.s32.totalorder %s10932_s1, %s10932_s1 }
  0xd5   : > { %p10935_p6 = pnand %p10933_p4, %p11605_p11  ;;  %p10942_p5 = por %p10941_p3, %p10940_p2 }
  0xd7   : > { %p10936_p7 = pneg %p10935_p6 }
  0xd9   : > { %p10943_p8 = pnand %p10942_p5, %p10936_p7 }
  0xdb   : > { %10946 = shalt.err (!%p10943_p8)
}
  0xdc   : > { %10473 = dma.hbm_to_vmem [thread:$0]  (!%p11593_p9), %s12717_s29, 32, %s11599_s15, [#allocation11]  }
  0xdd   : > { %s11250_s10 = smov [#allocation13]   ;;  %s11251_s2 = smov [#allocation2]  }
  0xde   : > { %s1563_s26 = sshll.u32 %s11250_s10, 4  ;;  %s1378_s23 = sshll.u32 %s11251_s2, 4  ;;  %s1564_s26 = int_to_ptr.vmem [resolvable:$true] %s1563_s26  ;;  %s1379_s23 = int_to_ptr.vmem [resolvable:$true] %s1378_s23 }
  0xdf   : > { %s10947_s3 = scalar_lea.hbm %s12725_s12, 32 }
  0xe0   : > { %p10948_p10 = scmp.ne.s32.totalorder %s12725_s12, %s10947_s3  ;;  %p10954_p0 = scmp.lt.u32.totalorder %s10947_s3, %s12725_s12 }
  0xe2   : > { %p10950_p12 = pnand %p10948_p10, %p11605_p11 }
  0xe4   : > { %p10951_p13 = pneg %p10950_p12 }
  0xe6   : > { %p10956_p1 = pnand %p10954_p0, %p10951_p13 }
  0xe8   : > { %10959 = shalt.err (!%p10956_p1)
}
  0xe9   : > { %s10960_s1 = scalar_lea.vmem %s1564_s26, 32  ;;  %p10968_p2 = scmp.lt.s32.totalorder %s1564_s26, %s1564_s26 }
  0xea   : > { %p10961_p4 = scmp.ne.s32.totalorder %s1564_s26, %s10960_s1  ;;  %p10969_p3 = scmp.lt.s32.totalorder %s10960_s1, %s10960_s1 }
  0xec   : > { %p10963_p6 = pnand %p10961_p4, %p11605_p11  ;;  %p10970_p5 = por %p10969_p3, %p10968_p2 }
  0xee   : > { %p10964_p7 = pneg %p10963_p6 }
  0xf0   : > { %p10971_p8 = pnand %p10970_p5, %p10964_p7 }
  0xf2   : > { %10974 = shalt.err (!%p10971_p8)
}
  0xf3   : > { %10479 = dma.hbm_to_vmem [thread:$0]  (!%p11593_p9), %s12725_s12, 32, %s1564_s26, [#allocation14]  }
  0xf4   : > { %s10975_s3 = scalar_lea.hbm %s12719_s21, 16 }
  0xf5   : > { %p10976_p10 = scmp.ne.s32.totalorder %s12719_s21, %s10975_s3  ;;  %p10982_p0 = scmp.lt.u32.totalorder %s10975_s3, %s12719_s21 }
  0xf7   : > { %p10978_p12 = pnand %p10976_p10, %p11605_p11 }
  0xf9   : > { %p10979_p13 = pneg %p10978_p12 }
  0xfb   : > { %p10984_p1 = pnand %p10982_p0, %p10979_p13 }
  0xfd   : > { %10987 = shalt.err (!%p10984_p1)
}
  0xfe   : > { %s10988_s15 = scalar_lea.vmem %s1379_s23, 16  ;;  %s10995_s10 = scalar_lea.vmem %s1379_s23, 32 }
  0xff   : > { %p10989_p4 = scmp.ne.s32.totalorder %s1379_s23, %s10988_s15  ;;  %p10996_p2 = scmp.lt.s32.totalorder %s1379_s23, %s1379_s23 }
 0x100   : > { %p10997_p3 = scmp.lt.s32.totalorder %s10995_s10, %s10988_s15 }
 0x101   : > { %p10991_p6 = pnand %p10989_p4, %p11605_p11 }
 0x102   : > { %p10998_p5 = por %p10997_p3, %p10996_p2 }
 0x103   : > { %p10992_p7 = pneg %p10991_p6 }
 0x105   : > { %p10999_p8 = pnand %p10998_p5, %p10992_p7 }
 0x107   : > { %11002 = shalt.err (!%p10999_p8)
}
 0x108   : > { %10458 = dma.hbm_to_vmem [thread:$0]  (!%p11593_p9), %s12719_s21, 16, %s1379_s23, [#allocation3]  }
 0x109   : > { %s11252_s26 = smov [#allocation6]   ;;  %s11253_s1 = smov [#allocation9]  }
 0x10a   : > { %s1406_s2 = sshll.u32 %s11252_s26, 4  ;;  %s1521_s3 = sshll.u32 %s11253_s1, 4  ;;  %s1407_s2 = int_to_ptr.vmem [resolvable:$true] %s1406_s2  ;;  %s1522_s3 = int_to_ptr.vmem [resolvable:$true] %s1521_s3 }
 0x10b   : > { %s11003_s12 = scalar_lea.hbm %s12722_s8, 16 }
 0x10c   : > { %p11004_p10 = scmp.ne.s32.totalorder %s12722_s8, %s11003_s12  ;;  %p11010_p0 = scmp.lt.u32.totalorder %s11003_s12, %s12722_s8 }
 0x10e   : > { %p11006_p12 = pnand %p11004_p10, %p11605_p11 }
 0x110   : > { %p11007_p13 = pneg %p11006_p12 }
 0x112   : > { %p11012_p1 = pnand %p11010_p0, %p11007_p13 }
 0x114   : > { %11015 = shalt.err (!%p11012_p1)
}
 0x115   : > { %s11016_s15 = scalar_lea.vmem %s1407_s2, 16  ;;  %s11023_s23 = scalar_lea.vmem %s1407_s2, 32 }
 0x116   : > { %p11017_p4 = scmp.ne.s32.totalorder %s1407_s2, %s11016_s15  ;;  %p11024_p2 = scmp.lt.s32.totalorder %s1407_s2, %s1407_s2 }
 0x117   : > { %p11025_p3 = scmp.lt.s32.totalorder %s11023_s23, %s11016_s15 }
 0x118   : > { %p11019_p6 = pnand %p11017_p4, %p11605_p11 }
 0x119   : > { %p11026_p5 = por %p11025_p3, %p11024_p2 }
 0x11a   : > { %p11020_p7 = pneg %p11019_p6 }
 0x11c   : > { %p11027_p8 = pnand %p11026_p5, %p11020_p7 }
 0x11e   : > { %11030 = shalt.err (!%p11027_p8)
}
 0x11f   : > { %10464 = dma.hbm_to_vmem [thread:$0]  (!%p11593_p9), %s12722_s8, 16, %s1407_s2, [#allocation5]  }
 0x120   : > { %s11031_s12 = scalar_lea.hbm %s12724_s4, 32 }
 0x121   : > { %p11032_p10 = scmp.ne.s32.totalorder %s12724_s4, %s11031_s12  ;;  %p11038_p0 = scmp.lt.u32.totalorder %s11031_s12, %s12724_s4 }
 0x123   : > { %p11034_p12 = pnand %p11032_p10, %p11605_p11 }
 0x125   : > { %p11035_p13 = pneg %p11034_p12 }
 0x127   : > { %p11040_p1 = pnand %p11038_p0, %p11035_p13 }
 0x129   : > { %11043 = shalt.err (!%p11040_p1)
}
 0x12a   : > { %s11044_s10 = scalar_lea.vmem %s1522_s3, 32  ;;  %p11052_p2 = scmp.lt.s32.totalorder %s1522_s3, %s1522_s3 }
 0x12b   : > { %p11045_p4 = scmp.ne.s32.totalorder %s1522_s3, %s11044_s10  ;;  %p11053_p3 = scmp.lt.s32.totalorder %s11044_s10, %s11044_s10 }
 0x12d   : > { %p11047_p6 = pnand %p11045_p4, %p11605_p11  ;;  %p11054_p5 = por %p11053_p3, %p11052_p2 }
 0x12f   : > { %p11048_p7 = pneg %p11047_p6 }
 0x131   : > { %p11055_p8 = pnand %p11054_p5, %p11048_p7 }
 0x133   : > { %11058 = shalt.err (!%p11055_p8)
}
 0x134   : > { %10470 = dma.hbm_to_vmem [thread:$0]  (!%p11593_p9), %s12724_s4, 32, %s1522_s3, [#allocation8]  }
 0x135   : > { %s11254_s26 = smov [#allocation12]   ;;  %s11255_s1 = smov [#allocation15]  }
 0x136   : > { %s1549_s2 = sshll.u32 %s11254_s26, 4  ;;  %s1577_s15 = sshll.u32 %s11255_s1, 4  ;;  %s1550_s2 = int_to_ptr.vmem [resolvable:$true] %s1549_s2  ;;  %s1578_s15 = int_to_ptr.vmem [resolvable:$true] %s1577_s15 }
 0x137   : > { %s11059_s23 = scalar_lea.hbm %s12718_s27, 32 }
 0x138   : > { %p11060_p10 = scmp.ne.s32.totalorder %s12718_s27, %s11059_s23  ;;  %p11066_p0 = scmp.lt.u32.totalorder %s11059_s23, %s12718_s27 }
 0x13a   : > { %p11062_p12 = pnand %p11060_p10, %p11605_p11 }
 0x13c   : > { %p11063_p13 = pneg %p11062_p12 }
 0x13e   : > { %p11068_p1 = pnand %p11066_p0, %p11063_p13 }
 0x140   : > { %11071 = shalt.err (!%p11068_p1)
}
 0x141   : > { %s11072_s12 = scalar_lea.vmem %s1550_s2, 32  ;;  %p11080_p2 = scmp.lt.s32.totalorder %s1550_s2, %s1550_s2 }
 0x142   : > { %p11073_p4 = scmp.ne.s32.totalorder %s1550_s2, %s11072_s12  ;;  %p11081_p3 = scmp.lt.s32.totalorder %s11072_s12, %s11072_s12 }
 0x144   : > { %p11075_p6 = pnand %p11073_p4, %p11605_p11  ;;  %p11082_p5 = por %p11081_p3, %p11080_p2 }
 0x146   : > { %p11076_p7 = pneg %p11075_p6 }
 0x148   : > { %p11083_p8 = pnand %p11082_p5, %p11076_p7 }
 0x14a   : > { %11086 = shalt.err (!%p11083_p8)
}
 0x14b   : > { %10476 = dma.hbm_to_vmem [thread:$0]  (!%p11593_p9), %s12718_s27, 32, %s1550_s2, [#allocation11]  }
 0x14c   : > { %s11087_s3 = scalar_lea.hbm %s12723_s6, 32 }
 0x14d   : > { %p11088_p10 = scmp.ne.s32.totalorder %s12723_s6, %s11087_s3  ;;  %p11094_p0 = scmp.lt.u32.totalorder %s11087_s3, %s12723_s6 }
 0x14f   : > { %p11090_p12 = pnand %p11088_p10, %p11605_p11 }
 0x151   : > { %p11091_p13 = pneg %p11090_p12 }
 0x153   : > { %p11096_p1 = pnand %p11094_p0, %p11091_p13 }
 0x155   : > { %11099 = shalt.err (!%p11096_p1)
}
 0x156   : > { %s11100_s10 = scalar_lea.vmem %s1578_s15, 32  ;;  %p11108_p2 = scmp.lt.s32.totalorder %s1578_s15, %s1578_s15 }
 0x157   : > { %p11101_p4 = scmp.ne.s32.totalorder %s1578_s15, %s11100_s10  ;;  %p11109_p3 = scmp.lt.s32.totalorder %s11100_s10, %s11100_s10 }
 0x159   : > { %p11103_p6 = pnand %p11101_p4, %p11605_p11  ;;  %p11110_p5 = por %p11109_p3, %p11108_p2 }
 0x15b   : > { %p11104_p7 = pneg %p11103_p6 }
 0x15d   : > { %p11111_p8 = pnand %p11110_p5, %p11104_p7 }
 0x15f   : > { %11114 = shalt.err (!%p11111_p8)
}
 0x160   : > { %10482 = dma.hbm_to_vmem [thread:$0]  (!%p11593_p9), %s12723_s6, 32, %s1578_s15, [#allocation14]  }
 0x161   : > { %s11256_s26 = smov [#allocation16]   ;;  %s11115_s1 = scalar_lea.hbm %s12716_s30, 32 }
 0x162   : > { %s1591_s2 = sshll.u32 %s11256_s26, 4  ;;  %p11116_p10 = scmp.ne.s32.totalorder %s12716_s30, %s11115_s1  ;;  %s1592_s2 = int_to_ptr.vmem [resolvable:$true] %s1591_s2 }
 0x163   : > { %p11122_p0 = scmp.lt.u32.totalorder %s11115_s1, %s12716_s30 }
 0x164   : > { %p11118_p12 = pnand %p11116_p10, %p11605_p11 }
 0x166   : > { %p11119_p13 = pneg %p11118_p12 }
 0x168   : > { %p11124_p1 = pnand %p11122_p0, %p11119_p13 }
 0x16a   : > { %11127 = shalt.err (!%p11124_p1)
}
 0x16b   : > { %s11128_s23 = scalar_lea.vmem %s1592_s2, 32  ;;  %p11136_p2 = scmp.lt.s32.totalorder %s1592_s2, %s1592_s2 }
 0x16c   : > { %p11129_p4 = scmp.ne.s32.totalorder %s1592_s2, %s11128_s23  ;;  %p11137_p3 = scmp.lt.s32.totalorder %s11128_s23, %s11128_s23 }
 0x16e   : > { %p11131_p6 = pnand %p11129_p4, %p11605_p11  ;;  %p11138_p5 = por %p11137_p3, %p11136_p2 }
 0x170   : > { %p11132_p7 = pneg %p11131_p6 }
 0x172   : > { %p11139_p8 = pnand %p11138_p5, %p11132_p7 }
 0x174   : > { %11142 = shalt.err (!%p11139_p8)
}
 0x175   : > { %10485 = dma.hbm_to_vmem [thread:$0]  (!%p11593_p9), %s12716_s30, 32, %s1592_s2, [#allocation17]  }
 0x176   : > { %p12736_p10 = scmp.ne.s32.totalorder %s12733_s18, 0 }
 0x177   : > { %p12737_p12 = scmp.eq.s32.totalorder (!%p12736_p10), %s11568_s0, 0 }
 0x178   : > { %1632 = sbr.rel (%p12736_p10) target bundleno = 17625 (0x44d9), region = 236 }
 0x17f   : > { %11156 = dma.done.wait (%p12737_p12), [#allocation3], 16   ;;  %p12738_p13 = pmov %p12737_p12 }
 0x180   : > { %p12739_p11 = pmov %p12737_p12 }
 0x181   : > { %11158 = vsyncadd (%p12738_p13), [#allocation3], 4294967280 }
 0x182   : > { %11160 = dma.done.wait (%p12739_p11), [#allocation5], 32   ;;  %p12740_p0 = pmov %p12739_p11 }
 0x184   : > { %11162 = vsyncadd (%p12740_p0), [#allocation5], 4294967264  ;;  %p12741_p1 = pmov %p12740_p0 }
 0x185   : > { %p12742_p9 = pmov %p12740_p0 }
 0x186   : > { %11164 = dma.done.wait (%p12741_p1), [#allocation8], 48  }
 0x187   : > { %11166 = vsyncadd (%p12742_p9), [#allocation8], 4294967248  ;;  %p12743_p4 = pmov %p12740_p0 }
 0x188   : > { %p12744_p6 = pmov %p12740_p0 }
 0x189   : > { %11168 = dma.done.wait (%p12743_p4), [#allocation11], 64  }
 0x18a   : > { %11170 = vsyncadd (%p12744_p6), [#allocation11], 4294967232  ;;  %p12745_p7 = pmov %p12740_p0 }
 0x18b   : > { %p12746_p2 = pmov %p12740_p0 }
 0x18c   : > { %11172 = dma.done.wait (%p12745_p7), [#allocation14], 64  }
 0x18d   : > { %11174 = vsyncadd (%p12746_p2), [#allocation14], 4294967232  ;;  %p12747_p3 = pmov %p12740_p0 }
 0x18e   : > { %p12748_p5 = pmov %p12740_p0 }
 0x18f   : > { %11176 = dma.done.wait (%p12747_p3), [#allocation17], 32  }
 0x190   : > { %11178 = vsyncadd (%p12748_p5), [#allocation17], 4294967264  ;;  %s12749_s5 = sld [smem:[#allocation27_spill]]  ;;  %s12750_s17 = sld [smem:[#allocation30_spill]]  ;;  %vm1846_vm0 = vcmask 1042432   ;;  %vm1839_vm1 = vcmask 23552  }
 0x191   : > { %p1813_p8 = scmp.lt.s32.totalorder %s11568_s0, 1  ;;  %s12751_s9 = sld [smem:[#allocation28_spill]]  ;;  %v1927_v3 = vld [vmem:[%s12720_s19] sm:$0xff]  ;;  %v1928_v4 = vld [vmem:[%s12720_s19 + $0x8] sm:$0xff]  ;;  %v1929_v7 = vld [vmem:[%s12720_s19 + $0x10] sm:$0xff]  ;;  %vm1941_vm2 = vcmask 261120  }
 0x192   : > { %v10609_v5 = vpack.i.bf16 %v1928_v4, %v1927_v3  ;;  %v10033_v6 = vpack.c.bf16 %v1928_v4, %v1927_v3  ;;  %v1930_v8 = vld [vmem:[%s12720_s19 + $0x18] sm:$0xff]  ;;  %v8788_v10 = vld [vmem:[#allocation2] ss:$0 sm:$0xff]  ;;  %s12752_s12 = sld [smem:[#allocation38_spill]]  ;;  %s12621_s3 = smov 64   ;;  %vm2130_vm3 = vcmask 130048  }
 0x193   : > { %s11746_s18 = scalar_select %p1813_p8, %s11568_s0, 1  ;;  %v10037_v9 = vpack.c.bf16 %v1930_v8, %v1929_v7  ;;  %v10614_v19 = vpack.i.bf16 %v1930_v8, %v1929_v7  ;;  %vm11787_vm4 = vmpackc.low %vm2130_vm3, %vm2130_vm3  ;;  %vm2776_vm5 = vcmask 523264   ;;  %vm11263_vm6 = vmmov 0  }
 0x194   : > { %10034 = vmatprep.subr.bf16.mxu1 %v10033_v6  ;;  %s12619_s10 = smov 96   ;;  %s12755_s26 = sld [smem:[#allocation29_spill]]  ;;  %vm4221_vm7 = vcmask 64512   ;;  %vm6148_vm8 = vcmask 7168   ;;  %vm6144_vm9 = vcmask 15360   ;;  %vm6146_vm10 = vcmask 31744  }
 0x195   : > { %s9049_s11 = sshll.u32 %s11746_s18, 4  ;;  %10036 = vmatpush3.bf16.msra.mxu1 %v10033_v6  ;;  %10615 = vrot.lane.b32.xlu1 %v10614_v19, %s12621_s3  ;;  %s12617_s1 = smov 80  }
 0x196   : > { %s1817_s22 = scalar_lea.vmem %s12749_s5, %s9049_s11  ;;  %v1831_v0 = vld [vmem:[%s12750_s17] sm:$0x7]  ;;  %10038 = vmatprep.subr.bf16.mxu1 %v10037_v9  ;;  %s12615_s23 = smov 112  }
 0x197   : > { %v1826_v1 = vld [vmem:[%s1817_s22] sm:$0xff]  ;;  %v1827_v2 = vld [vmem:[%s1817_s22 + $0x8] sm:$0xff]  ;;  %9371 = vmatprep.subr.msk.mxu0 %vm1846_vm0, %v1831_v0  ;;  %s11756_s15 = scalar_lea.vmem %s12751_s9, %s9049_s11  ;;  %s12757_s11 = sld [smem:[#allocation40_spill]] }
 0x198   : > { %9373 = vmatprep.mubr.msk.f32.mxu0 %vm1839_vm1, %v1826_v1  ;;  %9372 = vmatpush3.msk.msra.mxu0 %vm1846_vm0, %v1831_v0  ;;  %v11761_v14 = vld [vmem:[%s11756_s15] sm:$0xff]  ;;  %v11764_v15 = vld [vmem:[%s11756_s15 + $0x8] sm:$0xff]  ;;  %s12613_s22 = smov 16   ;;  %s12764_s4 = sld [smem:[#allocation44_spill]] }
 0x199   : > { %9374 = vmatmul.mubr.msk.f32.vlgmr.msra.gmra.mrb[0].mxu0 %vm1839_vm1, %v1827_v2  ;;  %10040 = vmatpush3.bf16.msra.mxu1 %v10037_v9  ;;  %v11778_v20 = vld [vmem:[%s12752_s12] ss:$0 sm:$0xff]  ;;  %s12767_s6 = sld [smem:[#allocation48_spill]]  ;;  %s12769_s8 = smov 96  }
 0x19a   : > { %s11800_s2 = scalar_lea.vmem %s12755_s26, %s11746_s18  ;;  %s12756_s18 = sld [smem:[#allocation39_spill]] }
 0x19b   : > { %v11803_v39 = vld [vmem:[%s11800_s2] ss:$0 sm:$0xff]  ;;  %s12758_s26 = sld [smem:[#allocation41_spill]]  ;;  %s12770_s9 = smov 80  }
 0x19c   : > { %s12772_s14 = smov 16   ;;  %s12774_s17 = sld [smem:[#allocation49_spill]] }
 0x19d   : > { %s12784_s21 = sld [smem:[#allocation56_spill]]  ;;  %s12789_s29 = sld [smem:[#allocation58_spill]] }
 0x19e   : > { %s12788_s27 = sld [smem:[#allocation64_spill]]  ;;  %s12790_s30 = sld [smem:[#allocation60_spill]] }
 0x19f   : > { %s12791_s7 = sld [smem:[#allocation65_spill]]  ;;  %s12792_s20 = sld [smem:[#allocation66_spill]] }
 0x1a0   : > { %s12793_s24 = sld [smem:[#allocation67_spill]]  ;;  %s12794_s25 = sld [smem:[#allocation69_spill]] }
 0x1a1   : > { %s12795_s0 = sld [smem:[#allocation71_spill]] }
 0x1a2   : > { %s12796_s16 = sld [smem:[#allocation79_spill]] }
 0x207   : > { %v10616_v27 = vpop.permute.xlu1 %10615 }
 0x208   : > { %v10618_v32 = vunpack.i.h.bf16 %v10616_v27  ;;  %v10617_v33 = vunpack.i.l.bf16 %v10616_v27 }
 0x20a   : > { %v10045_v38 = vpack.c.bf16 %v10618_v32, %v10617_v33 }
 0x26c   : > { %v9375_v11 = vpop.f32.mrb[0].mxu0 }
 0x26d   : > { %v11758_v12 = vadd.f32 %v9375_v11, %v8788_v10  ;;  %v1916_v13 = vpop.f32.mrb[1].mxu0 }
 0x26e   : > { %v11766_v16 = vadd.f32 %v8788_v10, %v1916_v13 }
 0x26f   : > { %v1926_v18 = vadd.f32 %v11758_v12, %v11764_v15 }
 0x270   : > { %9395 = vmatprep.mubr.msk.f32.mxu0 %vm1941_vm2, %v11766_v16  ;;  %v1925_v17 = vadd.f32 %v11766_v16, %v11761_v14 }
 0x272   : > { %9384 = vmatprep.mubr.msk.f32.mxu1 %vm1941_vm2, %v1925_v17 }
 0x273   : > { %9385 = vmatmul.mubr.msk.f32.vlgmr.msra.gmra.mrb[0].mxu1 %vm1941_vm2, %v1926_v18 }
 0x346   : > { %v9386_v21 = vpop.f32.mrb[0].mxu1 }
 0x347   : > { %v2020_v22 = vadd.f32 %v9386_v21, %v11778_v20  ;;  %v2014_v23 = vpop.f32.mrb[1].mxu1 }
 0x348   : > { %v2015_v24 = vadd.f32 %v11778_v20, %v2014_v23 }
 0x34a   : > { %9402 = vmatprep.mubr.msk.f32.mxu1 %vm2130_vm3, %v2015_v24  ;;  %v10604_v25 = vpack.i.bf16 %v2020_v22, %v2015_v24 }
 0x34c   : > { %10605 = vrot.lane.b32.xlu0 %v10604_v25, %s12619_s10 }
 0x350   : > { %10610 = vrot.lane.b32.xlu0 %v10609_v5, %s12621_s3 }
 0x3be   : > { %v10606_v26 = vpop.permute.xlu0 %10605 }
 0x3bf   : > { %v10608_v28 = vunpack.i.h.bf16 %v10606_v26  ;;  %v10607_v29 = vunpack.i.l.bf16 %v10606_v26 }
 0x3c1   : > { %v10049_v31 = vpack.c.bf16 %v10608_v28, %v10607_v29 }
 0x3c2   : > { %v10611_v34 = vpop.permute.xlu0 %10610 }
 0x3c3   : > { %v10613_v35 = vunpack.i.h.bf16 %v10611_v34  ;;  %v10612_v36 = vunpack.i.l.bf16 %v10611_v34  ;;  %10051 = vmatprep.subr.msk.bf16.mxu1 %vm11787_vm4, %v10049_v31 }
 0x3c4   : > { %10054 = vmatpush3.bf16.xpose.msk.msra.mxu1 %vm11787_vm4, %v10049_v31 }
 0x3c5   : > { %v10041_v37 = vpack.c.bf16 %v10613_v35, %v10612_v36 }
 0x3c7   : > { %10042 = vmatprep.subr.bf16.mxu0 %v10041_v37 }
 0x3c8   : > { %10044 = vmatpush3.bf16.msra.mxu0 %v10041_v37 }
 0x3c9   : > { %10046 = vmatprep.subr.bf16.mxu0 %v10045_v38 }
 0x3cb   : > { %9403 = vmatmul.mubr.msk.f32.vlgmr.msra.gmra.mrb[2].mxu1 %vm2130_vm3, %v2020_v22 }
 0x3cc   : > { %10048 = vmatpush3.bf16.msra.mxu0 %v10045_v38 }
 0x3cf   : > { %9396 = vmatmul.mubr.msk.f32.vlgmr.msra.gmra.mrb[2].mxu0 %vm1941_vm2, %v11758_v12 }
 0x49e   : > { %v9404_v40 = vpop.f32.mrb[2].mxu1 }
 0x49f   : > { %v2215_v41 = vmul.f32 0.25, %v9404_v40  ;;  %v2205_v42 = vpop.f32.mrb[3].mxu1 }
 0x4a0   : > { %v2214_v43 = vmul.f32 0.25, %v2205_v42 }
 0x4a1   : > { %v2223_v44 = vadd.f32 %v11803_v39, %v2215_v41 }
 0x4a2   : > { %v9397_v45 = vpop.f32.mrb[2].mxu0  ;;  %v2222_v46 = vadd.f32 %v11803_v39, %v2214_v43 }
 0x4a3   : > { %v2115_v47 = vpop.f32.mrb[3].mxu0  ;;  %v2227_v48 = vsel %vm2130_vm3, %v2223_v44, -inf }
 0x4a4   : > { %2228 = vmax.xlane.f32.xlu0 %v2227_v48  ;;  %v2224_v49 = vsel %vm2130_vm3, %v2222_v46, -inf }
 0x4a5   : > { %2225 = vmax.xlane.f32.xlu1 %v2224_v49  ;;  %v1932_v49 = vld [vmem:[%s12756_s18] sm:$0xff] }
 0x531   : > { %v2229_v50 = vpop.xlane.xlu0 %2228 }
 0x532   : > { %v2231_v51 = vsub.f32 %v2223_v44, %v2229_v50  ;;  %v2226_v52 = vpop.xlane.xlu1 %2225  ;;  %v1933_v50 = vld [vmem:[%s12756_s18 + $0x8] sm:$0xff] }
 0x533   : > { %v2230_v53 = vsub.f32 %v2222_v46, %v2226_v52  ;;  %v1934_v52 = vld [vmem:[%s12756_s18 + $0x10] sm:$0xff] }
 0x534   : > { %v2234_v54 = vmul.f32 1.442695, %v2231_v51  ;;  %v10069_v51 = vpack.c.bf16 %v1933_v50, %v1932_v49 }
 0x535   : > { %v2232_v55 = vmul.f32 1.442695, %v2230_v53  ;;  %v1935_v53 = vld [vmem:[%s12756_s18 + $0x18] sm:$0xff] }
 0x536   : > { %10734 = vpow2.f32 %v2234_v54  ;;  %10070 = vmatprep.subr.bf16.mxu1 %v10069_v51  ;;  %v10073_v54 = vpack.c.bf16 %v1935_v53, %v1934_v52 }
 0x537   : > { %10736 = vpow2.f32 %v2232_v55  ;;  %10072 = vmatpush3.bf16.msra.mxu1 %v10069_v51 }
 0x538   : > { %10074 = vmatprep.subr.bf16.mxu1 %v10073_v54 }
 0x53b   : > { %10076 = vmatpush3.bf16.msra.mxu1 %v10073_v54 }
 0x540   : > { %v10735_v56 = vpop.eup %10734 }
 0x541   : > { %v10737_v57 = vpop.eup %10736  ;;  %v2239_v58 = vsel %vm2130_vm3, %v10735_v56, 0.0 }
 0x542   : > { %2240 = vadd.xlane.f32.xlu1 %v2239_v58  ;;  %v2236_v59 = vsel %vm2130_vm3, %v10737_v57, 0.0 }
 0x543   : > { %2237 = vadd.xlane.f32.xlu0 %v2236_v59 }
 0x553   : > { %10620 = vrot.lane.b32.xlu1 %v10604_v25, %s12617_s1  ;;  %s12761_s1 = sld [smem:[#allocation46_spill]] }
 0x557   : > { %2327 = vrot.lane.b32.xlu1 %v2015_v24, %s12615_s23 }
 0x559   : > { %2040 = vrot.lane.b32.xlu0 %v11778_v20, %s12621_s3  ;;  %s12762_s10 = smov %s12761_s1  ;;  %s12763_s3 = sld [smem:[#allocation42_spill]] }
 0x55d   : > { %2329 = vrot.lane.b32.xlu0 %v2020_v22, %s12615_s23 }
 0x55f   : > { %v8815_v54 = vld [vmem:[%s12763_s3] ss:$0 sm:$0xff] }
 0x5cf   : > { %v2241_v60 = vpop.xlane.xlu1 %2240 }
 0x5d0   : > { %10738 = vrcp.f32 %v2241_v60  ;;  %v2238_v61 = vpop.xlane.xlu0 %2237 }
 0x5d1   : > { %10740 = vrcp.f32 %v2238_v61  ;;  %v8810_v61 = vld [vmem:[%s12757_s11] ss:$0 sm:$0xff] }
 0x5d3   : > { %v10621_v62 = vpop.permute.xlu1 %10620 }
 0x5d4   : > { %v2041_v63 = vpop.permute.xlu0 %2040  ;;  %v10623_v0 = vunpack.i.h.bf16 %v10621_v62  ;;  %v10622_v1 = vunpack.i.l.bf16 %v10621_v62 }
 0x5d5   : > { %v2116_v2 = vadd.f32 %v2115_v47, %v2041_v63  ;;  %v2121_v3 = vadd.f32 %v9397_v45, %v2041_v63 }
 0x5d6   : > { %v10059_v6 = vpack.c.bf16 %v10623_v0, %v10622_v1 }
 0x5d7   : > { %v10055_v4 = vpack.c.bf16 %v2121_v3, %v2116_v2  ;;  %v10624_v5 = vpack.i.bf16 %v2121_v3, %v2116_v2  ;;  %v2328_v11 = vpop.permute.xlu1 %2327 }
 0x5d8   : > { %v2330_v13 = vpop.permute.xlu0 %2329 }
 0x5d9   : > { %10056 = vmatprep.subr.bf16.mxu0 %v10055_v4 }
 0x5da   : > { %v10739_v7 = vpop.eup %10738  ;;  %10058 = vmatpush3.bf16.msra.mxu0 %v10055_v4 }
 0x5db   : > { %v10741_v8 = vpop.eup %10740  ;;  %10061 = vmatprep.subr.msk.bf16.mxu0 %vm11787_vm4, %v10059_v6  ;;  %v2245_v10 = vmul.f32 %v10739_v7, %v10735_v56 }
 0x5dc   : > { %v2243_v9 = vmul.f32 %v10741_v8, %v10737_v57 }
 0x5de   : > { %9409 = vmatprep.mubr.msk.f32.mxu0 %vm2130_vm3, %v2243_v9 }
 0x5df   : > { %9410 = vmatmul.mubr.msk.f32.vlgmr.msra.gmra.mrb[4].mxu0 %vm2130_vm3, %v2245_v10 }
 0x5e0   : > { %9416 = vmatprep.mubr.msk.f32.mxu0 %vm2130_vm3, %v2328_v11 }
 0x5e3   : > { %10064 = vmatpush3.bf16.xpose.msk.msra.mxu0 %vm11787_vm4, %v10059_v6 }
 0x5ea   : > { %9417 = vmatmul.mubr.msk.f32.vlgmr.msra.gmra.mrb[6].mxu0 %vm2130_vm3, %v2330_v13 }
 0x6b2   : > { %v11824_v17 = vpop.f32.mrb[4].mxu0 }
 0x6b3   : > { %v2318_v18 = vpop.f32.mrb[5].mxu0 }
 0x6bd   : > { %v9418_v19 = vpop.f32.mrb[6].mxu0 }
 0x6be   : > { %v2419_v20 = vmul.f32 0.25, %v9418_v19  ;;  %v2409_v21 = vpop.f32.mrb[7].mxu0  ;;  %v2672_v19 = vld [vmem:[%s12758_s26 + $0x8] sm:$0xff] }
 0x6bf   : > { %v2418_v22 = vmul.f32 0.25, %v2409_v21 }
 0x6c0   : > { %v2421_v23 = vadd.f32 %v11803_v39, %v2419_v20  ;;  %v2673_v20 = vld [vmem:[%s12758_s26 + $0x10] sm:$0xff] }
 0x6c1   : > { %v2420_v24 = vadd.f32 %v11803_v39, %v2418_v22  ;;  %v2674_v22 = vld [vmem:[%s12758_s26 + $0x18] sm:$0xff] }
 0x6c2   : > { %v2425_v25 = vsel %vm2130_vm3, %v2421_v23, -inf }
 0x6c3   : > { %2426 = vmax.xlane.f32.xlu0 %v2425_v25  ;;  %v2422_v26 = vsel %vm2130_vm3, %v2420_v24, -inf }
 0x6c4   : > { %2423 = vmax.xlane.f32.xlu1 %v2422_v26 }
 0x750   : > { %v2427_v27 = vpop.xlane.xlu0 %2426 }
 0x751   : > { %v2429_v28 = vsub.f32 %v2421_v23, %v2427_v27  ;;  %v2424_v29 = vpop.xlane.xlu1 %2423  ;;  %v10081_v23 = vpack.c.bf16 %v2674_v22, %v2673_v20  ;;  %v8826_v22 = vld [vmem:[%s12720_s19 + $0x38] sm:$0xff] }
 0x752   : > { %v2428_v31 = vsub.f32 %v2420_v24, %v2424_v29 }
 0x753   : > { %v2432_v32 = vmul.f32 1.442695, %v2429_v28 }
 0x754   : > { %v2430_v33 = vmul.f32 1.442695, %v2428_v31 }
 0x755   : > { %10742 = vpow2.f32 %v2432_v32 }
 0x756   : > { %10744 = vpow2.f32 %v2430_v33 }
 0x75f   : > { %v10743_v34 = vpop.eup %10742 }
 0x760   : > { %v10745_v35 = vpop.eup %10744  ;;  %v2437_v36 = vsel %vm2130_vm3, %v10743_v34, 0.0 }
 0x761   : > { %2438 = vadd.xlane.f32.xlu1 %v2437_v36  ;;  %v2434_v37 = vsel %vm2130_vm3, %v10745_v35, 0.0 }
 0x762   : > { %2435 = vadd.xlane.f32.xlu0 %v2434_v37 }
 0x778   : > { %10625 = vrot.lane.b32.xlu0 %v10624_v5, %s12615_s23  ;;  %s12760_s23 = sld [smem:[#allocation45_spill]] }
 0x7ee   : > { %v2439_v38 = vpop.xlane.xlu1 %2438 }
 0x7ef   : > { %10746 = vrcp.f32 %v2439_v38  ;;  %v2436_v40 = vpop.xlane.xlu0 %2435 }
 0x7f0   : > { %10748 = vrcp.f32 %v2436_v40 }
 0x7f3   : > { %v10626_v41 = vpop.permute.xlu0 %10625 }
 0x7f4   : > { %v10628_v42 = vunpack.i.h.bf16 %v10626_v41  ;;  %v10627_v43 = vunpack.i.l.bf16 %v10626_v41 }
 0x7f6   : > { %v10065_v44 = vpack.c.bf16 %v10628_v42, %v10627_v43  ;;  %v8813_v42 = vld [vmem:[%s12760_s23] ss:$0 sm:$0xff] }
 0x7f8   : > { %10066 = vmatprep.subr.bf16.mxu0 %v10065_v44 }
 0x7f9   : > { %v10747_v45 = vpop.eup %10746  ;;  %10068 = vmatpush3.bf16.msra.mxu0 %v10065_v44  ;;  %v8814_v44 = vld [vmem:[%s12761_s1] ss:$0 sm:$0xff]  ;;  %s12765_s1 = sld [smem:[#allocation47_spill]] }
 0x7fa   : > { %v10749_v46 = vpop.eup %10748  ;;  %v2443_v48 = vmul.f32 %v10747_v45, %v10743_v34 }
 0x7fb   : > { %v2441_v47 = vmul.f32 %v10749_v46, %v10745_v35 }
 0x7fd   : > { %9423 = vmatprep.mubr.msk.f32.mxu0 %vm2130_vm3, %v2441_v47 }
 0x7fe   : > { %9424 = vmatmul.mubr.msk.f32.vlgmr.msra.gmra.mrb[8].mxu0 %vm2130_vm3, %v2443_v48 }
 0x7ff   : > { %s12766_s5 = smov %s12765_s1 }
 0x8d1   : > { %v9425_v55 = vpop.f32.mrb[8].mxu0 }
 0x8d2   : > { %v2524_v56 = vpop.f32.mrb[9].mxu0 }
 0x8d3   : > { %2535 = vrot.lane.b32.xlu1 %v2524_v56, %s12613_s22 }
 0x8d7   : > { %2537 = vrot.lane.b32.xlu1 %v9425_v55, %s12613_s22  ;;  %s12759_s22 = sld [smem:[#allocation43_spill]] }
 0x8dd   : > { %v2763_v24 = vld [vmem:[%s12759_s22] sm:$0xff]  ;;  %v2764_v25 = vld [vmem:[%s12759_s22 + $0x8] sm:$0xff]  ;;  %v2765_v26 = vld [vmem:[%s12759_s22 + $0x10] sm:$0xff] }
 0x8de   : > { %v10085_v27 = vpack.c.bf16 %v2764_v25, %v2763_v24  ;;  %v2766_v28 = vld [vmem:[%s12759_s22 + $0x18] sm:$0xff]  ;;  %v2767_v31 = vld [vmem:[%s12759_s22 + $0x20] sm:$0xff]  ;;  %v2768_v32 = vld [vmem:[%s12759_s22 + $0x28] sm:$0xff] }
 0x8df   : > { %v10089_v29 = vpack.c.bf16 %v2766_v28, %v2765_v26  ;;  %v10093_v33 = vpack.c.bf16 %v2768_v32, %v2767_v31  ;;  %v2769_v51 = vld [vmem:[%s12759_s22 + $0x30] sm:$0xff]  ;;  %v2770_v52 = vld [vmem:[%s12759_s22 + $0x38] sm:$0xff]  ;;  %v8821_v32 = vld [vmem:[%s12765_s1] ss:$0 sm:$0xff]  ;;  %s12768_s1 = smov 64  }
 0x8e0   : > { %10086 = vmatprep.subr.bf16.mxu1 %v10085_v27  ;;  %v10097_v53 = vpack.c.bf16 %v2770_v52, %v2769_v51 }
 0x945   : > { %v2536_v57 = vpop.permute.xlu1 %2535 }
 0x946   : > { %v2541_v58 = vsel %vm2130_vm3, %v2318_v18, %v2536_v57  ;;  %v2671_v18 = vld [vmem:[%s12758_s26] sm:$0xff] }
 0x947   : > { %9434 = vmatprep.mubr.msk.f32.mxu1 %vm1941_vm2, %v2541_v58  ;;  %v10077_v21 = vpack.c.bf16 %v2672_v19, %v2671_v18  ;;  %v8823_v18 = vld [vmem:[%s12720_s19 + $0x20] sm:$0xff]  ;;  %v8824_v19 = vld [vmem:[%s12720_s19 + $0x28] sm:$0xff] }
 0x948   : > { %v10101_v20 = vpack.c.bf16 %v8824_v19, %v8823_v18 }
 0x949   : > { %v2538_v59 = vpop.permute.xlu1 %2537  ;;  %10078 = vmatprep.subr.bf16.mxu0 %v10077_v21 }
 0x94a   : > { %v2542_v60 = vsel %vm2130_vm3, %v11824_v17, %v2538_v59  ;;  %10080 = vmatpush3.bf16.msra.mxu0 %v10077_v21  ;;  %v8825_v21 = vld [vmem:[%s12720_s19 + $0x30] sm:$0xff]  ;;  %s12780_s19 = sld [smem:[#allocation54_spill]] }
 0x94b   : > { %9435 = vmatmul.mubr.msk.f32.vlgmr.msra.gmra.mrb[4].mxu1 %vm1941_vm2, %v2542_v60  ;;  %10082 = vmatprep.subr.bf16.mxu0 %v10081_v23 }
 0x94c   : > { %10088 = vmatpush3.bf16.msra.mxu1 %v10085_v27 }
 0x94d   : > { %10090 = vmatprep.subr.bf16.mxu1 %v10089_v29 }
 0x94e   : > { %10084 = vmatpush3.bf16.msra.mxu0 %v10081_v23  ;;  %v10105_v23 = vpack.c.bf16 %v8826_v22, %v8825_v21 }
 0x94f   : > { %10102 = vmatprep.subr.bf16.mxu0 %v10101_v20 }
 0x950   : > { %10092 = vmatpush3.bf16.msra.mxu1 %v10089_v29 }
 0x951   : > { %10094 = vmatprep.subr.bf16.mxu1 %v10093_v33 }
 0x954   : > { %10096 = vmatpush3.bf16.msra.mxu1 %v10093_v33 }
 0x955   : > { %10098 = vmatprep.subr.bf16.mxu1 %v10097_v53 }
 0x958   : > { %10100 = vmatpush3.bf16.msra.mxu1 %v10097_v53  ;;  %v10639_v53 = vpack.i.bf16 %v8826_v22, %v8825_v21 }
 0xa1e   : > { %v9436_v62 = vpop.f32.mrb[4].mxu1 }
 0xa1f   : > { %v2625_v63 = vadd.f32 %v9436_v62, %v8810_v61  ;;  %v2619_v0 = vpop.f32.mrb[5].mxu1 }
 0xa20   : > { %v2620_v1 = vadd.f32 %v8810_v61, %v2619_v0  ;;  %v8818_v61 = vld [vmem:[%s12764_s4] ss:$0 sm:$0xff] }
 0xa21   : > { %v2629_v2 = vadd.f32 %v2625_v63, %v11758_v12 }
 0xa22   : > { %v2628_v3 = vadd.f32 %v2620_v1, %v11766_v16 }
 0xa23   : > { %v2635_v4 = vsel %vm1941_vm2, %v2629_v2, 0.0 }
 0xa24   : > { %2636 = vadd.xlane.f32.xlu1 %v2635_v4  ;;  %v2632_v5 = vsel %vm1941_vm2, %v2628_v3, 0.0 }
 0xa25   : > { %2633 = vadd.xlane.f32.xlu0 %v2632_v5 }
 0xab1   : > { %v2637_v6 = vpop.xlane.xlu1 %2636 }
 0xab2   : > { %v2640_v7 = vmul.f32 0.03125, %v2637_v6  ;;  %v2634_v8 = vpop.xlane.xlu0 %2633 }
 0xab3   : > { %v2639_v9 = vmul.f32 0.03125, %v2634_v8 }
 0xab4   : > { %v2642_v10 = vsub.f32 %v2629_v2, %v2640_v7 }
 0xab5   : > { %v2641_v11 = vsub.f32 %v2628_v3, %v2639_v9 }
 0xab6   : > { %v2644_v16 = vmul.f32 %v2642_v10, %v2642_v10 }
 0xab7   : > { %v2643_v13 = vmul.f32 %v2641_v11, %v2641_v11 }
 0xab8   : > { %v2648_v17 = vsel %vm1941_vm2, %v2644_v16, 0.0 }
 0xab9   : > { %v2645_v12 = vsel %vm1941_vm2, %v2643_v13, 0.0 }
 0xaba   : > { %2646 = vadd.xlane.f32.xlu0 %v2645_v12 }
 0xabe   : > { %2649 = vadd.xlane.f32.xlu0 %v2648_v17 }
 0xb47   : > { %v2647_v34 = vpop.xlane.xlu0 %2646 }
 0xb48   : > { %v2651_v35 = vmul.f32 0.03125, %v2647_v34 }
 0xb4a   : > { %v2653_v36 = vadd.f32 1e-05, %v2651_v35 }
 0xb4b   : > { %v2650_v37 = vpop.xlane.xlu0 %2649 }
 0xb4c   : > { %10750 = vrsqrt.f32 %v2653_v36  ;;  %v2652_v38 = vmul.f32 0.03125, %v2650_v37  ;;  %v8822_v36 = vld [vmem:[%s12767_s6] ss:$0 sm:$0xff] }
 0xb4e   : > { %v2654_v40 = vadd.f32 1e-05, %v2652_v38 }
 0xb50   : > { %10752 = vrsqrt.f32 %v2654_v40 }
 0xb56   : > { %v10751_v41 = vpop.eup %10750 }
 0xb57   : > { %v2657_v43 = vmul.f32 %v10751_v41, %v2641_v11 }
 0xb59   : > { %v2663_v45 = vmul.f32 %v8813_v42, %v2657_v43 }
 0xb5a   : > { %v10753_v46 = vpop.eup %10752 }
 0xb5b   : > { %v2658_v47 = vmul.f32 %v10753_v46, %v2642_v10  ;;  %v2669_v48 = vadd.f32 %v8814_v44, %v2663_v45 }
 0xb5d   : > { %v2664_v49 = vmul.f32 %v8813_v42, %v2658_v47  ;;  %9445 = vmatprep.mubr.msk.f32.mxu0 %vm1941_vm2, %v2669_v48 }
 0xb5f   : > { %v2670_v50 = vadd.f32 %v8814_v44, %v2664_v49  ;;  %v10634_v44 = vpack.i.bf16 %v8824_v19, %v8823_v18  ;;  %v8831_v49 = vld [vmem:[%s12752_s12 + $0x1] ss:$0 sm:$0xff]  ;;  %s12771_s12 = smov 112  }
 0xb61   : > { %9446 = vmatmul.mubr.msk.f32.vlgmr.msra.gmra.mrb[10].mxu0 %vm1941_vm2, %v2670_v50 }
 0xb62   : > { %10104 = vmatpush3.bf16.msra.mxu0 %v10101_v20 }
 0xb63   : > { %10106 = vmatprep.subr.bf16.mxu0 %v10105_v23 }
 0xb66   : > { %10108 = vmatpush3.bf16.msra.mxu0 %v10105_v23 }
 0xc34   : > { %v9447_v55 = vpop.f32.mrb[10].mxu0 }
 0xc35   : > { %v2758_v56 = vadd.f32 %v9447_v55, %v8815_v54  ;;  %v2752_v57 = vpop.f32.mrb[11].mxu0 }
 0xc36   : > { %v2753_v58 = vadd.f32 %v8815_v54, %v2752_v57 }
 0xc37   : > { %v2762_v60 = vmax.f32 %v2758_v56, 0.0 }
 0xc38   : > { %v2761_v59 = vmax.f32 %v2753_v58, 0.0 }
 0xc3a   : > { %9464 = vmatprep.mubr.msk.f32.mxu1 %vm2776_vm5, %v2761_v59 }
 0xc3b   : > { %9465 = vmatmul.mubr.msk.f32.vlgmr.msra.gmra.mrb[6].mxu1 %vm2776_vm5, %v2762_v60 }
 0xd0e   : > { %v9466_v62 = vpop.f32.mrb[6].mxu1 }
 0xd0f   : > { %v2855_v63 = vadd.f32 %v9466_v62, %v8818_v61  ;;  %v2849_v0 = vpop.f32.mrb[7].mxu1 }
 0xd10   : > { %v2850_v1 = vadd.f32 %v8818_v61, %v2849_v0 }
 0xd11   : > { %v2859_v2 = vadd.f32 %v2855_v63, %v2670_v50 }
 0xd12   : > { %v2858_v3 = vadd.f32 %v2850_v1, %v2669_v48 }
 0xd13   : > { %v2865_v4 = vsel %vm1941_vm2, %v2859_v2, 0.0 }
 0xd14   : > { %2866 = vadd.xlane.f32.xlu0 %v2865_v4  ;;  %v2862_v5 = vsel %vm1941_vm2, %v2858_v3, 0.0 }
 0xd15   : > { %2863 = vadd.xlane.f32.xlu1 %v2862_v5 }
 0xda1   : > { %v2867_v6 = vpop.xlane.xlu0 %2866 }
 0xda2   : > { %v2869_v7 = vmul.f32 0.03125, %v2867_v6  ;;  %v2864_v8 = vpop.xlane.xlu1 %2863 }
 0xda3   : > { %v2868_v9 = vmul.f32 0.03125, %v2864_v8 }
 0xda4   : > { %v2871_v10 = vsub.f32 %v2859_v2, %v2869_v7 }
 0xda5   : > { %v2870_v11 = vsub.f32 %v2858_v3, %v2868_v9 }
 0xda6   : > { %v2873_v13 = vmul.f32 %v2871_v10, %v2871_v10 }
 0xda7   : > { %v2872_v12 = vmul.f32 %v2870_v11, %v2870_v11 }
 0xda8   : > { %v2877_v16 = vsel %vm1941_vm2, %v2873_v13, 0.0 }
 0xda9   : > { %2878 = vadd.xlane.f32.xlu0 %v2877_v16  ;;  %v2874_v17 = vsel %vm1941_vm2, %v2872_v12, 0.0 }
 0xdaa   : > { %2875 = vadd.xlane.f32.xlu1 %v2874_v17 }
 0xdbf   : > { %10635 = vrot.lane.b32.xlu0 %v10634_v44, %s12768_s1 }
 0xe36   : > { %v2879_v24 = vpop.xlane.xlu0 %2878 }
 0xe37   : > { %v2881_v25 = vmul.f32 0.03125, %v2879_v24  ;;  %v2876_v26 = vpop.xlane.xlu1 %2875 }
 0xe38   : > { %v2880_v27 = vmul.f32 0.03125, %v2876_v26 }
 0xe39   : > { %v2883_v28 = vadd.f32 1e-05, %v2881_v25 }
 0xe3a   : > { %v2882_v29 = vadd.f32 1e-05, %v2880_v27  ;;  %v10636_v45 = vpop.permute.xlu0 %10635 }
 0xe3b   : > { %10754 = vrsqrt.f32 %v2883_v28  ;;  %v10638_v46 = vunpack.i.h.bf16 %v10636_v45  ;;  %v10637_v47 = vunpack.i.l.bf16 %v10636_v45 }
 0xe3c   : > { %10756 = vrsqrt.f32 %v2882_v29 }
 0xe3d   : > { %v10109_v48 = vpack.c.bf16 %v10638_v46, %v10637_v47 }
 0xe3f   : > { %10110 = vmatprep.subr.bf16.mxu0 %v10109_v48 }
 0xe45   : > { %v10755_v31 = vpop.eup %10754 }
 0xe46   : > { %v10757_v33 = vpop.eup %10756  ;;  %v2887_v34 = vmul.f32 %v10755_v31, %v2871_v10 }
 0xe47   : > { %v2886_v35 = vmul.f32 %v10757_v33, %v2870_v11 }
 0xe48   : > { %v2893_v37 = vmul.f32 %v8821_v32, %v2887_v34 }
 0xe49   : > { %v2892_v38 = vmul.f32 %v8821_v32, %v2886_v35 }
 0xe4a   : > { %v11883_v40 = vadd.f32 %v8822_v36, %v2893_v37 }
 0xe4b   : > { %v11885_v41 = vadd.f32 %v8822_v36, %v2892_v38 }
 0xe4c   : > { %v2901_v43 = vadd.f32 %v11883_v40, %v11764_v15 }
 0xe4d   : > { %v2900_v42 = vadd.f32 %v11885_v41, %v11761_v14 }
 0xe4f   : > { %9475 = vmatprep.mubr.msk.f32.mxu0 %vm1941_vm2, %v2900_v42 }
 0xe50   : > { %9476 = vmatmul.mubr.msk.f32.vlgmr.msra.gmra.mrb[12].mxu0 %vm1941_vm2, %v2901_v43 }
 0xe51   : > { %9486 = vmatprep.mubr.msk.f32.mxu0 %vm1941_vm2, %v11885_v41  ;;  %10112 = vmatpush3.bf16.msra.mxu0 %v10109_v48 }
 0xf23   : > { %v9477_v14 = vpop.f32.mrb[12].mxu0 }
 0xf24   : > { %v2996_v50 = vadd.f32 %v9477_v14, %v8831_v49  ;;  %v2990_v15 = vpop.f32.mrb[13].mxu0 }
 0xf25   : > { %v2991_v51 = vadd.f32 %v8831_v49, %v2990_v15 }
 0xf27   : > { %9493 = vmatprep.mubr.msk.f32.mxu1 %vm2130_vm3, %v2991_v51  ;;  %v10629_v52 = vpack.i.bf16 %v2996_v50, %v2991_v51 }
 0xf29   : > { %10630 = vrot.lane.b32.xlu1 %v10629_v52, %s12769_s8 }
 0xf2d   : > { %10640 = vrot.lane.b32.xlu1 %v10639_v53, %s12768_s1 }
 0xf9b   : > { %v10631_v54 = vpop.permute.xlu1 %10630 }
 0xf9c   : > { %v10633_v55 = vunpack.i.h.bf16 %v10631_v54  ;;  %v10632_v56 = vunpack.i.l.bf16 %v10631_v54 }
 0xf9e   : > { %v10117_v57 = vpack.c.bf16 %v10633_v55, %v10632_v56 }
 0xf9f   : > { %v10641_v58 = vpop.permute.xlu1 %10640 }
 0xfa0   : > { %v10643_v59 = vunpack.i.h.bf16 %v10641_v58  ;;  %v10642_v60 = vunpack.i.l.bf16 %v10641_v58  ;;  %10119 = vmatprep.subr.msk.bf16.mxu1 %vm11787_vm4, %v10117_v57 }
 0xfa1   : > { %10122 = vmatpush3.bf16.xpose.msk.msra.mxu1 %vm11787_vm4, %v10117_v57 }
 0xfa2   : > { %v10113_v61 = vpack.c.bf16 %v10643_v59, %v10642_v60 }
 0xfa4   : > { %10114 = vmatprep.subr.bf16.mxu0 %v10113_v61 }
 0xfa5   : > { %10116 = vmatpush3.bf16.msra.mxu0 %v10113_v61 }
 0xfa8   : > { %9487 = vmatmul.mubr.msk.f32.vlgmr.msra.gmra.mrb[14].mxu0 %vm1941_vm2, %v11883_v40  ;;  %9494 = vmatmul.mubr.msk.f32.vlgmr.msra.gmra.mrb[8].mxu1 %vm2130_vm3, %v2996_v50 }
0x107b   : > { %v9488_v62 = vpop.f32.mrb[14].mxu0  ;;  %v9495_v63 = vpop.f32.mrb[8].mxu1 }
0x107c   : > { %v3190_v0 = vmul.f32 0.25, %v9495_v63  ;;  %v3091_v1 = vpop.f32.mrb[15].mxu0  ;;  %v3180_v2 = vpop.f32.mrb[9].mxu1 }
0x107d   : > { %v3189_v3 = vmul.f32 0.25, %v3180_v2 }
0x107e   : > { %v3192_v4 = vadd.f32 %v11803_v39, %v3190_v0 }
0x107f   : > { %v3191_v5 = vadd.f32 %v11803_v39, %v3189_v3 }
0x1080   : > { %v3196_v6 = vsel %vm2130_vm3, %v3192_v4, -inf }
0x1081   : > { %3197 = vmax.xlane.f32.xlu0 %v3196_v6  ;;  %v3193_v7 = vsel %vm2130_vm3, %v3191_v5, -inf }
0x1082   : > { %3194 = vmax.xlane.f32.xlu1 %v3193_v7  ;;  %v8829_v7 = vld [vmem:[%s12756_s18 + $0x30] sm:$0xff] }
0x110e   : > { %v3198_v8 = vpop.xlane.xlu0 %3197 }
0x110f   : > { %v3200_v9 = vsub.f32 %v3192_v4, %v3198_v8  ;;  %v3195_v10 = vpop.xlane.xlu1 %3194  ;;  %v8827_v4 = vld [vmem:[%s12756_s18 + $0x20] sm:$0xff]  ;;  %v8830_v8 = vld [vmem:[%s12756_s18 + $0x38] sm:$0xff] }
0x1110   : > { %v3199_v11 = vsub.f32 %v3191_v5, %v3195_v10  ;;  %v8828_v5 = vld [vmem:[%s12756_s18 + $0x28] sm:$0xff]  ;;  %s12775_s18 = sld [smem:[#allocation32_spill]] }
0x1111   : > { %v3203_v13 = vmul.f32 1.442695, %v3200_v9  ;;  %v10137_v6 = vpack.c.bf16 %v8828_v5, %v8827_v4  ;;  %v10141_v9 = vpack.c.bf16 %v8830_v8, %v8829_v7 }
0x1112   : > { %v3201_v12 = vmul.f32 1.442695, %v3199_v11 }
0x1113   : > { %10758 = vpow2.f32 %v3203_v13 }
0x1114   : > { %10760 = vpow2.f32 %v3201_v12 }
0x111d   : > { %v10759_v16 = vpop.eup %10758 }
0x111e   : > { %v10761_v17 = vpop.eup %10760  ;;  %v3208_v18 = vsel %vm2130_vm3, %v10759_v16, 0.0 }
0x111f   : > { %3209 = vadd.xlane.f32.xlu1 %v3208_v18  ;;  %v3205_v19 = vsel %vm2130_vm3, %v10761_v17, 0.0  ;;  %v8848_v18 = vld [vmem:[%s12757_s11 + $0x1] ss:$0 sm:$0xff]  ;;  %s12773_s11 = sld [smem:[#allocation33_spill]] }
0x1120   : > { %3206 = vadd.xlane.f32.xlu0 %v3205_v19 }
0x1125   : > { %v3874_v7 = vld [vmem:[%s12773_s11 + $0x10] sm:$0xff]  ;;  %v3875_v8 = vld [vmem:[%s12773_s11 + $0x18] sm:$0xff] }
0x1130   : > { %10645 = vrot.lane.b32.xlu1 %v10629_v52, %s12770_s9 }
0x1134   : > { %3296 = vrot.lane.b32.xlu1 %v2991_v51, %s12771_s12 }
0x1136   : > { %3016 = vrot.lane.b32.xlu0 %v8831_v49, %s12768_s1 }
0x113a   : > { %3298 = vrot.lane.b32.xlu0 %v2996_v50, %s12771_s12 }
0x11ac   : > { %v3210_v20 = vpop.xlane.xlu1 %3209 }
0x11ad   : > { %10762 = vrcp.f32 %v3210_v20  ;;  %v3207_v21 = vpop.xlane.xlu0 %3206 }
0x11ae   : > { %10764 = vrcp.f32 %v3207_v21 }
0x11b0   : > { %v10646_v22 = vpop.permute.xlu1 %10645 }
0x11b1   : > { %v3017_v23 = vpop.permute.xlu0 %3016  ;;  %v10648_v24 = vunpack.i.h.bf16 %v10646_v22  ;;  %v10647_v25 = vunpack.i.l.bf16 %v10646_v22 }
0x11b2   : > { %v3092_v26 = vadd.f32 %v3091_v1, %v3017_v23  ;;  %v3097_v27 = vadd.f32 %v9488_v62, %v3017_v23 }
0x11b3   : > { %v10127_v31 = vpack.c.bf16 %v10648_v24, %v10647_v25 }
0x11b4   : > { %v10649_v28 = vpack.i.bf16 %v3097_v27, %v3092_v26  ;;  %v10123_v29 = vpack.c.bf16 %v3097_v27, %v3092_v26  ;;  %v3297_v36 = vpop.permute.xlu1 %3296 }
0x11b5   : > { %v3299_v37 = vpop.permute.xlu0 %3298 }
0x11b6   : > { %10124 = vmatprep.subr.bf16.mxu0 %v10123_v29 }
0x11b7   : > { %v10763_v32 = vpop.eup %10762  ;;  %10126 = vmatpush3.bf16.msra.mxu0 %v10123_v29 }
0x11b8   : > { %v10765_v33 = vpop.eup %10764  ;;  %10129 = vmatprep.subr.msk.bf16.mxu0 %vm11787_vm4, %v10127_v31  ;;  %v3214_v35 = vmul.f32 %v10763_v32, %v10759_v16 }
0x11b9   : > { %v3212_v34 = vmul.f32 %v10765_v33, %v10761_v17 }
0x11bb   : > { %9500 = vmatprep.mubr.msk.f32.mxu0 %vm2130_vm3, %v3212_v34 }
0x11bc   : > { %9501 = vmatmul.mubr.msk.f32.vlgmr.msra.gmra.mrb[16].mxu0 %vm2130_vm3, %v3214_v35 }
0x11bd   : > { %9507 = vmatprep.mubr.msk.f32.mxu0 %vm2130_vm3, %v3297_v36  ;;  %v8853_v36 = vld [vmem:[%s12758_s26 + $0x20] sm:$0xff] }
0x11c0   : > { %10132 = vmatpush3.bf16.xpose.msk.msra.mxu0 %vm11787_vm4, %v10127_v31 }
0x11c7   : > { %9508 = vmatmul.mubr.msk.f32.vlgmr.msra.gmra.mrb[18].mxu0 %vm2130_vm3, %v3299_v37  ;;  %v8854_v37 = vld [vmem:[%s12758_s26 + $0x28] sm:$0xff] }
0x128f   : > { %v9502_v38 = vpop.f32.mrb[16].mxu0 }
0x1290   : > { %v3287_v42 = vpop.f32.mrb[17].mxu0 }
0x129a   : > { %v9509_v43 = vpop.f32.mrb[18].mxu0 }
0x129b   : > { %v3388_v44 = vmul.f32 0.25, %v9509_v43  ;;  %v3378_v45 = vpop.f32.mrb[19].mxu0  ;;  %v8856_v43 = vld [vmem:[%s12758_s26 + $0x38] sm:$0xff] }
0x129c   : > { %v3387_v46 = vmul.f32 0.25, %v3378_v45  ;;  %v11262_v45 = vmov 0.0|0.0  }
0x129d   : > { %v3390_v47 = vadd.f32 %v11803_v39, %v3388_v44 }
0x129e   : > { %v3389_v48 = vadd.f32 %v11803_v39, %v3387_v46  ;;  %v8860_v46 = vld [vmem:[%s12759_s22 + $0x40] sm:$0xff] }
0x129f   : > { %v3394_v49 = vsel %vm2130_vm3, %v3390_v47, -inf }
0x12a0   : > { %3395 = vmax.xlane.f32.xlu0 %v3394_v49  ;;  %v3391_v14 = vsel %vm2130_vm3, %v3389_v48, -inf }
0x12a1   : > { %3392 = vmax.xlane.f32.xlu1 %v3391_v14  ;;  %v8863_v14 = vld [vmem:[%s12759_s22 + $0x58] sm:$0xff] }
0x132d   : > { %v3396_v50 = vpop.xlane.xlu0 %3395 }
0x132e   : > { %v3398_v15 = vsub.f32 %v3390_v47, %v3396_v50  ;;  %v3393_v51 = vpop.xlane.xlu1 %3392  ;;  %v8861_v47 = vld [vmem:[%s12759_s22 + $0x48] sm:$0xff] }
0x132f   : > { %v3397_v52 = vsub.f32 %v3389_v48, %v3393_v51  ;;  %v8862_v48 = vld [vmem:[%s12759_s22 + $0x50] sm:$0xff]  ;;  %v10153_v49 = vpack.c.bf16 %v8861_v47, %v8860_v46  ;;  %v8865_v51 = vld [vmem:[%s12759_s22 + $0x68] sm:$0xff] }
0x1330   : > { %v3401_v53 = vmul.f32 1.442695, %v3398_v15  ;;  %v10157_v50 = vpack.c.bf16 %v8863_v14, %v8862_v48  ;;  %v8864_v15 = vld [vmem:[%s12759_s22 + $0x60] sm:$0xff] }
0x1331   : > { %v3399_v54 = vmul.f32 1.442695, %v3397_v52  ;;  %v10161_v52 = vpack.c.bf16 %v8865_v51, %v8864_v15  ;;  %v8868_v15 = vld [vmem:[%s12764_s4 + $0x1] ss:$0 sm:$0xff]  ;;  %s12778_s4 = sld [smem:[#allocation52_spill]] }
0x1332   : > { %10766 = vpow2.f32 %v3401_v53 }
0x1333   : > { %10768 = vpow2.f32 %v3399_v54 }
0x133c   : > { %v10767_v55 = vpop.eup %10766 }
0x133d   : > { %v10769_v56 = vpop.eup %10768  ;;  %v3406_v57 = vsel %vm2130_vm3, %v10767_v55, 0.0 }
0x133e   : > { %3407 = vadd.xlane.f32.xlu1 %v3406_v57  ;;  %v3403_v39 = vsel %vm2130_vm3, %v10769_v56, 0.0 }
0x133f   : > { %3404 = vadd.xlane.f32.xlu0 %v3403_v39 }
0x1355   : > { %10650 = vrot.lane.b32.xlu0 %v10649_v28, %s12771_s12 }
0x13cb   : > { %v3408_v58 = vpop.xlane.xlu1 %3407 }
0x13cc   : > { %10770 = vrcp.f32 %v3408_v58  ;;  %v3405_v59 = vpop.xlane.xlu0 %3404 }
0x13cd   : > { %10772 = vrcp.f32 %v3405_v59  ;;  %v8851_v59 = vld [vmem:[%s12760_s23 + $0x1] ss:$0 sm:$0xff]  ;;  %s12786_s23 = sld [smem:[#allocation59_spill]] }
0x13d0   : > { %v10651_v60 = vpop.permute.xlu0 %10650 }
0x13d1   : > { %v10653_v61 = vunpack.i.h.bf16 %v10651_v60  ;;  %v10652_v62 = vunpack.i.l.bf16 %v10651_v60 }
0x13d3   : > { %v10133_v63 = vpack.c.bf16 %v10653_v61, %v10652_v62  ;;  %v8852_v61 = vld [vmem:[%s12762_s10 + $0x1] ss:$0 sm:$0xff]  ;;  %s12776_s10 = sld [smem:[#allocation50_spill]] }
0x13d5   : > { %10134 = vmatprep.subr.bf16.mxu1 %v10133_v63 }
0x13d6   : > { %v10771_v0 = vpop.eup %10770  ;;  %10136 = vmatpush3.bf16.msra.mxu1 %v10133_v63 }
0x13d7   : > { %v10773_v1 = vpop.eup %10772  ;;  %v3412_v3 = vmul.f32 %v10771_v0, %v10767_v55  ;;  %10138 = vmatprep.subr.bf16.mxu1 %v10137_v6 }
0x13d8   : > { %v3410_v2 = vmul.f32 %v10773_v1, %v10769_v56 }
0x13da   : > { %9514 = vmatprep.mubr.msk.f32.mxu1 %vm2130_vm3, %v3410_v2  ;;  %v3872_v2 = vld [vmem:[%s12773_s11] sm:$0xff] }
0x13db   : > { %9515 = vmatmul.mubr.msk.f32.vlgmr.msra.gmra.mrb[10].mxu1 %vm2130_vm3, %v3412_v3  ;;  %v3873_v3 = vld [vmem:[%s12773_s11 + $0x8] sm:$0xff]  ;;  %s12779_s11 = sld [smem:[#allocation53_spill]] }
0x13dc   : > { %10140 = vmatpush3.bf16.msra.mxu1 %v10137_v6  ;;  %v10170_v5 = vpack.c.bf16 %v3873_v3, %v3872_v2 }
0x13dd   : > { %10142 = vmatprep.subr.bf16.mxu1 %v10141_v9 }
0x13e0   : > { %10144 = vmatpush3.bf16.msra.mxu1 %v10141_v9  ;;  %v10173_v9 = vpack.c.bf16 %v3875_v8, %v3874_v7 }
0x13e1   : > { %10154 = vmatprep.subr.bf16.mxu1 %v10153_v49 }
0x14ae   : > { %v9516_v10 = vpop.f32.mrb[10].mxu1 }
0x14af   : > { %v3493_v11 = vpop.f32.mrb[11].mxu1 }
0x14b0   : > { %3504 = vrot.lane.b32.xlu1 %v3493_v11, %s12772_s14  ;;  %v3963_v11 = vld [vmem:[%s12774_s17] sm:$0xff] }
0x14b4   : > { %3506 = vrot.lane.b32.xlu1 %v9516_v10, %s12772_s14  ;;  %v11264_v10 = vmov 0.0  }
0x1522   : > { %v3505_v13 = vpop.permute.xlu1 %3504 }
0x1523   : > { %v3510_v12 = vsel %vm2130_vm3, %v3287_v42, %v3505_v13  ;;  %v8855_v42 = vld [vmem:[%s12758_s26 + $0x30] sm:$0xff]  ;;  %v3964_v13 = vld [vmem:[%s12774_s17 + $0x8] sm:$0xff]  ;;  %s12787_s26 = sld [smem:[#allocation63_spill]] }
0x1524   : > { %9525 = vmatprep.mubr.msk.f32.mxu1 %vm1941_vm2, %v3510_v12  ;;  %v10149_v44 = vpack.c.bf16 %v8856_v43, %v8855_v42  ;;  %v11982_v12 = vld [vmem:[%s12775_s18] sm:$0xff] }
0x1526   : > { %v3507_v16 = vpop.permute.xlu1 %3506 }
0x1527   : > { %v3511_v17 = vsel %vm2130_vm3, %v9502_v38, %v3507_v16  ;;  %v10145_v38 = vpack.c.bf16 %v8854_v37, %v8853_v36  ;;  %v10176_v16 = vpack.c.bf16 %v3964_v13, %v3963_v11 }
0x1528   : > { %9526 = vmatmul.mubr.msk.f32.vlgmr.msra.gmra.mrb[12].mxu1 %vm1941_vm2, %v3511_v17  ;;  %v3965_v17 = vld [vmem:[%s12774_s17 + $0x10] sm:$0xff] }
0x1529   : > { %10146 = vmatprep.subr.bf16.mxu0 %v10145_v38  ;;  %10156 = vmatpush3.bf16.msra.mxu1 %v10153_v49 }
0x152a   : > { %10148 = vmatpush3.bf16.msra.mxu0 %v10145_v38  ;;  %10158 = vmatprep.subr.bf16.mxu1 %v10157_v50 }
0x152b   : > { %10150 = vmatprep.subr.bf16.mxu0 %v10149_v44 }
0x152d   : > { %10160 = vmatpush3.bf16.msra.mxu1 %v10157_v50 }
0x152e   : > { %10152 = vmatpush3.bf16.msra.mxu0 %v10149_v44  ;;  %10162 = vmatprep.subr.bf16.mxu1 %v10161_v52  ;;  %v8875_v44 = vld [vmem:[%s12776_s10] ss:$0 sm:$0xff] }
0x152f   : > { %10169 = vmatprep.subr.bf16.mxu0 %v11262_v45 }
0x1531   : > { %10164 = vmatpush3.bf16.msra.mxu1 %v10161_v52 }
0x15fb   : > { %v9527_v19 = vpop.f32.mrb[12].mxu1 }
0x15fc   : > { %v3594_v20 = vadd.f32 %v9527_v19, %v8848_v18  ;;  %v3588_v21 = vpop.f32.mrb[13].mxu1 }
0x15fd   : > { %v3589_v22 = vadd.f32 %v8848_v18, %v3588_v21  ;;  %v3966_v18 = vld [vmem:[%s12774_s17 + $0x18] sm:$0xff] }
0x15fe   : > { %v3598_v23 = vadd.f32 %v3594_v20, %v11883_v40  ;;  %v10179_v19 = vpack.c.bf16 %v3966_v18, %v3965_v17  ;;  %v8866_v20 = vld [vmem:[%s12759_s22 + $0x70] sm:$0xff]  ;;  %v8867_v21 = vld [vmem:[%s12759_s22 + $0x78] sm:$0xff]  ;;  %s12785_s22 = sld [smem:[#allocation57_spill]] }
0x15ff   : > { %v3597_v24 = vadd.f32 %v3589_v22, %v11885_v41  ;;  %v10165_v22 = vpack.c.bf16 %v8867_v21, %v8866_v20 }
0x1600   : > { %v3604_v25 = vsel %vm1941_vm2, %v3598_v23, 0.0 }
0x1601   : > { %3605 = vadd.xlane.f32.xlu1 %v3604_v25  ;;  %v3601_v26 = vsel %vm1941_vm2, %v3597_v24, 0.0  ;;  %10166 = vmatprep.subr.bf16.mxu1 %v10165_v22 }
0x1602   : > { %3602 = vadd.xlane.f32.xlu0 %v3601_v26  ;;  %10168 = vmatpush3.bf16.msra.mxu1 %v10165_v22  ;;  %v8857_v26 = vld [vmem:[%s12763_s3 + $0x1] ss:$0 sm:$0xff]  ;;  %s12777_s3 = sld [smem:[#allocation51_spill]] }
0x1603   : > { %10181 = vmatprep.subr.bf16.mxu1 %v11262_v45 }
0x168e   : > { %v3606_v27 = vpop.xlane.xlu1 %3605 }
0x168f   : > { %v3608_v28 = vmul.f32 0.03125, %v3606_v27  ;;  %v3603_v29 = vpop.xlane.xlu0 %3602 }
0x1690   : > { %v3607_v31 = vmul.f32 0.03125, %v3603_v29 }
0x1691   : > { %v3610_v32 = vsub.f32 %v3598_v23, %v3608_v28  ;;  %v10654_v23 = vpack.i.bf16 %v3964_v13, %v3963_v11 }
0x1692   : > { %v3609_v33 = vsub.f32 %v3597_v24, %v3607_v31  ;;  %v10659_v24 = vpack.i.bf16 %v3966_v18, %v3965_v17 }
0x1693   : > { %v3612_v41 = vmul.f32 %v3610_v32, %v3610_v32  ;;  %10655 = vrot.lane.b32.xlu1 %v10654_v23, %s12768_s1 }
0x1694   : > { %v3611_v34 = vmul.f32 %v3609_v33, %v3609_v33 }
0x1695   : > { %v3616_v35 = vsel %vm1941_vm2, %v3612_v41, 0.0 }
0x1696   : > { %v3613_v40 = vsel %vm1941_vm2, %v3611_v34, 0.0 }
0x1697   : > { %3614 = vadd.xlane.f32.xlu0 %v3613_v40 }
0x169b   : > { %3617 = vadd.xlane.f32.xlu0 %v3616_v35 }
0x16b1   : > { %10660 = vrot.lane.b32.xlu0 %v10659_v24, %s12768_s1 }
0x1705   : > { %v10656_v25 = vpop.permute.xlu1 %10655 }
0x1706   : > { %v10658_v28 = vunpack.i.h.bf16 %v10656_v25  ;;  %v10657_v29 = vunpack.i.l.bf16 %v10656_v25 }
0x1708   : > { %v10182_v41 = vpack.c.bf16 %v10658_v28, %v10657_v29 }
0x1724   : > { %v3615_v53 = vpop.xlane.xlu0 %3614 }
0x1725   : > { %v3619_v54 = vmul.f32 0.03125, %v3615_v53 }
0x1727   : > { %v3621_v55 = vadd.f32 1e-05, %v3619_v54 }
0x1728   : > { %v3618_v56 = vpop.xlane.xlu0 %3617 }
0x1729   : > { %10774 = vrsqrt.f32 %v3621_v55  ;;  %v3620_v57 = vmul.f32 0.03125, %v3618_v56 }
0x172b   : > { %v3622_v39 = vadd.f32 1e-05, %v3620_v57 }
0x172d   : > { %10776 = vrsqrt.f32 %v3622_v39 }
0x1733   : > { %v10775_v58 = vpop.eup %10774 }
0x1734   : > { %v3625_v60 = vmul.f32 %v10775_v58, %v3609_v33  ;;  %v10661_v33 = vpop.permute.xlu0 %10660 }
0x1735   : > { %v10663_v35 = vunpack.i.h.bf16 %v10661_v33  ;;  %v10662_v36 = vunpack.i.l.bf16 %v10661_v33  ;;  %v3969_v33 = vld [vmem:[%s12777_s3 + $0x8] sm:$0xff] }
0x1736   : > { %v3631_v62 = vmul.f32 %v8851_v59, %v3625_v60 }
0x1737   : > { %v10777_v63 = vpop.eup %10776  ;;  %v10185_v42 = vpack.c.bf16 %v10663_v35, %v10662_v36 }
0x1738   : > { %v3626_v0 = vmul.f32 %v10777_v63, %v3610_v32  ;;  %v11964_v1 = vadd.f32 %v8852_v61, %v3631_v62 }
0x173a   : > { %v3632_v4 = vmul.f32 %v8851_v59, %v3626_v0  ;;  %9536 = vmatprep.mubr.msk.f32.mxu0 %vm1941_vm2, %v11964_v1 }
0x173c   : > { %v11970_v6 = vadd.f32 %v8852_v61, %v3632_v4 }
0x173e   : > { %9537 = vmatmul.mubr.msk.f32.vlgmr.msra.gmra.mrb[20].mxu0 %vm1941_vm2, %v11970_v6 }
0x173f   : > { %10171 = vmatpush3.bf16.msra.mxu0 %v10170_v5  ;;  %9566 = vmatprep.mubr.msk.f32.mxu0 %vm11263_vm6, %v11264_v10 }
0x1740   : > { %10172 = vmatprep.subr.bf16.mxu0 %v11262_v45 }
0x1743   : > { %10174 = vmatpush3.bf16.msra.mxu0 %v10173_v9 }
0x1744   : > { %10175 = vmatprep.subr.bf16.mxu0 %v11262_v45 }
0x1746   : > { %9567 = vmatmul.mubr.msk.f32.vlgmr.msra.gmra.mrb[22].mxu0 %vm1941_vm2, %v11982_v12 }
0x1747   : > { %10177 = vmatpush3.bf16.msra.mxu0 %v10176_v16  ;;  %9577 = vmatprep.mubr.msk.f32.mxu0 %vm11263_vm6, %v11264_v10 }
0x1748   : > { %10178 = vmatprep.subr.bf16.mxu0 %v11262_v45 }
0x174b   : > { %10180 = vmatpush3.bf16.msra.mxu0 %v10179_v19 }
0x174c   : > { %9591 = vmatprep.subr.mxu0 %v11264_v10 }
0x174e   : > { %9578 = vmatmul.mubr.msk.f32.vlgmr.msra.gmra.mrb[24].mxu0 %vm1941_vm2, %v11982_v12 }
0x174f   : > { %9593 = vmatprep.mubr.msk.f32.mxu0 %vm11263_vm6, %v11264_v10 }
0x1811   : > { %v9538_v27 = vpop.f32.mrb[20].mxu0 }
0x1812   : > { %v3727_v31 = vadd.f32 %v9538_v27, %v8857_v26  ;;  %v3721_v32 = vpop.f32.mrb[21].mxu0 }
0x1813   : > { %v3722_v34 = vadd.f32 %v8857_v26, %v3721_v32  ;;  %v3968_v32 = vld [vmem:[%s12777_s3] sm:$0xff] }
0x1814   : > { %v3731_v37 = vmax.f32 %v3727_v31, 0.0 }
0x1815   : > { %v3730_v40 = vmax.f32 %v3722_v34, 0.0  ;;  %v3970_v34 = vld [vmem:[%s12777_s3 + $0x10] sm:$0xff] }
0x1817   : > { %9555 = vmatprep.mubr.msk.f32.mxu1 %vm2776_vm5, %v3730_v40  ;;  %v10188_v40 = vpack.c.bf16 %v3969_v33, %v3968_v32 }
0x1818   : > { %9556 = vmatmul.mubr.msk.f32.vlgmr.msra.gmra.mrb[14].mxu1 %vm2776_vm5, %v3731_v37 }
0x1819   : > { %v12005_v38 = vpop.f32.mrb[22].mxu0  ;;  %10183 = vmatpush3.bf16.msra.mxu1 %v10182_v41  ;;  %9588 = vmatprep.mubr.msk.f32.mxu1 %vm11263_vm6, %v11264_v10  ;;  %v3971_v41 = vld [vmem:[%s12777_s3 + $0x18] sm:$0xff] }
0x181a   : > { %v9568_v43 = vpop.f32.mrb[23].mxu0  ;;  %10184 = vmatprep.subr.bf16.mxu1 %v11262_v45  ;;  %v10191_v35 = vpack.c.bf16 %v3971_v41, %v3970_v34 }
0x181d   : > { %10186 = vmatpush3.bf16.msra.mxu1 %v10185_v42 }
0x181e   : > { %9601 = vmatprep.subr.mxu1 %v11264_v10 }
0x1820   : > { %9589 = vmatmul.mubr.f32.vlgmr.msra.gmra.mrb[16].mxu1 %v11264_v10 }
0x1821   : > { %v4046_v46 = vpop.f32.mrb[24].mxu0  ;;  %9603 = vmatprep.mubr.msk.f32.mxu1 %vm11263_vm6, %v11264_v10 }
0x1822   : > { %v4047_v47 = vadd.f32 %v8875_v44, %v4046_v46  ;;  %v9579_v48 = vpop.f32.mrb[25].mxu0 }
0x1824   : > { %4306 = vrot.lane.b32.xlu0 %v4047_v47, %s12771_s12  ;;  %4144 = vrot.lane.b32.xlu1 %v4047_v47, %s12769_s8 }
0x1828   : > { %4308 = vrot.lane.b32.xlu1 %v4047_v47, %s12770_s9 }
0x1896   : > { %v4145_v49 = vpop.permute.xlu1 %4144  ;;  %v4307_v50 = vpop.permute.xlu0 %4306 }
0x1897   : > { %9592 = vmatpush3.xpose.msk.msra.mxu0 %vm2130_vm3, %v4145_v49 }
0x1898   : > { %9596 = vmatprep.subr.mxu0 %v11264_v10 }
0x189a   : > { %9594 = vmatmul.mubr.msk.f32.vlgmr.msra.gmra.mrb[26].mxu0 %vm2130_vm3, %v4047_v47  ;;  %v4309_v14 = vpop.permute.xlu1 %4308 }
0x189b   : > { %9602 = vmatpush3.xpose.msk.msra.mxu1 %vm2130_vm3, %v4309_v14  ;;  %9598 = vmatprep.mubr.msk.f32.mxu0 %vm11263_vm6, %v11264_v10 }
0x189c   : > { %10187 = vmatprep.subr.bf16.mxu1 %v11262_v45 }
0x189e   : > { %9604 = vmatmul.mubr.msk.f32.vlgmr.msra.gmra.mrb[18].mxu1 %vm2130_vm3, %v4307_v50  ;;  %v8883_v50 = vld [vmem:[%s12778_s4] ss:$0 sm:$0xff] }
0x189f   : > { %9619 = vmatprep.mubr.msk.f32.mxu1 %vm11263_vm6, %v11264_v10  ;;  %10189 = vmatpush3.bf16.msra.mxu1 %v10188_v40 }
0x18a0   : > { %10190 = vmatprep.subr.bf16.mxu1 %v11262_v45 }
0x18a3   : > { %10192 = vmatpush3.bf16.msra.mxu1 %v10191_v35 }
0x18eb   : > { %v9557_v51 = vpop.f32.mrb[14].mxu1 }
0x18ec   : > { %v3818_v52 = vpop.f32.mrb[15].mxu1  ;;  %v3824_v17 = vadd.f32 %v9557_v51, %v8868_v15 }
0x18ed   : > { %v12029_v53 = vadd.f32 %v8868_v15, %v3818_v52 }
0x18ee   : > { %v3828_v18 = vadd.f32 %v3824_v17, %v11970_v6 }
0x18f0   : > { %v3834_v19 = vsel %vm1941_vm2, %v3828_v18, 0.0 }
0x18f3   : > { %v4139_v54 = vpop.f32.mrb[16].mxu1 }
0x18f4   : > { %v9590_v55 = vpop.f32.mrb[17].mxu1 }
0x196d   : > { %v4216_v56 = vpop.f32.mrb[26].mxu0 }
0x196e   : > { %v4220_v57 = vmul.f32 0.25, %v4216_v56  ;;  %v9595_v39 = vpop.f32.mrb[27].mxu0  ;;  %v4582_v56 = vld [vmem:[%s12779_s11] sm:$0xff] }
0x1970   : > { %v4222_v58 = vsel %vm4221_vm7, %v4220_v57, -inf }
0x1971   : > { %4223 = vmax.xlane.f32.xlu1 %v4222_v58  ;;  %v4380_v59 = vpop.f32.mrb[18].mxu1  ;;  %v12070_v58 = vld [vmem:[%s12780_s19] ss:$0 sm:$0xff] }
0x1972   : > { %v4384_v60 = vmul.f32 0.25, %v4380_v59  ;;  %v9605_v61 = vpop.f32.mrb[19].mxu1 }
0x1974   : > { %v4385_v62 = vsel %vm4221_vm7, %v4384_v60, -inf }
0x1975   : > { %4386 = vmax.xlane.f32.xlu0 %v4385_v62 }
0x198b   : > { %4067 = vrot.lane.b32.xlu0 %v8875_v44, %s12768_s1  ;;  %v3827_v44 = vadd.f32 %v12029_v53, %v11964_v1 }
0x198d   : > { %v3831_v46 = vsel %vm1941_vm2, %v3827_v44, 0.0 }
0x19fe   : > { %v4224_v63 = vpop.xlane.xlu1 %4223 }
0x19ff   : > { %v4225_v0 = vsub.f32 %v4220_v57, %v4224_v63  ;;  %v4583_v57 = vld [vmem:[%s12779_s11 + $0x8] sm:$0xff] }
0x1a00   : > { %v10664_v39 = vpack.i.bf16 %v4583_v57, %v4582_v56 }
0x1a01   : > { %v4226_v2 = vmul.f32 1.442695, %v4225_v0 }
0x1a02   : > { %v4387_v3 = vpop.xlane.xlu0 %4386 }
0x1a03   : > { %10778 = vpow2.f32 %v4226_v2  ;;  %v4388_v4 = vsub.f32 %v4384_v60, %v4387_v3 }
0x1a05   : > { %v4389_v5 = vmul.f32 1.442695, %v4388_v4 }
0x1a06   : > { %v4068_v7 = vpop.permute.xlu0 %4067 }
0x1a07   : > { %10780 = vpow2.f32 %v4389_v5  ;;  %v4140_v8 = vadd.f32 %v4139_v54, %v4068_v7 }
0x1a09   : > { %9597 = vmatpush3.msra.mxu0 %v4140_v8 }
0x1a0a   : > { %9606 = vmatprep.subr.mxu0 %v11264_v10 }
0x1a0d   : > { %v10779_v9 = vpop.eup %10778 }
0x1a0e   : > { %v4228_v11 = vsel %vm4221_vm7, %v10779_v9, 0.0 }
0x1a0f   : > { %4229 = vadd.xlane.f32.xlu1 %v4228_v11 }
0x1a11   : > { %v10781_v13 = vpop.eup %10780 }
0x1a12   : > { %v4391_v16 = vsel %vm4221_vm7, %v10781_v13, 0.0 }
0x1a13   : > { %4392 = vadd.xlane.f32.xlu1 %v4391_v16  ;;  %v8871_v16 = vld [vmem:[%s12766_s5 + $0x1] ss:$0 sm:$0xff]  ;;  %s12781_s5 = sld [smem:[#allocation61_spill]] }
0x1a24   : > { %4397 = vrot.lane.b32.xlu1 %v4140_v8, %s12771_s12 }
0x1a48   : > { %3835 = vadd.xlane.f32.xlu1 %v3834_v19  ;;  %v4584_v19 = vld [vmem:[%s12779_s11 + $0x10] sm:$0xff] }
0x1a9c   : > { %v4230_v20 = vpop.xlane.xlu1 %4229 }
0x1a9d   : > { %10782 = vrcp.f32 %v4230_v20  ;;  %v4585_v20 = vld [vmem:[%s12779_s11 + $0x18] sm:$0xff] }
0x1aa0   : > { %v4393_v21 = vpop.xlane.xlu1 %4392 }
0x1aa1   : > { %10784 = vrcp.f32 %v4393_v21 }
0x1aa4   : > { %v4398_v24 = vpop.permute.xlu1 %4397 }
0x1aa7   : > { %v10783_v22 = vpop.eup %10782 }
0x1aa8   : > { %v4232_v23 = vmul.f32 %v10783_v22, %v10779_v9  ;;  %v10858_v22 = vld [vmem:[%s11756_s15] sm:$0xff] }
0x1aaa   : > { %9599 = vmatmul.mubr.msk.f32.vlgmr.msra.gmra.mrb[28].mxu0 %vm4221_vm7, %v4232_v23 }
0x1aab   : > { %v10785_v25 = vpop.eup %10784  ;;  %9607 = vmatpush3.msra.mxu0 %v4398_v24  ;;  %9608 = vmatprep.mubr.msk.f32.mxu0 %vm11263_vm6, %v11264_v10  ;;  %v10669_v24 = vpack.i.bf16 %v4585_v20, %v4584_v19 }
0x1aac   : > { %v4395_v6 = vmul.f32 %v10785_v25, %v10781_v13  ;;  %10193 = vmatprep.subr.bf16.mxu0 %v11262_v45 }
0x1aae   : > { %9609 = vmatmul.mubr.msk.f32.vlgmr.msra.gmra.mrb[30].mxu0 %vm4221_vm7, %v4395_v6  ;;  %v10194_v6 = vpack.c.bf16 %v4583_v57, %v4582_v56 }
0x1aaf   : > { %9630 = vmatprep.mubr.msk.f32.mxu0 %vm11263_vm6, %v11264_v10 }
0x1ab0   : > { %10195 = vmatpush3.bf16.msra.mxu0 %v10194_v6 }
0x1ab1   : > { %10196 = vmatprep.subr.bf16.mxu0 %v11262_v45 }
0x1ad5   : > { %v3836_v26 = vpop.xlane.xlu1 %3835 }
0x1ad6   : > { %v3838_v27 = vmul.f32 0.03125, %v3836_v26  ;;  %v10197_v26 = vpack.c.bf16 %v4585_v20, %v4584_v19 }
0x1ad8   : > { %v12047_v28 = vsub.f32 %v3828_v18, %v3838_v27  ;;  %v8872_v18 = vld [vmem:[%s12767_s6 + $0x1] ss:$0 sm:$0xff]  ;;  %10198 = vmatpush3.bf16.msra.mxu0 %v10197_v26  ;;  %s12782_s6 = sld [smem:[#allocation62_spill]] }
0x1ada   : > { %v3842_v29 = vmul.f32 %v12047_v28, %v12047_v28 }
0x1adc   : > { %v3846_v31 = vsel %vm1941_vm2, %v3842_v29, 0.0 }
0x1add   : > { %3847 = vadd.xlane.f32.xlu1 %v3846_v31 }
0x1aee   : > { %10665 = vrot.lane.b32.xlu1 %v10664_v39, %s12769_s8 }
0x1af2   : > { %4686 = vrot.lane.b32.xlu1 %v12070_v58, %s12769_s8 }
0x1af6   : > { %10675 = vrot.lane.b32.xlu1 %v10664_v39, %s12768_s1 }
0x1b6a   : > { %v3848_v4 = vpop.xlane.xlu1 %3847 }
0x1b6b   : > { %v3850_v33 = vmul.f32 0.03125, %v3848_v4 }
0x1b6d   : > { %v3852_v34 = vadd.f32 1e-05, %v3850_v33 }
0x1b6e   : > { %v10666_v5 = vpop.permute.xlu1 %10665 }
0x1b6f   : > { %v10668_v7 = vunpack.i.h.bf16 %v10666_v5  ;;  %v10667_v8 = vunpack.i.l.bf16 %v10666_v5 }
0x1b71   : > { %v10199_v13 = vpack.c.bf16 %v10668_v7, %v10667_v8 }
0x1b72   : > { %v4687_v25 = vpop.permute.xlu1 %4686 }
0x1b73   : > { %10200 = vmatprep.subr.bf16.mxu1 %v10199_v13 }
0x1b76   : > { %v10676_v27 = vpop.permute.xlu1 %10675 }
0x1b77   : > { %v10678_v29 = vunpack.i.h.bf16 %v10676_v27  ;;  %v10677_v31 = vunpack.i.l.bf16 %v10676_v27 }
0x1b79   : > { %v10207_v32 = vpack.c.bf16 %v10678_v29, %v10677_v31 }
0x1b7b   : > { %10208 = vmatprep.subr.bf16.mxu0 %v10207_v32 }
0x1b7d   : > { %v4302_v36 = vpop.f32.mrb[28].mxu0 }
0x1b7e   : > { %v9600_v37 = vpop.f32.mrb[29].mxu0 }
0x1b81   : > { %v4469_v42 = vpop.f32.mrb[30].mxu0 }
0x1b82   : > { %4474 = vrot.lane.b32.xlu0 %v4469_v42, %s12772_s14  ;;  %v9610_v43 = vpop.f32.mrb[31].mxu0 }
0x1ba1   : > { %3832 = vadd.xlane.f32.xlu0 %v3831_v46 }
0x1bf4   : > { %v4475_v47 = vpop.permute.xlu0 %4474 }
0x1bf5   : > { %v4477_v48 = vsel %vm2130_vm3, %v4302_v36, %v4475_v47 }
0x1bf6   : > { %9620 = vmatmul.mubr.msk.f32.vlgmr.msra.gmra.mrb[20].mxu1 %vm1941_vm2, %v4477_v48 }
0x1bf7   : > { %10202 = vmatpush3.bf16.msra.mxu1 %v10199_v13 }
0x1c2e   : > { %v3833_v49 = vpop.xlane.xlu0 %3832 }
0x1c2f   : > { %v3837_v14 = vmul.f32 0.03125, %v3833_v49  ;;  %v10859_v49 = vld [vmem:[%s11756_s15 + $0x8] sm:$0xff]  ;;  %s12783_s15 = sld [smem:[#allocation55_spill]] }
0x1c31   : > { %v3839_v15 = vsub.f32 %v3827_v44, %v3837_v14 }
0x1c33   : > { %v3841_v53 = vmul.f32 %v3839_v15, %v3839_v15 }
0x1c35   : > { %v3843_v55 = vsel %vm1941_vm2, %v3841_v53, 0.0 }
0x1cc9   : > { %v4551_v51 = vpop.f32.mrb[20].mxu1 }
0x1cca   : > { %v4552_v52 = vadd.f32 %v8883_v50, %v4551_v51  ;;  %v9621_v54 = vpop.f32.mrb[21].mxu1  ;;  %v8885_v50 = vld [vmem:[%s12781_s5] ss:$0 sm:$0xff] }
0x1ccc   : > { %v4558_v1 = vsel %vm1941_vm2, %v4552_v52, 0.0 }
0x1ccd   : > { %4559 = vadd.xlane.f32.xlu0 %v4558_v1 }
0x1cd1   : > { %3844 = vadd.xlane.f32.xlu0 %v3843_v55 }
0x1d5a   : > { %v4560_v59 = vpop.xlane.xlu0 %4559 }
0x1d5b   : > { %v4561_v60 = vmul.f32 0.03125, %v4560_v59 }
0x1d5d   : > { %v12075_v61 = vsub.f32 %v4552_v52, %v4561_v60  ;;  %v8886_v52 = vld [vmem:[%s12782_s6] ss:$0 sm:$0xff] }
0x1d5e   : > { %v3845_v62 = vpop.xlane.xlu0 %3844 }
0x1d5f   : > { %v3849_v63 = vmul.f32 0.03125, %v3845_v62  ;;  %v4563_v0 = vmul.f32 %v12075_v61, %v12075_v61 }
0x1d61   : > { %v3851_v2 = vadd.f32 1e-05, %v3849_v63  ;;  %v4564_v3 = vsel %vm1941_vm2, %v4563_v0, 0.0 }
0x1d62   : > { %4565 = vadd.xlane.f32.xlu0 %v4564_v3 }
0x1d63   : > { %10786 = vrsqrt.f32 %v3851_v2 }
0x1d64   : > { %10788 = vrsqrt.f32 %v3852_v34 }
0x1d6d   : > { %v10787_v9 = vpop.eup %10786 }
0x1d6e   : > { %v3855_v11 = vmul.f32 %v10787_v9, %v3839_v15  ;;  %v10789_v40 = vpop.eup %10788  ;;  %v10860_v9 = vld [vmem:[%s11800_s2] ss:$0 sm:$0xff] }
0x1d6f   : > { %v3856_v41 = vmul.f32 %v10789_v40, %v12047_v28 }
0x1d70   : > { %v3861_v17 = vmul.f32 %v8871_v16, %v3855_v11 }
0x1d71   : > { %v3862_v37 = vmul.f32 %v8871_v16, %v3856_v41 }
0x1d72   : > { %v12084_v21 = vadd.f32 %v8872_v18, %v3861_v17 }
0x1d73   : > { %v12096_v47 = vadd.f32 %v8872_v18, %v3862_v37 }
0x1d74   : > { %v12088_v23 = vadd.f32 %v10858_v22, %v12084_v21 }
0x1d75   : > { %v12100_v14 = vadd.f32 %v10859_v49, %v12096_v47 }
0x1d76   : > { %9641 = vmatprep.mubr.msk.f32.mxu1 %vm1941_vm2, %v12088_v23 }
0x1d78   : > { %10670 = vrot.lane.b32.xlu0 %v10669_v24, %s12769_s8 }
0x1d7c   : > { %10680 = vrot.lane.b32.xlu0 %v10669_v24, %s12768_s1 }
0x1def   : > { %v4566_v35 = vpop.xlane.xlu0 %4565 }
0x1df0   : > { %v4567_v36 = vmul.f32 0.03125, %v4566_v35 }
0x1df2   : > { %v4568_v42 = vadd.f32 1e-05, %v4567_v36 }
0x1df3   : > { %v10671_v43 = vpop.permute.xlu0 %10670 }
0x1df4   : > { %10790 = vrsqrt.f32 %v4568_v42  ;;  %v10673_v44 = vunpack.i.h.bf16 %v10671_v43  ;;  %v10672_v46 = vunpack.i.l.bf16 %v10671_v43 }
0x1df6   : > { %v10203_v48 = vpack.c.bf16 %v10673_v44, %v10672_v46 }
0x1df7   : > { %v10681_v15 = vpop.permute.xlu0 %10680 }
0x1df8   : > { %10204 = vmatprep.subr.bf16.mxu1 %v10203_v48  ;;  %v10683_v1 = vunpack.i.h.bf16 %v10681_v15  ;;  %v10682_v53 = vunpack.i.l.bf16 %v10681_v15 }
0x1df9   : > { %10206 = vmatpush3.bf16.msra.mxu1 %v10203_v48 }
0x1dfa   : > { %10215 = vmatprep.subr.bf16.mxu1 %v11262_v45  ;;  %v10211_v56 = vpack.c.bf16 %v10683_v1, %v10682_v53 }
0x1dfc   : > { %9642 = vmatmul.mubr.msk.f32.vlgmr.msra.gmra.mrb[22].mxu1 %vm1941_vm2, %v12100_v14 }
0x1dfd   : > { %9659 = vmatprep.mubr.msk.f32.mxu1 %vm11263_vm6, %v11264_v10 }
0x1dfe   : > { %v10791_v28 = vpop.eup %10790 }
0x1dff   : > { %v4570_v51 = vmul.f32 %v10791_v28, %v12075_v61 }
0x1e01   : > { %v4575_v54 = vmul.f32 %v8885_v50, %v4570_v51 }
0x1e03   : > { %v12110_v55 = vadd.f32 %v8886_v52, %v4575_v54 }
0x1e05   : > { %v4581_v57 = vadd.f32 %v12110_v55, %v11982_v12 }
0x1e07   : > { %9631 = vmatmul.mubr.msk.f32.vlgmr.msra.gmra.mrb[32].mxu0 %vm1941_vm2, %v4581_v57  ;;  %v4587_v57 = vld [vmem:[%s12783_s15] sm:$0xff] }
0x1e08   : > { %10210 = vmatpush3.bf16.msra.mxu0 %v10207_v32  ;;  %9652 = vmatprep.mubr.msk.f32.mxu0 %vm1941_vm2, %v12084_v21 }
0x1e09   : > { %10212 = vmatprep.subr.bf16.mxu0 %v10211_v56 }
0x1e0c   : > { %10214 = vmatpush3.bf16.msra.mxu0 %v10211_v56 }
0x1e0d   : > { %10219 = vmatprep.subr.bf16.mxu0 %v11262_v45 }
0x1e0f   : > { %9653 = vmatmul.mubr.msk.f32.vlgmr.msra.gmra.mrb[34].mxu0 %vm1941_vm2, %v12096_v47 }
0x1e10   : > { %9666 = vmatprep.mubr.msk.f32.mxu0 %vm11263_vm6, %v11264_v10 }
0x1ecf   : > { %v9643_v39 = vpop.f32.mrb[22].mxu1 }
0x1ed0   : > { %v4767_v59 = vadd.f32 %v9643_v39, %v4687_v25  ;;  %v4761_v60 = vpop.f32.mrb[23].mxu1  ;;  %v4588_v39 = vld [vmem:[%s12783_s15 + $0x8] sm:$0xff] }
0x1ed1   : > { %v4762_v12 = vadd.f32 %v4761_v60, %v4687_v25  ;;  %v10230_v60 = vpack.c.bf16 %v4588_v39, %v4587_v57 }
0x1ed3   : > { %v10684_v61 = vpack.i.bf16 %v4767_v59, %v4762_v12  ;;  %v10216_v62 = vpack.c.bf16 %v4767_v59, %v4762_v12  ;;  %v4589_v59 = vld [vmem:[%s12783_s15 + $0x10] sm:$0xff]  ;;  %v4590_v12 = vld [vmem:[%s12783_s15 + $0x18] sm:$0xff] }
0x1ed5   : > { %10218 = vmatpush3.bf16.xpose.msk.msra.mxu1 %vm11787_vm4, %v10216_v62 }
0x1ed6   : > { %10226 = vmatprep.subr.bf16.mxu1 %v11262_v45 }
0x1eda   : > { %v4665_v63 = vpop.f32.mrb[32].mxu0 }
0x1edb   : > { %v4666_v0 = vadd.f32 %v12070_v58, %v4665_v63  ;;  %v9632_v2 = vpop.f32.mrb[33].mxu0 }
0x1edd   : > { %9660 = vmatmul.mubr.msk.f32.vlgmr.msra.gmra.mrb[24].mxu1 %vm2130_vm3, %v4666_v0 }
0x1ede   : > { %9680 = vmatprep.mubr.msk.f32.mxu1 %vm11263_vm6, %v11264_v10 }
0x1ee2   : > { %v9654_v3 = vpop.f32.mrb[34].mxu0 }
0x1ee3   : > { %v4857_v4 = vpop.f32.mrb[35].mxu0 }
0x1fb0   : > { %v4941_v5 = vpop.f32.mrb[24].mxu1 }
0x1fb1   : > { %v4945_v7 = vmul.f32 0.25, %v4941_v5  ;;  %v9661_v8 = vpop.f32.mrb[25].mxu1 }
0x1fb3   : > { %v4946_v11 = vadd.f32 %v10860_v9, %v4945_v7 }
0x1fb5   : > { %v4947_v13 = vsel %vm2130_vm3, %v4946_v11, -inf }
0x1fb6   : > { %4948 = vmax.xlane.f32.xlu1 %v4947_v13 }
0x1fc7   : > { %10685 = vrot.lane.b32.xlu1 %v10684_v61, %s12771_s12  ;;  %v10233_v61 = vpack.c.bf16 %v4590_v12, %v4589_v59 }
0x1fcb   : > { %5031 = vrot.lane.b32.xlu1 %v4666_v0, %s12771_s12 }
0x2043   : > { %v4949_v16 = vpop.xlane.xlu1 %4948 }
0x2044   : > { %v4950_v17 = vsub.f32 %v4946_v11, %v4949_v16 }
0x2046   : > { %v4951_v18 = vmul.f32 1.442695, %v4950_v17 }
0x2047   : > { %v10686_v29 = vpop.permute.xlu1 %10685 }
0x2048   : > { %10792 = vpow2.f32 %v4951_v18  ;;  %v10688_v32 = vunpack.i.h.bf16 %v10686_v29  ;;  %v10687_v33 = vunpack.i.l.bf16 %v10686_v29 }
0x204b   : > { %v5032_v40 = vpop.permute.xlu1 %5031 }
0x2052   : > { %v10793_v19 = vpop.eup %10792 }
0x2053   : > { %v4953_v20 = vsel %vm2130_vm3, %v10793_v19, 0.0 }
0x2054   : > { %4954 = vadd.xlane.f32.xlu0 %v4953_v20  ;;  %v5316_v20 = vld [vmem:[%s12785_s22 + $0x8] sm:$0xff] }
0x206a   : > { %4782 = vrot.lane.b32.xlu0 %v12070_v58, %s12768_s1  ;;  %v10223_v58 = vpack.c.bf16 %v10688_v32, %v10687_v33  ;;  %v5402_v33 = vld [vmem:[%s12786_s23 + $0x20] sm:$0xff] }
0x20e1   : > { %v4955_v22 = vpop.xlane.xlu0 %4954 }
0x20e2   : > { %10794 = vrcp.f32 %v4955_v22 }
0x20e5   : > { %v4783_v24 = vpop.permute.xlu0 %4782 }
0x20e6   : > { %v4858_v25 = vadd.f32 %v4857_v4, %v4783_v24  ;;  %v4863_v6 = vadd.f32 %v9654_v3, %v4783_v24  ;;  %v8901_v3 = vld [vmem:[%s12784_s21] ss:$0 sm:$0xff]  ;;  %v5318_v24 = vld [vmem:[%s12785_s22 + $0x18] sm:$0xff] }
0x20e8   : > { %v10689_v26 = vpack.i.bf16 %v4863_v6, %v4858_v25  ;;  %v10220_v27 = vpack.c.bf16 %v4863_v6, %v4858_v25  ;;  %v5398_v6 = vld [vmem:[%s12786_s23] sm:$0xff] }
0x20ea   : > { %10221 = vmatpush3.bf16.msra.mxu0 %v10220_v27  ;;  %v5400_v27 = vld [vmem:[%s12786_s23 + $0x10] sm:$0xff] }
0x20eb   : > { %10222 = vmatprep.subr.bf16.mxu0 %v11262_v45 }
0x20ec   : > { %v10795_v31 = vpop.eup %10794 }
0x20ed   : > { %v4957_v34 = vmul.f32 %v10795_v31, %v10793_v19  ;;  %v5315_v19 = vld [vmem:[%s12785_s22] sm:$0xff]  ;;  %v5401_v31 = vld [vmem:[%s12786_s23 + $0x18] sm:$0xff] }
0x20ee   : > { %v10236_v22 = vpack.c.bf16 %v5316_v20, %v5315_v19  ;;  %v10245_v32 = vpack.c.bf16 %v5401_v31, %v5400_v27 }
0x20ef   : > { %9667 = vmatmul.mubr.msk.f32.vlgmr.msra.gmra.mrb[36].mxu0 %vm2130_vm3, %v4957_v34  ;;  %v5403_v34 = vld [vmem:[%s12786_s23 + $0x28] sm:$0xff] }
0x20f0   : > { %9673 = vmatprep.mubr.msk.f32.mxu0 %vm11263_vm6, %v11264_v10 }
0x20f3   : > { %10225 = vmatpush3.bf16.xpose.msk.msra.mxu0 %vm11787_vm4, %v10223_v58  ;;  %v10248_v58 = vpack.c.bf16 %v5403_v34, %v5402_v33  ;;  %v8911_v33 = vld [vmem:[#allocation6] ss:$0 sm:$0xff] }
0x20f4   : > { %10235 = vmatprep.subr.bf16.mxu0 %v11262_v45 }
0x20fa   : > { %9674 = vmatmul.mubr.msk.f32.vlgmr.msra.gmra.mrb[38].mxu0 %vm2130_vm3, %v5032_v40 }
0x20fb   : > { %9702 = vmatprep.mubr.msk.f32.mxu0 %vm11263_vm6, %v11264_v10  ;;  %10237 = vmatpush3.bf16.msra.mxu0 %v10236_v22  ;;  %v5539_v22 = vld [vmem:[%s12793_s24] sm:$0xff] }
0x20fc   : > { %10238 = vmatprep.subr.bf16.mxu0 %v11262_v45 }
0x21c2   : > { %v5027_v41 = vpop.f32.mrb[36].mxu0 }
0x21c3   : > { %v9668_v35 = vpop.f32.mrb[37].mxu0 }
0x21cd   : > { %v5109_v36 = vpop.f32.mrb[38].mxu0 }
0x21ce   : > { %v5113_v37 = vmul.f32 0.25, %v5109_v36  ;;  %v9675_v42 = vpop.f32.mrb[39].mxu0 }
0x21d0   : > { %v5114_v43 = vadd.f32 %v10860_v9, %v5113_v37  ;;  %v8903_v37 = vld [vmem:[%s12787_s26] ss:$0 sm:$0xff] }
0x21d2   : > { %v5115_v44 = vsel %vm2130_vm3, %v5114_v43, -inf }
0x21d3   : > { %5116 = vmax.xlane.f32.xlu0 %v5115_v44 }
0x21e9   : > { %10690 = vrot.lane.b32.xlu0 %v10689_v26, %s12771_s12  ;;  %v5399_v26 = vld [vmem:[%s12786_s23 + $0x8] sm:$0xff] }
0x21ea   : > { %v10242_v29 = vpack.c.bf16 %v5399_v26, %v5398_v6  ;;  %v5542_v6 = vld [vmem:[%s12793_s24 + $0x18] sm:$0xff] }
0x2260   : > { %v5117_v46 = vpop.xlane.xlu0 %5116 }
0x2261   : > { %v5118_v48 = vsub.f32 %v5114_v43, %v5117_v46  ;;  %v8904_v43 = vld [vmem:[%s12788_s27] ss:$0 sm:$0xff] }
0x2263   : > { %v5119_v49 = vmul.f32 1.442695, %v5118_v48  ;;  %v5404_v48 = vld [vmem:[%s12786_s23 + $0x30] sm:$0xff] }
0x2264   : > { %v10691_v28 = vpop.permute.xlu0 %10690 }
0x2265   : > { %10796 = vpow2.f32 %v5119_v49  ;;  %v10693_v50 = vunpack.i.h.bf16 %v10691_v28  ;;  %v10692_v15 = vunpack.i.l.bf16 %v10691_v28  ;;  %v5405_v49 = vld [vmem:[%s12786_s23 + $0x38] sm:$0xff] }
0x2266   : > { %v10251_v28 = vpack.c.bf16 %v5405_v49, %v5404_v48  ;;  %v5706_v48 = vld [vmem:[%s12795_s0 + $0x8] sm:$0xff] }
0x2267   : > { %v10227_v51 = vpack.c.bf16 %v10693_v50, %v10692_v15  ;;  %v8905_v50 = vld [vmem:[%s12789_s29] ss:$0 sm:$0xff] }
0x2269   : > { %10228 = vmatpush3.bf16.msra.mxu1 %v10227_v51 }
0x226a   : > { %10229 = vmatprep.subr.bf16.mxu1 %v11262_v45 }
0x226f   : > { %v10797_v52 = vpop.eup %10796 }
0x2270   : > { %v5121_v54 = vsel %vm2130_vm3, %v10797_v52, 0.0 }
0x2271   : > { %5122 = vadd.xlane.f32.xlu1 %v5121_v54 }
0x22fe   : > { %v5123_v1 = vpop.xlane.xlu1 %5122 }
0x22ff   : > { %10798 = vrcp.f32 %v5123_v1  ;;  %v8907_v1 = vld [vmem:[%s12790_s30] ss:$0 sm:$0xff] }
0x2309   : > { %v10799_v53 = vpop.eup %10798 }
0x230a   : > { %v5125_v56 = vmul.f32 %v10799_v53, %v10797_v52 }
0x230c   : > { %9681 = vmatmul.mubr.msk.f32.vlgmr.msra.gmra.mrb[26].mxu1 %vm2130_vm3, %v5125_v56 }
0x230d   : > { %9691 = vmatprep.mubr.msk.f32.mxu1 %vm11263_vm6, %v11264_v10  ;;  %10231 = vmatpush3.bf16.msra.mxu1 %v10230_v60 }
0x230e   : > { %10232 = vmatprep.subr.bf16.mxu1 %v11262_v45 }
0x2311   : > { %10234 = vmatpush3.bf16.msra.mxu1 %v10233_v61 }
0x2312   : > { %10241 = vmatprep.subr.bf16.mxu1 %v11262_v45 }
0x23df   : > { %v5203_v62 = vpop.f32.mrb[26].mxu1 }
0x23e0   : > { %5208 = vrot.lane.b32.xlu1 %v5203_v62, %s12772_s14  ;;  %v9682_v63 = vpop.f32.mrb[27].mxu1 }
0x2452   : > { %v5209_v0 = vpop.permute.xlu1 %5208 }
0x2453   : > { %v5211_v2 = vsel %vm2130_vm3, %v5027_v41, %v5209_v0 }
0x2454   : > { %9692 = vmatmul.mubr.msk.f32.vlgmr.msra.gmra.mrb[28].mxu1 %vm1941_vm2, %v5211_v2 }
0x2455   : > { %9721 = vmatprep.mubr.msk.f32.mxu1 %vm11263_vm6, %v11264_v10  ;;  %10243 = vmatpush3.bf16.msra.mxu1 %v10242_v29 }
0x2456   : > { %10244 = vmatprep.subr.bf16.mxu1 %v11262_v45 }
0x2459   : > { %10246 = vmatpush3.bf16.msra.mxu1 %v10245_v32 }
0x245a   : > { %10247 = vmatprep.subr.bf16.mxu1 %v11262_v45 }
0x245d   : > { %10249 = vmatpush3.bf16.msra.mxu1 %v10248_v58  ;;  %v5622_v58 = vld [vmem:[%s12794_s25] sm:$0xff] }
0x245e   : > { %10250 = vmatprep.subr.bf16.mxu1 %v11262_v45 }
0x2461   : > { %10252 = vmatpush3.bf16.msra.mxu1 %v10251_v28  ;;  %v8913_v28 = vld [vmem:[#allocation9] ss:$0 sm:$0xff] }
0x2462   : > { %10265 = vmatprep.subr.bf16.mxu1 %v11262_v45 }
0x2527   : > { %v5285_v4 = vpop.f32.mrb[28].mxu1 }
0x2528   : > { %v5286_v5 = vadd.f32 %v8901_v3, %v5285_v4  ;;  %v9693_v7 = vpop.f32.mrb[29].mxu1 }
0x252a   : > { %v5289_v8 = vadd.f32 %v5286_v5, %v12110_v55  ;;  %v5317_v55 = vld [vmem:[%s12785_s22 + $0x10] sm:$0xff]  ;;  %v8909_v5 = vld [vmem:[%s12791_s7] ss:$0 sm:$0xff] }
0x252b   : > { %v10239_v25 = vpack.c.bf16 %v5318_v24, %v5317_v55  ;;  %v5540_v55 = vld [vmem:[%s12793_s24 + $0x8] sm:$0xff] }
0x252c   : > { %v5292_v9 = vsel %vm1941_vm2, %v5289_v8, 0.0  ;;  %v10254_v24 = vpack.c.bf16 %v5540_v55, %v5539_v22 }
0x252d   : > { %5293 = vadd.xlane.f32.xlu0 %v5292_v9  ;;  %10240 = vmatpush3.bf16.msra.mxu0 %v10239_v25  ;;  %v5541_v25 = vld [vmem:[%s12793_s24 + $0x10] sm:$0xff] }
0x252e   : > { %10253 = vmatprep.subr.bf16.mxu0 %v11262_v45  ;;  %v10257_v26 = vpack.c.bf16 %v5542_v6, %v5541_v25  ;;  %v8928_v6 = vld [vmem:[%s12774_s17 + $0x20] sm:$0xff] }
0x25ba   : > { %v5294_v11 = vpop.xlane.xlu0 %5293 }
0x25bb   : > { %v5295_v13 = vmul.f32 0.03125, %v5294_v11 }
0x25bd   : > { %v5296_v16 = vsub.f32 %v5289_v8, %v5295_v13  ;;  %v8910_v8 = vld [vmem:[%s12792_s20] ss:$0 sm:$0xff] }
0x25bf   : > { %v5297_v17 = vmul.f32 %v5296_v16, %v5296_v16 }
0x25c1   : > { %v5298_v18 = vsel %vm1941_vm2, %v5297_v17, 0.0 }
0x25c2   : > { %5299 = vadd.xlane.f32.xlu1 %v5298_v18 }
0x264f   : > { %v5300_v40 = vpop.xlane.xlu1 %5299 }
0x2650   : > { %v5301_v41 = vmul.f32 0.03125, %v5300_v40  ;;  %v5623_v40 = vld [vmem:[%s12794_s25 + $0x8] sm:$0xff] }
0x2652   : > { %v5302_v35 = vadd.f32 1e-05, %v5301_v41  ;;  %v8912_v41 = vld [vmem:[#allocation7] ss:$0 sm:$0xff] }
0x2654   : > { %10800 = vrsqrt.f32 %v5302_v35 }
0x265e   : > { %v10801_v36 = vpop.eup %10800 }
0x265f   : > { %v5304_v42 = vmul.f32 %v10801_v36, %v5296_v16  ;;  %v10260_v36 = vpack.c.bf16 %v5623_v40, %v5622_v58 }
0x2661   : > { %v5309_v44 = vmul.f32 %v8903_v37, %v5304_v42  ;;  %v5624_v42 = vld [vmem:[%s12794_s25 + $0x10] sm:$0xff] }
0x2663   : > { %v5314_v46 = vadd.f32 %v8904_v43, %v5309_v44  ;;  %v5625_v43 = vld [vmem:[%s12794_s25 + $0x18] sm:$0xff]  ;;  %s12797_s25 = sld [smem:[#allocation73_spill]] }
0x2664   : > { %v10263_v44 = vpack.c.bf16 %v5625_v43, %v5624_v42 }
0x2665   : > { %9703 = vmatmul.mubr.msk.f32.vlgmr.msra.gmra.mrb[40].mxu0 %vm1941_vm2, %v5314_v46 }
0x2666   : > { %9732 = vmatprep.mubr.msk.f32.mxu0 %vm11263_vm6, %v11264_v10  ;;  %10255 = vmatpush3.bf16.msra.mxu0 %v10254_v24 }
0x2667   : > { %10256 = vmatprep.subr.bf16.mxu0 %v11262_v45 }
0x266a   : > { %10258 = vmatpush3.bf16.msra.mxu0 %v10257_v26  ;;  %v8929_v26 = vld [vmem:[%s12774_s17 + $0x28] sm:$0xff] }
0x266b   : > { %10259 = vmatprep.subr.bf16.mxu0 %v11262_v45 }
0x2738   : > { %v5393_v15 = vpop.f32.mrb[40].mxu0 }
0x2739   : > { %v5394_v51 = vadd.f32 %v8905_v50, %v5393_v15  ;;  %v9704_v52 = vpop.f32.mrb[41].mxu0  ;;  %v5803_v50 = vld [vmem:[%s12796_s16] sm:$0xff]  ;;  %v5804_v15 = vld [vmem:[%s12796_s16 + $0x8] sm:$0xff] }
0x273b   : > { %v5397_v54 = vmax.f32 %v5394_v51, 0.0 }
0x273d   : > { %9722 = vmatmul.mubr.msk.f32.vlgmr.msra.gmra.mrb[30].mxu1 %vm2776_vm5, %v5397_v54 }
0x273e   : > { %9754 = vmatprep.mubr.msk.f32.mxu1 %vm11263_vm6, %v11264_v10 }
0x2810   : > { %v5480_v53 = vpop.f32.mrb[30].mxu1 }
0x2811   : > { %v5481_v56 = vadd.f32 %v8907_v1, %v5480_v53  ;;  %v9723_v57 = vpop.f32.mrb[31].mxu1  ;;  %v10272_v1 = vpack.c.bf16 %v5804_v15, %v5803_v50 }
0x2812   : > { %v5806_v57 = vld [vmem:[%s12796_s16 + $0x18] sm:$0xff] }
0x2813   : > { %v5484_v39 = vadd.f32 %v5481_v56, %v5314_v46  ;;  %v5705_v46 = vld [vmem:[%s12795_s0] sm:$0xff]  ;;  %v5805_v56 = vld [vmem:[%s12796_s16 + $0x10] sm:$0xff]  ;;  %s1798_s16 = sand.u32 1, %s11181_s28  }
0x2814   : > { %v10266_v49 = vpack.c.bf16 %v5706_v48, %v5705_v46  ;;  %s12249_s24 = sshll.u32 %s1798_s16, 4  ;;  %s12799_s16 = sld [smem:[#allocation77_spill]] }
0x2815   : > { %v5487_v59 = vsel %vm1941_vm2, %v5484_v39, 0.0  ;;  %s12256_s28 = scalar_lea.vmem [#allocation19], %s12249_s24 }
0x2816   : > { %5488 = vadd.xlane.f32.xlu0 %v5487_v59  ;;  %10267 = vmatpush3.bf16.msra.mxu1 %v10266_v49  ;;  %v5707_v59 = vld [vmem:[%s12795_s0 + $0x10] sm:$0xff] }
0x2817   : > { %10268 = vmatprep.subr.bf16.mxu1 %v11262_v45 }
0x281a   : > { %v6045_v58 = vld [vmem:[%s12799_s16] sm:$0xff]  ;;  %v6046_v40 = vld [vmem:[%s12799_s16 + $0x8] sm:$0xff] }
0x28a3   : > { %v5489_v60 = vpop.xlane.xlu0 %5488 }
0x28a4   : > { %v5490_v12 = vmul.f32 0.03125, %v5489_v60  ;;  %v5708_v60 = vld [vmem:[%s12795_s0 + $0x18] sm:$0xff]  ;;  %s12798_s0 = sld [smem:[#allocation75_spill]] }
0x28a6   : > { %v5491_v61 = vsub.f32 %v5484_v39, %v5490_v12  ;;  %v10275_v39 = vpack.c.bf16 %v5806_v57, %v5805_v56  ;;  %v10269_v12 = vpack.c.bf16 %v5708_v60, %v5707_v59  ;;  %v8921_v60 = vld [vmem:[#allocation13] ss:$0 sm:$0xff] }
0x28a8   : > { %v5492_v62 = vmul.f32 %v5491_v61, %v5491_v61  ;;  %10270 = vmatpush3.bf16.msra.mxu1 %v10269_v12 }
0x28a9   : > { %10277 = vmatprep.subr.bf16.mxu1 %v11262_v45 }
0x28aa   : > { %v5493_v63 = vsel %vm1941_vm2, %v5492_v62, 0.0  ;;  %v5882_v62 = vld [vmem:[%s12797_s25] sm:$0xff]  ;;  %v5964_v55 = vld [vmem:[%s12798_s0 + $0x10] sm:$0xff]  ;;  %v5965_v24 = vld [vmem:[%s12798_s0 + $0x18] sm:$0xff] }
0x28ab   : > { %5494 = vadd.xlane.f32.xlu0 %v5493_v63  ;;  %v5883_v63 = vld [vmem:[%s12797_s25 + $0x8] sm:$0xff]  ;;  %v10287_v25 = vpack.c.bf16 %v5965_v24, %v5964_v55  ;;  %v8923_v24 = vld [vmem:[#allocation15] ss:$0 sm:$0xff] }
0x2938   : > { %v5495_v0 = vpop.xlane.xlu0 %5494 }
0x2939   : > { %v5496_v2 = vmul.f32 0.03125, %v5495_v0 }
0x293b   : > { %v5497_v3 = vadd.f32 1e-05, %v5496_v2 }
0x293d   : > { %10802 = vrsqrt.f32 %v5497_v3 }
0x2947   : > { %v10803_v4 = vpop.eup %10802 }
0x2948   : > { %v5499_v7 = vmul.f32 %v10803_v4, %v5491_v61  ;;  %v8915_v61 = vld [vmem:[#allocation10] ss:$0 sm:$0xff]  ;;  %v10278_v4 = vpack.c.bf16 %v5883_v63, %v5882_v62 }
0x294a   : > { %v5504_v9 = vmul.f32 %v8909_v5, %v5499_v7  ;;  %v5884_v7 = vld [vmem:[%s12797_s25 + $0x10] sm:$0xff] }
0x294c   : > { %v12200_v11 = vadd.f32 %v8910_v8, %v5504_v9  ;;  %v5885_v8 = vld [vmem:[%s12797_s25 + $0x18] sm:$0xff]  ;;  %v8919_v9 = vld [vmem:[%s11538_s13] ss:$0 sm:$0xff] }
0x294e   : > { %v5512_v13 = vsel %vm1941_vm2, %v12200_v11, 0.0 }
0x294f   : > { %5513 = vadd.xlane.f32.xlu1 %v5512_v13  ;;  %v10281_v13 = vpack.c.bf16 %v5885_v8, %v5884_v7 }
0x29dc   : > { %v5514_v16 = vpop.xlane.xlu1 %5513 }
0x29dd   : > { %v5515_v17 = vmul.f32 0.03125, %v5514_v16 }
0x29df   : > { %v5516_v18 = vsub.f32 %v12200_v11, %v5515_v17 }
0x29e1   : > { %v5517_v19 = vmul.f32 %v5516_v18, %v5516_v18 }
0x29e3   : > { %v5518_v20 = vsel %vm1941_vm2, %v5517_v19, 0.0  ;;  %v5962_v19 = vld [vmem:[%s12798_s0] sm:$0xff] }
0x29e4   : > { %5519 = vadd.xlane.f32.xlu0 %v5518_v20  ;;  %v5963_v20 = vld [vmem:[%s12798_s0 + $0x8] sm:$0xff] }
0x29e5   : > { %v10284_v22 = vpack.c.bf16 %v5963_v20, %v5962_v19 }
0x2a71   : > { %v5520_v27 = vpop.xlane.xlu0 %5519 }
0x2a72   : > { %v5521_v29 = vmul.f32 0.03125, %v5520_v27  ;;  %v10296_v27 = vpack.c.bf16 %v8929_v26, %v8928_v6 }
0x2a74   : > { %v5522_v31 = vadd.f32 1e-05, %v5521_v29  ;;  %v8930_v29 = vld [vmem:[%s12774_s17 + $0x30] sm:$0xff] }
0x2a76   : > { %10804 = vrsqrt.f32 %v5522_v31  ;;  %v8931_v31 = vld [vmem:[%s12774_s17 + $0x38] sm:$0xff]  ;;  %s12299_s17 = scalar_lea.vmem [#allocation18], %s12249_s24 }
0x2a80   : > { %v10805_v32 = vpop.eup %10804 }
0x2a81   : > { %v5524_v34 = vmul.f32 %v10805_v32, %v5516_v18  ;;  %v10299_v32 = vpack.c.bf16 %v8931_v31, %v8930_v29 }
0x2a83   : > { %v5531_v35 = vmul.f32 %v8911_v33, %v5524_v34  ;;  %v10694_v33 = vpack.i.bf16 %v8929_v26, %v8928_v6  ;;  %v10699_v34 = vpack.i.bf16 %v8931_v31, %v8930_v29 }
0x2a85   : > { %v12214_v37 = vadd.f32 %v8912_v41, %v5531_v35  ;;  %v10290_v41 = vpack.c.bf16 %v6046_v40, %v6045_v58  ;;  %10695 = vrot.lane.b32.xlu1 %v10694_v33, %s12768_s1  ;;  %10700 = vrot.lane.b32.xlu0 %v10699_v34, %s12768_s1  ;;  %v8873_v35 = vld [vmem:[#allocation4] ss:$0 sm:$0xff]  ;;  %v8936_v58 = vld [vmem:[%s12776_s10 + $0x1] ss:$0 sm:$0xff] }
0x2a87   : > { %9733 = vmatmul.mubr.msk.f32.vlgmr.msra.gmra.mrb[42].mxu0 %vm1941_vm2, %v12214_v37 }
0x2a88   : > { %10261 = vmatpush3.bf16.msra.mxu0 %v10260_v36  ;;  %9743 = vmatprep.mubr.msk.f32.mxu0 %vm11263_vm6, %v11264_v10  ;;  %v3953_v36 = vadd.f32 %v8873_v35, %v12005_v38 }
0x2a89   : > { %10262 = vmatprep.subr.bf16.mxu0 %v11262_v45 }
0x2a8c   : > { %10264 = vmatpush3.bf16.msra.mxu0 %v10263_v44 }
0x2a8d   : > { %10271 = vmatprep.subr.bf16.mxu0 %v11262_v45 }
0x2af7   : > { %v10696_v20 = vpop.permute.xlu1 %10695 }
0x2af8   : > { %v10697_v55 = vunpack.i.l.bf16 %v10696_v20 }
0x2b5a   : > { %v5617_v51 = vpop.f32.mrb[42].mxu0 }
0x2b5b   : > { %v5618_v52 = vadd.f32 %v8913_v28, %v5617_v51  ;;  %v9734_v54 = vpop.f32.mrb[43].mxu0 }
0x2b5d   : > { %v5621_v53 = vmax.f32 %v5618_v52, 0.0 }
0x2b5f   : > { %9744 = vmatmul.mubr.msk.f32.vlgmr.msra.gmra.mrb[44].mxu0 %vm1941_vm2, %v5621_v53 }
0x2b60   : > { %10273 = vmatpush3.bf16.msra.mxu0 %v10272_v1  ;;  %9765 = vmatprep.mubr.msk.f32.mxu0 %vm11263_vm6, %v11264_v10  ;;  %v8917_v1 = vld [vmem:[#allocation12] ss:$0 sm:$0xff] }
0x2b61   : > { %10274 = vmatprep.subr.bf16.mxu0 %v11262_v45 }
0x2b64   : > { %10276 = vmatpush3.bf16.msra.mxu0 %v10275_v39 }
0x2b65   : > { %10283 = vmatprep.subr.bf16.mxu0 %v11262_v45 }
0x2b67   : > { %9766 = vmatmul.mubr.msk.f32.vlgmr.msra.gmra.mrb[46].mxu0 %vm1941_vm2, %v12214_v37 }
0x2b68   : > { %9787 = vmatprep.mubr.msk.f32.mxu0 %vm11263_vm6, %v11264_v10  ;;  %10285 = vmatpush3.bf16.msra.mxu0 %v10284_v22  ;;  %v10698_v22 = vunpack.i.h.bf16 %v10696_v20 }
0x2b69   : > { %10286 = vmatprep.subr.bf16.mxu0 %v11262_v45 }
0x2b6a   : > { %v10302_v29 = vpack.c.bf16 %v10698_v22, %v10697_v55 }
0x2b6c   : > { %10288 = vmatpush3.bf16.msra.mxu0 %v10287_v25  ;;  %v10701_v25 = vpop.permute.xlu0 %10700 }
0x2b6d   : > { %10295 = vmatprep.subr.bf16.mxu0 %v11262_v45  ;;  %v10703_v31 = vunpack.i.h.bf16 %v10701_v25 }
0x2c32   : > { %v5700_v0 = vpop.f32.mrb[44].mxu0 }
0x2c33   : > { %v5701_v2 = vadd.f32 %v8915_v61, %v5700_v0  ;;  %v9745_v3 = vpop.f32.mrb[45].mxu0 }
0x2c34   : > { %v12286_v3 = vld [vmem:[%s12775_s18] sm:$0xff] }
0x2c35   : > { %v5704_v5 = vmax.f32 %v5701_v2, 0.0 }
0x2c37   : > { %9755 = vmatmul.mubr.msk.f32.vlgmr.msra.gmra.mrb[32].mxu1 %vm1941_vm2, %v5704_v5 }
0x2c38   : > { %10279 = vmatpush3.bf16.msra.mxu1 %v10278_v4  ;;  %9776 = vmatprep.mubr.msk.f32.mxu1 %vm11263_vm6, %v11264_v10  ;;  %v6151_v4 = vadd.f32 %v12286_v3, %v12200_v11 }
0x2c39   : > { %10280 = vmatprep.subr.bf16.mxu1 %v11262_v45 }
0x2c3a   : > { %v5878_v16 = vpop.f32.mrb[46].mxu0 }
0x2c3b   : > { %v5879_v17 = vadd.f32 %v8919_v9, %v5878_v16  ;;  %v9767_v18 = vpop.f32.mrb[47].mxu0 }
0x2c3c   : > { %10282 = vmatpush3.bf16.msra.mxu1 %v10281_v13  ;;  %v6048_v18 = vld [vmem:[%s12799_s16 + $0x18] sm:$0xff] }
0x2c3d   : > { %6149 = vst.msk [vmem:[%s12256_s28] sm:$0xff] %vm6148_vm8, %v5879_v17  ;;  %10289 = vmatprep.subr.bf16.mxu1 %v11262_v45  ;;  %v6047_v17 = vld [vmem:[%s12799_s16 + $0x10] sm:$0xff] }
0x2c3e   : > { %v10293_v19 = vpack.c.bf16 %v6048_v18, %v6047_v17 }
0x2c3f   : > { %9777 = vmatmul.mubr.msk.f32.vlgmr.msra.gmra.mrb[34].mxu1 %vm1941_vm2, %v12214_v37  ;;  %v3956_v37 = vsub.f32 0.0, %v3953_v36 }
0x2c40   : > { %9798 = vmatprep.mubr.msk.f32.mxu1 %vm11263_vm6, %v11264_v10  ;;  %10291 = vmatpush3.bf16.msra.mxu1 %v10290_v41 }
0x2c41   : > { %10292 = vmatprep.subr.bf16.mxu1 %v11262_v45  ;;  %v3957_v42 = vmul.f32 1.442695, %v3956_v37 }
0x2c43   : > { %10806 = vpow2.f32 %v3957_v42 }
0x2c44   : > { %10294 = vmatpush3.bf16.msra.mxu1 %v10293_v19 }
0x2c45   : > { %10301 = vmatprep.subr.bf16.mxu1 %v11262_v45 }
0x2c4d   : > { %v10807_v43 = vpop.eup %10806 }
0x2c4e   : > { %v3959_v44 = vadd.f32 1.0, %v10807_v43  ;;  %v8925_v43 = vld [vmem:[#allocation16] ss:$0 sm:$0xff] }
0x2c50   : > { %10808 = vrcp.f32 %v3959_v44 }
0x2c5a   : > { %v10809_v46 = vpop.eup %10808 }
0x2c5b   : > { %v5787_v48 = vmax.f32 %v10809_v46, 0.0 }
0x2c5d   : > { %v5788_v49 = vmin.f32 %v5787_v48, 1.0 }
0x2c5f   : > { %v5790_v28 = vsub.f32 1.0, %v5788_v49  ;;  %v5789_v51 = vmax.f32 %v5788_v49, 1e-05 }
0x2c61   : > { %v5791_v50 = vmax.f32 %v5790_v28, 1e-05 }
0x2c63   : > { %10810 = vrcp.f32 %v5791_v50 }
0x2c6d   : > { %v10811_v15 = vpop.eup %10810 }
0x2c6e   : > { %v5793_v52 = vmul.f32 %v10811_v15, %v5789_v51 }
0x2c70   : > { %10812 = vlog2.f32 %v5793_v52 }
0x2c7a   : > { %v10813_v54 = vpop.eup %10812 }
0x2c7b   : > { %v5795_v56 = vmul.f32 0.6931472, %v10813_v54 }
0x2d0a   : > { %v5783_v53 = vpop.f32.mrb[32].mxu1 }
0x2d0b   : > { %v5784_v38 = vadd.f32 %v8917_v1, %v5783_v53  ;;  %v9756_v57 = vpop.f32.mrb[33].mxu1 }
0x2d0d   : > { %v5796_v39 = vadd.f32 %v5795_v56, %v5784_v38 }
0x2d0f   : > { %v5797_v59 = vsub.f32 0.0, %v5796_v39 }
0x2d11   : > { %v5798_v12 = vmul.f32 1.442695, %v5797_v59 }
0x2d12   : > { %v5957_v61 = vpop.f32.mrb[34].mxu1 }
0x2d13   : > { %10814 = vpow2.f32 %v5798_v12  ;;  %v5958_v62 = vadd.f32 %v8921_v60, %v5957_v61  ;;  %v9778_v63 = vpop.f32.mrb[35].mxu1 }
0x2d15   : > { %v5961_v0 = vmax.f32 %v5958_v62, 0.0 }
0x2d17   : > { %9788 = vmatmul.mubr.msk.f32.vlgmr.msra.gmra.mrb[48].mxu0 %vm1941_vm2, %v5961_v0 }
0x2d18   : > { %10297 = vmatpush3.bf16.msra.mxu0 %v10296_v27  ;;  %9809 = vmatprep.mubr.msk.f32.mxu0 %vm11263_vm6, %v11264_v10 }
0x2d19   : > { %10298 = vmatprep.subr.bf16.mxu0 %v11262_v45 }
0x2d1c   : > { %10300 = vmatpush3.bf16.msra.mxu0 %v10299_v32  ;;  %v10702_v32 = vunpack.i.l.bf16 %v10701_v25 }
0x2d1d   : > { %v10815_v2 = vpop.eup %10814  ;;  %9823 = vmatprep.subr.mxu0 %v11264_v10 }
0x2d1e   : > { %v5800_v5 = vadd.f32 1.0, %v10815_v2  ;;  %v10305_v34 = vpack.c.bf16 %v10703_v31, %v10702_v32 }
0x2d1f   : > { %9810 = vmatmul.mubr.msk.f32.vlgmr.msra.gmra.mrb[50].mxu0 %vm1941_vm2, %v6151_v4 }
0x2d20   : > { %10816 = vrcp.f32 %v5800_v5  ;;  %9825 = vmatprep.mubr.msk.f32.mxu0 %vm11263_vm6, %v11264_v10 }
0x2d2a   : > { %v12294_v7 = vpop.eup %10816 }
0x2d2b   : > { %v8927_v8 = vadd.f32 -0.5, %v12294_v7 }
0x2d2d   : > { %v6142_v9 = vmul.f32 40.0, %v8927_v8  ;;  %v6143_v13 = vmul.f32 20.0, %v8927_v8 }
0x2d2f   : > { %v6145_v16 = vsel %vm6144_vm9, %v6142_v9, %v6143_v13 }
0x2d30   : > { %6147 = vst.msk [vmem:[%s12299_s17] sm:$0xff] %vm6146_vm10, %v6145_v16 }
0x2dea   : > { %v6040_v6 = vpop.f32.mrb[48].mxu0 }
0x2deb   : > { %v6041_v26 = vadd.f32 %v8923_v24, %v6040_v6  ;;  %v9789_v27 = vpop.f32.mrb[49].mxu0 }
0x2ded   : > { %v6044_v33 = vmax.f32 %v6041_v26, 0.0 }
0x2def   : > { %9799 = vmatmul.mubr.msk.f32.vlgmr.msra.gmra.mrb[36].mxu1 %vm1941_vm2, %v6044_v33  ;;  %v8932_v33 = vld [vmem:[%s12777_s3 + $0x20] sm:$0xff] }
0x2df0   : > { %10303 = vmatpush3.bf16.msra.mxu1 %v10302_v29  ;;  %9820 = vmatprep.mubr.msk.f32.mxu1 %vm11263_vm6, %v11264_v10 }
0x2df1   : > { %10304 = vmatprep.subr.bf16.mxu1 %v11262_v45 }
0x2df2   : > { %v6237_v40 = vpop.f32.mrb[50].mxu0 }
0x2df3   : > { %v6238_v41 = vadd.f32 %v8936_v58, %v6237_v40  ;;  %v9811_v35 = vpop.f32.mrb[51].mxu0 }
0x2df4   : > { %10306 = vmatpush3.bf16.msra.mxu1 %v10305_v34  ;;  %v8933_v34 = vld [vmem:[%s12777_s3 + $0x28] sm:$0xff] }
0x2df5   : > { %6496 = vrot.lane.b32.xlu0 %v6238_v41, %s12771_s12  ;;  %6335 = vrot.lane.b32.xlu1 %v6238_v41, %s12769_s8  ;;  %v10308_v40 = vpack.c.bf16 %v8933_v34, %v8932_v33 }
0x2df6   : > { %9833 = vmatprep.subr.mxu1 %v11264_v10 }
0x2df7   : > { %9821 = vmatmul.mubr.msk.f32.vlgmr.msra.gmra.mrb[38].mxu1 %vm1941_vm2, %v12200_v11 }
0x2df8   : > { %9835 = vmatprep.mubr.msk.f32.mxu1 %vm11263_vm6, %v11264_v10 }
0x2df9   : > { %6498 = vrot.lane.b32.xlu1 %v6238_v41, %s12770_s9  ;;  %s12330_s9 = scalar_lea.vmem [#allocation20], %s12249_s24  ;;  %s12802_s24 = sld [smem:[#allocation71_spill]] }
0x2e67   : > { %v6336_v36 = vpop.permute.xlu1 %6335  ;;  %v6497_v42 = vpop.permute.xlu0 %6496 }
0x2e68   : > { %9824 = vmatpush3.xpose.msk.msra.mxu0 %vm2130_vm3, %v6336_v36 }
0x2e69   : > { %9828 = vmatprep.subr.mxu0 %v11264_v10 }
0x2e6b   : > { %9826 = vmatmul.mubr.msk.f32.vlgmr.msra.gmra.mrb[52].mxu0 %vm2130_vm3, %v6238_v41  ;;  %v6499_v37 = vpop.permute.xlu1 %6498  ;;  %v8935_v41 = vld [vmem:[%s12777_s3 + $0x38] sm:$0xff] }
0x2e6c   : > { %9834 = vmatpush3.xpose.msk.msra.mxu1 %vm2130_vm3, %v6499_v37  ;;  %9830 = vmatprep.mubr.msk.f32.mxu0 %vm11263_vm6, %v11264_v10 }
0x2e6d   : > { %10307 = vmatprep.subr.bf16.mxu1 %v11262_v45 }
0x2e6f   : > { %9836 = vmatmul.mubr.msk.f32.vlgmr.msra.gmra.mrb[40].mxu1 %vm2130_vm3, %v6497_v42 }
0x2e70   : > { %9851 = vmatprep.mubr.msk.f32.mxu1 %vm11263_vm6, %v11264_v10  ;;  %10309 = vmatpush3.bf16.msra.mxu1 %v10308_v40 }
0x2e71   : > { %10310 = vmatprep.subr.bf16.mxu1 %v11262_v45 }
0x2ec2   : > { %v6123_v44 = vpop.f32.mrb[36].mxu1 }
0x2ec3   : > { %v6124_v46 = vadd.f32 %v8925_v43, %v6123_v44  ;;  %v9800_v48 = vpop.f32.mrb[37].mxu1 }
0x2ec4   : > { %v8945_v48 = vld [vmem:[%s12778_s4 + $0x1] ss:$0 sm:$0xff] }
0x2ec5   : > { %v6128_v49 = vmin.f32 %v6124_v46, 20.0  ;;  %vm6127_vm12 = vcmp.gt.f32.partialorder %v6124_v46, 20.0 }
0x2ec7   : > { %v6129_v28 = vmul.f32 1.442695, %v6128_v49 }
0x2ec9   : > { %10818 = vpow2.f32 %v6129_v28 }
0x2eca   : > { %v6330_v50 = vpop.f32.mrb[38].mxu1 }
0x2ecb   : > { %v9822_v15 = vpop.f32.mrb[39].mxu1 }
0x2ed3   : > { %v10819_v51 = vpop.eup %10818 }
0x2ed4   : > { %v6131_v52 = vadd.f32 1.0, %v10819_v51  ;;  %v6134_v54 = vmul.f32 -0.5, %v10819_v51  ;;  %v6137_v53 = vand.u32 2147483647, %v10819_v51 }
0x2ed6   : > { %10820 = vlog2.f32 %v6131_v52  ;;  %v6135_v1 = vadd.f32 1.0, %v6134_v54  ;;  %vm6138_vm11 = vcmp.lt.f32.partialorder %v6137_v53, 0.0004427343  ;;  %v8949_v52 = vld [vmem:[%s12779_s11 + $0x20] sm:$0xff]  ;;  %v8950_v54 = vld [vmem:[%s12779_s11 + $0x28] sm:$0xff] }
0x2ed7   : > { %v12365_v53 = vld [vmem:[%s12780_s19 + $0x1] ss:$0 sm:$0xff] }
0x2ed8   : > { %v6136_v57 = vmul.f32 %v10819_v51, %v6135_v1  ;;  %v10704_v1 = vpack.i.bf16 %v8950_v54, %v8949_v52 }
0x2ee0   : > { %v10821_v38 = vpop.eup %10820 }
0x2ee1   : > { %v6133_v56 = vmul.f32 0.6931472, %v10821_v38  ;;  %v8952_v38 = vld [vmem:[%s12779_s11 + $0x38] sm:$0xff] }
0x2ee3   : > { %v6139_v39 = vsel %vm6138_vm11, %v6136_v57, %v6133_v56 }
0x2ee4   : > { %v6140_v59 = vsel %vm6127_vm12, %v6124_v46, %v6139_v39 }
0x2ee5   : > { %6150 = vst.msk [vmem:[%s12330_s9] sm:$0xff] %vm6146_vm10, %v6140_v59 }
0x2f3e   : > { %v6407_v60 = vpop.f32.mrb[52].mxu0 }
0x2f3f   : > { %v6411_v12 = vmul.f32 0.25, %v6407_v60  ;;  %v9827_v61 = vpop.f32.mrb[53].mxu0 }
0x2f41   : > { %v6412_v62 = vsel %vm4221_vm7, %v6411_v12, -inf }
0x2f42   : > { %6413 = vmax.xlane.f32.xlu1 %v6412_v62  ;;  %v6570_v63 = vpop.f32.mrb[40].mxu1 }
0x2f43   : > { %v6574_v0 = vmul.f32 0.25, %v6570_v63  ;;  %v9837_v2 = vpop.f32.mrb[41].mxu1 }
0x2f45   : > { %v6575_v4 = vsel %vm4221_vm7, %v6574_v0, -inf }
0x2f46   : > { %6576 = vmax.xlane.f32.xlu0 %v6575_v4 }
0x2f5c   : > { %6258 = vrot.lane.b32.xlu0 %v8936_v58, %s12768_s1  ;;  %v8934_v58 = vld [vmem:[%s12777_s3 + $0x30] sm:$0xff] }
0x2f5d   : > { %v10311_v35 = vpack.c.bf16 %v8935_v41, %v8934_v58 }
0x2f5f   : > { %10312 = vmatpush3.bf16.msra.mxu1 %v10311_v35 }
0x2fcf   : > { %v6414_v5 = vpop.xlane.xlu1 %6413 }
0x2fd0   : > { %v6415_v8 = vsub.f32 %v6411_v12, %v6414_v5 }
0x2fd2   : > { %v6416_v9 = vmul.f32 1.442695, %v6415_v8 }
0x2fd3   : > { %v6577_v13 = vpop.xlane.xlu0 %6576 }
0x2fd4   : > { %10822 = vpow2.f32 %v6416_v9  ;;  %v6578_v16 = vsub.f32 %v6574_v0, %v6577_v13  ;;  %v10314_v0 = vpack.c.bf16 %v8950_v54, %v8949_v52 }
0x2fd6   : > { %v6579_v17 = vmul.f32 1.442695, %v6578_v16 }
0x2fd7   : > { %v6259_v18 = vpop.permute.xlu0 %6258 }
0x2fd8   : > { %10824 = vpow2.f32 %v6579_v17  ;;  %v6331_v19 = vadd.f32 %v6330_v50, %v6259_v18 }
0x2fda   : > { %9829 = vmatpush3.msra.mxu0 %v6331_v19 }
0x2fdb   : > { %9838 = vmatprep.subr.mxu0 %v11264_v10 }
0x2fde   : > { %v10823_v20 = vpop.eup %10822 }
0x2fdf   : > { %v6418_v22 = vsel %vm4221_vm7, %v10823_v20, 0.0 }
0x2fe0   : > { %6419 = vadd.xlane.f32.xlu1 %v6418_v22 }
0x2fe2   : > { %v10825_v55 = vpop.eup %10824 }
0x2fe3   : > { %v6581_v24 = vsel %vm4221_vm7, %v10825_v55, 0.0 }
0x2fe4   : > { %6582 = vadd.xlane.f32.xlu1 %v6581_v24 }
0x2ff5   : > { %6587 = vrot.lane.b32.xlu1 %v6331_v19, %s12771_s12 }
0x306d   : > { %v6420_v25 = vpop.xlane.xlu1 %6419 }
0x306e   : > { %10826 = vrcp.f32 %v6420_v25  ;;  %v8947_v25 = vld [vmem:[%s12781_s5 + $0x1] ss:$0 sm:$0xff] }
0x3071   : > { %v6583_v6 = vpop.xlane.xlu1 %6582 }
0x3072   : > { %10828 = vrcp.f32 %v6583_v6 }
0x3075   : > { %v6588_v29 = vpop.permute.xlu1 %6587 }
0x3078   : > { %v10827_v26 = vpop.eup %10826 }
0x3079   : > { %v6422_v27 = vmul.f32 %v10827_v26, %v10823_v20 }
0x307b   : > { %9831 = vmatmul.mubr.msk.f32.vlgmr.msra.gmra.mrb[54].mxu0 %vm4221_vm7, %v6422_v27  ;;  %v8948_v27 = vld [vmem:[%s12782_s6 + $0x1] ss:$0 sm:$0xff] }
0x307c   : > { %v10829_v31 = vpop.eup %10828  ;;  %9839 = vmatpush3.msra.mxu0 %v6588_v29  ;;  %9840 = vmatprep.mubr.msk.f32.mxu0 %vm11263_vm6, %v11264_v10 }
0x307d   : > { %v6585_v32 = vmul.f32 %v10829_v31, %v10825_v55  ;;  %10313 = vmatprep.subr.bf16.mxu0 %v11262_v45 }
0x307f   : > { %9841 = vmatmul.mubr.msk.f32.vlgmr.msra.gmra.mrb[56].mxu0 %vm4221_vm7, %v6585_v32 }
0x3080   : > { %9862 = vmatprep.mubr.msk.f32.mxu0 %vm11263_vm6, %v11264_v10  ;;  %10315 = vmatpush3.bf16.msra.mxu0 %v10314_v0 }
0x3081   : > { %10316 = vmatprep.subr.bf16.mxu0 %v11262_v45 }
0x314e   : > { %v6492_v36 = vpop.f32.mrb[54].mxu0 }
0x314f   : > { %v9832_v37 = vpop.f32.mrb[55].mxu0 }
0x3152   : > { %v6659_v42 = vpop.f32.mrb[56].mxu0 }
0x3153   : > { %6664 = vrot.lane.b32.xlu0 %v6659_v42, %s12772_s14  ;;  %v9842_v43 = vpop.f32.mrb[57].mxu0 }
0x31c5   : > { %v6665_v44 = vpop.permute.xlu0 %6664 }
0x31c6   : > { %v6667_v46 = vsel %vm2130_vm3, %v6492_v36, %v6665_v44 }
0x31c7   : > { %9852 = vmatmul.mubr.msk.f32.vlgmr.msra.gmra.mrb[42].mxu1 %vm1941_vm2, %v6667_v46 }
0x31c8   : > { %9873 = vmatprep.mubr.msk.f32.mxu1 %vm1941_vm2, %v12088_v23  ;;  %v8951_v23 = vld [vmem:[%s12779_s11 + $0x30] sm:$0xff] }
0x31c9   : > { %v10719_v56 = vpack.i.bf16 %v8952_v38, %v8951_v23  ;;  %v10317_v2 = vpack.c.bf16 %v8952_v38, %v8951_v23 }
0x31cb   : > { %10318 = vmatpush3.bf16.msra.mxu0 %v10317_v2 }
0x329a   : > { %v6741_v49 = vpop.f32.mrb[42].mxu1 }
0x329b   : > { %v6742_v28 = vadd.f32 %v8945_v48, %v6741_v49  ;;  %v9853_v50 = vpop.f32.mrb[43].mxu1  ;;  %v10862_v49 = vld [vmem:[%s11800_s2] ss:$0 sm:$0xff]  ;;  %s12804_s2 = sld [smem:[#allocation87_spill]] }
0x329d   : > { %v6745_v15 = vadd.f32 %v6742_v28, %v12200_v11 }
0x329f   : > { %v6748_v51 = vsel %vm1941_vm2, %v6745_v15, 0.0 }
0x32a0   : > { %6749 = vadd.xlane.f32.xlu0 %v6748_v51 }
0x32a1   : > { %p12805_p10 = scmp.ne.s32.totalorder %s12804_s2, 0 }
0x32b6   : > { %10705 = vrot.lane.b32.xlu0 %v10704_v1, %s12769_s8 }
0x32ba   : > { %6878 = vrot.lane.b32.xlu0 %v12365_v53, %s12769_s8 }
0x32be   : > { %10720 = vrot.lane.b32.xlu0 %v10719_v56, %s12768_s1 }
0x332d   : > { %v6750_v57 = vpop.xlane.xlu0 %6749 }
0x332e   : > { %v6751_v11 = vmul.f32 0.03125, %v6750_v57 }
0x3330   : > { %v6752_v39 = vsub.f32 %v6745_v15, %v6751_v11 }
0x3331   : > { %v10706_v12 = vpop.permute.xlu0 %10705 }
0x3332   : > { %v6753_v59 = vmul.f32 %v6752_v39, %v6752_v39  ;;  %v10708_v61 = vunpack.i.h.bf16 %v10706_v12  ;;  %v10707_v62 = vunpack.i.l.bf16 %v10706_v12 }
0x3334   : > { %v6754_v60 = vsel %vm1941_vm2, %v6753_v59, 0.0  ;;  %v10319_v63 = vpack.c.bf16 %v10708_v61, %v10707_v62 }
0x3335   : > { %6755 = vadd.xlane.f32.xlu1 %v6754_v60  ;;  %v6879_v22 = vpop.permute.xlu0 %6878 }
0x3336   : > { %10320 = vmatprep.subr.bf16.mxu1 %v10319_v63 }
0x3337   : > { %10322 = vmatpush3.bf16.msra.mxu1 %v10319_v63 }
0x3339   : > { %v10721_v6 = vpop.permute.xlu0 %10720 }
0x333a   : > { %v10723_v31 = vunpack.i.h.bf16 %v10721_v6  ;;  %v10722_v32 = vunpack.i.l.bf16 %v10721_v6 }
0x333c   : > { %v10331_v34 = vpack.c.bf16 %v10723_v31, %v10722_v32  ;;  %v8955_v31 = vld [vmem:[%s12783_s15 + $0x30] sm:$0xff] }
0x3346   : > { %10710 = vrot.lane.b32.xlu1 %v10719_v56, %s12769_s8  ;;  %s12800_s8 = sld [smem:[#allocation67_spill]] }
0x334a   : > { %10715 = vrot.lane.b32.xlu1 %v10704_v1, %s12768_s1 }
0x33c2   : > { %v6756_v4 = vpop.xlane.xlu1 %6755 }
0x33c3   : > { %v6757_v5 = vmul.f32 0.03125, %v6756_v4 }
0x33c5   : > { %v6758_v8 = vadd.f32 1e-05, %v6757_v5 }
0x33c6   : > { %v10711_v9 = vpop.permute.xlu1 %10710 }
0x33c7   : > { %10830 = vrsqrt.f32 %v6758_v8  ;;  %v10713_v13 = vunpack.i.h.bf16 %v10711_v9  ;;  %v10712_v16 = vunpack.i.l.bf16 %v10711_v9 }
0x33c9   : > { %v10323_v17 = vpack.c.bf16 %v10713_v13, %v10712_v16 }
0x33ca   : > { %v10716_v18 = vpop.permute.xlu1 %10715 }
0x33cb   : > { %10324 = vmatprep.subr.bf16.mxu1 %v10323_v17  ;;  %v10718_v19 = vunpack.i.h.bf16 %v10716_v18  ;;  %v10717_v20 = vunpack.i.l.bf16 %v10716_v18 }
0x33cc   : > { %10326 = vmatpush3.bf16.msra.mxu1 %v10323_v17 }
0x33cd   : > { %v10327_v55 = vpack.c.bf16 %v10718_v19, %v10717_v20  ;;  %10335 = vmatprep.subr.bf16.mxu1 %v11262_v45 }
0x33cf   : > { %9874 = vmatmul.mubr.msk.f32.vlgmr.msra.gmra.mrb[44].mxu1 %vm1941_vm2, %v12100_v14  ;;  %10328 = vmatprep.subr.bf16.mxu0 %v10327_v55 }
0x33d0   : > { %9891 = vmatprep.mubr.msk.f32.mxu1 %vm11263_vm6, %v11264_v10 }
0x33d1   : > { %v10831_v24 = vpop.eup %10830 }
0x33d2   : > { %v6760_v26 = vmul.f32 %v10831_v24, %v6752_v39 }
0x33d4   : > { %v6765_v29 = vmul.f32 %v8947_v25, %v6760_v26 }
0x33d6   : > { %v12383_v33 = vadd.f32 %v8948_v27, %v6765_v29  ;;  %v8953_v27 = vld [vmem:[%s12783_s15 + $0x20] sm:$0xff]  ;;  %v8954_v29 = vld [vmem:[%s12783_s15 + $0x28] sm:$0xff] }
0x33d7   : > { %v10350_v32 = vpack.c.bf16 %v8954_v29, %v8953_v27 }
0x33d8   : > { %v6771_v58 = vadd.f32 %v12286_v3, %v12383_v33 }
0x33da   : > { %9863 = vmatmul.mubr.msk.f32.vlgmr.msra.gmra.mrb[58].mxu0 %vm1941_vm2, %v6771_v58 }
0x33db   : > { %10330 = vmatpush3.bf16.msra.mxu0 %v10327_v55  ;;  %9884 = vmatprep.mubr.msk.f32.mxu0 %vm1941_vm2, %v12084_v21 }
0x33dc   : > { %10332 = vmatprep.subr.bf16.mxu0 %v10331_v34 }
0x33df   : > { %10334 = vmatpush3.bf16.msra.mxu0 %v10331_v34  ;;  %v8956_v34 = vld [vmem:[%s12783_s15 + $0x38] sm:$0xff] }
0x33e0   : > { %10339 = vmatprep.subr.bf16.mxu0 %v11262_v45  ;;  %v10353_v58 = vpack.c.bf16 %v8956_v34, %v8955_v31 }
0x33e2   : > { %9885 = vmatmul.mubr.msk.f32.vlgmr.msra.gmra.mrb[60].mxu0 %vm1941_vm2, %v12096_v47 }
0x33e3   : > { %9898 = vmatprep.mubr.msk.f32.mxu0 %vm11263_vm6, %v11264_v10 }
0x34a2   : > { %v9875_v14 = vpop.f32.mrb[44].mxu1 }
0x34a3   : > { %v6953_v40 = vadd.f32 %v9875_v14, %v6879_v22  ;;  %v6947_v41 = vpop.f32.mrb[45].mxu1 }
0x34a4   : > { %v6948_v3 = vadd.f32 %v6947_v41, %v6879_v22 }
0x34a6   : > { %v10724_v35 = vpack.i.bf16 %v6953_v40, %v6948_v3  ;;  %v10336_v36 = vpack.c.bf16 %v6953_v40, %v6948_v3 }
0x34a8   : > { %10338 = vmatpush3.bf16.xpose.msk.msra.mxu1 %vm11787_vm4, %v10336_v36 }
0x34a9   : > { %10346 = vmatprep.subr.bf16.mxu1 %v11262_v45 }
0x34ad   : > { %v6857_v21 = vpop.f32.mrb[58].mxu0 }
0x34ae   : > { %v6858_v37 = vadd.f32 %v12365_v53, %v6857_v21  ;;  %v9864_v42 = vpop.f32.mrb[59].mxu0 }
0x34b0   : > { %9892 = vmatmul.mubr.msk.f32.vlgmr.msra.gmra.mrb[46].mxu1 %vm2130_vm3, %v6858_v37 }
0x34b1   : > { %9912 = vmatprep.mubr.msk.f32.mxu1 %vm11263_vm6, %v11264_v10 }
0x34b5   : > { %v9886_v47 = vpop.f32.mrb[60].mxu0 }
0x34b6   : > { %v7037_v43 = vpop.f32.mrb[61].mxu0 }
0x3583   : > { %v7121_v44 = vpop.f32.mrb[46].mxu1 }
0x3584   : > { %v7125_v46 = vmul.f32 0.25, %v7121_v44  ;;  %v9893_v48 = vpop.f32.mrb[47].mxu1 }
0x3586   : > { %v7126_v28 = vadd.f32 %v10862_v49, %v7125_v46 }
0x3588   : > { %v7127_v50 = vsel %vm2130_vm3, %v7126_v28, -inf }
0x3589   : > { %7128 = vmax.xlane.f32.xlu1 %v7127_v50  ;;  %v8976_v50 = vld [vmem:[%s12785_s22 + $0x28] sm:$0xff] }
0x359a   : > { %10725 = vrot.lane.b32.xlu1 %v10724_v35, %s12771_s12  ;;  %v8971_v35 = vld [vmem:[%s12784_s21 + $0x1] ss:$0 sm:$0xff] }
0x359e   : > { %7211 = vrot.lane.b32.xlu1 %v6858_v37, %s12771_s12 }
0x3616   : > { %v7129_v15 = vpop.xlane.xlu1 %7128 }
0x3617   : > { %v7130_v51 = vsub.f32 %v7126_v28, %v7129_v15  ;;  %v8975_v28 = vld [vmem:[%s12785_s22 + $0x20] sm:$0xff] }
0x3618   : > { %v10356_v15 = vpack.c.bf16 %v8976_v50, %v8975_v28  ;;  %v8997_v28 = vld [vmem:[%s12800_s8 + $0x30] sm:$0xff]  ;;  %v8998_v50 = vld [vmem:[%s12800_s8 + $0x38] sm:$0xff] }
0x3619   : > { %v7131_v52 = vmul.f32 1.442695, %v7130_v51  ;;  %v8978_v51 = vld [vmem:[%s12785_s22 + $0x38] sm:$0xff] }
0x361a   : > { %v10726_v59 = vpop.permute.xlu1 %10725 }
0x361b   : > { %10832 = vpow2.f32 %v7131_v52  ;;  %v10728_v12 = vunpack.i.h.bf16 %v10726_v59  ;;  %v10727_v61 = vunpack.i.l.bf16 %v10726_v59 }
0x361e   : > { %v7212_v63 = vpop.permute.xlu1 %7211 }
0x3625   : > { %v10833_v54 = vpop.eup %10832 }
0x3626   : > { %v7133_v1 = vsel %vm2130_vm3, %v10833_v54, 0.0 }
0x3627   : > { %7134 = vadd.xlane.f32.xlu0 %v7133_v1  ;;  %v8982_v1 = vld [vmem:[%s12786_s23 + $0x48] sm:$0xff] }
0x363d   : > { %6968 = vrot.lane.b32.xlu0 %v12365_v53, %s12768_s1  ;;  %v10343_v53 = vpack.c.bf16 %v10728_v12, %v10727_v61  ;;  %s12806_s1 = sld [smem:[#allocation84_spill]] (%p12805_p10) }
0x3643   : > { %s9044_s3 = sshll.u32 (%p12805_p10), %s12806_s1, 3 }
0x36b4   : > { %v7135_v23 = vpop.xlane.xlu0 %7134 }
0x36b5   : > { %10834 = vrcp.f32 %v7135_v23  ;;  %v8983_v23 = vld [vmem:[%s12786_s23 + $0x50] sm:$0xff] }
0x36b8   : > { %v6969_v38 = vpop.permute.xlu0 %6968 }
0x36b9   : > { %v7038_v56 = vadd.f32 %v7037_v43, %v6969_v38  ;;  %v7043_v57 = vadd.f32 %v9886_v47, %v6969_v38 }
0x36bb   : > { %v10729_v11 = vpack.i.bf16 %v7043_v57, %v7038_v56  ;;  %v10340_v39 = vpack.c.bf16 %v7043_v57, %v7038_v56  ;;  %v8984_v56 = vld [vmem:[%s12786_s23 + $0x58] sm:$0xff] }
0x36bc   : > { %v10365_v57 = vpack.c.bf16 %v8984_v56, %v8983_v23 }
0x36bd   : > { %10341 = vmatpush3.bf16.msra.mxu0 %v10340_v39  ;;  %v8986_v39 = vld [vmem:[%s12786_s23 + $0x68] sm:$0xff] }
0x36be   : > { %10342 = vmatprep.subr.bf16.mxu0 %v11262_v45 }
0x36bf   : > { %v10835_v60 = vpop.eup %10834 }
0x36c0   : > { %v7137_v62 = vmul.f32 %v10835_v60, %v10833_v54  ;;  %v8981_v54 = vld [vmem:[%s12786_s23 + $0x40] sm:$0xff] }
0x36c1   : > { %v10362_v38 = vpack.c.bf16 %v8982_v1, %v8981_v54  ;;  %v8993_v1 = vld [vmem:[#allocation6] ss:$0 sm:$0xff] }
0x36c2   : > { %9899 = vmatmul.mubr.msk.f32.vlgmr.msra.gmra.mrb[62].mxu0 %vm2130_vm3, %v7137_v62 }
0x36c3   : > { %9905 = vmatprep.mubr.msk.f32.mxu0 %vm11263_vm6, %v11264_v10 }
0x36c6   : > { %10345 = vmatpush3.bf16.xpose.msk.msra.mxu0 %vm11787_vm4, %v10343_v53  ;;  %v8973_v53 = vld [vmem:[%s12787_s26 + $0x1] ss:$0 sm:$0xff] }
0x36c7   : > { %10355 = vmatprep.subr.bf16.mxu0 %v11262_v45 }
0x36cd   : > { %9906 = vmatmul.mubr.msk.f32.vlgmr.msra.gmra.mrb[64].mxu0 %vm2130_vm3, %v7212_v63 }
0x36ce   : > { %9934 = vmatprep.mubr.msk.f32.mxu0 %vm11263_vm6, %v11264_v10  ;;  %10357 = vmatpush3.bf16.msra.mxu0 %v10356_v15  ;;  %v10377_v15 = vpack.c.bf16 %v8998_v50, %v8997_v28 }
0x36cf   : > { %10358 = vmatprep.subr.bf16.mxu0 %v11262_v45 }
0x3795   : > { %v7207_v0 = vpop.f32.mrb[62].mxu0 }
0x3796   : > { %v9900_v2 = vpop.f32.mrb[63].mxu0 }
0x37a0   : > { %v7289_v4 = vpop.f32.mrb[64].mxu0 }
0x37a1   : > { %v7293_v5 = vmul.f32 0.25, %v7289_v4  ;;  %v9907_v8 = vpop.f32.mrb[65].mxu0 }
0x37a2   : > { %v8988_v8 = vld [vmem:[%s12786_s23 + $0x78] sm:$0xff] }
0x37a3   : > { %v7294_v9 = vadd.f32 %v10862_v49, %v7293_v5  ;;  %v8987_v5 = vld [vmem:[%s12786_s23 + $0x70] sm:$0xff] }
0x37a5   : > { %v7295_v13 = vsel %vm2130_vm3, %v7294_v9, -inf }
0x37a6   : > { %7296 = vmax.xlane.f32.xlu0 %v7295_v13  ;;  %v8979_v13 = vld [vmem:[%s12789_s29 + $0x1] ss:$0 sm:$0xff] }
0x37bc   : > { %10730 = vrot.lane.b32.xlu0 %v10729_v11, %s12771_s12  ;;  %v8985_v11 = vld [vmem:[%s12786_s23 + $0x60] sm:$0xff]  ;;  %s12803_s12 = sld [smem:[#allocation79_spill]] }
0x37bd   : > { %v10368_v59 = vpack.c.bf16 %v8986_v39, %v8985_v11 }
0x3833   : > { %v7297_v30 = vpop.xlane.xlu0 %7296 }
0x3834   : > { %v7298_v16 = vsub.f32 %v7294_v9, %v7297_v30  ;;  %v10371_v9 = vpack.c.bf16 %v8988_v8, %v8987_v5 }
0x3836   : > { %v7299_v17 = vmul.f32 1.442695, %v7298_v16 }
0x3837   : > { %v10731_v18 = vpop.permute.xlu0 %10730 }
0x3838   : > { %10836 = vpow2.f32 %v7299_v17  ;;  %v10733_v19 = vunpack.i.h.bf16 %v10731_v18  ;;  %v10732_v20 = vunpack.i.l.bf16 %v10731_v18 }
0x383a   : > { %v10347_v22 = vpack.c.bf16 %v10733_v19, %v10732_v20  ;;  %v8989_v19 = vld [vmem:[%s12790_s30 + $0x1] ss:$0 sm:$0xff] }
0x383c   : > { %10348 = vmatpush3.bf16.msra.mxu1 %v10347_v22 }
0x383d   : > { %10349 = vmatprep.subr.bf16.mxu1 %v11262_v45 }
0x3842   : > { %v10837_v55 = vpop.eup %10836 }
0x3843   : > { %v7301_v24 = vsel %vm2130_vm3, %v10837_v55, 0.0 }
0x3844   : > { %7302 = vadd.xlane.f32.xlu1 %v7301_v24 }
0x38d1   : > { %v7303_v25 = vpop.xlane.xlu1 %7302 }
0x38d2   : > { %10838 = vrcp.f32 %v7303_v25 }
0x38dc   : > { %v10839_v6 = vpop.eup %10838 }
0x38dd   : > { %v7305_v26 = vmul.f32 %v10839_v6, %v10837_v55 }
0x38df   : > { %9913 = vmatmul.mubr.msk.f32.vlgmr.msra.gmra.mrb[48].mxu1 %vm2130_vm3, %v7305_v26 }
0x38e0   : > { %9923 = vmatprep.mubr.msk.f32.mxu1 %vm11263_vm6, %v11264_v10  ;;  %10351 = vmatpush3.bf16.msra.mxu1 %v10350_v32 }
0x38e1   : > { %10352 = vmatprep.subr.bf16.mxu1 %v11262_v45 }
0x38e4   : > { %10354 = vmatpush3.bf16.msra.mxu1 %v10353_v58 }
0x38e5   : > { %10361 = vmatprep.subr.bf16.mxu1 %v11262_v45 }
0x39b2   : > { %v7383_v14 = vpop.f32.mrb[48].mxu1 }
0x39b3   : > { %7388 = vrot.lane.b32.xlu1 %v7383_v14, %s12772_s14  ;;  %v9914_v40 = vpop.f32.mrb[49].mxu1  ;;  %s12801_s14 = sld [smem:[#allocation69_spill]] }
0x39b4   : > { %v8991_v40 = vld [vmem:[%s12791_s7 + $0x1] ss:$0 sm:$0xff] }
0x39b9   : > { %v9002_v56 = vld [vmem:[%s12801_s14 + $0x28] sm:$0xff] }
0x3a25   : > { %v7389_v41 = vpop.permute.xlu1 %7388 }
0x3a26   : > { %v7391_v3 = vsel %vm2130_vm3, %v7207_v0, %v7389_v41  ;;  %v8974_v0 = vld [vmem:[%s12788_s27 + $0x1] ss:$0 sm:$0xff] }
0x3a27   : > { %9924 = vmatmul.mubr.msk.f32.vlgmr.msra.gmra.mrb[50].mxu1 %vm1941_vm2, %v7391_v3  ;;  %v8992_v3 = vld [vmem:[%s12792_s20 + $0x1] ss:$0 sm:$0xff] }
0x3a28   : > { %9953 = vmatprep.mubr.msk.f32.mxu1 %vm11263_vm6, %v11264_v10  ;;  %10363 = vmatpush3.bf16.msra.mxu1 %v10362_v38  ;;  %v9001_v38 = vld [vmem:[%s12801_s14 + $0x20] sm:$0xff] }
0x3a29   : > { %10364 = vmatprep.subr.bf16.mxu1 %v11262_v45  ;;  %v10380_v39 = vpack.c.bf16 %v9002_v56, %v9001_v38 }
0x3a2c   : > { %10366 = vmatpush3.bf16.msra.mxu1 %v10365_v57  ;;  %v8994_v57 = vld [vmem:[#allocation7] ss:$0 sm:$0xff] }
0x3a2d   : > { %10367 = vmatprep.subr.bf16.mxu1 %v11262_v45 }
0x3a30   : > { %10369 = vmatpush3.bf16.msra.mxu1 %v10368_v59 }
0x3a31   : > { %10370 = vmatprep.subr.bf16.mxu1 %v11262_v45 }
0x3a34   : > { %10372 = vmatpush3.bf16.msra.mxu1 %v10371_v9 }
0x3a35   : > { %10385 = vmatprep.subr.bf16.mxu1 %v11262_v45 }
0x3afa   : > { %v7465_v36 = vpop.f32.mrb[50].mxu1 }
0x3afb   : > { %v7466_v21 = vadd.f32 %v8971_v35, %v7465_v36  ;;  %v9925_v37 = vpop.f32.mrb[51].mxu1 }
0x3afd   : > { %v7469_v42 = vadd.f32 %v7466_v21, %v12383_v33  ;;  %v8977_v33 = vld [vmem:[%s12785_s22 + $0x30] sm:$0xff] }
0x3afe   : > { %v10359_v52 = vpack.c.bf16 %v8978_v51, %v8977_v33 }
0x3aff   : > { %v7472_v47 = vsel %vm1941_vm2, %v7469_v42, 0.0 }
0x3b00   : > { %7473 = vadd.xlane.f32.xlu0 %v7472_v47  ;;  %10360 = vmatpush3.bf16.msra.mxu0 %v10359_v52 }
0x3b01   : > { %10373 = vmatprep.subr.bf16.mxu0 %v11262_v45 }
0x3b8d   : > { %v7474_v43 = vpop.xlane.xlu0 %7473 }
0x3b8e   : > { %v7475_v44 = vmul.f32 0.03125, %v7474_v43 }
0x3b90   : > { %v7476_v46 = vsub.f32 %v7469_v42, %v7475_v44 }
0x3b92   : > { %v7477_v48 = vmul.f32 %v7476_v46, %v7476_v46 }
0x3b94   : > { %v7478_v49 = vsel %vm1941_vm2, %v7477_v48, 0.0  ;;  %v8996_v48 = vld [vmem:[%s12800_s8 + $0x28] sm:$0xff] }
0x3b95   : > { %7479 = vadd.xlane.f32.xlu1 %v7478_v49 }
0x3c22   : > { %v7480_v60 = vpop.xlane.xlu1 %7479 }
0x3c23   : > { %v7481_v12 = vmul.f32 0.03125, %v7480_v60  ;;  %v9003_v60 = vld [vmem:[%s12801_s14 + $0x30] sm:$0xff] }
0x3c25   : > { %v7482_v61 = vadd.f32 1e-05, %v7481_v12  ;;  %v9004_v12 = vld [vmem:[%s12801_s14 + $0x38] sm:$0xff] }
0x3c27   : > { %10840 = vrsqrt.f32 %v7482_v61  ;;  %v10383_v61 = vpack.c.bf16 %v9004_v12, %v9003_v60 }
0x3c31   : > { %v10841_v62 = vpop.eup %10840 }
0x3c32   : > { %v7484_v63 = vmul.f32 %v10841_v62, %v7476_v46  ;;  %v8995_v46 = vld [vmem:[%s12800_s8 + $0x20] sm:$0xff] }
0x3c33   : > { %v10374_v49 = vpack.c.bf16 %v8996_v48, %v8995_v46  ;;  %v9007_v62 = vld [vmem:[%s12802_s24 + $0x20] sm:$0xff]  ;;  %v7972_v48 = vmax.f32 %v12294_v7, 0.0 }
0x3c34   : > { %v7489_v2 = vmul.f32 %v8973_v53, %v7484_v63  ;;  %v9008_v53 = vld [vmem:[%s12802_s24 + $0x28] sm:$0xff] }
0x3c35   : > { %v10386_v63 = vpack.c.bf16 %v9008_v53, %v9007_v62 }
0x3c36   : > { %v7494_v4 = vadd.f32 %v8974_v0, %v7489_v2  ;;  %v8999_v0 = vld [vmem:[#allocation9 + $0x1] ss:$0 sm:$0xff]  ;;  %v9013_v2 = vld [vmem:[%s12803_s12 + $0x20] sm:$0xff] }
0x3c38   : > { %9935 = vmatmul.mubr.msk.f32.vlgmr.msra.gmra.mrb[66].mxu0 %vm1941_vm2, %v7494_v4 }
0x3c39   : > { %9964 = vmatprep.mubr.msk.f32.mxu0 %vm11263_vm6, %v11264_v10  ;;  %10375 = vmatpush3.bf16.msra.mxu0 %v10374_v49  ;;  %v7973_v49 = vmin.f32 %v7972_v48, 1.0 }
0x3c3a   : > { %10376 = vmatprep.subr.bf16.mxu0 %v11262_v45 }
0x3c3d   : > { %10378 = vmatpush3.bf16.msra.mxu0 %v10377_v15  ;;  %v7974_v15 = vmax.f32 %v7973_v49, 1e-05 }
0x3c3e   : > { %10379 = vmatprep.subr.bf16.mxu0 %v11262_v45 }
0x3d0b   : > { %v7574_v30 = vpop.f32.mrb[66].mxu0 }
0x3d0c   : > { %v7575_v16 = vadd.f32 %v8979_v13, %v7574_v30  ;;  %v9936_v17 = vpop.f32.mrb[67].mxu0 }
0x3d0d   : > { %v9016_v17 = vld [vmem:[%s12803_s12 + $0x38] sm:$0xff] }
0x3d0e   : > { %v7578_v18 = vmax.f32 %v7575_v16, 0.0  ;;  %v9015_v16 = vld [vmem:[%s12803_s12 + $0x30] sm:$0xff] }
0x3d10   : > { %9954 = vmatmul.mubr.msk.f32.vlgmr.msra.gmra.mrb[52].mxu1 %vm2776_vm5, %v7578_v18  ;;  %v10395_v18 = vpack.c.bf16 %v9016_v17, %v9015_v16 }
0x3d11   : > { %9986 = vmatprep.mubr.msk.f32.mxu1 %vm11263_vm6, %v11264_v10  ;;  %10387 = vmatpush3.bf16.msra.mxu1 %v10386_v63 }
0x3d12   : > { %10388 = vmatprep.subr.bf16.mxu1 %v11262_v45 }
0x3de3   : > { %v7662_v20 = vpop.f32.mrb[52].mxu1 }
0x3de4   : > { %v7663_v22 = vadd.f32 %v8989_v19, %v7662_v20  ;;  %v9955_v55 = vpop.f32.mrb[53].mxu1  ;;  %v9009_v19 = vld [vmem:[%s12802_s24 + $0x30] sm:$0xff]  ;;  %v9010_v20 = vld [vmem:[%s12802_s24 + $0x38] sm:$0xff] }
0x3de5   : > { %v9005_v55 = vld [vmem:[#allocation10 + $0x1] ss:$0 sm:$0xff] }
0x3de6   : > { %v7666_v24 = vadd.f32 %v7663_v22, %v7494_v4  ;;  %v9014_v4 = vld [vmem:[%s12803_s12 + $0x28] sm:$0xff]  ;;  %v10389_v22 = vpack.c.bf16 %v9010_v20, %v9009_v19 }
0x3de7   : > { %v10392_v13 = vpack.c.bf16 %v9014_v4, %v9013_v2  ;;  %v9033_v4 = vld [vmem:[%s12799_s16 + $0x30] sm:$0xff] }
0x3de8   : > { %v7669_v25 = vsel %vm1941_vm2, %v7666_v24, 0.0  ;;  %10390 = vmatpush3.bf16.msra.mxu1 %v10389_v22 }
0x3de9   : > { %7670 = vadd.xlane.f32.xlu0 %v7669_v25  ;;  %10397 = vmatprep.subr.bf16.mxu1 %v11262_v45  ;;  %v9020_v25 = vld [vmem:[%s12797_s25 + $0x28] sm:$0xff] }
0x3e76   : > { %v7671_v6 = vpop.xlane.xlu0 %7670 }
0x3e77   : > { %v7672_v26 = vmul.f32 0.03125, %v7671_v6 }
0x3e79   : > { %v7673_v27 = vsub.f32 %v7666_v24, %v7672_v26  ;;  %v9019_v24 = vld [vmem:[%s12797_s25 + $0x20] sm:$0xff] }
0x3e7b   : > { %v7674_v29 = vmul.f32 %v7673_v27, %v7673_v27 }
0x3e7d   : > { %v7675_v31 = vsel %vm1941_vm2, %v7674_v29, 0.0  ;;  %v10398_v29 = vpack.c.bf16 %v9020_v25, %v9019_v24 }
0x3e7e   : > { %7676 = vadd.xlane.f32.xlu0 %v7675_v31 }
0x3f0b   : > { %v7677_v32 = vpop.xlane.xlu0 %7676 }
0x3f0c   : > { %v7678_v34 = vmul.f32 0.03125, %v7677_v32  ;;  %v9021_v32 = vld [vmem:[%s12797_s25 + $0x30] sm:$0xff] }
0x3f0e   : > { %v7679_v58 = vadd.f32 1e-05, %v7678_v34  ;;  %v9022_v34 = vld [vmem:[%s12797_s25 + $0x38] sm:$0xff] }
0x3f10   : > { %10842 = vrsqrt.f32 %v7679_v58  ;;  %v9017_v58 = vld [vmem:[%s11538_s13 + $0x1] ss:$0 sm:$0xff] }
0x3f1a   : > { %v10843_v14 = vpop.eup %10842 }
0x3f1b   : > { %v7681_v41 = vmul.f32 %v10843_v14, %v7673_v27  ;;  %v10401_v14 = vpack.c.bf16 %v9022_v34, %v9021_v32 }
0x3f1d   : > { %v7686_v35 = vmul.f32 %v8991_v40, %v7681_v41 }
0x3f1f   : > { %v7691_v36 = vadd.f32 %v8992_v3, %v7686_v35  ;;  %v9025_v35 = vld [vmem:[%s12798_s0 + $0x20] sm:$0xff] }
0x3f21   : > { %v7694_v21 = vsel %vm1941_vm2, %v7691_v36, 0.0 }
0x3f22   : > { %7695 = vadd.xlane.f32.xlu1 %v7694_v21 }
0x3faf   : > { %v7696_v37 = vpop.xlane.xlu1 %7695 }
0x3fb0   : > { %v7697_v42 = vmul.f32 0.03125, %v7696_v37  ;;  %v9027_v37 = vld [vmem:[%s12798_s0 + $0x30] sm:$0xff] }
0x3fb2   : > { %v7698_v47 = vsub.f32 %v7691_v36, %v7697_v42  ;;  %v9026_v36 = vld [vmem:[%s12798_s0 + $0x28] sm:$0xff]  ;;  %v9028_v42 = vld [vmem:[%s12798_s0 + $0x38] sm:$0xff]  ;;  %s12807_s0 = sld [smem:[#allocation80_spill]] (%p12805_p10) }
0x3fb3   : > { %v10404_v21 = vpack.c.bf16 %v9026_v36, %v9025_v35 }
0x3fb4   : > { %v7699_v43 = vmul.f32 %v7698_v47, %v7698_v47 }
0x3fb6   : > { %v7700_v44 = vsel %vm1941_vm2, %v7699_v43, 0.0  ;;  %v9031_v43 = vld [vmem:[%s12799_s16 + $0x20] sm:$0xff] }
0x3fb7   : > { %7701 = vadd.xlane.f32.xlu0 %v7700_v44  ;;  %v9032_v44 = vld [vmem:[%s12799_s16 + $0x28] sm:$0xff] }
0x3fb8   : > { %v10410_v46 = vpack.c.bf16 %v9032_v44, %v9031_v43  ;;  %s8356_s4 = scalar_lea.vmem (%p12805_p10), %s12807_s0, %s9044_s3 }
0x4044   : > { %v7702_v33 = vpop.xlane.xlu0 %7701 }
0x4045   : > { %v7703_v51 = vmul.f32 0.03125, %v7702_v33 }
0x4047   : > { %v7704_v52 = vadd.f32 1e-05, %v7703_v51 }
0x4049   : > { %10844 = vrsqrt.f32 %v7704_v52  ;;  %v9011_v52 = vld [vmem:[#allocation12 + $0x1] ss:$0 sm:$0xff] }
0x4053   : > { %v10845_v54 = vpop.eup %10844 }
0x4054   : > { %v7706_v23 = vmul.f32 %v10845_v54, %v7698_v47  ;;  %v10407_v47 = vpack.c.bf16 %v9028_v42, %v9027_v37 }
0x4056   : > { %v7713_v11 = vmul.f32 %v8993_v1, %v7706_v23 }
0x4058   : > { %v7720_v59 = vadd.f32 %v8994_v57, %v7713_v11  ;;  %v9023_v11 = vld [vmem:[#allocation13 + $0x1] ss:$0 sm:$0xff] }
0x405a   : > { %9965 = vmatmul.mubr.msk.f32.vlgmr.msra.gmra.mrb[68].mxu0 %vm1941_vm2, %v7720_v59 }
0x405b   : > { %10381 = vmatpush3.bf16.msra.mxu0 %v10380_v39  ;;  %9975 = vmatprep.mubr.msk.f32.mxu0 %vm11263_vm6, %v11264_v10 }
0x405c   : > { %10382 = vmatprep.subr.bf16.mxu0 %v11262_v45 }
0x405f   : > { %10384 = vmatpush3.bf16.msra.mxu0 %v10383_v61 }
0x4060   : > { %10391 = vmatprep.subr.bf16.mxu0 %v11262_v45 }
0x412d   : > { %v7800_v5 = vpop.f32.mrb[68].mxu0 }
0x412e   : > { %v7801_v8 = vadd.f32 %v8999_v0, %v7800_v5  ;;  %v9966_v9 = vpop.f32.mrb[69].mxu0  ;;  %v9034_v5 = vld [vmem:[%s12799_s16 + $0x38] sm:$0xff] }
0x412f   : > { %v9029_v9 = vld [vmem:[#allocation15 + $0x1] ss:$0 sm:$0xff] }
0x4130   : > { %v7804_v30 = vmax.f32 %v7801_v8, 0.0  ;;  %v10413_v8 = vpack.c.bf16 %v9034_v5, %v9033_v4 }
0x4132   : > { %9976 = vmatmul.mubr.msk.f32.vlgmr.msra.gmra.mrb[70].mxu0 %vm1941_vm2, %v7804_v30 }
0x4133   : > { %10393 = vmatpush3.bf16.msra.mxu0 %v10392_v13  ;;  %9997 = vmatprep.mubr.msk.f32.mxu0 %vm11263_vm6, %v11264_v10 }
0x4134   : > { %10394 = vmatprep.subr.bf16.mxu0 %v11262_v45 }
0x4137   : > { %10396 = vmatpush3.bf16.msra.mxu0 %v10395_v18  ;;  %v9035_v18 = vld [vmem:[#allocation16 + $0x1] ss:$0 sm:$0xff] }
0x4138   : > { %10403 = vmatprep.subr.bf16.mxu0 %v11262_v45 }
0x413a   : > { %9998 = vmatmul.mubr.msk.f32.vlgmr.msra.gmra.mrb[72].mxu0 %vm1941_vm2, %v7720_v59 }
0x413b   : > { %10019 = vmatprep.mubr.msk.f32.mxu0 %vm11263_vm6, %v11264_v10  ;;  %10405 = vmatpush3.bf16.msra.mxu0 %v10404_v21 }
0x413c   : > { %10406 = vmatprep.subr.bf16.mxu0 %v11262_v45 }
0x413f   : > { %10408 = vmatpush3.bf16.msra.mxu0 %v10407_v47 }
0x4205   : > { %v7884_v6 = vpop.f32.mrb[70].mxu0 }
0x4206   : > { %v7885_v26 = vadd.f32 %v9005_v55, %v7884_v6  ;;  %v9977_v27 = vpop.f32.mrb[71].mxu0 }
0x4208   : > { %v7888_v31 = vmax.f32 %v7885_v26, 0.0 }
0x420a   : > { %9987 = vmatmul.mubr.msk.f32.vlgmr.msra.gmra.mrb[54].mxu1 %vm1941_vm2, %v7888_v31 }
0x420b   : > { %10399 = vmatpush3.bf16.msra.mxu1 %v10398_v29  ;;  %10008 = vmatprep.mubr.msk.f32.mxu1 %vm11263_vm6, %v11264_v10 }
0x420c   : > { %10400 = vmatprep.subr.bf16.mxu1 %v11262_v45 }
0x420d   : > { %v8064_v40 = vpop.f32.mrb[72].mxu0 }
0x420e   : > { %v8065_v41 = vadd.f32 %v9017_v58, %v8064_v40  ;;  %v9999_v3 = vpop.f32.mrb[73].mxu0  ;;  %v8386_v40 = vld [vmem:[%s12299_s17] sm:$0xff] (%p12805_p10) }
0x420f   : > { %10402 = vmatpush3.bf16.msra.mxu1 %v10401_v14  ;;  %8387 = vst [vmem:[%s8356_s4] sm:$0xff] (%p12805_p10), %v8386_v40 }
0x4210   : > { %9039 = vst.msk [vmem:[%s12256_s28 + $0x8] sm:$0xff] %vm6148_vm8, %v8065_v41  ;;  %10409 = vmatprep.subr.bf16.mxu1 %v11262_v45 }
0x4212   : > { %10009 = vmatmul.mubr.msk.f32.vlgmr.msra.gmra.mrb[56].mxu1 %vm1941_vm2, %v7720_v59 }
0x4213   : > { %10030 = vmatprep.mubr.msk.f32.mxu1 %vm11263_vm6, %v11264_v10  ;;  %10411 = vmatpush3.bf16.msra.mxu1 %v10410_v46  ;;  %v7975_v10 = vsub.f32 1.0, %v7973_v49 }
0x4214   : > { %10412 = vmatprep.subr.bf16.mxu1 %v11262_v45 }
0x4215   : > { %v7976_v28 = vmax.f32 %v7975_v10, 1e-05 }
0x4217   : > { %10846 = vrcp.f32 %v7976_v28  ;;  %10414 = vmatpush3.bf16.msra.mxu1 %v10413_v8 }
0x4221   : > { %v10847_v50 = vpop.eup %10846 }
0x4222   : > { %v7978_v33 = vmul.f32 %v10847_v50, %v7974_v15 }
0x4224   : > { %10848 = vlog2.f32 %v7978_v33 }
0x422e   : > { %v10849_v51 = vpop.eup %10848 }
0x422f   : > { %v7980_v23 = vmul.f32 0.6931472, %v10849_v51 }
0x42dd   : > { %v7968_v54 = vpop.f32.mrb[54].mxu1 }
0x42de   : > { %v7969_v1 = vadd.f32 %v9011_v52, %v7968_v54  ;;  %v9988_v38 = vpop.f32.mrb[55].mxu1 }
0x42e0   : > { %v7981_v56 = vadd.f32 %v7980_v23, %v7969_v1 }
0x42e2   : > { %v7982_v57 = vsub.f32 0.0, %v7981_v56 }
0x42e4   : > { %v7983_v45 = vmul.f32 1.442695, %v7982_v57 }
0x42e5   : > { %v8144_v7 = vpop.f32.mrb[56].mxu1 }
0x42e6   : > { %10850 = vpow2.f32 %v7983_v45  ;;  %v8145_v39 = vadd.f32 %v9023_v11, %v8144_v7  ;;  %v10010_v59 = vpop.f32.mrb[57].mxu1 }
0x42e8   : > { %v8148_v60 = vmax.f32 %v8145_v39, 0.0 }
0x42ea   : > { %10020 = vmatmul.mubr.msk.f32.vlgmr.msra.gmra.mrb[74].mxu0 %vm1941_vm2, %v8148_v60 }
0x42f0   : > { %v10851_v12 = vpop.eup %10850 }
0x42f1   : > { %v7985_v61 = vadd.f32 1.0, %v10851_v12 }
0x42f3   : > { %10852 = vrcp.f32 %v7985_v61 }
0x42fd   : > { %v10853_v62 = vpop.eup %10852 }
0x42fe   : > { %v9037_v53 = vadd.f32 -0.5, %v10853_v62 }
0x4300   : > { %v8331_v63 = vmul.f32 40.0, %v9037_v53  ;;  %v8332_v0 = vmul.f32 20.0, %v9037_v53 }
0x4302   : > { %v8333_v2 = vsel %vm6144_vm9, %v8331_v63, %v8332_v0 }
0x4303   : > { %9038 = vst.msk [vmem:[%s12299_s17 + $0x8] sm:$0xff] %vm6146_vm10, %v8333_v2 }
0x430a   : > { %v8388_v41 = vld [vmem:[%s12299_s17 + $0x8] sm:$0xff] (%p12805_p10) }
0x430b   : > { %8389 = vst [vmem:[%s8356_s4 + $0x10] sm:$0xff] (%p12805_p10), %v8388_v41 }
0x43bd   : > { %v8228_v13 = vpop.f32.mrb[74].mxu0 }
0x43be   : > { %v8229_v30 = vadd.f32 %v9029_v9, %v8228_v13  ;;  %v10021_v16 = vpop.f32.mrb[75].mxu0 }
0x43c0   : > { %v8232_v17 = vmax.f32 %v8229_v30, 0.0 }
0x43c2   : > { %10031 = vmatmul.mubr.msk.f32.vlgmr.msra.gmra.mrb[58].mxu1 %vm1941_vm2, %v8232_v17 }
0x4495   : > { %v8312_v19 = vpop.f32.mrb[58].mxu1 }
0x4496   : > { %v8313_v20 = vadd.f32 %v9035_v18, %v8312_v19  ;;  %v10032_v22 = vpop.f32.mrb[59].mxu1 }
0x4498   : > { %v8317_v55 = vmin.f32 %v8313_v20, 20.0  ;;  %vm8316_vm14 = vcmp.gt.f32.partialorder %v8313_v20, 20.0 }
0x449a   : > { %v8318_v24 = vmul.f32 1.442695, %v8317_v55 }
0x449c   : > { %10854 = vpow2.f32 %v8318_v24 }
0x44a6   : > { %v10855_v25 = vpop.eup %10854 }
0x44a7   : > { %v8320_v6 = vadd.f32 1.0, %v10855_v25  ;;  %v8323_v26 = vmul.f32 -0.5, %v10855_v25  ;;  %v8326_v29 = vand.u32 2147483647, %v10855_v25 }
0x44a9   : > { %10856 = vlog2.f32 %v8320_v6  ;;  %v8324_v27 = vadd.f32 1.0, %v8323_v26  ;;  %vm8327_vm13 = vcmp.lt.f32.partialorder %v8326_v29, 0.0004427343 }
0x44ab   : > { %v8325_v34 = vmul.f32 %v10855_v25, %v8324_v27 }
0x44b2   : > { %8354 = sbr.rel (!%p12805_p10) target bundleno = 17593 (0x44b9), region = 280 }
0x44b3   : > { %v10857_v31 = vpop.eup %10856 }
0x44b4   : > { %v8322_v32 = vmul.f32 0.6931472, %v10857_v31 }
0x44b6   : > { %v8328_v58 = vsel %vm8327_vm13, %v8325_v34, %v8322_v32 }
0x44b7   : > { %v8329_v14 = vsel %vm8316_vm14, %v8313_v20, %v8328_v58 }
0x44b8   : > { %9040 = vst.msk [vmem:[%s12330_s9 + $0x8] sm:$0xff] %vm6146_vm10, %v8329_v14 }
0x44b9 PF: > { %s12808_s5 = sld [smem:[#allocation87_spill]] }
0x44bf   : > { %p12809_p12 = scmp.ne.s32.totalorder %s12808_s5, 0 }
0x44c0   : > { %s12810_s6 = sld [smem:[#allocation84_spill]] (%p12809_p12)  ;;  %s12811_s7 = sld [smem:[#allocation81_spill]] (%p12809_p12)  ;;  %v8427_v3 = vld [vmem:[%s12256_s28] sm:$0xff] (%p12809_p12)  ;;  %v8429_v35 = vld [vmem:[%s12256_s28 + $0x8] sm:$0xff] (%p12809_p12) }
0x44c1   : > { %8395 = sbr.rel (!%p12809_p12) target bundleno = 17609 (0x44c9), region = 318 }
0x44c6   : > { %s9045_s2 = sshll.u32 (%p12809_p12), %s12810_s6, 3 }
0x44c7   : > { %s8397_s8 = scalar_lea.vmem (%p12809_p12), %s12811_s7, %s9045_s2 }
0x44c8   : > { %8428 = vst [vmem:[%s8397_s8] sm:$0xff] %v8427_v3  ;;  %8430 = vst [vmem:[%s8397_s8 + $0x10] sm:$0xff] %v8429_v35 }
0x44c9 PF: > { %s12812_s1 = sld [smem:[#allocation87_spill]] }
0x44cf   : > { %p12813_p13 = scmp.ne.s32.totalorder %s12812_s1, 0 }
0x44d0   : > { %s12814_s17 = sld [smem:[#allocation84_spill]] (%p12813_p13)  ;;  %s12815_s4 = sld [smem:[#allocation82_spill]] (%p12813_p13)  ;;  %v8468_v36 = vld [vmem:[%s12330_s9] sm:$0xff] (%p12813_p13)  ;;  %v8470_v21 = vld [vmem:[%s12330_s9 + $0x8] sm:$0xff] (%p12813_p13) }
0x44d1   : > { %8436 = sbr.rel (!%p12813_p13) target bundleno = 17625 (0x44d9), region = 356 }
0x44d6   : > { %s9046_s5 = sshll.u32 (%p12813_p13), %s12814_s17, 3 }
0x44d7   : > { %s8438_s0 = scalar_lea.vmem (%p12813_p13), %s12815_s4, %s9046_s5 }
0x44d8   : > { %8469 = vst [vmem:[%s8438_s0] sm:$0xff] %v8468_v36  ;;  %8471 = vst [vmem:[%s8438_s0 + $0x10] sm:$0xff] %v8470_v21 }
0x44d9 PF: > { %s12816_s2 = sld [smem:[#allocation85_spill]]  ;;  %s12817_s28 = sld [smem:[#allocation83_spill]] }
0x44da   : > { %s12818_s1 = sld [smem:[#allocation86_spill]] }
0x44df   : > { %p127_p11 = scmp.ge.s32.totalorder %s12816_s2, 4  }
0x44e1   :  { %129 = sbr.rel (!%p127_p11) target bundleno = 137 (0x89), region = 527 }
0x44e8   :  { %8501 = vsyncpa [#allocation3], 1 }
0x44e9   :  { %8503 = vsyncpa [#allocation3 + $0x1], 1 }
0x44ea   :  { %8504 = vsyncpa [#allocation5], 1 }
0x44eb   :  { %8505 = vsyncpa [#allocation8], 1 }
0x44ec   :  { %8506 = vsyncpa [#allocation11], 1 }
0x44ed   :  { %8507 = vsyncpa [#allocation14], 1 }
0x44ee   :  { %8508 = vsyncpa [#allocation17], 1 }

</bundles_post_ra>
